<compile_context>
chip_gen: v7x
topology: tpu7x:2x2x1
jax: 0.10.0
libtpu: 0.0.40
codegen_flags: <defaults>
</compile_context>

<pallas_src>
import jax
import jax.numpy as jnp
from jax.experimental import pallas as pl
from jax.experimental.pallas import tpu as pltpu

EPS = 1e-5
MATMUL_DTYPE = jnp.bfloat16  # MXU-native; halves the weight DMA.


def bn_relu_conv_bn_kernel(x_ref, w_ref, p1_ref, p2_ref, o_ref):
    # x_ref : (Cin, S)  f32   (native NCHW view, S = N*H*W on the lane axis)
    # w_ref : (Cout, Cin) bf16 (native PyTorch conv-weight layout)
    # p1_ref: (Cin, 2)  f32   columns = [gamma1 | beta1]
    # p2_ref: (Cout, 2) f32   columns = [gamma2 | beta2]
    # o_ref : (Cout, S) f32
    x = x_ref[...]
    inv_n = jnp.float32(1.0 / x.shape[1])

    # --- BatchNorm2d #1: two-pass centered batch stats over S (per channel) ---
    mean1 = jnp.sum(x, axis=1, keepdims=True) * inv_n            # (Cin, 1)
    xc = x - mean1
    var1 = jnp.sum(xc * xc, axis=1, keepdims=True) * inv_n       # (Cin, 1)
    scale1 = p1_ref[:, 0:1] * jax.lax.rsqrt(var1 + EPS)
    # centered form: bn(x) = (x - mean) * scale + beta
    xh = jnp.maximum(xc * scale1 + p1_ref[:, 1:2], 0.0)          # BN1 + ReLU

    # --- 1x1 Conv (no bias): (Cout, Cin) @ (Cin, S) on the MXU, f32 acc ---
    y = jnp.dot(w_ref[...], xh.astype(w_ref.dtype),
                preferred_element_type=jnp.float32)              # (Cout, S)

    # --- BatchNorm2d #2: two-pass centered batch stats over S ---
    mean2 = jnp.sum(y, axis=1, keepdims=True) * inv_n            # (Cout, 1)
    yc = y - mean2
    var2 = jnp.sum(yc * yc, axis=1, keepdims=True) * inv_n
    scale2 = p2_ref[:, 0:1] * jax.lax.rsqrt(var2 + EPS)
    o_ref[...] = (yc * scale2 + p2_ref[:, 1:2]).astype(o_ref.dtype)


def prepare_params(w, g1, b1, g2, b2):
    """One-time parameter preparation (parameter-load time, NOT per call)."""
    w_bf16 = w.astype(MATMUL_DTYPE)                                   # (Cout, Cin)
    p1 = jnp.stack([g1, b1], axis=1).astype(jnp.float32)              # (Cin, 2)
    p2 = jnp.stack([g2, b2], axis=1).astype(jnp.float32)              # (Cout, 2)
    return w_bf16, p1, p2


@jax.jit
def bn_relu_conv_bn(x_nchw, w_bf16, p1, p2):
    """x_nchw: (1, Cin, H, W) f32; w_bf16: (Cout, Cin); p1/p2: packed gamma/beta."""
    N, Cin, H, W = x_nchw.shape
    Cout = w_bf16.shape[0]
    S = N * H * W
    assert N == 1, "kernel exploits the free NCHW->(Cin,S) reshape for N == 1"

    # Free view: NCHW with N=1 is already channel-major (Cin, H*W).
    x2d = x_nchw.reshape(Cin, S)

    out2d = pl.pallas_call(
        bn_relu_conv_bn_kernel,
        out_shape=jax.ShapeDtypeStruct((Cout, S), jnp.float32),
        grid_spec=pltpu.PrefetchScalarGridSpec(
            num_scalar_prefetch=0,
            grid=(1,),
            in_specs=[
                pl.BlockSpec((Cin, S), lambda i: (0, 0)),
                pl.BlockSpec((Cout, Cin), lambda i: (0, 0)),
                pl.BlockSpec((Cin, 2), lambda i: (0, 0)),
                pl.BlockSpec((Cout, 2), lambda i: (0, 0)),
            ],
            out_specs=pl.BlockSpec((Cout, S), lambda i: (0, 0)),
        ),
        compiler_params=pltpu.CompilerParams(
            dimension_semantics=("arbitrary",),
            # ~4.2 MiB worst case incl. double buffers and lane padding of the
            # (Cin, S) / (Cin, 2) tiles; 16 MiB is safe on v5e/v6e/v7x.
            vmem_limit_bytes=16 << 20,
        ),
    )(x2d, w_bf16, p1, p2)

    # Free view: (Cout, S) is already (1, Cout, H, W) in memory.
    return out2d.reshape(N, Cout, H, W)


def _reference(x, w, g1, b1, g2, b2):
    # Pure-JAX f32 reference (PyTorch training-mode BN forward, biased variance).
    def bn(t, g, b):
        mean = jnp.mean(t, axis=(0, 2, 3), keepdims=True)
        var = jnp.mean(jnp.square(t - mean), axis=(0, 2, 3), keepdims=True)
        return ((t - mean) * jax.lax.rsqrt(var + EPS)
                * g.reshape(1, -1, 1, 1) + b.reshape(1, -1, 1, 1))

    h = jnp.maximum(bn(x, g1, b1), 0.0)
    y = jnp.einsum("nchw,oc->nohw", h, w)
    return bn(y, g2, b2)


if __name__ == "__main__":
    # Shapes implied by the module: x [1, 1568, 7, 7], 1x1 conv 1568 -> 128.
    # TODO(synk): BatchNorm running_mean/running_var updates (training-mode side
    # effect) are not reproduced; forward output uses batch statistics as PyTorch does.
    N, Cin, H, W = 1, 1568, 7, 7
    Cout = 128

    key = jax.random.PRNGKey(0)
    kx, kw, kg1, kb1, kg2, kb2 = jax.random.split(key, 6)

    x = jax.random.normal(kx, (N, Cin, H, W), dtype=jnp.float32)
    w = (jax.random.normal(kw, (Cout, Cin), dtype=jnp.float32)
         * (1.0 / jnp.sqrt(jnp.float32(Cin))))
    # Non-trivial affine params to exercise the gamma/beta path (deterministic).
    gamma1 = 1.0 + 0.1 * jax.random.normal(kg1, (Cin,), jnp.float32)
    beta1 = 0.1 * jax.random.normal(kb1, (Cin,), jnp.float32)
    gamma2 = 1.0 + 0.1 * jax.random.normal(kg2, (Cout,), jnp.float32)
    beta2 = 0.1 * jax.random.normal(kb2, (Cout,), jnp.float32)

    # One-time parameter prep (weight bf16 cast + gamma/beta packing), outside
    # the per-call jitted path.
    w_bf16, p1, p2 = jax.block_until_ready(
        prepare_params(w, gamma1, beta1, gamma2, beta2))

    out = jax.block_until_ready(bn_relu_conv_bn(x, w_bf16, p1, p2))
    assert out.shape == (N, Cout, H, W), out.shape

    ref = jax.block_until_ready(_reference(x, w, gamma1, beta1, gamma2, beta2))
    max_err = float(jnp.max(jnp.abs(out - ref)))
    # Loose bound: the conv runs bf16 x bf16 -> f32 on the MXU.
    assert max_err < 1e-1, f"max abs error vs f32 reference: {max_err}"

    print("KERNEL_OK")
</pallas_src>

<mosaic_0001>
module attributes {stable_mosaic.version = 11 : i64} {
  func.func @bn_relu_conv_bn_kernel(%arg0: i32, %arg1: memref<1568x49xf32, #tpu.memory_space<vmem>>, %arg2: memref<128x1568xbf16, #tpu.memory_space<vmem>>, %arg3: memref<1568x2xf32, #tpu.memory_space<vmem>>, %arg4: memref<128x2xf32, #tpu.memory_space<vmem>>, %arg5: memref<128x49xf32, #tpu.memory_space<vmem>>) attributes {dimension_semantics = [#tpu.dimension_semantics<arbitrary>], iteration_bounds = array<i64: 1>, scalar_prefetch = 0 : i64, scratch_operands = 0 : i64, tpu.core_type = #tpu.core_type<tc>, window_params = [{pipeline_mode = #tpu.pipeline_mode<synchronous>, transform_indices = @transform_0, window_bounds = array<i64: 1568, 49>}, {pipeline_mode = #tpu.pipeline_mode<synchronous>, transform_indices = @transform_1, window_bounds = array<i64: 128, 1568>}, {pipeline_mode = #tpu.pipeline_mode<synchronous>, transform_indices = @transform_2, window_bounds = array<i64: 1568, 2>}, {pipeline_mode = #tpu.pipeline_mode<synchronous>, transform_indices = @transform_3, window_bounds = array<i64: 128, 2>}, {pipeline_mode = #tpu.pipeline_mode<synchronous>, transform_indices = @transform_4, window_bounds = array<i64: 128, 49>}]} {
    %c0 = arith.constant 0 : index
    %c0_0 = arith.constant 0 : index
    %0 = vector.load %arg1[%c0, %c0_0] : memref<1568x49xf32, #tpu.memory_space<vmem>>, vector<1568x49xf32>
    %cst = arith.constant dense<0.000000e+00> : vector<1568xf32>
    %1 = vector.multi_reduction <add>, %0, %cst [1] : vector<1568x49xf32> to vector<1568xf32>
    %2 = vector.shape_cast %1 : vector<1568xf32> to vector<1568x1xf32>
    %cst_1 = arith.constant 0.0204081628 : f32
    %3 = vector.broadcast %cst_1 : f32 to vector<1568x1xf32>
    %4 = arith.mulf %2, %3 : vector<1568x1xf32>
    %5 = vector.broadcast %4 : vector<1568x1xf32> to vector<1568x49xf32>
    %6 = arith.subf %0, %5 : vector<1568x49xf32>
    %7 = arith.mulf %6, %6 : vector<1568x49xf32>
    %cst_2 = arith.constant dense<0.000000e+00> : vector<1568xf32>
    %8 = vector.multi_reduction <add>, %7, %cst_2 [1] : vector<1568x49xf32> to vector<1568xf32>
    %9 = vector.shape_cast %8 : vector<1568xf32> to vector<1568x1xf32>
    %cst_3 = arith.constant 0.0204081628 : f32
    %10 = vector.broadcast %cst_3 : f32 to vector<1568x1xf32>
    %11 = arith.mulf %9, %10 : vector<1568x1xf32>
    %c0_4 = arith.constant 0 : index
    %c0_5 = arith.constant 0 : index
    %12 = vector.load %arg3[%c0_4, %c0_5] : memref<1568x2xf32, #tpu.memory_space<vmem>>, vector<1568x1xf32>
    %cst_6 = arith.constant 9.99999974E-6 : f32
    %13 = vector.broadcast %cst_6 : f32 to vector<1568x1xf32>
    %14 = arith.addf %11, %13 : vector<1568x1xf32>
    %15 = math.rsqrt %14 : vector<1568x1xf32>
    %16 = arith.mulf %12, %15 : vector<1568x1xf32>
    %17 = vector.broadcast %16 : vector<1568x1xf32> to vector<1568x49xf32>
    %18 = arith.mulf %6, %17 : vector<1568x49xf32>
    %c0_7 = arith.constant 0 : index
    %c1 = arith.constant 1 : index
    %19 = vector.load %arg3[%c0_7, %c1] : memref<1568x2xf32, #tpu.memory_space<vmem>>, vector<1568x1xf32>
    %20 = vector.broadcast %19 : vector<1568x1xf32> to vector<1568x49xf32>
    %21 = arith.addf %18, %20 : vector<1568x49xf32>
    %cst_8 = arith.constant 0.000000e+00 : f32
    %22 = vector.broadcast %cst_8 : f32 to vector<1568x49xf32>
    %23 = arith.maximumf %21, %22 : vector<1568x49xf32>
    %c0_9 = arith.constant 0 : index
    %c0_10 = arith.constant 0 : index
    %24 = vector.load %arg2[%c0_9, %c0_10] : memref<128x1568xbf16, #tpu.memory_space<vmem>>, vector<128x1568xbf16>
    %25 = arith.truncf %23 : vector<1568x49xf32> to vector<1568x49xbf16>
    %cst_11 = arith.constant dense<0.000000e+00> : vector<128x49xf32>
    %26 = tpu.matmul %24, %25, %cst_11 {dimension_numbers = #tpu.dot_dimension_numbers<[1], [0], [0], [1], [0, 0, 1, 1], [], []>} : vector<128x1568xbf16>, vector<1568x49xbf16>, vector<128x49xf32> -> vector<128x49xf32>
    %cst_12 = arith.constant dense<0.000000e+00> : vector<128xf32>
    %27 = vector.multi_reduction <add>, %26, %cst_12 [1] : vector<128x49xf32> to vector<128xf32>
    %28 = vector.shape_cast %27 : vector<128xf32> to vector<128x1xf32>
    %cst_13 = arith.constant 0.0204081628 : f32
    %29 = vector.broadcast %cst_13 : f32 to vector<128x1xf32>
    %30 = arith.mulf %28, %29 : vector<128x1xf32>
    %31 = vector.broadcast %30 : vector<128x1xf32> to vector<128x49xf32>
    %32 = arith.subf %26, %31 : vector<128x49xf32>
    %33 = arith.mulf %32, %32 : vector<128x49xf32>
    %cst_14 = arith.constant dense<0.000000e+00> : vector<128xf32>
    %34 = vector.multi_reduction <add>, %33, %cst_14 [1] : vector<128x49xf32> to vector<128xf32>
    %35 = vector.shape_cast %34 : vector<128xf32> to vector<128x1xf32>
    %cst_15 = arith.constant 0.0204081628 : f32
    %36 = vector.broadcast %cst_15 : f32 to vector<128x1xf32>
    %37 = arith.mulf %35, %36 : vector<128x1xf32>
    %c0_16 = arith.constant 0 : index
    %c0_17 = arith.constant 0 : index
    %38 = vector.load %arg4[%c0_16, %c0_17] : memref<128x2xf32, #tpu.memory_space<vmem>>, vector<128x1xf32>
    %cst_18 = arith.constant 9.99999974E-6 : f32
    %39 = vector.broadcast %cst_18 : f32 to vector<128x1xf32>
    %40 = arith.addf %37, %39 : vector<128x1xf32>
    %41 = math.rsqrt %40 : vector<128x1xf32>
    %42 = arith.mulf %38, %41 : vector<128x1xf32>
    %43 = vector.broadcast %42 : vector<128x1xf32> to vector<128x49xf32>
    %44 = arith.mulf %32, %43 : vector<128x49xf32>
    %c0_19 = arith.constant 0 : index
    %c1_20 = arith.constant 1 : index
    %45 = vector.load %arg4[%c0_19, %c1_20] : memref<128x2xf32, #tpu.memory_space<vmem>>, vector<128x1xf32>
    %46 = vector.broadcast %45 : vector<128x1xf32> to vector<128x49xf32>
    %47 = arith.addf %44, %46 : vector<128x49xf32>
    %c0_21 = arith.constant 0 : index
    %c0_22 = arith.constant 0 : index
    %48 = vector.load %arg5[%c0_21, %c0_22] : memref<128x49xf32, #tpu.memory_space<vmem>>, vector<128x49xf32>
    tpu.vector_store %arg5[%c0_21, %c0_22], %47 {strides = array<i32>} : memref<128x49xf32, #tpu.memory_space<vmem>>, vector<128x49xf32>,
    return
  }
  func.func @transform_0(%arg0: i32) -> (i32, i32) {
    %c0_i32 = arith.constant 0 : i32
    %c0_i32_0 = arith.constant 0 : i32
    %c0_i32_1 = arith.constant 0 : i32
    return %c0_i32, %c0_i32_0 : i32, i32
  }
  func.func @transform_1(%arg0: i32) -> (i32, i32) {
    %c0_i32 = arith.constant 0 : i32
    %c0_i32_0 = arith.constant 0 : i32
    %c0_i32_1 = arith.constant 0 : i32
    return %c0_i32, %c0_i32_0 : i32, i32
  }
  func.func @transform_2(%arg0: i32) -> (i32, i32) {
    %c0_i32 = arith.constant 0 : i32
    %c0_i32_0 = arith.constant 0 : i32
    %c0_i32_1 = arith.constant 0 : i32
    return %c0_i32, %c0_i32_0 : i32, i32
  }
  func.func @transform_3(%arg0: i32) -> (i32, i32) {
    %c0_i32 = arith.constant 0 : i32
    %c0_i32_0 = arith.constant 0 : i32
    %c0_i32_1 = arith.constant 0 : i32
    return %c0_i32, %c0_i32_0 : i32, i32
  }
  func.func @transform_4(%arg0: i32) -> (i32, i32) {
    %c0_i32 = arith.constant 0 : i32
    %c0_i32_0 = arith.constant 0 : i32
    %c0_i32_1 = arith.constant 0 : i32
    return %c0_i32, %c0_i32_0 : i32, i32
  }
}

</mosaic_0001>

<bundles_post_ra>
// kernel: bn_relu_conv_bn.1
= control target key start
LH: loop header
LB: loop body
LE: loop exit
PB: predicated region body
PF: predicated region fallthrough
CT: control target
= control target key end

     0   :  { %vm214_vm0 = vcmask 400384   ;;  %vm6237_vm1 = vcmask 261120   ;;  %s15528_s0 = inlined_call_operand.vmem [shape: f32[1568,49], index: 0, kind: input, shape index: {}]   ;;  %s15529_s2 = inlined_call_operand.vmem [shape: f32[1568,2], index: 2, kind: input, shape index: {}]   ;;  %s15530_s1 = inlined_call_operand.vmem [shape: bf16[128,1568], index: 1, kind: input, shape index: {}]   ;;  %s15531_s3 = inlined_call_operand.vmem [shape: f32[128,2], index: 3, kind: input, shape index: {}]   ;;  %s15532_s4 = inlined_call_operand.vmem [shape: f32[128,49], index: 4, kind: output, shape index: {}]  }
   0x1   :  { %v20_v0 = vld [vmem:[%s15528_s0 + $0x10] sm:$0xff]  ;;  %v18_v1 = vld [vmem:[%s15528_s0] sm:$0xff]  ;;  %v21_v2 = vld [vmem:[%s15528_s0 + $0x18] sm:$0xff] }
   0x2   :  { %v221_v3 = vsel %vm214_vm0, %v20_v0, 0.0  ;;  %v215_v4 = vsel %vm214_vm0, %v18_v1, 0.0  ;;  %v19_v5 = vld [vmem:[%s15528_s0 + $0x8] sm:$0xff]  ;;  %v224_v6 = vsel %vm214_vm0, %v21_v2, 0.0  ;;  %v22_v9 = vld [vmem:[%s15528_s0 + $0x20] sm:$0xff]  ;;  %v25_v12 = vld [vmem:[%s15528_s0 + $0x38] sm:$0xff] }
   0x3   :  { %222 = vadd.xlane.f32.xlu1 %v221_v3  ;;  %216 = vadd.xlane.f32.xlu0 %v215_v4  ;;  %v218_v7 = vsel %vm214_vm0, %v19_v5, 0.0  ;;  %v23_v8 = vld [vmem:[%s15528_s0 + $0x28] sm:$0xff]  ;;  %v227_v11 = vsel %vm214_vm0, %v22_v9, 0.0  ;;  %v24_v13 = vld [vmem:[%s15528_s0 + $0x30] sm:$0xff]  ;;  %v236_v14 = vsel %vm214_vm0, %v25_v12, 0.0  ;;  %v26_v17 = vld [vmem:[%s15528_s0 + $0x40] sm:$0xff] }
   0x4   :  { %v230_v10 = vsel %vm214_vm0, %v23_v8, 0.0  ;;  %v233_v15 = vsel %vm214_vm0, %v24_v13, 0.0  ;;  %v27_v16 = vld [vmem:[%s15528_s0 + $0x48] sm:$0xff]  ;;  %v239_v19 = vsel %vm214_vm0, %v26_v17, 0.0  ;;  %v29_v20 = vld [vmem:[%s15528_s0 + $0x58] sm:$0xff]  ;;  %v28_v21 = vld [vmem:[%s15528_s0 + $0x50] sm:$0xff] }
   0x5   :  { %v242_v18 = vsel %vm214_vm0, %v27_v16, 0.0  ;;  %v248_v22 = vsel %vm214_vm0, %v29_v20, 0.0  ;;  %v245_v23 = vsel %vm214_vm0, %v28_v21, 0.0  ;;  %v31_v24 = vld [vmem:[%s15528_s0 + $0x68] sm:$0xff]  ;;  %v30_v25 = vld [vmem:[%s15528_s0 + $0x60] sm:$0xff]  ;;  %v33_v28 = vld [vmem:[%s15528_s0 + $0x78] sm:$0xff] }
   0x6   :  { %v254_v26 = vsel %vm214_vm0, %v31_v24, 0.0  ;;  %v251_v27 = vsel %vm214_vm0, %v30_v25, 0.0  ;;  %v32_v29 = vld [vmem:[%s15528_s0 + $0x70] sm:$0xff]  ;;  %v260_v30 = vsel %vm214_vm0, %v33_v28, 0.0  ;;  %v35_v32 = vld [vmem:[%s15528_s0 + $0x88] sm:$0xff]  ;;  %v34_v33 = vld [vmem:[%s15528_s0 + $0x80] sm:$0xff] }
   0x7   :  { %225 = vadd.xlane.f32.xlu1 %v224_v6  ;;  %219 = vadd.xlane.f32.xlu0 %v218_v7  ;;  %v257_v31 = vsel %vm214_vm0, %v32_v29, 0.0  ;;  %v266_v34 = vsel %vm214_vm0, %v35_v32, 0.0  ;;  %v263_v35 = vsel %vm214_vm0, %v34_v33, 0.0  ;;  %v37_v36 = vld [vmem:[%s15528_s0 + $0x98] sm:$0xff]  ;;  %v36_v37 = vld [vmem:[%s15528_s0 + $0x90] sm:$0xff]  ;;  %v39_v40 = vld [vmem:[%s15528_s0 + $0xa8] sm:$0xff] }
   0x8   :  { %v272_v38 = vsel %vm214_vm0, %v37_v36, 0.0  ;;  %v269_v39 = vsel %vm214_vm0, %v36_v37, 0.0  ;;  %v38_v41 = vld [vmem:[%s15528_s0 + $0xa0] sm:$0xff]  ;;  %v278_v42 = vsel %vm214_vm0, %v39_v40, 0.0  ;;  %v41_v44 = vld [vmem:[%s15528_s0 + $0xb8] sm:$0xff]  ;;  %v40_v45 = vld [vmem:[%s15528_s0 + $0xb0] sm:$0xff] }
   0x9   :  { %v275_v43 = vsel %vm214_vm0, %v38_v41, 0.0  ;;  %v284_v46 = vsel %vm214_vm0, %v41_v44, 0.0  ;;  %v281_v47 = vsel %vm214_vm0, %v40_v45, 0.0  ;;  %v43_v48 = vld [vmem:[%s15528_s0 + $0xc8] sm:$0xff]  ;;  %v42_v49 = vld [vmem:[%s15528_s0 + $0xc0] sm:$0xff]  ;;  %v45_v52 = vld [vmem:[%s15528_s0 + $0xd8] sm:$0xff] }
   0xa   :  { %v290_v50 = vsel %vm214_vm0, %v43_v48, 0.0  ;;  %v287_v51 = vsel %vm214_vm0, %v42_v49, 0.0  ;;  %v44_v53 = vld [vmem:[%s15528_s0 + $0xd0] sm:$0xff]  ;;  %v296_v54 = vsel %vm214_vm0, %v45_v52, 0.0  ;;  %v47_v56 = vld [vmem:[%s15528_s0 + $0xe8] sm:$0xff]  ;;  %v46_v57 = vld [vmem:[%s15528_s0 + $0xe0] sm:$0xff] }
   0xb   :  { %231 = vadd.xlane.f32.xlu1 %v230_v10  ;;  %228 = vadd.xlane.f32.xlu0 %v227_v11  ;;  %v293_v55 = vsel %vm214_vm0, %v44_v53, 0.0  ;;  %v302_v58 = vsel %vm214_vm0, %v47_v56, 0.0  ;;  %v299_v59 = vsel %vm214_vm0, %v46_v57, 0.0  ;;  %v49_v60 = vld [vmem:[%s15528_s0 + $0xf8] sm:$0xff]  ;;  %v48_v61 = vld [vmem:[%s15528_s0 + $0xf0] sm:$0xff]  ;;  %v51_v0 = vld [vmem:[%s15528_s0 + $0x108] sm:$0xff] }
   0xc   :  { %v308_v62 = vsel %vm214_vm0, %v49_v60, 0.0  ;;  %v305_v63 = vsel %vm214_vm0, %v48_v61, 0.0  ;;  %v50_v1 = vld [vmem:[%s15528_s0 + $0x100] sm:$0xff]  ;;  %v314_v2 = vsel %vm214_vm0, %v51_v0, 0.0  ;;  %v53_v4 = vld [vmem:[%s15528_s0 + $0x118] sm:$0xff]  ;;  %v52_v5 = vld [vmem:[%s15528_s0 + $0x110] sm:$0xff] }
   0xd   :  { %v311_v3 = vsel %vm214_vm0, %v50_v1, 0.0  ;;  %v320_v6 = vsel %vm214_vm0, %v53_v4, 0.0  ;;  %v317_v7 = vsel %vm214_vm0, %v52_v5, 0.0  ;;  %v55_v8 = vld [vmem:[%s15528_s0 + $0x128] sm:$0xff]  ;;  %v54_v9 = vld [vmem:[%s15528_s0 + $0x120] sm:$0xff]  ;;  %v57_v12 = vld [vmem:[%s15528_s0 + $0x138] sm:$0xff] }
   0xe   :  { %v326_v10 = vsel %vm214_vm0, %v55_v8, 0.0  ;;  %v323_v11 = vsel %vm214_vm0, %v54_v9, 0.0  ;;  %v56_v13 = vld [vmem:[%s15528_s0 + $0x130] sm:$0xff]  ;;  %v59_v16 = vld [vmem:[%s15528_s0 + $0x148] sm:$0xff]  ;;  %v58_v17 = vld [vmem:[%s15528_s0 + $0x140] sm:$0xff] }
   0xf   :  { %237 = vadd.xlane.f32.xlu1 %v236_v14  ;;  %234 = vadd.xlane.f32.xlu0 %v233_v15  ;;  %v332_v14 = vsel %vm214_vm0, %v57_v12, 0.0  ;;  %v329_v15 = vsel %vm214_vm0, %v56_v13, 0.0  ;;  %v61_v20 = vld [vmem:[%s15528_s0 + $0x158] sm:$0xff]  ;;  %v60_v21 = vld [vmem:[%s15528_s0 + $0x150] sm:$0xff]  ;;  %v63_v24 = vld [vmem:[%s15528_s0 + $0x168] sm:$0xff] }
  0x10   :  { %v62_v25 = vld [vmem:[%s15528_s0 + $0x160] sm:$0xff]  ;;  %v65_v28 = vld [vmem:[%s15528_s0 + $0x178] sm:$0xff]  ;;  %v64_v29 = vld [vmem:[%s15528_s0 + $0x170] sm:$0xff] }
  0x11   :  { %v67_v32 = vld [vmem:[%s15528_s0 + $0x188] sm:$0xff]  ;;  %v66_v33 = vld [vmem:[%s15528_s0 + $0x180] sm:$0xff]  ;;  %v69_v36 = vld [vmem:[%s15528_s0 + $0x198] sm:$0xff] }
  0x12   :  { %v68_v37 = vld [vmem:[%s15528_s0 + $0x190] sm:$0xff]  ;;  %v71_v40 = vld [vmem:[%s15528_s0 + $0x1a8] sm:$0xff]  ;;  %v70_v41 = vld [vmem:[%s15528_s0 + $0x1a0] sm:$0xff] }
  0x13   :  { %243 = vadd.xlane.f32.xlu1 %v242_v18  ;;  %240 = vadd.xlane.f32.xlu0 %v239_v19  ;;  %v338_v18 = vsel %vm214_vm0, %v59_v16, 0.0  ;;  %v335_v19 = vsel %vm214_vm0, %v58_v17, 0.0  ;;  %v73_v44 = vld [vmem:[%s15528_s0 + $0x1b8] sm:$0xff]  ;;  %v72_v45 = vld [vmem:[%s15528_s0 + $0x1b0] sm:$0xff]  ;;  %v75_v48 = vld [vmem:[%s15528_s0 + $0x1c8] sm:$0xff] }
  0x14   :  { %v74_v49 = vld [vmem:[%s15528_s0 + $0x1c0] sm:$0xff]  ;;  %v77_v52 = vld [vmem:[%s15528_s0 + $0x1d8] sm:$0xff]  ;;  %v76_v53 = vld [vmem:[%s15528_s0 + $0x1d0] sm:$0xff] }
  0x15   :  { %v79_v56 = vld [vmem:[%s15528_s0 + $0x1e8] sm:$0xff]  ;;  %v78_v57 = vld [vmem:[%s15528_s0 + $0x1e0] sm:$0xff]  ;;  %v81_v60 = vld [vmem:[%s15528_s0 + $0x1f8] sm:$0xff] }
  0x16   :  { %v80_v61 = vld [vmem:[%s15528_s0 + $0x1f0] sm:$0xff]  ;;  %v83_v0 = vld [vmem:[%s15528_s0 + $0x208] sm:$0xff]  ;;  %v82_v1 = vld [vmem:[%s15528_s0 + $0x200] sm:$0xff] }
  0x17   :  { %249 = vadd.xlane.f32.xlu1 %v248_v22  ;;  %246 = vadd.xlane.f32.xlu0 %v245_v23  ;;  %v344_v22 = vsel %vm214_vm0, %v61_v20, 0.0  ;;  %v341_v23 = vsel %vm214_vm0, %v60_v21, 0.0  ;;  %v85_v4 = vld [vmem:[%s15528_s0 + $0x218] sm:$0xff]  ;;  %v84_v5 = vld [vmem:[%s15528_s0 + $0x210] sm:$0xff]  ;;  %v87_v8 = vld [vmem:[%s15528_s0 + $0x228] sm:$0xff] }
  0x18   :  { %v86_v9 = vld [vmem:[%s15528_s0 + $0x220] sm:$0xff]  ;;  %v89_v12 = vld [vmem:[%s15528_s0 + $0x238] sm:$0xff]  ;;  %v88_v13 = vld [vmem:[%s15528_s0 + $0x230] sm:$0xff] }
  0x19   :  { %v91_v16 = vld [vmem:[%s15528_s0 + $0x248] sm:$0xff]  ;;  %v90_v17 = vld [vmem:[%s15528_s0 + $0x240] sm:$0xff] }
  0x1a   :  { %v434_v20 = vsel %vm214_vm0, %v91_v16, 0.0  ;;  %v431_v21 = vsel %vm214_vm0, %v90_v17, 0.0 }
  0x1b   :  { %255 = vadd.xlane.f32.xlu1 %v254_v26  ;;  %252 = vadd.xlane.f32.xlu0 %v251_v27  ;;  %v350_v26 = vsel %vm214_vm0, %v63_v24, 0.0  ;;  %v347_v27 = vsel %vm214_vm0, %v62_v25, 0.0 }
  0x1f   :  { %261 = vadd.xlane.f32.xlu1 %v260_v30  ;;  %258 = vadd.xlane.f32.xlu0 %v257_v31  ;;  %v356_v30 = vsel %vm214_vm0, %v65_v28, 0.0  ;;  %v353_v31 = vsel %vm214_vm0, %v64_v29, 0.0  ;;  %v95_v28 = vld [vmem:[%s15528_s0 + $0x268] sm:$0xff]  ;;  %v94_v29 = vld [vmem:[%s15528_s0 + $0x260] sm:$0xff] }
  0x23   :  { %267 = vadd.xlane.f32.xlu1 %v266_v34  ;;  %264 = vadd.xlane.f32.xlu0 %v263_v35  ;;  %v362_v34 = vsel %vm214_vm0, %v67_v32, 0.0  ;;  %v359_v35 = vsel %vm214_vm0, %v66_v33, 0.0  ;;  %v446_v32 = vsel %vm214_vm0, %v95_v28, 0.0  ;;  %v443_v33 = vsel %vm214_vm0, %v94_v29, 0.0  ;;  %v115_v28 = vld [vmem:[%s15528_s0 + $0x308] sm:$0xff]  ;;  %v114_v29 = vld [vmem:[%s15528_s0 + $0x300] sm:$0xff] }
  0x27   :  { %273 = vadd.xlane.f32.xlu1 %v272_v38  ;;  %270 = vadd.xlane.f32.xlu0 %v269_v39  ;;  %v368_v38 = vsel %vm214_vm0, %v69_v36, 0.0  ;;  %v365_v39 = vsel %vm214_vm0, %v68_v37, 0.0 }
  0x2b   :  { %279 = vadd.xlane.f32.xlu1 %v278_v42  ;;  %276 = vadd.xlane.f32.xlu0 %v275_v43  ;;  %v374_v42 = vsel %vm214_vm0, %v71_v40, 0.0  ;;  %v371_v43 = vsel %vm214_vm0, %v70_v41, 0.0  ;;  %v99_v40 = vld [vmem:[%s15528_s0 + $0x288] sm:$0xff]  ;;  %v98_v41 = vld [vmem:[%s15528_s0 + $0x280] sm:$0xff] }
  0x2f   :  { %285 = vadd.xlane.f32.xlu1 %v284_v46  ;;  %282 = vadd.xlane.f32.xlu0 %v281_v47  ;;  %v380_v46 = vsel %vm214_vm0, %v73_v44, 0.0  ;;  %v377_v47 = vsel %vm214_vm0, %v72_v45, 0.0  ;;  %v458_v44 = vsel %vm214_vm0, %v99_v40, 0.0  ;;  %v455_v45 = vsel %vm214_vm0, %v98_v41, 0.0 }
  0x33   :  { %291 = vadd.xlane.f32.xlu1 %v290_v50  ;;  %288 = vadd.xlane.f32.xlu0 %v287_v51  ;;  %v386_v50 = vsel %vm214_vm0, %v75_v48, 0.0  ;;  %v383_v51 = vsel %vm214_vm0, %v74_v49, 0.0 }
  0x37   :  { %297 = vadd.xlane.f32.xlu1 %v296_v54  ;;  %294 = vadd.xlane.f32.xlu0 %v293_v55  ;;  %v392_v54 = vsel %vm214_vm0, %v77_v52, 0.0  ;;  %v389_v55 = vsel %vm214_vm0, %v76_v53, 0.0  ;;  %v103_v52 = vld [vmem:[%s15528_s0 + $0x2a8] sm:$0xff]  ;;  %v102_v53 = vld [vmem:[%s15528_s0 + $0x2a0] sm:$0xff] }
  0x3b   :  { %303 = vadd.xlane.f32.xlu1 %v302_v58  ;;  %300 = vadd.xlane.f32.xlu0 %v299_v59  ;;  %v398_v58 = vsel %vm214_vm0, %v79_v56, 0.0  ;;  %v395_v59 = vsel %vm214_vm0, %v78_v57, 0.0  ;;  %v470_v56 = vsel %vm214_vm0, %v103_v52, 0.0  ;;  %v467_v57 = vsel %vm214_vm0, %v102_v53, 0.0 }
  0x3f   :  { %309 = vadd.xlane.f32.xlu1 %v308_v62  ;;  %306 = vadd.xlane.f32.xlu0 %v305_v63  ;;  %v404_v62 = vsel %vm214_vm0, %v81_v60, 0.0  ;;  %v401_v63 = vsel %vm214_vm0, %v80_v61, 0.0 }
  0x43   :  { %315 = vadd.xlane.f32.xlu1 %v314_v2  ;;  %312 = vadd.xlane.f32.xlu0 %v311_v3  ;;  %v410_v2 = vsel %vm214_vm0, %v83_v0, 0.0  ;;  %v407_v3 = vsel %vm214_vm0, %v82_v1, 0.0  ;;  %v107_v0 = vld [vmem:[%s15528_s0 + $0x2c8] sm:$0xff]  ;;  %v106_v1 = vld [vmem:[%s15528_s0 + $0x2c0] sm:$0xff] }
  0x47   :  { %321 = vadd.xlane.f32.xlu1 %v320_v6  ;;  %318 = vadd.xlane.f32.xlu0 %v317_v7  ;;  %v416_v6 = vsel %vm214_vm0, %v85_v4, 0.0  ;;  %v413_v7 = vsel %vm214_vm0, %v84_v5, 0.0  ;;  %v482_v4 = vsel %vm214_vm0, %v107_v0, 0.0  ;;  %v479_v5 = vsel %vm214_vm0, %v106_v1, 0.0  ;;  %v123_v0 = vld [vmem:[%s15528_s0 + $0x348] sm:$0xff]  ;;  %v122_v1 = vld [vmem:[%s15528_s0 + $0x340] sm:$0xff] }
  0x4b   :  { %327 = vadd.xlane.f32.xlu1 %v326_v10  ;;  %324 = vadd.xlane.f32.xlu0 %v323_v11  ;;  %v422_v10 = vsel %vm214_vm0, %v87_v8, 0.0  ;;  %v419_v11 = vsel %vm214_vm0, %v86_v9, 0.0 }
  0x4f   :  { %333 = vadd.xlane.f32.xlu1 %v332_v14  ;;  %330 = vadd.xlane.f32.xlu0 %v329_v15  ;;  %v428_v14 = vsel %vm214_vm0, %v89_v12, 0.0  ;;  %v425_v15 = vsel %vm214_vm0, %v88_v13, 0.0  ;;  %v111_v12 = vld [vmem:[%s15528_s0 + $0x2e8] sm:$0xff]  ;;  %v110_v13 = vld [vmem:[%s15528_s0 + $0x2e0] sm:$0xff] }
  0x50   :  { %v494_v16 = vsel %vm214_vm0, %v111_v12, 0.0  ;;  %v491_v17 = vsel %vm214_vm0, %v110_v13, 0.0 }
  0x53   :  { %339 = vadd.xlane.f32.xlu1 %v338_v18  ;;  %336 = vadd.xlane.f32.xlu0 %v335_v19 }
  0x57   :  { %345 = vadd.xlane.f32.xlu1 %v344_v22  ;;  %342 = vadd.xlane.f32.xlu0 %v341_v23  ;;  %v93_v22 = vld [vmem:[%s15528_s0 + $0x258] sm:$0xff]  ;;  %v92_v23 = vld [vmem:[%s15528_s0 + $0x250] sm:$0xff] }
  0x5b   :  { %351 = vadd.xlane.f32.xlu1 %v350_v26  ;;  %348 = vadd.xlane.f32.xlu0 %v347_v27  ;;  %v440_v26 = vsel %vm214_vm0, %v93_v22, 0.0  ;;  %v437_v27 = vsel %vm214_vm0, %v92_v23, 0.0 }
  0x5f   :  { %357 = vadd.xlane.f32.xlu1 %v356_v30  ;;  %354 = vadd.xlane.f32.xlu0 %v353_v31 }
  0x63   :  { %363 = vadd.xlane.f32.xlu1 %v362_v34  ;;  %360 = vadd.xlane.f32.xlu0 %v359_v35  ;;  %v97_v34 = vld [vmem:[%s15528_s0 + $0x278] sm:$0xff]  ;;  %v96_v35 = vld [vmem:[%s15528_s0 + $0x270] sm:$0xff] }
  0x67   :  { %369 = vadd.xlane.f32.xlu1 %v368_v38  ;;  %366 = vadd.xlane.f32.xlu0 %v365_v39  ;;  %v452_v38 = vsel %vm214_vm0, %v97_v34, 0.0  ;;  %v449_v39 = vsel %vm214_vm0, %v96_v35, 0.0  ;;  %v506_v34 = vsel %vm214_vm0, %v115_v28, 0.0  ;;  %v503_v35 = vsel %vm214_vm0, %v114_v29, 0.0 }
  0x6b   :  { %375 = vadd.xlane.f32.xlu1 %v374_v42  ;;  %372 = vadd.xlane.f32.xlu0 %v371_v43 }
  0x6f   :  { %381 = vadd.xlane.f32.xlu1 %v380_v46  ;;  %378 = vadd.xlane.f32.xlu0 %v377_v47  ;;  %v101_v46 = vld [vmem:[%s15528_s0 + $0x298] sm:$0xff]  ;;  %v100_v47 = vld [vmem:[%s15528_s0 + $0x290] sm:$0xff] }
  0x73   :  { %387 = vadd.xlane.f32.xlu1 %v386_v50  ;;  %384 = vadd.xlane.f32.xlu0 %v383_v51  ;;  %v464_v50 = vsel %vm214_vm0, %v101_v46, 0.0  ;;  %v461_v51 = vsel %vm214_vm0, %v100_v47, 0.0  ;;  %v119_v46 = vld [vmem:[%s15528_s0 + $0x328] sm:$0xff]  ;;  %v118_v47 = vld [vmem:[%s15528_s0 + $0x320] sm:$0xff] }
  0x74   :  { %v518_v52 = vsel %vm214_vm0, %v119_v46, 0.0  ;;  %v515_v53 = vsel %vm214_vm0, %v118_v47, 0.0  ;;  %v131_v46 = vld [vmem:[%s15528_s0 + $0x388] sm:$0xff]  ;;  %v130_v47 = vld [vmem:[%s15528_s0 + $0x380] sm:$0xff] }
  0x77   :  { %393 = vadd.xlane.f32.xlu1 %v392_v54  ;;  %390 = vadd.xlane.f32.xlu0 %v389_v55 }
  0x7b   :  { %399 = vadd.xlane.f32.xlu1 %v398_v58  ;;  %396 = vadd.xlane.f32.xlu0 %v395_v59  ;;  %v105_v58 = vld [vmem:[%s15528_s0 + $0x2b8] sm:$0xff]  ;;  %v104_v59 = vld [vmem:[%s15528_s0 + $0x2b0] sm:$0xff] }
  0x7f   :  { %405 = vadd.xlane.f32.xlu1 %v404_v62  ;;  %402 = vadd.xlane.f32.xlu0 %v401_v63  ;;  %v476_v62 = vsel %vm214_vm0, %v105_v58, 0.0  ;;  %v473_v63 = vsel %vm214_vm0, %v104_v59, 0.0 }
  0x83   :  { %411 = vadd.xlane.f32.xlu1 %v410_v2  ;;  %408 = vadd.xlane.f32.xlu0 %v407_v3 }
  0x87   :  { %417 = vadd.xlane.f32.xlu1 %v416_v6  ;;  %414 = vadd.xlane.f32.xlu0 %v413_v7  ;;  %v109_v6 = vld [vmem:[%s15528_s0 + $0x2d8] sm:$0xff]  ;;  %v108_v7 = vld [vmem:[%s15528_s0 + $0x2d0] sm:$0xff] }
  0x8b   :  { %423 = vadd.xlane.f32.xlu1 %v422_v10  ;;  %420 = vadd.xlane.f32.xlu0 %v419_v11  ;;  %v488_v10 = vsel %vm214_vm0, %v109_v6, 0.0  ;;  %v485_v11 = vsel %vm214_vm0, %v108_v7, 0.0  ;;  %v530_v6 = vsel %vm214_vm0, %v123_v0, 0.0  ;;  %v527_v7 = vsel %vm214_vm0, %v122_v1, 0.0 }
  0x8f   :  { %429 = vadd.xlane.f32.xlu1 %v428_v14  ;;  %426 = vadd.xlane.f32.xlu0 %v425_v15 }
  0x90   :  { %v9206_v18 = vpop.xlane.xlu1 %222  ;;  %v9208_v19 = vpop.xlane.xlu0 %216 }
  0x93   :  { %435 = vadd.xlane.f32.xlu1 %v434_v20  ;;  %432 = vadd.xlane.f32.xlu0 %v431_v21  ;;  %v113_v20 = vld [vmem:[%s15528_s0 + $0x2f8] sm:$0xff]  ;;  %v112_v21 = vld [vmem:[%s15528_s0 + $0x2f0] sm:$0xff] }
  0x94   :  { %v9218_v24 = vpop.xlane.xlu1 %225  ;;  %v9220_v25 = vpop.xlane.xlu0 %219 }
  0x97   :  { %441 = vadd.xlane.f32.xlu1 %v440_v26  ;;  %438 = vadd.xlane.f32.xlu0 %v437_v27  ;;  %v500_v26 = vsel %vm214_vm0, %v113_v20, 0.0  ;;  %v497_v27 = vsel %vm214_vm0, %v112_v21, 0.0  ;;  %v127_v20 = vld [vmem:[%s15528_s0 + $0x368] sm:$0xff]  ;;  %v126_v21 = vld [vmem:[%s15528_s0 + $0x360] sm:$0xff] }
  0x98   :  { %v9230_v30 = vpop.xlane.xlu1 %231  ;;  %v9232_v31 = vpop.xlane.xlu0 %228  ;;  %v542_v28 = vsel %vm214_vm0, %v127_v20, 0.0  ;;  %v539_v29 = vsel %vm214_vm0, %v126_v21, 0.0 }
  0x9b   :  { %447 = vadd.xlane.f32.xlu1 %v446_v32  ;;  %444 = vadd.xlane.f32.xlu0 %v443_v33 }
  0x9c   :  { %v9242_v36 = vpop.xlane.xlu1 %237  ;;  %v9244_v37 = vpop.xlane.xlu0 %234 }
  0x9f   :  { %453 = vadd.xlane.f32.xlu1 %v452_v38  ;;  %450 = vadd.xlane.f32.xlu0 %v449_v39  ;;  %v117_v38 = vld [vmem:[%s15528_s0 + $0x318] sm:$0xff]  ;;  %v116_v39 = vld [vmem:[%s15528_s0 + $0x310] sm:$0xff] }
  0xa0   :  { %v9254_v42 = vpop.xlane.xlu1 %243  ;;  %v9256_v43 = vpop.xlane.xlu0 %240 }
  0xa3   :  { %459 = vadd.xlane.f32.xlu1 %v458_v44  ;;  %456 = vadd.xlane.f32.xlu0 %v455_v45  ;;  %v512_v44 = vsel %vm214_vm0, %v117_v38, 0.0  ;;  %v509_v45 = vsel %vm214_vm0, %v116_v39, 0.0 }
  0xa4   :  { %v9266_v48 = vpop.xlane.xlu1 %249  ;;  %v9268_v49 = vpop.xlane.xlu0 %246 }
  0xa7   :  { %465 = vadd.xlane.f32.xlu1 %v464_v50  ;;  %462 = vadd.xlane.f32.xlu0 %v461_v51 }
  0xa8   :  { %v9278_v54 = vpop.xlane.xlu1 %255  ;;  %v9280_v55 = vpop.xlane.xlu0 %252 }
  0xab   :  { %471 = vadd.xlane.f32.xlu1 %v470_v56  ;;  %468 = vadd.xlane.f32.xlu0 %v467_v57  ;;  %v121_v56 = vld [vmem:[%s15528_s0 + $0x338] sm:$0xff]  ;;  %v120_v57 = vld [vmem:[%s15528_s0 + $0x330] sm:$0xff] }
  0xac   :  { %v9290_v60 = vpop.xlane.xlu1 %261  ;;  %v9292_v61 = vpop.xlane.xlu0 %258 }
  0xaf   :  { %477 = vadd.xlane.f32.xlu1 %v476_v62  ;;  %474 = vadd.xlane.f32.xlu0 %v473_v63  ;;  %v524_v62 = vsel %vm214_vm0, %v121_v56, 0.0  ;;  %v521_v63 = vsel %vm214_vm0, %v120_v57, 0.0  ;;  %v554_v56 = vsel %vm214_vm0, %v131_v46, 0.0  ;;  %v551_v57 = vsel %vm214_vm0, %v130_v47, 0.0  ;;  %v139_v46 = vld [vmem:[%s15528_s0 + $0x3c8] sm:$0xff]  ;;  %v138_v47 = vld [vmem:[%s15528_s0 + $0x3c0] sm:$0xff] }
  0xb0   :  { %v9302_v2 = vpop.xlane.xlu1 %267  ;;  %v9304_v3 = vpop.xlane.xlu0 %264 }
  0xb3   :  { %483 = vadd.xlane.f32.xlu1 %v482_v4  ;;  %480 = vadd.xlane.f32.xlu0 %v479_v5 }
  0xb4   :  { %v9314_v8 = vpop.xlane.xlu1 %273  ;;  %v9316_v9 = vpop.xlane.xlu0 %270 }
  0xb7   :  { %489 = vadd.xlane.f32.xlu1 %v488_v10  ;;  %486 = vadd.xlane.f32.xlu0 %v485_v11  ;;  %v125_v10 = vld [vmem:[%s15528_s0 + $0x358] sm:$0xff]  ;;  %v124_v11 = vld [vmem:[%s15528_s0 + $0x350] sm:$0xff] }
  0xb8   :  { %v9326_v14 = vpop.xlane.xlu1 %279  ;;  %v9328_v15 = vpop.xlane.xlu0 %276 }
  0xbb   :  { %495 = vadd.xlane.f32.xlu1 %v494_v16  ;;  %492 = vadd.xlane.f32.xlu0 %v491_v17  ;;  %v536_v16 = vsel %vm214_vm0, %v125_v10, 0.0  ;;  %v533_v17 = vsel %vm214_vm0, %v124_v11, 0.0  ;;  %v135_v10 = vld [vmem:[%s15528_s0 + $0x3a8] sm:$0xff]  ;;  %v134_v11 = vld [vmem:[%s15528_s0 + $0x3a0] sm:$0xff] }
  0xbc   :  { %v9338_v22 = vpop.xlane.xlu1 %285  ;;  %v9340_v23 = vpop.xlane.xlu0 %282  ;;  %v566_v20 = vsel %vm214_vm0, %v135_v10, 0.0  ;;  %v563_v21 = vsel %vm214_vm0, %v134_v11, 0.0 }
  0xbf   :  { %501 = vadd.xlane.f32.xlu1 %v500_v26  ;;  %498 = vadd.xlane.f32.xlu0 %v497_v27 }
  0xc0   :  { %v9350_v32 = vpop.xlane.xlu1 %291  ;;  %v9352_v33 = vpop.xlane.xlu0 %288 }
  0xc3   :  { %507 = vadd.xlane.f32.xlu1 %v506_v34  ;;  %504 = vadd.xlane.f32.xlu0 %v503_v35  ;;  %v129_v34 = vld [vmem:[%s15528_s0 + $0x378] sm:$0xff]  ;;  %v128_v35 = vld [vmem:[%s15528_s0 + $0x370] sm:$0xff] }
  0xc4   :  { %v9362_v40 = vpop.xlane.xlu1 %297  ;;  %v9364_v41 = vpop.xlane.xlu0 %294 }
  0xc7   :  { %513 = vadd.xlane.f32.xlu1 %v512_v44  ;;  %510 = vadd.xlane.f32.xlu0 %v509_v45  ;;  %v548_v44 = vsel %vm214_vm0, %v129_v34, 0.0  ;;  %v545_v45 = vsel %vm214_vm0, %v128_v35, 0.0 }
  0xc8   :  { %v9374_v50 = vpop.xlane.xlu1 %303  ;;  %v9376_v51 = vpop.xlane.xlu0 %300 }
  0xcb   :  { %519 = vadd.xlane.f32.xlu1 %v518_v52  ;;  %516 = vadd.xlane.f32.xlu0 %v515_v53 }
  0xcc   :  { %v9386_v58 = vpop.xlane.xlu1 %309  ;;  %v9388_v59 = vpop.xlane.xlu0 %306 }
  0xcf   :  { %525 = vadd.xlane.f32.xlu1 %v524_v62  ;;  %522 = vadd.xlane.f32.xlu0 %v521_v63  ;;  %v133_v62 = vld [vmem:[%s15528_s0 + $0x398] sm:$0xff]  ;;  %v132_v63 = vld [vmem:[%s15528_s0 + $0x390] sm:$0xff] }
  0xd0   :  { %v9398_v4 = vpop.xlane.xlu1 %315  ;;  %v9400_v5 = vpop.xlane.xlu0 %312 }
  0xd3   :  { %531 = vadd.xlane.f32.xlu1 %v530_v6  ;;  %528 = vadd.xlane.f32.xlu0 %v527_v7  ;;  %v560_v6 = vsel %vm214_vm0, %v133_v62, 0.0  ;;  %v557_v7 = vsel %vm214_vm0, %v132_v63, 0.0  ;;  %v578_v62 = vsel %vm214_vm0, %v139_v46, 0.0  ;;  %v575_v63 = vsel %vm214_vm0, %v138_v47, 0.0 }
  0xd4   :  { %v9410_v12 = vpop.xlane.xlu1 %321  ;;  %v9412_v13 = vpop.xlane.xlu0 %318 }
  0xd7   :  { %537 = vadd.xlane.f32.xlu1 %v536_v16  ;;  %534 = vadd.xlane.f32.xlu0 %v533_v17 }
  0xd8   :  { %v9422_v26 = vpop.xlane.xlu1 %327  ;;  %v9424_v27 = vpop.xlane.xlu0 %324 }
  0xdb   :  { %543 = vadd.xlane.f32.xlu1 %v542_v28  ;;  %540 = vadd.xlane.f32.xlu0 %v539_v29  ;;  %v137_v28 = vld [vmem:[%s15528_s0 + $0x3b8] sm:$0xff]  ;;  %v136_v29 = vld [vmem:[%s15528_s0 + $0x3b0] sm:$0xff] }
  0xdc   :  { %v9434_v38 = vpop.xlane.xlu1 %333  ;;  %v9436_v39 = vpop.xlane.xlu0 %330 }
  0xdf   :  { %549 = vadd.xlane.f32.xlu1 %v548_v44  ;;  %546 = vadd.xlane.f32.xlu0 %v545_v45  ;;  %v572_v44 = vsel %vm214_vm0, %v137_v28, 0.0  ;;  %v569_v45 = vsel %vm214_vm0, %v136_v29, 0.0  ;;  %v143_v28 = vld [vmem:[%s15528_s0 + $0x3e8] sm:$0xff]  ;;  %v142_v29 = vld [vmem:[%s15528_s0 + $0x3e0] sm:$0xff] }
  0xe0   :  { %v9446_v52 = vpop.xlane.xlu1 %339  ;;  %v9448_v53 = vpop.xlane.xlu0 %336  ;;  %v590_v46 = vsel %vm214_vm0, %v143_v28, 0.0  ;;  %v587_v47 = vsel %vm214_vm0, %v142_v29, 0.0  ;;  %v147_v28 = vld [vmem:[%s15528_s0 + $0x408] sm:$0xff]  ;;  %v146_v29 = vld [vmem:[%s15528_s0 + $0x400] sm:$0xff] }
  0xe3   :  { %555 = vadd.xlane.f32.xlu1 %v554_v56  ;;  %552 = vadd.xlane.f32.xlu0 %v551_v57 }
  0xe4   :  { %v9458_v0 = vpop.xlane.xlu1 %345  ;;  %v9460_v1 = vpop.xlane.xlu0 %342 }
  0xe7   :  { %561 = vadd.xlane.f32.xlu1 %v560_v6  ;;  %558 = vadd.xlane.f32.xlu0 %v557_v7  ;;  %v141_v6 = vld [vmem:[%s15528_s0 + $0x3d8] sm:$0xff]  ;;  %v140_v7 = vld [vmem:[%s15528_s0 + $0x3d0] sm:$0xff] }
  0xe8   :  { %v9470_v16 = vpop.xlane.xlu1 %351  ;;  %v9472_v17 = vpop.xlane.xlu0 %348 }
  0xeb   :  { %567 = vadd.xlane.f32.xlu1 %v566_v20  ;;  %564 = vadd.xlane.f32.xlu0 %v563_v21  ;;  %v584_v20 = vsel %vm214_vm0, %v141_v6, 0.0  ;;  %v581_v21 = vsel %vm214_vm0, %v140_v7, 0.0 }
  0xec   :  { %v9482_v34 = vpop.xlane.xlu1 %357  ;;  %v9484_v35 = vpop.xlane.xlu0 %354 }
  0xef   :  { %573 = vadd.xlane.f32.xlu1 %v572_v44  ;;  %570 = vadd.xlane.f32.xlu0 %v569_v45 }
  0xf0   :  { %v9494_v56 = vpop.xlane.xlu1 %363  ;;  %v9496_v57 = vpop.xlane.xlu0 %360 }
  0xf3   :  { %579 = vadd.xlane.f32.xlu1 %v578_v62  ;;  %576 = vadd.xlane.f32.xlu0 %v575_v63  ;;  %v145_v62 = vld [vmem:[%s15528_s0 + $0x3f8] sm:$0xff]  ;;  %v144_v63 = vld [vmem:[%s15528_s0 + $0x3f0] sm:$0xff] }
  0xf4   :  { %v9506_v10 = vpop.xlane.xlu1 %369  ;;  %v9508_v11 = vpop.xlane.xlu0 %366 }
  0xf5   :  { %15733 = vst [vmem:[#allocation2_spill] sm:$0xff] %v9508_v11 }
  0xf7   :  { %585 = vadd.xlane.f32.xlu1 %v584_v20  ;;  %582 = vadd.xlane.f32.xlu0 %v581_v21  ;;  %v596_v20 = vsel %vm214_vm0, %v145_v62, 0.0  ;;  %v593_v21 = vsel %vm214_vm0, %v144_v63, 0.0  ;;  %v599_v62 = vsel %vm214_vm0, %v146_v29, 0.0  ;;  %v149_v63 = vld [vmem:[%s15528_s0 + $0x418] sm:$0xff]  ;;  %v151_v29 = vld [vmem:[%s15528_s0 + $0x428] sm:$0xff] }
  0xf8   :  { %v9518_v44 = vpop.xlane.xlu1 %375  ;;  %v9520_v45 = vpop.xlane.xlu0 %372 }
  0xf9   :  { %15734 = vst [vmem:[#allocation3_spill] sm:$0xff] %v9518_v44  ;;  %15735 = vst [vmem:[#allocation4_spill] sm:$0xff] %v9520_v45  ;;  %v803_v45 = vmul.f32 0.020408163, %v9208_v19  ;;  %v212_v19 = vld [vmem:[%s15528_s0 + $0x610] sm:$0xff] }
  0xfa   :  { %v797_v11 = vsel %vm214_vm0, %v212_v19, 0.0 }
  0xfb   :  { %591 = vadd.xlane.f32.xlu1 %v590_v46  ;;  %588 = vadd.xlane.f32.xlu0 %v587_v47 }
  0xfc   :  { %v9530_v6 = vpop.xlane.xlu1 %381  ;;  %v9532_v7 = vpop.xlane.xlu0 %378 }
  0xfd   :  { %15736 = vst [vmem:[#allocation5_spill] sm:$0xff] %v9530_v6  ;;  %15737 = vst [vmem:[#allocation6_spill] sm:$0xff] %v9532_v7  ;;  %v602_v7 = vsel %vm214_vm0, %v147_v28, 0.0  ;;  %v148_v6 = vld [vmem:[%s15528_s0 + $0x410] sm:$0xff] }
  0xfe   :  { %v605_v28 = vsel %vm214_vm0, %v148_v6, 0.0  ;;  %v153_v6 = vld [vmem:[%s15528_s0 + $0x438] sm:$0xff] }
  0xff   :  { %597 = vadd.xlane.f32.xlu1 %v596_v20  ;;  %594 = vadd.xlane.f32.xlu0 %v593_v21 }
 0x100   :  { %v9542_v46 = vpop.xlane.xlu1 %387  ;;  %v9544_v47 = vpop.xlane.xlu0 %384 }
 0x101   :  { %15738 = vst [vmem:[#allocation7_spill] sm:$0xff] %v9542_v46  ;;  %15739 = vst [vmem:[#allocation8_spill] sm:$0xff] %v9544_v47  ;;  %v608_v47 = vsel %vm214_vm0, %v149_v63, 0.0  ;;  %v150_v46 = vld [vmem:[%s15528_s0 + $0x420] sm:$0xff] }
 0x102   :  { %v611_v63 = vsel %vm214_vm0, %v150_v46, 0.0  ;;  %v155_v46 = vld [vmem:[%s15528_s0 + $0x448] sm:$0xff] }
 0x103   :  { %603 = vadd.xlane.f32.xlu1 %v602_v7  ;;  %600 = vadd.xlane.f32.xlu0 %v599_v62 }
 0x104   :  { %v9554_v20 = vpop.xlane.xlu1 %393  ;;  %v9556_v21 = vpop.xlane.xlu0 %390 }
 0x105   :  { %15740 = vst [vmem:[#allocation9_spill] sm:$0xff] %v9554_v20  ;;  %15741 = vst [vmem:[#allocation10_spill] sm:$0xff] %v9556_v21  ;;  %v614_v21 = vsel %vm214_vm0, %v151_v29, 0.0  ;;  %v152_v20 = vld [vmem:[%s15528_s0 + $0x430] sm:$0xff] }
 0x106   :  { %v617_v29 = vsel %vm214_vm0, %v152_v20, 0.0  ;;  %v157_v20 = vld [vmem:[%s15528_s0 + $0x458] sm:$0xff] }
 0x107   :  { %609 = vadd.xlane.f32.xlu1 %v608_v47  ;;  %606 = vadd.xlane.f32.xlu0 %v605_v28 }
 0x108   :  { %v9566_v7 = vpop.xlane.xlu1 %399  ;;  %v9568_v62 = vpop.xlane.xlu0 %396 }
 0x109   :  { %15742 = vst [vmem:[#allocation11_spill] sm:$0xff] %v9566_v7  ;;  %15743 = vst [vmem:[#allocation12_spill] sm:$0xff] %v9568_v62  ;;  %v620_v62 = vsel %vm214_vm0, %v153_v6, 0.0  ;;  %v154_v7 = vld [vmem:[%s15528_s0 + $0x440] sm:$0xff] }
 0x10a   :  { %v623_v6 = vsel %vm214_vm0, %v154_v7, 0.0  ;;  %v159_v7 = vld [vmem:[%s15528_s0 + $0x468] sm:$0xff] }
 0x10b   :  { %615 = vadd.xlane.f32.xlu1 %v614_v21  ;;  %612 = vadd.xlane.f32.xlu0 %v611_v63 }
 0x10c   :  { %v9578_v47 = vpop.xlane.xlu1 %405  ;;  %v9580_v28 = vpop.xlane.xlu0 %402 }
 0x10d   :  { %15744 = vst [vmem:[#allocation13_spill] sm:$0xff] %v9578_v47  ;;  %15745 = vst [vmem:[#allocation14_spill] sm:$0xff] %v9580_v28  ;;  %v626_v28 = vsel %vm214_vm0, %v155_v46, 0.0  ;;  %v156_v47 = vld [vmem:[%s15528_s0 + $0x450] sm:$0xff] }
 0x10e   :  { %v629_v46 = vsel %vm214_vm0, %v156_v47, 0.0  ;;  %v161_v47 = vld [vmem:[%s15528_s0 + $0x478] sm:$0xff] }
 0x10f   :  { %621 = vadd.xlane.f32.xlu1 %v620_v62  ;;  %618 = vadd.xlane.f32.xlu0 %v617_v29 }
 0x110   :  { %v9590_v21 = vpop.xlane.xlu1 %411  ;;  %v9592_v63 = vpop.xlane.xlu0 %408 }
 0x111   :  { %15746 = vst [vmem:[#allocation15_spill] sm:$0xff] %v9590_v21  ;;  %15747 = vst [vmem:[#allocation16_spill] sm:$0xff] %v9592_v63  ;;  %v632_v63 = vsel %vm214_vm0, %v157_v20, 0.0  ;;  %v158_v21 = vld [vmem:[%s15528_s0 + $0x460] sm:$0xff] }
 0x112   :  { %v635_v20 = vsel %vm214_vm0, %v158_v21, 0.0  ;;  %v163_v21 = vld [vmem:[%s15528_s0 + $0x488] sm:$0xff] }
 0x113   :  { %627 = vadd.xlane.f32.xlu1 %v626_v28  ;;  %624 = vadd.xlane.f32.xlu0 %v623_v6 }
 0x114   :  { %v9602_v62 = vpop.xlane.xlu1 %417  ;;  %v9604_v29 = vpop.xlane.xlu0 %414 }
 0x115   :  { %15748 = vst [vmem:[#allocation17_spill] sm:$0xff] %v9602_v62  ;;  %15749 = vst [vmem:[#allocation18_spill] sm:$0xff] %v9604_v29  ;;  %v638_v29 = vsel %vm214_vm0, %v159_v7, 0.0  ;;  %v160_v62 = vld [vmem:[%s15528_s0 + $0x470] sm:$0xff] }
 0x116   :  { %v641_v7 = vsel %vm214_vm0, %v160_v62, 0.0  ;;  %v165_v62 = vld [vmem:[%s15528_s0 + $0x498] sm:$0xff] }
 0x117   :  { %633 = vadd.xlane.f32.xlu1 %v632_v63  ;;  %630 = vadd.xlane.f32.xlu0 %v629_v46 }
 0x118   :  { %v9614_v28 = vpop.xlane.xlu1 %423  ;;  %v9616_v6 = vpop.xlane.xlu0 %420 }
 0x119   :  { %15750 = vst [vmem:[#allocation19_spill] sm:$0xff] %v9614_v28  ;;  %15751 = vst [vmem:[#allocation20_spill] sm:$0xff] %v9616_v6  ;;  %v644_v6 = vsel %vm214_vm0, %v161_v47, 0.0  ;;  %v162_v28 = vld [vmem:[%s15528_s0 + $0x480] sm:$0xff] }
 0x11a   :  { %v647_v47 = vsel %vm214_vm0, %v162_v28, 0.0  ;;  %v167_v28 = vld [vmem:[%s15528_s0 + $0x4a8] sm:$0xff] }
 0x11b   :  { %639 = vadd.xlane.f32.xlu1 %v638_v29  ;;  %636 = vadd.xlane.f32.xlu0 %v635_v20 }
 0x11c   :  { %v9626_v63 = vpop.xlane.xlu1 %429  ;;  %v9628_v46 = vpop.xlane.xlu0 %426 }
 0x11d   :  { %15752 = vst [vmem:[#allocation21_spill] sm:$0xff] %v9626_v63  ;;  %15753 = vst [vmem:[#allocation22_spill] sm:$0xff] %v9628_v46  ;;  %v650_v46 = vsel %vm214_vm0, %v163_v21, 0.0  ;;  %v164_v63 = vld [vmem:[%s15528_s0 + $0x490] sm:$0xff] }
 0x11e   :  { %v653_v21 = vsel %vm214_vm0, %v164_v63, 0.0  ;;  %v169_v63 = vld [vmem:[%s15528_s0 + $0x4b8] sm:$0xff] }
 0x11f   :  { %645 = vadd.xlane.f32.xlu1 %v644_v6  ;;  %642 = vadd.xlane.f32.xlu0 %v641_v7 }
 0x120   :  { %v9638_v29 = vpop.xlane.xlu1 %435  ;;  %v9640_v20 = vpop.xlane.xlu0 %432 }
 0x121   :  { %15754 = vst [vmem:[#allocation23_spill] sm:$0xff] %v9638_v29  ;;  %15755 = vst [vmem:[#allocation24_spill] sm:$0xff] %v9640_v20  ;;  %v656_v20 = vsel %vm214_vm0, %v165_v62, 0.0  ;;  %v166_v29 = vld [vmem:[%s15528_s0 + $0x4a0] sm:$0xff] }
 0x122   :  { %v659_v62 = vsel %vm214_vm0, %v166_v29, 0.0  ;;  %v171_v29 = vld [vmem:[%s15528_s0 + $0x4c8] sm:$0xff] }
 0x123   :  { %651 = vadd.xlane.f32.xlu1 %v650_v46  ;;  %648 = vadd.xlane.f32.xlu0 %v647_v47 }
 0x124   :  { %v9650_v6 = vpop.xlane.xlu1 %441  ;;  %v9652_v7 = vpop.xlane.xlu0 %438 }
 0x125   :  { %15756 = vst [vmem:[#allocation25_spill] sm:$0xff] %v9650_v6  ;;  %15757 = vst [vmem:[#allocation26_spill] sm:$0xff] %v9652_v7  ;;  %v662_v7 = vsel %vm214_vm0, %v167_v28, 0.0  ;;  %v168_v6 = vld [vmem:[%s15528_s0 + $0x4b0] sm:$0xff] }
 0x126   :  { %v665_v28 = vsel %vm214_vm0, %v168_v6, 0.0  ;;  %v173_v6 = vld [vmem:[%s15528_s0 + $0x4d8] sm:$0xff] }
 0x127   :  { %657 = vadd.xlane.f32.xlu1 %v656_v20  ;;  %654 = vadd.xlane.f32.xlu0 %v653_v21 }
 0x128   :  { %v9662_v46 = vpop.xlane.xlu1 %447  ;;  %v9664_v47 = vpop.xlane.xlu0 %444 }
 0x129   :  { %15758 = vst [vmem:[#allocation27_spill] sm:$0xff] %v9662_v46  ;;  %15759 = vst [vmem:[#allocation28_spill] sm:$0xff] %v9664_v47  ;;  %v668_v47 = vsel %vm214_vm0, %v169_v63, 0.0  ;;  %v170_v46 = vld [vmem:[%s15528_s0 + $0x4c0] sm:$0xff] }
 0x12a   :  { %v671_v63 = vsel %vm214_vm0, %v170_v46, 0.0  ;;  %v175_v46 = vld [vmem:[%s15528_s0 + $0x4e8] sm:$0xff] }
 0x12b   :  { %663 = vadd.xlane.f32.xlu1 %v662_v7  ;;  %660 = vadd.xlane.f32.xlu0 %v659_v62 }
 0x12c   :  { %v9674_v20 = vpop.xlane.xlu1 %453  ;;  %v9676_v21 = vpop.xlane.xlu0 %450 }
 0x12d   :  { %15760 = vst [vmem:[#allocation29_spill] sm:$0xff] %v9674_v20  ;;  %15761 = vst [vmem:[#allocation30_spill] sm:$0xff] %v9676_v21  ;;  %v674_v21 = vsel %vm214_vm0, %v171_v29, 0.0  ;;  %v172_v20 = vld [vmem:[%s15528_s0 + $0x4d0] sm:$0xff] }
 0x12e   :  { %v677_v29 = vsel %vm214_vm0, %v172_v20, 0.0  ;;  %v177_v20 = vld [vmem:[%s15528_s0 + $0x4f8] sm:$0xff] }
 0x12f   :  { %669 = vadd.xlane.f32.xlu1 %v668_v47  ;;  %666 = vadd.xlane.f32.xlu0 %v665_v28 }
 0x130   :  { %v9686_v7 = vpop.xlane.xlu1 %459  ;;  %v9688_v62 = vpop.xlane.xlu0 %456 }
 0x131   :  { %15762 = vst [vmem:[#allocation31_spill] sm:$0xff] %v9686_v7  ;;  %15763 = vst [vmem:[#allocation32_spill] sm:$0xff] %v9688_v62  ;;  %v680_v62 = vsel %vm214_vm0, %v173_v6, 0.0  ;;  %v174_v7 = vld [vmem:[%s15528_s0 + $0x4e0] sm:$0xff] }
 0x132   :  { %v683_v6 = vsel %vm214_vm0, %v174_v7, 0.0  ;;  %v179_v7 = vld [vmem:[%s15528_s0 + $0x508] sm:$0xff] }
 0x133   :  { %675 = vadd.xlane.f32.xlu1 %v674_v21  ;;  %672 = vadd.xlane.f32.xlu0 %v671_v63 }
 0x134   :  { %v9698_v47 = vpop.xlane.xlu1 %465  ;;  %v9700_v28 = vpop.xlane.xlu0 %462 }
 0x135   :  { %15764 = vst [vmem:[#allocation33_spill] sm:$0xff] %v9698_v47  ;;  %15765 = vst [vmem:[#allocation34_spill] sm:$0xff] %v9700_v28  ;;  %v686_v28 = vsel %vm214_vm0, %v175_v46, 0.0  ;;  %v176_v47 = vld [vmem:[%s15528_s0 + $0x4f0] sm:$0xff] }
 0x136   :  { %v689_v46 = vsel %vm214_vm0, %v176_v47, 0.0  ;;  %v181_v47 = vld [vmem:[%s15528_s0 + $0x518] sm:$0xff] }
 0x137   :  { %681 = vadd.xlane.f32.xlu1 %v680_v62  ;;  %678 = vadd.xlane.f32.xlu0 %v677_v29 }
 0x138   :  { %v9710_v21 = vpop.xlane.xlu1 %471  ;;  %v9712_v63 = vpop.xlane.xlu0 %468 }
 0x139   :  { %15766 = vst [vmem:[#allocation35_spill] sm:$0xff] %v9710_v21  ;;  %15767 = vst [vmem:[#allocation36_spill] sm:$0xff] %v9712_v63  ;;  %v692_v63 = vsel %vm214_vm0, %v177_v20, 0.0  ;;  %v178_v21 = vld [vmem:[%s15528_s0 + $0x500] sm:$0xff] }
 0x13a   :  { %v695_v20 = vsel %vm214_vm0, %v178_v21, 0.0  ;;  %v183_v21 = vld [vmem:[%s15528_s0 + $0x528] sm:$0xff] }
 0x13b   :  { %687 = vadd.xlane.f32.xlu1 %v686_v28  ;;  %684 = vadd.xlane.f32.xlu0 %v683_v6 }
 0x13c   :  { %v9722_v62 = vpop.xlane.xlu1 %477  ;;  %v9724_v29 = vpop.xlane.xlu0 %474 }
 0x13d   :  { %15768 = vst [vmem:[#allocation37_spill] sm:$0xff] %v9722_v62  ;;  %15769 = vst [vmem:[#allocation38_spill] sm:$0xff] %v9724_v29  ;;  %v698_v29 = vsel %vm214_vm0, %v179_v7, 0.0  ;;  %v180_v62 = vld [vmem:[%s15528_s0 + $0x510] sm:$0xff] }
 0x13e   :  { %v701_v7 = vsel %vm214_vm0, %v180_v62, 0.0  ;;  %v185_v62 = vld [vmem:[%s15528_s0 + $0x538] sm:$0xff] }
 0x13f   :  { %693 = vadd.xlane.f32.xlu1 %v692_v63  ;;  %690 = vadd.xlane.f32.xlu0 %v689_v46 }
 0x140   :  { %v9734_v28 = vpop.xlane.xlu1 %483  ;;  %v9736_v6 = vpop.xlane.xlu0 %480 }
 0x141   :  { %15770 = vst [vmem:[#allocation39_spill] sm:$0xff] %v9734_v28  ;;  %15771 = vst [vmem:[#allocation40_spill] sm:$0xff] %v9736_v6  ;;  %v704_v6 = vsel %vm214_vm0, %v181_v47, 0.0  ;;  %v182_v28 = vld [vmem:[%s15528_s0 + $0x520] sm:$0xff] }
 0x142   :  { %v707_v47 = vsel %vm214_vm0, %v182_v28, 0.0  ;;  %v187_v28 = vld [vmem:[%s15528_s0 + $0x548] sm:$0xff] }
 0x143   :  { %699 = vadd.xlane.f32.xlu1 %v698_v29  ;;  %696 = vadd.xlane.f32.xlu0 %v695_v20 }
 0x144   :  { %v9746_v63 = vpop.xlane.xlu1 %489  ;;  %v9748_v46 = vpop.xlane.xlu0 %486 }
 0x145   :  { %15772 = vst [vmem:[#allocation41_spill] sm:$0xff] %v9746_v63  ;;  %15773 = vst [vmem:[#allocation42_spill] sm:$0xff] %v9748_v46  ;;  %v710_v46 = vsel %vm214_vm0, %v183_v21, 0.0  ;;  %v184_v63 = vld [vmem:[%s15528_s0 + $0x530] sm:$0xff] }
 0x146   :  { %v713_v21 = vsel %vm214_vm0, %v184_v63, 0.0  ;;  %v189_v63 = vld [vmem:[%s15528_s0 + $0x558] sm:$0xff] }
 0x147   :  { %705 = vadd.xlane.f32.xlu1 %v704_v6  ;;  %702 = vadd.xlane.f32.xlu0 %v701_v7 }
 0x148   :  { %v9758_v29 = vpop.xlane.xlu1 %495  ;;  %v9760_v20 = vpop.xlane.xlu0 %492 }
 0x149   :  { %15774 = vst [vmem:[#allocation43_spill] sm:$0xff] %v9758_v29  ;;  %15775 = vst [vmem:[#allocation44_spill] sm:$0xff] %v9760_v20  ;;  %v716_v20 = vsel %vm214_vm0, %v185_v62, 0.0  ;;  %v186_v29 = vld [vmem:[%s15528_s0 + $0x540] sm:$0xff] }
 0x14a   :  { %v719_v62 = vsel %vm214_vm0, %v186_v29, 0.0  ;;  %v191_v29 = vld [vmem:[%s15528_s0 + $0x568] sm:$0xff] }
 0x14b   :  { %711 = vadd.xlane.f32.xlu1 %v710_v46  ;;  %708 = vadd.xlane.f32.xlu0 %v707_v47 }
 0x14c   :  { %v9770_v6 = vpop.xlane.xlu1 %501  ;;  %v9772_v7 = vpop.xlane.xlu0 %498 }
 0x14d   :  { %15776 = vst [vmem:[#allocation45_spill] sm:$0xff] %v9770_v6  ;;  %15777 = vst [vmem:[#allocation46_spill] sm:$0xff] %v9772_v7  ;;  %v722_v7 = vsel %vm214_vm0, %v187_v28, 0.0  ;;  %v188_v6 = vld [vmem:[%s15528_s0 + $0x550] sm:$0xff] }
 0x14e   :  { %v725_v28 = vsel %vm214_vm0, %v188_v6, 0.0  ;;  %v193_v6 = vld [vmem:[%s15528_s0 + $0x578] sm:$0xff] }
 0x14f   :  { %717 = vadd.xlane.f32.xlu1 %v716_v20  ;;  %714 = vadd.xlane.f32.xlu0 %v713_v21 }
 0x150   :  { %v9782_v46 = vpop.xlane.xlu1 %507  ;;  %v9784_v47 = vpop.xlane.xlu0 %504 }
 0x151   :  { %15778 = vst [vmem:[#allocation47_spill] sm:$0xff] %v9782_v46  ;;  %15779 = vst [vmem:[#allocation48_spill] sm:$0xff] %v9784_v47  ;;  %v728_v47 = vsel %vm214_vm0, %v189_v63, 0.0  ;;  %v190_v46 = vld [vmem:[%s15528_s0 + $0x560] sm:$0xff] }
 0x152   :  { %v731_v63 = vsel %vm214_vm0, %v190_v46, 0.0  ;;  %v195_v46 = vld [vmem:[%s15528_s0 + $0x588] sm:$0xff] }
 0x153   :  { %723 = vadd.xlane.f32.xlu1 %v722_v7  ;;  %720 = vadd.xlane.f32.xlu0 %v719_v62 }
 0x154   :  { %v9794_v20 = vpop.xlane.xlu1 %513  ;;  %v9796_v21 = vpop.xlane.xlu0 %510 }
 0x155   :  { %15780 = vst [vmem:[#allocation49_spill] sm:$0xff] %v9794_v20  ;;  %15781 = vst [vmem:[#allocation50_spill] sm:$0xff] %v9796_v21  ;;  %v734_v21 = vsel %vm214_vm0, %v191_v29, 0.0  ;;  %v192_v20 = vld [vmem:[%s15528_s0 + $0x570] sm:$0xff] }
 0x156   :  { %v737_v29 = vsel %vm214_vm0, %v192_v20, 0.0  ;;  %v197_v20 = vld [vmem:[%s15528_s0 + $0x598] sm:$0xff] }
 0x157   :  { %729 = vadd.xlane.f32.xlu1 %v728_v47  ;;  %726 = vadd.xlane.f32.xlu0 %v725_v28 }
 0x158   :  { %v9806_v7 = vpop.xlane.xlu1 %519  ;;  %v9808_v62 = vpop.xlane.xlu0 %516 }
 0x159   :  { %15782 = vst [vmem:[#allocation51_spill] sm:$0xff] %v9806_v7  ;;  %15783 = vst [vmem:[#allocation52_spill] sm:$0xff] %v9808_v62  ;;  %v740_v62 = vsel %vm214_vm0, %v193_v6, 0.0  ;;  %v194_v7 = vld [vmem:[%s15528_s0 + $0x580] sm:$0xff] }
 0x15a   :  { %v743_v6 = vsel %vm214_vm0, %v194_v7, 0.0  ;;  %v199_v7 = vld [vmem:[%s15528_s0 + $0x5a8] sm:$0xff] }
 0x15b   :  { %735 = vadd.xlane.f32.xlu1 %v734_v21  ;;  %732 = vadd.xlane.f32.xlu0 %v731_v63 }
 0x15c   :  { %v9818_v47 = vpop.xlane.xlu1 %525  ;;  %v9820_v28 = vpop.xlane.xlu0 %522 }
 0x15d   :  { %15784 = vst [vmem:[#allocation53_spill] sm:$0xff] %v9818_v47  ;;  %15785 = vst [vmem:[#allocation54_spill] sm:$0xff] %v9820_v28  ;;  %v746_v28 = vsel %vm214_vm0, %v195_v46, 0.0  ;;  %v196_v47 = vld [vmem:[%s15528_s0 + $0x590] sm:$0xff] }
 0x15e   :  { %v749_v46 = vsel %vm214_vm0, %v196_v47, 0.0  ;;  %v201_v47 = vld [vmem:[%s15528_s0 + $0x5b8] sm:$0xff] }
 0x15f   :  { %741 = vadd.xlane.f32.xlu1 %v740_v62  ;;  %738 = vadd.xlane.f32.xlu0 %v737_v29 }
 0x160   :  { %v9830_v21 = vpop.xlane.xlu1 %531  ;;  %v9832_v63 = vpop.xlane.xlu0 %528 }
 0x161   :  { %15786 = vst [vmem:[#allocation55_spill] sm:$0xff] %v9830_v21  ;;  %15787 = vst [vmem:[#allocation56_spill] sm:$0xff] %v9832_v63  ;;  %v752_v63 = vsel %vm214_vm0, %v197_v20, 0.0  ;;  %v198_v21 = vld [vmem:[%s15528_s0 + $0x5a0] sm:$0xff] }
 0x162   :  { %v755_v20 = vsel %vm214_vm0, %v198_v21, 0.0  ;;  %v203_v21 = vld [vmem:[%s15528_s0 + $0x5c8] sm:$0xff] }
 0x163   :  { %747 = vadd.xlane.f32.xlu1 %v746_v28  ;;  %744 = vadd.xlane.f32.xlu0 %v743_v6 }
 0x164   :  { %v9842_v62 = vpop.xlane.xlu1 %537  ;;  %v9844_v29 = vpop.xlane.xlu0 %534 }
 0x165   :  { %15788 = vst [vmem:[#allocation57_spill] sm:$0xff] %v9842_v62  ;;  %15789 = vst [vmem:[#allocation58_spill] sm:$0xff] %v9844_v29  ;;  %v758_v29 = vsel %vm214_vm0, %v199_v7, 0.0  ;;  %v200_v62 = vld [vmem:[%s15528_s0 + $0x5b0] sm:$0xff] }
 0x166   :  { %v761_v7 = vsel %vm214_vm0, %v200_v62, 0.0  ;;  %v205_v62 = vld [vmem:[%s15528_s0 + $0x5d8] sm:$0xff] }
 0x167   :  { %753 = vadd.xlane.f32.xlu1 %v752_v63  ;;  %750 = vadd.xlane.f32.xlu0 %v749_v46 }
 0x168   :  { %v9854_v28 = vpop.xlane.xlu1 %543  ;;  %v9856_v6 = vpop.xlane.xlu0 %540 }
 0x169   :  { %15790 = vst [vmem:[#allocation59_spill] sm:$0xff] %v9854_v28  ;;  %15791 = vst [vmem:[#allocation60_spill] sm:$0xff] %v9856_v6  ;;  %v764_v6 = vsel %vm214_vm0, %v201_v47, 0.0  ;;  %v202_v28 = vld [vmem:[%s15528_s0 + $0x5c0] sm:$0xff] }
 0x16a   :  { %v767_v47 = vsel %vm214_vm0, %v202_v28, 0.0  ;;  %v207_v28 = vld [vmem:[%s15528_s0 + $0x5e8] sm:$0xff] }
 0x16b   :  { %759 = vadd.xlane.f32.xlu1 %v758_v29  ;;  %756 = vadd.xlane.f32.xlu0 %v755_v20 }
 0x16c   :  { %v9866_v63 = vpop.xlane.xlu1 %549  ;;  %v9868_v46 = vpop.xlane.xlu0 %546 }
 0x16d   :  { %15792 = vst [vmem:[#allocation61_spill] sm:$0xff] %v9866_v63  ;;  %15793 = vst [vmem:[#allocation62_spill] sm:$0xff] %v9868_v46  ;;  %v770_v46 = vsel %vm214_vm0, %v203_v21, 0.0  ;;  %v204_v63 = vld [vmem:[%s15528_s0 + $0x5d0] sm:$0xff] }
 0x16e   :  { %v773_v21 = vsel %vm214_vm0, %v204_v63, 0.0  ;;  %v209_v63 = vld [vmem:[%s15528_s0 + $0x5f8] sm:$0xff] }
 0x16f   :  { %765 = vadd.xlane.f32.xlu1 %v764_v6  ;;  %762 = vadd.xlane.f32.xlu0 %v761_v7 }
 0x170   :  { %v9878_v29 = vpop.xlane.xlu1 %555  ;;  %v9880_v20 = vpop.xlane.xlu0 %552 }
 0x171   :  { %15794 = vst [vmem:[#allocation63_spill] sm:$0xff] %v9878_v29  ;;  %15795 = vst [vmem:[#allocation64_spill] sm:$0xff] %v9880_v20  ;;  %v776_v20 = vsel %vm214_vm0, %v205_v62, 0.0  ;;  %v206_v29 = vld [vmem:[%s15528_s0 + $0x5e0] sm:$0xff] }
 0x172   :  { %v779_v62 = vsel %vm214_vm0, %v206_v29, 0.0  ;;  %v211_v29 = vld [vmem:[%s15528_s0 + $0x608] sm:$0xff] }
 0x173   :  { %771 = vadd.xlane.f32.xlu1 %v770_v46  ;;  %768 = vadd.xlane.f32.xlu0 %v767_v47 }
 0x174   :  { %v9890_v6 = vpop.xlane.xlu1 %561  ;;  %v9892_v7 = vpop.xlane.xlu0 %558 }
 0x175   :  { %15796 = vst [vmem:[#allocation65_spill] sm:$0xff] %v9890_v6  ;;  %15797 = vst [vmem:[#allocation66_spill] sm:$0xff] %v9892_v7  ;;  %v782_v7 = vsel %vm214_vm0, %v207_v28, 0.0  ;;  %v208_v6 = vld [vmem:[%s15528_s0 + $0x5f0] sm:$0xff] }
 0x176   :  { %v785_v28 = vsel %vm214_vm0, %v208_v6, 0.0  ;;  %v794_v6 = vsel %vm214_vm0, %v211_v29, 0.0  ;;  %v806_v29 = vmul.f32 0.020408163, %v9218_v24  ;;  %v807_v24 = vmul.f32 0.020408163, %v9232_v31 }
 0x177   :  { %777 = vadd.xlane.f32.xlu1 %v776_v20  ;;  %774 = vadd.xlane.f32.xlu0 %v773_v21 }
 0x178   :  { %v9902_v46 = vpop.xlane.xlu1 %567  ;;  %v9904_v47 = vpop.xlane.xlu0 %564 }
 0x179   :  { %15798 = vst [vmem:[#allocation67_spill] sm:$0xff] %v9902_v46  ;;  %15799 = vst [vmem:[#allocation68_spill] sm:$0xff] %v9904_v47  ;;  %v788_v47 = vsel %vm214_vm0, %v209_v63, 0.0  ;;  %v210_v46 = vld [vmem:[%s15528_s0 + $0x600] sm:$0xff] }
 0x17a   :  { %v791_v63 = vsel %vm214_vm0, %v210_v46, 0.0  ;;  %v8494_v46 = vld [vmem:[%s15528_s0 + $0x8] sm:$0xff] }
 0x17b   :  { %783 = vadd.xlane.f32.xlu1 %v782_v7  ;;  %780 = vadd.xlane.f32.xlu0 %v779_v62  ;;  %v804_v7 = vmul.f32 0.020408163, %v9220_v25  ;;  %v805_v25 = vmul.f32 0.020408163, %v9206_v18 }
 0x17c   :  { %v9914_v20 = vpop.xlane.xlu1 %573  ;;  %v9916_v21 = vpop.xlane.xlu0 %570 }
 0x17d   :  { %15800 = vst [vmem:[#allocation69_spill] sm:$0xff] %v9914_v20  ;;  %15801 = vst [vmem:[#allocation70_spill] sm:$0xff] %v9916_v21  ;;  %v213_v20 = vld [vmem:[%s15528_s0 + $0x618] sm:$0xff] }
 0x17e   :  { %v800_v18 = vsel %vm214_vm0, %v213_v20, 0.0 }
 0x17f   :  { %789 = vadd.xlane.f32.xlu1 %v788_v47  ;;  %786 = vadd.xlane.f32.xlu0 %v785_v28  ;;  %v8493_v47 = vld [vmem:[%s15528_s0] sm:$0xff] }
 0x180   :  { %v9928_v62 = vpop.xlane.xlu1 %579  ;;  %v9930_v21 = vpop.xlane.xlu0 %576  ;;  %v9944_v28 = vsub.f32 %v8493_v47, %v803_v45  ;;  %v808_v45 = vmul.f32 0.020408163, %v9230_v30  ;;  %v8495_v47 = vld [vmem:[%s15528_s0 + $0x10] sm:$0xff] }
 0x181   :  { %15802 = vst [vmem:[#allocation71_spill] sm:$0xff] %v9928_v62  ;;  %15803 = vst [vmem:[#allocation72_spill] sm:$0xff] %v9930_v21  ;;  %v9950_v21 = vsub.f32 %v8494_v46, %v804_v7  ;;  %v9963_v7 = vsub.f32 %v8495_v47, %v805_v25  ;;  %v8497_v25 = vld [vmem:[%s15528_s0 + $0x28] sm:$0xff] }
 0x182   :  { %15804 = vst [vmem:[#allocation73_spill] sm:$0xff] %v9944_v28  ;;  %v1195_v30 = vmul.f32 %v9944_v28, %v9944_v28  ;;  %v9981_v46 = vsub.f32 %v8497_v25, %v808_v45 }
 0x183   :  { %15805 = vst [vmem:[#allocation74_spill] sm:$0xff] %v9950_v21  ;;  %795 = vadd.xlane.f32.xlu1 %v794_v6  ;;  %792 = vadd.xlane.f32.xlu0 %v791_v63  ;;  %15806 = vst [vmem:[#allocation75_spill] sm:$0xff] %v9963_v7  ;;  %v8496_v6 = vld [vmem:[%s15528_s0 + $0x18] sm:$0xff]  ;;  %v1196_v20 = vmul.f32 %v9950_v21, %v9950_v21  ;;  %v1197_v45 = vmul.f32 %v9963_v7, %v9963_v7  ;;  %v811_v7 = vmul.f32 0.020408163, %v9256_v43  ;;  %v8501_v43 = vld [vmem:[%s15528_s0 + $0x48] sm:$0xff] }
 0x184   :  { %v9952_v62 = vpop.xlane.xlu1 %585  ;;  %v9954_v44 = vpop.xlane.xlu0 %582  ;;  %v9968_v63 = vsub.f32 %v8496_v6, %v806_v29  ;;  %15808 = vst [vmem:[#allocation77_spill] sm:$0xff] %v9981_v46  ;;  %v8498_v29 = vld [vmem:[%s15528_s0 + $0x20] sm:$0xff]  ;;  %v810_v6 = vmul.f32 0.020408163, %v9242_v36  ;;  %v1391_v21 = vsel %vm214_vm0, %v1195_v30, 0.0  ;;  %v8499_v36 = vld [vmem:[%s15528_s0 + $0x38] sm:$0xff] }
 0x185   :  { %v9986_v47 = vsub.f32 %v8498_v29, %v807_v24  ;;  %v1200_v29 = vmul.f32 %v9981_v46, %v9981_v46 }
 0x186   :  { %15807 = vst [vmem:[#allocation76_spill] sm:$0xff] %v9968_v63  ;;  %v1198_v28 = vmul.f32 %v9968_v63, %v9968_v63 }
 0x187   :  { %801 = vadd.xlane.f32.xlu1 %v800_v18  ;;  %798 = vadd.xlane.f32.xlu0 %v797_v11  ;;  %15809 = vst [vmem:[#allocation78_spill] sm:$0xff] %v9986_v47  ;;  %v809_v11 = vmul.f32 0.020408163, %v9244_v37  ;;  %v1394_v18 = vsel %vm214_vm0, %v1196_v20, 0.0  ;;  %v10003_v37 = vsub.f32 %v8499_v36, %v810_v6  ;;  %v8500_v20 = vld [vmem:[%s15528_s0 + $0x30] sm:$0xff]  ;;  %v1397_v6 = vsel %vm214_vm0, %v1197_v45, 0.0 }
 0x188   :  { %v9974_v31 = vpop.xlane.xlu1 %591  ;;  %v9976_v19 = vpop.xlane.xlu0 %588  ;;  %v1400_v63 = vsel %vm214_vm0, %v1198_v28, 0.0 }
 0x189   :  { %15810 = vst [vmem:[#allocation79_spill] sm:$0xff] %v10003_v37  ;;  %v10008_v30 = vsub.f32 %v8500_v20, %v809_v11  ;;  %v1406_v20 = vsel %vm214_vm0, %v1200_v29, 0.0  ;;  %v814_v29 = vmul.f32 0.020408163, %v9266_v48  ;;  %v8503_v48 = vld [vmem:[%s15528_s0 + $0x58] sm:$0xff] }
 0x18b   :  { %1395 = vadd.xlane.f32.xlu1 %v1394_v18  ;;  %1392 = vadd.xlane.f32.xlu0 %v1391_v21  ;;  %15811 = vst [vmem:[#allocation80_spill] sm:$0xff] %v10008_v30  ;;  %v1199_v21 = vmul.f32 %v9986_v47, %v9986_v47  ;;  %v812_v18 = vmul.f32 0.020408163, %v9254_v42  ;;  %v1202_v47 = vmul.f32 %v10003_v37, %v10003_v37  ;;  %v816_v37 = vmul.f32 0.020408163, %v9278_v54 }
 0x18c   :  { %v9996_v25 = vpop.xlane.xlu1 %597  ;;  %v9998_v24 = vpop.xlane.xlu0 %594  ;;  %v1201_v42 = vmul.f32 %v10008_v30, %v10008_v30 }
 0x18d   :  { %v1403_v46 = vsel %vm214_vm0, %v1199_v21, 0.0  ;;  %v10031_v28 = vsub.f32 %v8501_v43, %v812_v18  ;;  %v813_v21 = vmul.f32 0.020408163, %v9268_v49  ;;  %v815_v18 = vmul.f32 0.020408163, %v9280_v55  ;;  %v8504_v49 = vld [vmem:[%s15528_s0 + $0x50] sm:$0xff] }
 0x18e   :  { %v1412_v43 = vsel %vm214_vm0, %v1202_v47, 0.0 }
 0x18f   :  { %1401 = vadd.xlane.f32.xlu1 %v1400_v63  ;;  %1398 = vadd.xlane.f32.xlu0 %v1397_v6  ;;  %15813 = vst [vmem:[#allocation82_spill] sm:$0xff] %v10031_v28  ;;  %v8502_v63 = vld [vmem:[%s15528_s0 + $0x40] sm:$0xff]  ;;  %v1204_v54 = vmul.f32 %v10031_v28, %v10031_v28 }
 0x190   :  { %v10018_v36 = vpop.xlane.xlu1 %603  ;;  %v10020_v11 = vpop.xlane.xlu0 %600  ;;  %v10036_v45 = vsub.f32 %v8502_v63, %v811_v7  ;;  %v10051_v7 = vsub.f32 %v8503_v48, %v814_v29  ;;  %v8506_v29 = vld [vmem:[%s15528_s0 + $0x60] sm:$0xff]  ;;  %v818_v48 = vmul.f32 0.020408163, %v9290_v60  ;;  %v8507_v60 = vld [vmem:[%s15528_s0 + $0x78] sm:$0xff] }
 0x191   :  { %15812 = vst [vmem:[#allocation81_spill] sm:$0xff] %v10020_v11  ;;  %v1409_v11 = vsel %vm214_vm0, %v1201_v42, 0.0  ;;  %v8505_v42 = vld [vmem:[%s15528_s0 + $0x68] sm:$0xff] }
 0x192   :  { %15814 = vst [vmem:[#allocation83_spill] sm:$0xff] %v10036_v45  ;;  %15815 = vst [vmem:[#allocation84_spill] sm:$0xff] %v10051_v7  ;;  %v1203_v55 = vmul.f32 %v10036_v45, %v10036_v45  ;;  %v10069_v63 = vsub.f32 %v8505_v42, %v816_v37  ;;  %v1206_v45 = vmul.f32 %v10051_v7, %v10051_v7 }
 0x193   :  { %1407 = vadd.xlane.f32.xlu1 %v1406_v20  ;;  %1404 = vadd.xlane.f32.xlu0 %v1403_v46  ;;  %v10056_v46 = vsub.f32 %v8504_v49, %v813_v21  ;;  %v10074_v21 = vsub.f32 %v8506_v29, %v815_v18 }
 0x194   :  { %v10040_v6 = vpop.xlane.xlu1 %609  ;;  %v10042_v30 = vpop.xlane.xlu0 %606  ;;  %15817 = vst [vmem:[#allocation86_spill] sm:$0xff] %v10069_v63  ;;  %v1415_v49 = vsel %vm214_vm0, %v1203_v55, 0.0  ;;  %v1208_v29 = vmul.f32 %v10069_v63, %v10069_v63  ;;  %v1424_v7 = vsel %vm214_vm0, %v1206_v45, 0.0 }
 0x195   :  { %15816 = vst [vmem:[#allocation85_spill] sm:$0xff] %v10056_v46  ;;  %15818 = vst [vmem:[#allocation87_spill] sm:$0xff] %v10074_v21  ;;  %v1205_v37 = vmul.f32 %v10056_v46, %v10056_v46  ;;  %v819_v46 = vmul.f32 0.020408163, %v9304_v3  ;;  %v8509_v3 = vld [vmem:[%s15528_s0 + $0x88] sm:$0xff] }
 0x197   :  { %1413 = vadd.xlane.f32.xlu1 %v1412_v43  ;;  %1410 = vadd.xlane.f32.xlu0 %v1409_v11  ;;  %v817_v11 = vmul.f32 0.020408163, %v9292_v61  ;;  %v1418_v43 = vsel %vm214_vm0, %v1204_v54, 0.0  ;;  %v10091_v61 = vsub.f32 %v8507_v60, %v818_v48  ;;  %v8508_v54 = vld [vmem:[%s15528_s0 + $0x70] sm:$0xff]  ;;  %v1421_v48 = vsel %vm214_vm0, %v1205_v37, 0.0 }
 0x198   :  { %v10062_v47 = vpop.xlane.xlu1 %615  ;;  %v10064_v20 = vpop.xlane.xlu0 %612 }
 0x199   :  { %15819 = vst [vmem:[#allocation88_spill] sm:$0xff] %v10091_v61  ;;  %v10096_v55 = vsub.f32 %v8508_v54, %v817_v11  ;;  %v1430_v54 = vsel %vm214_vm0, %v1208_v29, 0.0  ;;  %v822_v29 = vmul.f32 0.020408163, %v9314_v8  ;;  %v8511_v8 = vld [vmem:[%s15528_s0 + $0x98] sm:$0xff] }
 0x19b   :  { %1419 = vadd.xlane.f32.xlu1 %v1418_v43  ;;  %1416 = vadd.xlane.f32.xlu0 %v1415_v49  ;;  %15820 = vst [vmem:[#allocation89_spill] sm:$0xff] %v10096_v55  ;;  %v1207_v43 = vmul.f32 %v10074_v21, %v10074_v21  ;;  %v820_v49 = vmul.f32 0.020408163, %v9302_v2  ;;  %v1210_v21 = vmul.f32 %v10091_v61, %v10091_v61  ;;  %v824_v61 = vmul.f32 0.020408163, %v9326_v14 }
 0x19c   :  { %v10084_v42 = vpop.xlane.xlu1 %621  ;;  %v10086_v18 = vpop.xlane.xlu0 %618  ;;  %v1209_v2 = vmul.f32 %v10096_v55, %v10096_v55 }
 0x19d   :  { %v1427_v63 = vsel %vm214_vm0, %v1207_v43, 0.0  ;;  %v10119_v45 = vsub.f32 %v8509_v3, %v820_v49  ;;  %v821_v43 = vmul.f32 0.020408163, %v9316_v9  ;;  %v823_v49 = vmul.f32 0.020408163, %v9328_v15  ;;  %v8512_v9 = vld [vmem:[%s15528_s0 + $0x90] sm:$0xff] }
 0x19e   :  { %v1436_v3 = vsel %vm214_vm0, %v1210_v21, 0.0  ;;  %v1433_v28 = vsel %vm214_vm0, %v1209_v2, 0.0  ;;  %v8513_v2 = vld [vmem:[%s15528_s0 + $0xa8] sm:$0xff] }
 0x19f   :  { %1425 = vadd.xlane.f32.xlu1 %v1424_v7  ;;  %1422 = vadd.xlane.f32.xlu0 %v1421_v48  ;;  %15821 = vst [vmem:[#allocation90_spill] sm:$0xff] %v10119_v45  ;;  %v8510_v7 = vld [vmem:[%s15528_s0 + $0x80] sm:$0xff]  ;;  %v1212_v14 = vmul.f32 %v10119_v45, %v10119_v45 }
 0x1a0   :  { %v10106_v60 = vpop.xlane.xlu1 %627  ;;  %v10108_v11 = vpop.xlane.xlu0 %624  ;;  %v10124_v37 = vsub.f32 %v8510_v7, %v819_v46  ;;  %v10139_v46 = vsub.f32 %v8511_v8, %v822_v29  ;;  %v10157_v7 = vsub.f32 %v8513_v2, %v824_v61  ;;  %v8514_v29 = vld [vmem:[%s15528_s0 + $0xa0] sm:$0xff]  ;;  %v826_v8 = vmul.f32 0.020408163, %v9338_v22  ;;  %v8515_v22 = vld [vmem:[%s15528_s0 + $0xb8] sm:$0xff] }
 0x1a2   :  { %15822 = vst [vmem:[#allocation91_spill] sm:$0xff] %v10124_v37  ;;  %15823 = vst [vmem:[#allocation92_spill] sm:$0xff] %v10139_v46  ;;  %v1211_v15 = vmul.f32 %v10124_v37, %v10124_v37  ;;  %v1214_v45 = vmul.f32 %v10139_v46, %v10139_v46  ;;  %v827_v46 = vmul.f32 0.020408163, %v9352_v33  ;;  %v8517_v33 = vld [vmem:[%s15528_s0 + $0xc8] sm:$0xff] }
 0x1a3   :  { %1431 = vadd.xlane.f32.xlu1 %v1430_v54  ;;  %1428 = vadd.xlane.f32.xlu0 %v1427_v63  ;;  %v10144_v63 = vsub.f32 %v8512_v9, %v821_v43  ;;  %15825 = vst [vmem:[#allocation94_spill] sm:$0xff] %v10157_v7  ;;  %v10162_v43 = vsub.f32 %v8514_v29, %v823_v49 }
 0x1a4   :  { %v10128_v48 = vpop.xlane.xlu1 %633  ;;  %v10130_v55 = vpop.xlane.xlu0 %630  ;;  %v1439_v9 = vsel %vm214_vm0, %v1211_v15, 0.0  ;;  %v1216_v29 = vmul.f32 %v10157_v7, %v10157_v7 }
 0x1a5   :  { %15824 = vst [vmem:[#allocation93_spill] sm:$0xff] %v10144_v63  ;;  %15826 = vst [vmem:[#allocation95_spill] sm:$0xff] %v10162_v43  ;;  %v1213_v61 = vmul.f32 %v10144_v63, %v10144_v63  ;;  %v1448_v63 = vsel %vm214_vm0, %v1214_v45, 0.0 }
 0x1a7   :  { %1437 = vadd.xlane.f32.xlu1 %v1436_v3  ;;  %1434 = vadd.xlane.f32.xlu0 %v1433_v28  ;;  %v825_v28 = vmul.f32 0.020408163, %v9340_v23  ;;  %v1442_v3 = vsel %vm214_vm0, %v1212_v14, 0.0  ;;  %v10179_v23 = vsub.f32 %v8515_v22, %v826_v8  ;;  %v8516_v14 = vld [vmem:[%s15528_s0 + $0xb0] sm:$0xff]  ;;  %v1445_v8 = vsel %vm214_vm0, %v1213_v61, 0.0 }
 0x1a8   :  { %v10150_v21 = vpop.xlane.xlu1 %639  ;;  %v10152_v54 = vpop.xlane.xlu0 %636 }
 0x1a9   :  { %15827 = vst [vmem:[#allocation96_spill] sm:$0xff] %v10179_v23  ;;  %v10184_v15 = vsub.f32 %v8516_v14, %v825_v28  ;;  %v1454_v14 = vsel %vm214_vm0, %v1216_v29, 0.0  ;;  %v830_v29 = vmul.f32 0.020408163, %v9362_v40  ;;  %v8519_v40 = vld [vmem:[%s15528_s0 + $0xd8] sm:$0xff] }
 0x1ab   :  { %1443 = vadd.xlane.f32.xlu1 %v1442_v3  ;;  %1440 = vadd.xlane.f32.xlu0 %v1439_v9  ;;  %15828 = vst [vmem:[#allocation97_spill] sm:$0xff] %v10184_v15  ;;  %v1215_v3 = vmul.f32 %v10162_v43, %v10162_v43  ;;  %v828_v9 = vmul.f32 0.020408163, %v9350_v32  ;;  %v1218_v43 = vmul.f32 %v10179_v23, %v10179_v23 }
 0x1ac   :  { %v10172_v2 = vpop.xlane.xlu1 %645  ;;  %v10174_v49 = vpop.xlane.xlu0 %642  ;;  %v1217_v32 = vmul.f32 %v10184_v15, %v10184_v15  ;;  %v832_v15 = vmul.f32 0.020408163, %v9374_v50 }
 0x1ad   :  { %v1451_v7 = vsel %vm214_vm0, %v1215_v3, 0.0  ;;  %v10207_v45 = vsub.f32 %v8517_v33, %v828_v9  ;;  %v829_v3 = vmul.f32 0.020408163, %v9364_v41  ;;  %v831_v9 = vmul.f32 0.020408163, %v9376_v51  ;;  %v8520_v41 = vld [vmem:[%s15528_s0 + $0xd0] sm:$0xff] }
 0x1ae   :  { %v1460_v33 = vsel %vm214_vm0, %v1218_v43, 0.0  ;;  %v1457_v37 = vsel %vm214_vm0, %v1217_v32, 0.0  ;;  %v8521_v32 = vld [vmem:[%s15528_s0 + $0xe8] sm:$0xff] }
 0x1af   :  { %1449 = vadd.xlane.f32.xlu1 %v1448_v63  ;;  %1446 = vadd.xlane.f32.xlu0 %v1445_v8  ;;  %15829 = vst [vmem:[#allocation98_spill] sm:$0xff] %v10207_v45  ;;  %v8518_v63 = vld [vmem:[%s15528_s0 + $0xc0] sm:$0xff]  ;;  %v1220_v50 = vmul.f32 %v10207_v45, %v10207_v45 }
 0x1b0   :  { %v10194_v22 = vpop.xlane.xlu1 %651  ;;  %v10196_v28 = vpop.xlane.xlu0 %648  ;;  %v10212_v61 = vsub.f32 %v8518_v63, %v827_v46  ;;  %v10227_v46 = vsub.f32 %v8519_v40, %v830_v29  ;;  %v10245_v63 = vsub.f32 %v8521_v32, %v832_v15  ;;  %v8522_v29 = vld [vmem:[%s15528_s0 + $0xe0] sm:$0xff]  ;;  %v834_v40 = vmul.f32 0.020408163, %v9386_v58  ;;  %v8523_v58 = vld [vmem:[%s15528_s0 + $0xf8] sm:$0xff] }
 0x1b2   :  { %15830 = vst [vmem:[#allocation99_spill] sm:$0xff] %v10212_v61  ;;  %15831 = vst [vmem:[#allocation100_spill] sm:$0xff] %v10227_v46  ;;  %v1219_v51 = vmul.f32 %v10212_v61, %v10212_v61  ;;  %v1222_v45 = vmul.f32 %v10227_v46, %v10227_v46  ;;  %v835_v46 = vmul.f32 0.020408163, %v9400_v5  ;;  %v8525_v5 = vld [vmem:[%s15528_s0 + $0x108] sm:$0xff] }
 0x1b3   :  { %1455 = vadd.xlane.f32.xlu1 %v1454_v14  ;;  %1452 = vadd.xlane.f32.xlu0 %v1451_v7  ;;  %v10232_v7 = vsub.f32 %v8520_v41, %v829_v3  ;;  %15833 = vst [vmem:[#allocation102_spill] sm:$0xff] %v10245_v63  ;;  %v10250_v3 = vsub.f32 %v8522_v29, %v831_v9 }
 0x1b4   :  { %v10216_v8 = vpop.xlane.xlu1 %657  ;;  %v10218_v23 = vpop.xlane.xlu0 %654  ;;  %v1463_v41 = vsel %vm214_vm0, %v1219_v51, 0.0  ;;  %v1224_v29 = vmul.f32 %v10245_v63, %v10245_v63 }
 0x1b5   :  { %15832 = vst [vmem:[#allocation101_spill] sm:$0xff] %v10232_v7  ;;  %15834 = vst [vmem:[#allocation103_spill] sm:$0xff] %v10250_v3  ;;  %v1221_v15 = vmul.f32 %v10232_v7, %v10232_v7  ;;  %v1472_v7 = vsel %vm214_vm0, %v1222_v45, 0.0 }
 0x1b7   :  { %1461 = vadd.xlane.f32.xlu1 %v1460_v33  ;;  %1458 = vadd.xlane.f32.xlu0 %v1457_v37  ;;  %v833_v37 = vmul.f32 0.020408163, %v9388_v59  ;;  %v1466_v33 = vsel %vm214_vm0, %v1220_v50, 0.0  ;;  %v10267_v59 = vsub.f32 %v8523_v58, %v834_v40  ;;  %v8524_v50 = vld [vmem:[%s15528_s0 + $0xf0] sm:$0xff]  ;;  %v1469_v40 = vsel %vm214_vm0, %v1221_v15, 0.0 }
 0x1b8   :  { %v10238_v43 = vpop.xlane.xlu1 %663  ;;  %v10240_v14 = vpop.xlane.xlu0 %660 }
 0x1b9   :  { %15835 = vst [vmem:[#allocation104_spill] sm:$0xff] %v10267_v59  ;;  %v10272_v51 = vsub.f32 %v8524_v50, %v833_v37  ;;  %v1478_v50 = vsel %vm214_vm0, %v1224_v29, 0.0  ;;  %v838_v29 = vmul.f32 0.020408163, %v9410_v12  ;;  %v8527_v12 = vld [vmem:[%s15528_s0 + $0x118] sm:$0xff] }
 0x1bb   :  { %1467 = vadd.xlane.f32.xlu1 %v1466_v33  ;;  %1464 = vadd.xlane.f32.xlu0 %v1463_v41  ;;  %15836 = vst [vmem:[#allocation105_spill] sm:$0xff] %v10272_v51  ;;  %v1223_v33 = vmul.f32 %v10250_v3, %v10250_v3  ;;  %v836_v41 = vmul.f32 0.020408163, %v9398_v4  ;;  %v1226_v3 = vmul.f32 %v10267_v59, %v10267_v59 }
 0x1bc   :  { %v10260_v32 = vpop.xlane.xlu1 %669  ;;  %v10262_v9 = vpop.xlane.xlu0 %666  ;;  %v1225_v4 = vmul.f32 %v10272_v51, %v10272_v51  ;;  %v840_v51 = vmul.f32 0.020408163, %v9422_v26 }
 0x1bd   :  { %v1475_v63 = vsel %vm214_vm0, %v1223_v33, 0.0  ;;  %v10295_v45 = vsub.f32 %v8525_v5, %v836_v41  ;;  %v837_v33 = vmul.f32 0.020408163, %v9412_v13  ;;  %v839_v41 = vmul.f32 0.020408163, %v9424_v27  ;;  %v8528_v13 = vld [vmem:[%s15528_s0 + $0x110] sm:$0xff] }
 0x1be   :  { %v1484_v5 = vsel %vm214_vm0, %v1226_v3, 0.0  ;;  %v1481_v61 = vsel %vm214_vm0, %v1225_v4, 0.0  ;;  %v8529_v4 = vld [vmem:[%s15528_s0 + $0x128] sm:$0xff] }
 0x1bf   :  { %1473 = vadd.xlane.f32.xlu1 %v1472_v7  ;;  %1470 = vadd.xlane.f32.xlu0 %v1469_v40  ;;  %15837 = vst [vmem:[#allocation106_spill] sm:$0xff] %v10295_v45  ;;  %v8526_v7 = vld [vmem:[%s15528_s0 + $0x100] sm:$0xff]  ;;  %v1228_v26 = vmul.f32 %v10295_v45, %v10295_v45 }
 0x1c0   :  { %v10282_v58 = vpop.xlane.xlu1 %675  ;;  %v10284_v37 = vpop.xlane.xlu0 %672  ;;  %v10300_v15 = vsub.f32 %v8526_v7, %v835_v46  ;;  %v10315_v46 = vsub.f32 %v8527_v12, %v838_v29  ;;  %v10333_v7 = vsub.f32 %v8529_v4, %v840_v51  ;;  %v8530_v29 = vld [vmem:[%s15528_s0 + $0x120] sm:$0xff]  ;;  %v842_v12 = vmul.f32 0.020408163, %v9434_v38  ;;  %v8531_v38 = vld [vmem:[%s15528_s0 + $0x138] sm:$0xff] }
 0x1c2   :  { %15838 = vst [vmem:[#allocation107_spill] sm:$0xff] %v10300_v15  ;;  %15839 = vst [vmem:[#allocation108_spill] sm:$0xff] %v10315_v46  ;;  %v1227_v27 = vmul.f32 %v10300_v15, %v10300_v15  ;;  %v1230_v15 = vmul.f32 %v10315_v46, %v10315_v46 }
 0x1c3   :  { %1479 = vadd.xlane.f32.xlu1 %v1478_v50  ;;  %1476 = vadd.xlane.f32.xlu0 %v1475_v63  ;;  %v10320_v63 = vsub.f32 %v8528_v13, %v837_v33  ;;  %15841 = vst [vmem:[#allocation110_spill] sm:$0xff] %v10333_v7  ;;  %v10338_v33 = vsub.f32 %v8530_v29, %v839_v41 }
 0x1c4   :  { %v10304_v40 = vpop.xlane.xlu1 %681  ;;  %v10306_v59 = vpop.xlane.xlu0 %678  ;;  %v1487_v13 = vsel %vm214_vm0, %v1227_v27, 0.0  ;;  %v1232_v29 = vmul.f32 %v10333_v7, %v10333_v7  ;;  %v1496_v46 = vsel %vm214_vm0, %v1230_v15, 0.0 }
 0x1c5   :  { %15840 = vst [vmem:[#allocation109_spill] sm:$0xff] %v10320_v63  ;;  %15842 = vst [vmem:[#allocation111_spill] sm:$0xff] %v10338_v33  ;;  %v1229_v51 = vmul.f32 %v10320_v63, %v10320_v63  ;;  %v843_v63 = vmul.f32 0.020408163, %v9448_v53  ;;  %v8533_v53 = vld [vmem:[%s15528_s0 + $0x148] sm:$0xff] }
 0x1c7   :  { %1485 = vadd.xlane.f32.xlu1 %v1484_v5  ;;  %1482 = vadd.xlane.f32.xlu0 %v1481_v61  ;;  %v841_v61 = vmul.f32 0.020408163, %v9436_v39  ;;  %v1490_v5 = vsel %vm214_vm0, %v1228_v26, 0.0  ;;  %v10355_v39 = vsub.f32 %v8531_v38, %v842_v12  ;;  %v8532_v26 = vld [vmem:[%s15528_s0 + $0x130] sm:$0xff]  ;;  %v1493_v12 = vsel %vm214_vm0, %v1229_v51, 0.0 }
 0x1c8   :  { %v10326_v3 = vpop.xlane.xlu1 %687  ;;  %v10328_v50 = vpop.xlane.xlu0 %684 }
 0x1c9   :  { %15843 = vst [vmem:[#allocation112_spill] sm:$0xff] %v10355_v39  ;;  %v10360_v27 = vsub.f32 %v8532_v26, %v841_v61  ;;  %v1502_v26 = vsel %vm214_vm0, %v1232_v29, 0.0  ;;  %v846_v29 = vmul.f32 0.020408163, %v9458_v0  ;;  %v8535_v0 = vld [vmem:[%s15528_s0 + $0x158] sm:$0xff] }
 0x1cb   :  { %1491 = vadd.xlane.f32.xlu1 %v1490_v5  ;;  %1488 = vadd.xlane.f32.xlu0 %v1487_v13  ;;  %15844 = vst [vmem:[#allocation113_spill] sm:$0xff] %v10360_v27  ;;  %v1231_v5 = vmul.f32 %v10338_v33, %v10338_v33  ;;  %v844_v13 = vmul.f32 0.020408163, %v9446_v52  ;;  %v1234_v33 = vmul.f32 %v10355_v39, %v10355_v39  ;;  %v848_v39 = vmul.f32 0.020408163, %v9470_v16 }
 0x1cc   :  { %v10348_v4 = vpop.xlane.xlu1 %693  ;;  %v10350_v41 = vpop.xlane.xlu0 %690  ;;  %v1233_v52 = vmul.f32 %v10360_v27, %v10360_v27 }
 0x1cd   :  { %v1499_v7 = vsel %vm214_vm0, %v1231_v5, 0.0  ;;  %v10383_v15 = vsub.f32 %v8533_v53, %v844_v13  ;;  %v845_v5 = vmul.f32 0.020408163, %v9460_v1  ;;  %v847_v13 = vmul.f32 0.020408163, %v9472_v17  ;;  %v8536_v1 = vld [vmem:[%s15528_s0 + $0x150] sm:$0xff] }
 0x1ce   :  { %v1508_v53 = vsel %vm214_vm0, %v1234_v33, 0.0  ;;  %v1505_v45 = vsel %vm214_vm0, %v1233_v52, 0.0  ;;  %v8537_v52 = vld [vmem:[%s15528_s0 + $0x168] sm:$0xff] }
 0x1cf   :  { %1497 = vadd.xlane.f32.xlu1 %v1496_v46  ;;  %1494 = vadd.xlane.f32.xlu0 %v1493_v12  ;;  %15845 = vst [vmem:[#allocation114_spill] sm:$0xff] %v10383_v15  ;;  %v8534_v46 = vld [vmem:[%s15528_s0 + $0x140] sm:$0xff]  ;;  %v1236_v16 = vmul.f32 %v10383_v15, %v10383_v15  ;;  %v15861_v15 = vld [vmem:[#allocation3_spill] sm:$0xff] }
 0x1d0   :  { %v10370_v38 = vpop.xlane.xlu1 %699  ;;  %v10372_v61 = vpop.xlane.xlu0 %696  ;;  %v10388_v51 = vsub.f32 %v8534_v46, %v843_v63  ;;  %v10403_v63 = vsub.f32 %v8535_v0, %v846_v29  ;;  %v10421_v46 = vsub.f32 %v8537_v52, %v848_v39  ;;  %v8538_v29 = vld [vmem:[%s15528_s0 + $0x160] sm:$0xff]  ;;  %v850_v0 = vmul.f32 0.020408163, %v9482_v34  ;;  %v8539_v34 = vld [vmem:[%s15528_s0 + $0x178] sm:$0xff] }
 0x1d2   :  { %15846 = vst [vmem:[#allocation115_spill] sm:$0xff] %v10388_v51  ;;  %15847 = vst [vmem:[#allocation116_spill] sm:$0xff] %v10403_v63  ;;  %v1235_v17 = vmul.f32 %v10388_v51, %v10388_v51  ;;  %v1238_v51 = vmul.f32 %v10403_v63, %v10403_v63 }
 0x1d3   :  { %1503 = vadd.xlane.f32.xlu1 %v1502_v26  ;;  %1500 = vadd.xlane.f32.xlu0 %v1499_v7  ;;  %v10408_v7 = vsub.f32 %v8536_v1, %v845_v5  ;;  %15849 = vst [vmem:[#allocation118_spill] sm:$0xff] %v10421_v46  ;;  %v10426_v5 = vsub.f32 %v8538_v29, %v847_v13 }
 0x1d4   :  { %v10392_v12 = vpop.xlane.xlu1 %705  ;;  %v10394_v27 = vpop.xlane.xlu0 %702  ;;  %v1511_v1 = vsel %vm214_vm0, %v1235_v17, 0.0  ;;  %v1240_v29 = vmul.f32 %v10421_v46, %v10421_v46  ;;  %v1520_v63 = vsel %vm214_vm0, %v1238_v51, 0.0 }
 0x1d5   :  { %15848 = vst [vmem:[#allocation117_spill] sm:$0xff] %v10408_v7  ;;  %15850 = vst [vmem:[#allocation119_spill] sm:$0xff] %v10426_v5  ;;  %v1237_v39 = vmul.f32 %v10408_v7, %v10408_v7  ;;  %v851_v7 = vmul.f32 0.020408163, %v9496_v57  ;;  %v8541_v57 = vld [vmem:[%s15528_s0 + $0x188] sm:$0xff] }
 0x1d7   :  { %1509 = vadd.xlane.f32.xlu1 %v1508_v53  ;;  %1506 = vadd.xlane.f32.xlu0 %v1505_v45  ;;  %v849_v45 = vmul.f32 0.020408163, %v9484_v35  ;;  %v1514_v53 = vsel %vm214_vm0, %v1236_v16, 0.0  ;;  %v10443_v35 = vsub.f32 %v8539_v34, %v850_v0  ;;  %v8540_v16 = vld [vmem:[%s15528_s0 + $0x170] sm:$0xff]  ;;  %v1517_v0 = vsel %vm214_vm0, %v1237_v39, 0.0 }
 0x1d8   :  { %v10414_v33 = vpop.xlane.xlu1 %711  ;;  %v10416_v26 = vpop.xlane.xlu0 %708 }
 0x1d9   :  { %15852 = vst [vmem:[#allocation121_spill] sm:$0xff] %v10443_v35  ;;  %v10448_v17 = vsub.f32 %v8540_v16, %v849_v45  ;;  %v1526_v16 = vsel %vm214_vm0, %v1240_v29, 0.0  ;;  %v854_v29 = vmul.f32 0.020408163, %v9506_v10  ;;  %v8543_v10 = vld [vmem:[%s15528_s0 + $0x198] sm:$0xff] }
 0x1db   :  { %1515 = vadd.xlane.f32.xlu1 %v1514_v53  ;;  %1512 = vadd.xlane.f32.xlu0 %v1511_v1  ;;  %15853 = vst [vmem:[#allocation122_spill] sm:$0xff] %v10448_v17  ;;  %v1239_v53 = vmul.f32 %v10426_v5, %v10426_v5  ;;  %v852_v1 = vmul.f32 0.020408163, %v9494_v56  ;;  %v1242_v5 = vmul.f32 %v10443_v35, %v10443_v35 }
 0x1dc   :  { %v10436_v52 = vpop.xlane.xlu1 %717  ;;  %v10438_v13 = vpop.xlane.xlu0 %714  ;;  %v1241_v56 = vmul.f32 %v10448_v17, %v10448_v17 }
 0x1dd   :  { %15851 = vst [vmem:[#allocation120_spill] sm:$0xff] %v10438_v13  ;;  %v1523_v46 = vsel %vm214_vm0, %v1239_v53, 0.0  ;;  %v10471_v51 = vsub.f32 %v8541_v57, %v852_v1  ;;  %v15858_v53 = vld [vmem:[#allocation2_spill] sm:$0xff]  ;;  %v15862_v1 = vld [vmem:[#allocation4_spill] sm:$0xff] }
 0x1de   :  { %v855_v57 = vmul.f32 0.020408163, %v15862_v1  ;;  %v1529_v13 = vsel %vm214_vm0, %v1241_v56, 0.0 }
 0x1df   :  { %1521 = vadd.xlane.f32.xlu1 %v1520_v63  ;;  %1518 = vadd.xlane.f32.xlu0 %v1517_v0  ;;  %15856 = vst [vmem:[#allocation125_spill] sm:$0xff] %v10471_v51  ;;  %v8542_v63 = vld [vmem:[%s15528_s0 + $0x180] sm:$0xff]  ;;  %v853_v0 = vmul.f32 0.020408163, %v15858_v53 }
 0x1e0   :  { %v10458_v34 = vpop.xlane.xlu1 %723  ;;  %v10460_v45 = vpop.xlane.xlu0 %720  ;;  %v10476_v39 = vsub.f32 %v8542_v63, %v851_v7  ;;  %v10491_v7 = vsub.f32 %v8543_v10, %v854_v29  ;;  %v8545_v29 = vld [vmem:[%s15528_s0 + $0x1a8] sm:$0xff]  ;;  %v15869_v10 = vld [vmem:[#allocation5_spill] sm:$0xff] }
 0x1e1   :  { %15854 = vst [vmem:[#allocation123_spill] sm:$0xff] %v10458_v34  ;;  %15855 = vst [vmem:[#allocation124_spill] sm:$0xff] %v10460_v45  ;;  %v856_v45 = vmul.f32 0.020408163, %v15861_v15  ;;  %v1532_v34 = vsel %vm214_vm0, %v1242_v5, 0.0  ;;  %v1244_v15 = vmul.f32 %v10471_v51, %v10471_v51 }
 0x1e2   :  { %15857 = vst [vmem:[#allocation126_spill] sm:$0xff] %v10476_v39  ;;  %15863 = vst [vmem:[#allocation3_spill] sm:$0xff] %v10491_v7  ;;  %v1243_v5 = vmul.f32 %v10476_v39, %v10476_v39 }
 0x1e3   :  { %1527 = vadd.xlane.f32.xlu1 %v1526_v16  ;;  %1524 = vadd.xlane.f32.xlu0 %v1523_v46  ;;  %v8544_v46 = vld [vmem:[%s15528_s0 + $0x190] sm:$0xff]  ;;  %v10509_v53 = vsub.f32 %v8545_v29, %v856_v45  ;;  %v1538_v51 = vsel %vm214_vm0, %v1244_v15, 0.0 }
 0x1e4   :  { %v10480_v35 = vpop.xlane.xlu1 %729  ;;  %v10482_v17 = vpop.xlane.xlu0 %726  ;;  %v10496_v16 = vsub.f32 %v8544_v46, %v853_v0  ;;  %v8546_v0 = vld [vmem:[%s15528_s0 + $0x1a0] sm:$0xff]  ;;  %v858_v46 = vmul.f32 0.020408163, %v15869_v10  ;;  %v1535_v39 = vsel %vm214_vm0, %v1243_v5, 0.0  ;;  %v8548_v15 = vld [vmem:[%s15528_s0 + $0x1b0] sm:$0xff] }
 0x1e5   :  { %15859 = vst [vmem:[#allocation2_spill] sm:$0xff] %v10480_v35  ;;  %15860 = vst [vmem:[#allocation127_spill] sm:$0xff] %v10482_v17  ;;  %v10514_v1 = vsub.f32 %v8546_v0, %v855_v57  ;;  %v8547_v0 = vld [vmem:[%s15528_s0 + $0x1b8] sm:$0xff] }
 0x1e6   :  { %15864 = vst [vmem:[#allocation4_spill] sm:$0xff] %v10496_v16  ;;  %15867 = vst [vmem:[#allocation130_spill] sm:$0xff] %v10509_v53  ;;  %v1245_v45 = vmul.f32 %v10496_v16, %v10496_v16  ;;  %v10531_v10 = vsub.f32 %v8547_v0, %v858_v46  ;;  %v15876_v16 = vld [vmem:[#allocation8_spill] sm:$0xff] }
 0x1e7   :  { %1533 = vadd.xlane.f32.xlu1 %v1532_v34  ;;  %1530 = vadd.xlane.f32.xlu0 %v1529_v13  ;;  %15868 = vst [vmem:[#allocation131_spill] sm:$0xff] %v10514_v1  ;;  %v15870_v34 = vld [vmem:[#allocation6_spill] sm:$0xff] }
 0x1e8   :  { %v10502_v56 = vpop.xlane.xlu1 %735  ;;  %v10504_v63 = vpop.xlane.xlu0 %732  ;;  %v857_v13 = vmul.f32 0.020408163, %v15870_v34  ;;  %15873 = vst [vmem:[#allocation132_spill] sm:$0xff] %v10531_v10  ;;  %v15875_v34 = vld [vmem:[#allocation7_spill] sm:$0xff]  ;;  %v1541_v46 = vsel %vm214_vm0, %v1245_v45, 0.0 }
 0x1e9   :  { %15865 = vst [vmem:[#allocation128_spill] sm:$0xff] %v10502_v56  ;;  %15866 = vst [vmem:[#allocation129_spill] sm:$0xff] %v10504_v63  ;;  %v1246_v63 = vmul.f32 %v10491_v7, %v10491_v7  ;;  %v860_v7 = vmul.f32 0.020408163, %v15875_v34 }
 0x1ea   :  { %v10536_v5 = vsub.f32 %v8548_v15, %v857_v13 }
 0x1eb   :  { %1539 = vadd.xlane.f32.xlu1 %v1538_v51  ;;  %1536 = vadd.xlane.f32.xlu0 %v1535_v39  ;;  %v1248_v51 = vmul.f32 %v10509_v53, %v10509_v53  ;;  %v1247_v39 = vmul.f32 %v10514_v1, %v10514_v1  ;;  %v1250_v1 = vmul.f32 %v10531_v10, %v10531_v10 }
 0x1ec   :  { %v10524_v29 = vpop.xlane.xlu1 %741  ;;  %v10526_v57 = vpop.xlane.xlu0 %738  ;;  %15874 = vst [vmem:[#allocation133_spill] sm:$0xff] %v10536_v5 }
 0x1ed   :  { %15871 = vst [vmem:[#allocation5_spill] sm:$0xff] %v10524_v29  ;;  %15872 = vst [vmem:[#allocation6_spill] sm:$0xff] %v10526_v57  ;;  %v859_v57 = vmul.f32 0.020408163, %v15876_v16  ;;  %v1544_v29 = vsel %vm214_vm0, %v1246_v63, 0.0  ;;  %v1550_v15 = vsel %vm214_vm0, %v1248_v51, 0.0  ;;  %v1249_v16 = vmul.f32 %v10536_v5, %v10536_v5 }
 0x1ee   :  { %v1547_v53 = vsel %vm214_vm0, %v1247_v39, 0.0  ;;  %v8549_v63 = vld [vmem:[%s15528_s0 + $0x1c8] sm:$0xff]  ;;  %v15881_v51 = vld [vmem:[#allocation9_spill] sm:$0xff]  ;;  %v1556_v17 = vsel %vm214_vm0, %v1250_v1, 0.0 }
 0x1ef   :  { %1545 = vadd.xlane.f32.xlu1 %v1544_v29  ;;  %1542 = vadd.xlane.f32.xlu0 %v1541_v46  ;;  %v10559_v45 = vsub.f32 %v8549_v63, %v860_v7  ;;  %v8550_v29 = vld [vmem:[%s15528_s0 + $0x1c0] sm:$0xff]  ;;  %v862_v39 = vmul.f32 0.020408163, %v15881_v51  ;;  %v15886_v7 = vld [vmem:[#allocation12_spill] sm:$0xff]  ;;  %v1553_v35 = vsel %vm214_vm0, %v1249_v16, 0.0 }
 0x1f0   :  { %v10546_v0 = vpop.xlane.xlu1 %747  ;;  %v10548_v13 = vpop.xlane.xlu0 %744  ;;  %v10564_v34 = vsub.f32 %v8550_v29, %v859_v57  ;;  %v15882_v46 = vld [vmem:[#allocation10_spill] sm:$0xff]  ;;  %v863_v63 = vmul.f32 0.020408163, %v15886_v7  ;;  %v8551_v57 = vld [vmem:[%s15528_s0 + $0x1d8] sm:$0xff] }
 0x1f1   :  { %15877 = vst [vmem:[#allocation7_spill] sm:$0xff] %v10546_v0  ;;  %15878 = vst [vmem:[#allocation8_spill] sm:$0xff] %v10548_v13  ;;  %v861_v13 = vmul.f32 0.020408163, %v15882_v46  ;;  %v15885_v0 = vld [vmem:[#allocation11_spill] sm:$0xff]  ;;  %v10579_v29 = vsub.f32 %v8551_v57, %v862_v39  ;;  %v15893_v57 = vld [vmem:[#allocation13_spill] sm:$0xff] }
 0x1f2   :  { %15879 = vst [vmem:[#allocation134_spill] sm:$0xff] %v10559_v45  ;;  %15880 = vst [vmem:[#allocation135_spill] sm:$0xff] %v10564_v34  ;;  %v864_v56 = vmul.f32 0.020408163, %v15885_v0  ;;  %v1252_v0 = vmul.f32 %v10559_v45, %v10559_v45  ;;  %v1251_v1 = vmul.f32 %v10564_v34, %v10564_v34  ;;  %v8553_v39 = vld [vmem:[%s15528_s0 + $0x1e8] sm:$0xff] }
 0x1f3   :  { %1551 = vadd.xlane.f32.xlu1 %v1550_v15  ;;  %1548 = vadd.xlane.f32.xlu0 %v1547_v53  ;;  %15887 = vst [vmem:[#allocation11_spill] sm:$0xff] %v10579_v29  ;;  %v8552_v53 = vld [vmem:[%s15528_s0 + $0x1d0] sm:$0xff] }
 0x1f4   :  { %v10568_v10 = vpop.xlane.xlu1 %753  ;;  %v10570_v5 = vpop.xlane.xlu0 %750  ;;  %v10584_v15 = vsub.f32 %v8552_v53, %v861_v13  ;;  %v10597_v46 = vsub.f32 %v8553_v39, %v864_v56  ;;  %v8554_v13 = vld [vmem:[%s15528_s0 + $0x1e0] sm:$0xff]  ;;  %v866_v53 = vmul.f32 0.020408163, %v15893_v57  ;;  %v1562_v45 = vsel %vm214_vm0, %v1252_v0, 0.0  ;;  %v8556_v0 = vld [vmem:[%s15528_s0 + $0x1f0] sm:$0xff] }
 0x1f5   :  { %15883 = vst [vmem:[#allocation9_spill] sm:$0xff] %v10568_v10  ;;  %15884 = vst [vmem:[#allocation10_spill] sm:$0xff] %v10570_v5  ;;  %v10602_v7 = vsub.f32 %v8554_v13, %v863_v63  ;;  %v1559_v34 = vsel %vm214_vm0, %v1251_v1, 0.0  ;;  %v8555_v13 = vld [vmem:[%s15528_s0 + $0x1f8] sm:$0xff] }
 0x1f6   :  { %15888 = vst [vmem:[#allocation12_spill] sm:$0xff] %v10584_v15  ;;  %15891 = vst [vmem:[#allocation138_spill] sm:$0xff] %v10597_v46  ;;  %v1253_v56 = vmul.f32 %v10584_v15, %v10584_v15  ;;  %v10619_v57 = vsub.f32 %v8555_v13, %v866_v53  ;;  %v15900_v15 = vld [vmem:[#allocation16_spill] sm:$0xff] }
 0x1f7   :  { %1557 = vadd.xlane.f32.xlu1 %v1556_v17  ;;  %1554 = vadd.xlane.f32.xlu0 %v1553_v35  ;;  %15892 = vst [vmem:[#allocation139_spill] sm:$0xff] %v10602_v7  ;;  %v15894_v17 = vld [vmem:[#allocation14_spill] sm:$0xff] }
 0x1f8   :  { %v10590_v16 = vpop.xlane.xlu1 %759  ;;  %v10592_v51 = vpop.xlane.xlu0 %756  ;;  %v865_v35 = vmul.f32 0.020408163, %v15894_v17  ;;  %15897 = vst [vmem:[#allocation140_spill] sm:$0xff] %v10619_v57  ;;  %v15899_v17 = vld [vmem:[#allocation15_spill] sm:$0xff]  ;;  %v1565_v53 = vsel %vm214_vm0, %v1253_v56, 0.0 }
 0x1f9   :  { %15889 = vst [vmem:[#allocation136_spill] sm:$0xff] %v10590_v16  ;;  %15890 = vst [vmem:[#allocation137_spill] sm:$0xff] %v10592_v51  ;;  %v1254_v51 = vmul.f32 %v10579_v29, %v10579_v29  ;;  %v868_v29 = vmul.f32 0.020408163, %v15899_v17 }
 0x1fa   :  { %v10624_v1 = vsub.f32 %v8556_v0, %v865_v35 }
 0x1fb   :  { %1563 = vadd.xlane.f32.xlu1 %v1562_v45  ;;  %1560 = vadd.xlane.f32.xlu0 %v1559_v34  ;;  %v1256_v45 = vmul.f32 %v10597_v46, %v10597_v46  ;;  %v1255_v34 = vmul.f32 %v10602_v7, %v10602_v7  ;;  %v1258_v7 = vmul.f32 %v10619_v57, %v10619_v57 }
 0x1fc   :  { %v10612_v39 = vpop.xlane.xlu1 %765  ;;  %v10614_v63 = vpop.xlane.xlu0 %762  ;;  %15898 = vst [vmem:[#allocation141_spill] sm:$0xff] %v10624_v1 }
 0x1fd   :  { %15895 = vst [vmem:[#allocation13_spill] sm:$0xff] %v10612_v39  ;;  %15896 = vst [vmem:[#allocation14_spill] sm:$0xff] %v10614_v63  ;;  %v867_v63 = vmul.f32 0.020408163, %v15900_v15  ;;  %v1568_v39 = vsel %vm214_vm0, %v1254_v51, 0.0  ;;  %v1574_v0 = vsel %vm214_vm0, %v1256_v45, 0.0  ;;  %v1257_v15 = vmul.f32 %v10624_v1, %v10624_v1 }
 0x1fe   :  { %v1571_v46 = vsel %vm214_vm0, %v1255_v34, 0.0  ;;  %v8557_v51 = vld [vmem:[%s15528_s0 + $0x208] sm:$0xff]  ;;  %v15905_v45 = vld [vmem:[#allocation17_spill] sm:$0xff]  ;;  %v1580_v5 = vsel %vm214_vm0, %v1258_v7, 0.0 }
 0x1ff   :  { %1569 = vadd.xlane.f32.xlu1 %v1568_v39  ;;  %1566 = vadd.xlane.f32.xlu0 %v1565_v53  ;;  %v10647_v56 = vsub.f32 %v8557_v51, %v868_v29  ;;  %v8558_v39 = vld [vmem:[%s15528_s0 + $0x200] sm:$0xff]  ;;  %v870_v34 = vmul.f32 0.020408163, %v15905_v45  ;;  %v15910_v29 = vld [vmem:[#allocation20_spill] sm:$0xff]  ;;  %v1577_v10 = vsel %vm214_vm0, %v1257_v15, 0.0 }
 0x200   :  { %v10634_v13 = vpop.xlane.xlu1 %771  ;;  %v10636_v35 = vpop.xlane.xlu0 %768  ;;  %v10652_v17 = vsub.f32 %v8558_v39, %v867_v63  ;;  %v15906_v53 = vld [vmem:[#allocation18_spill] sm:$0xff]  ;;  %v871_v51 = vmul.f32 0.020408163, %v15910_v29  ;;  %v8559_v63 = vld [vmem:[%s15528_s0 + $0x218] sm:$0xff] }
 0x201   :  { %15901 = vst [vmem:[#allocation15_spill] sm:$0xff] %v10634_v13  ;;  %15902 = vst [vmem:[#allocation16_spill] sm:$0xff] %v10636_v35  ;;  %v869_v35 = vmul.f32 0.020408163, %v15906_v53  ;;  %v15909_v13 = vld [vmem:[#allocation19_spill] sm:$0xff]  ;;  %v10667_v39 = vsub.f32 %v8559_v63, %v870_v34  ;;  %v15917_v63 = vld [vmem:[#allocation21_spill] sm:$0xff] }
 0x202   :  { %15903 = vst [vmem:[#allocation142_spill] sm:$0xff] %v10647_v56  ;;  %15904 = vst [vmem:[#allocation143_spill] sm:$0xff] %v10652_v17  ;;  %v872_v16 = vmul.f32 0.020408163, %v15909_v13  ;;  %v1260_v13 = vmul.f32 %v10647_v56, %v10647_v56  ;;  %v1259_v7 = vmul.f32 %v10652_v17, %v10652_v17  ;;  %v8561_v34 = vld [vmem:[%s15528_s0 + $0x228] sm:$0xff] }
 0x203   :  { %1575 = vadd.xlane.f32.xlu1 %v1574_v0  ;;  %1572 = vadd.xlane.f32.xlu0 %v1571_v46  ;;  %15911 = vst [vmem:[#allocation19_spill] sm:$0xff] %v10667_v39  ;;  %v8560_v46 = vld [vmem:[%s15528_s0 + $0x210] sm:$0xff] }
 0x204   :  { %v10656_v57 = vpop.xlane.xlu1 %777  ;;  %v10658_v1 = vpop.xlane.xlu0 %774  ;;  %v10672_v0 = vsub.f32 %v8560_v46, %v869_v35  ;;  %v10685_v53 = vsub.f32 %v8561_v34, %v872_v16  ;;  %v8562_v35 = vld [vmem:[%s15528_s0 + $0x220] sm:$0xff]  ;;  %v874_v46 = vmul.f32 0.020408163, %v15917_v63  ;;  %v1586_v17 = vsel %vm214_vm0, %v1260_v13, 0.0  ;;  %v8564_v13 = vld [vmem:[%s15528_s0 + $0x230] sm:$0xff] }
 0x205   :  { %15907 = vst [vmem:[#allocation17_spill] sm:$0xff] %v10656_v57  ;;  %15908 = vst [vmem:[#allocation18_spill] sm:$0xff] %v10658_v1  ;;  %v10690_v29 = vsub.f32 %v8562_v35, %v871_v51  ;;  %v1583_v56 = vsel %vm214_vm0, %v1259_v7, 0.0  ;;  %v8563_v35 = vld [vmem:[%s15528_s0 + $0x238] sm:$0xff] }
 0x206   :  { %15912 = vst [vmem:[#allocation20_spill] sm:$0xff] %v10672_v0  ;;  %15915 = vst [vmem:[#allocation146_spill] sm:$0xff] %v10685_v53  ;;  %v1261_v16 = vmul.f32 %v10672_v0, %v10672_v0  ;;  %v10707_v63 = vsub.f32 %v8563_v35, %v874_v46 }
 0x207   :  { %1581 = vadd.xlane.f32.xlu1 %v1580_v5  ;;  %1578 = vadd.xlane.f32.xlu0 %v1577_v10  ;;  %15916 = vst [vmem:[#allocation147_spill] sm:$0xff] %v10690_v29  ;;  %v15918_v5 = vld [vmem:[#allocation22_spill] sm:$0xff] }
 0x208   :  { %v10678_v15 = vpop.xlane.xlu1 %783  ;;  %v10680_v45 = vpop.xlane.xlu0 %780  ;;  %v873_v10 = vmul.f32 0.020408163, %v15918_v5  ;;  %15921 = vst [vmem:[#allocation148_spill] sm:$0xff] %v10707_v63  ;;  %v15923_v5 = vld [vmem:[#allocation23_spill] sm:$0xff]  ;;  %v1589_v46 = vsel %vm214_vm0, %v1261_v16, 0.0 }
 0x209   :  { %15913 = vst [vmem:[#allocation144_spill] sm:$0xff] %v10678_v15  ;;  %15914 = vst [vmem:[#allocation145_spill] sm:$0xff] %v10680_v45  ;;  %v1262_v45 = vmul.f32 %v10667_v39, %v10667_v39  ;;  %v876_v0 = vmul.f32 0.020408163, %v15923_v5  ;;  %v15924_v39 = vld [vmem:[#allocation24_spill] sm:$0xff] }
 0x20a   :  { %v10712_v7 = vsub.f32 %v8564_v13, %v873_v10 }
 0x20b   :  { %1587 = vadd.xlane.f32.xlu1 %v1586_v17  ;;  %1584 = vadd.xlane.f32.xlu0 %v1583_v56  ;;  %v1264_v17 = vmul.f32 %v10685_v53, %v10685_v53  ;;  %v1263_v56 = vmul.f32 %v10690_v29, %v10690_v29  ;;  %v1266_v29 = vmul.f32 %v10707_v63, %v10707_v63 }
 0x20c   :  { %v10700_v34 = vpop.xlane.xlu1 %789  ;;  %v10702_v51 = vpop.xlane.xlu0 %786  ;;  %15922 = vst [vmem:[#allocation149_spill] sm:$0xff] %v10712_v7 }
 0x20d   :  { %15919 = vst [vmem:[#allocation21_spill] sm:$0xff] %v10700_v34  ;;  %15920 = vst [vmem:[#allocation22_spill] sm:$0xff] %v10702_v51  ;;  %v875_v51 = vmul.f32 0.020408163, %v15924_v39  ;;  %v1592_v34 = vsel %vm214_vm0, %v1262_v45, 0.0  ;;  %v1598_v13 = vsel %vm214_vm0, %v1264_v17, 0.0  ;;  %v1265_v39 = vmul.f32 %v10712_v7, %v10712_v7 }
 0x20e   :  { %v1595_v53 = vsel %vm214_vm0, %v1263_v56, 0.0  ;;  %v8565_v45 = vld [vmem:[%s15528_s0 + $0x248] sm:$0xff]  ;;  %v15929_v17 = vld [vmem:[#allocation25_spill] sm:$0xff]  ;;  %v1604_v1 = vsel %vm214_vm0, %v1266_v29, 0.0 }
 0x20f   :  { %1593 = vadd.xlane.f32.xlu1 %v1592_v34  ;;  %1590 = vadd.xlane.f32.xlu0 %v1589_v46  ;;  %v10735_v16 = vsub.f32 %v8565_v45, %v876_v0  ;;  %v8566_v34 = vld [vmem:[%s15528_s0 + $0x240] sm:$0xff]  ;;  %v878_v56 = vmul.f32 0.020408163, %v15929_v17  ;;  %v15934_v0 = vld [vmem:[#allocation28_spill] sm:$0xff]  ;;  %v1601_v57 = vsel %vm214_vm0, %v1265_v39, 0.0 }
 0x210   :  { %v10722_v35 = vpop.xlane.xlu1 %795  ;;  %v10724_v10 = vpop.xlane.xlu0 %792  ;;  %v10740_v5 = vsub.f32 %v8566_v34, %v875_v51  ;;  %v15930_v46 = vld [vmem:[#allocation26_spill] sm:$0xff]  ;;  %v879_v45 = vmul.f32 0.020408163, %v15934_v0  ;;  %v8567_v51 = vld [vmem:[%s15528_s0 + $0x258] sm:$0xff] }
 0x211   :  { %15925 = vst [vmem:[#allocation23_spill] sm:$0xff] %v10722_v35  ;;  %15926 = vst [vmem:[#allocation24_spill] sm:$0xff] %v10724_v10  ;;  %v877_v10 = vmul.f32 0.020408163, %v15930_v46  ;;  %v15933_v35 = vld [vmem:[#allocation27_spill] sm:$0xff]  ;;  %v10755_v34 = vsub.f32 %v8567_v51, %v878_v56  ;;  %v15941_v51 = vld [vmem:[#allocation29_spill] sm:$0xff] }
 0x212   :  { %15927 = vst [vmem:[#allocation150_spill] sm:$0xff] %v10735_v16  ;;  %15928 = vst [vmem:[#allocation151_spill] sm:$0xff] %v10740_v5  ;;  %v880_v15 = vmul.f32 0.020408163, %v15933_v35  ;;  %v1268_v35 = vmul.f32 %v10735_v16, %v10735_v16  ;;  %v1267_v29 = vmul.f32 %v10740_v5, %v10740_v5  ;;  %v8569_v56 = vld [vmem:[%s15528_s0 + $0x268] sm:$0xff] }
 0x213   :  { %1599 = vadd.xlane.f32.xlu1 %v1598_v13  ;;  %1596 = vadd.xlane.f32.xlu0 %v1595_v53  ;;  %15935 = vst [vmem:[#allocation27_spill] sm:$0xff] %v10755_v34  ;;  %v8568_v53 = vld [vmem:[%s15528_s0 + $0x250] sm:$0xff] }
 0x214   :  { %v10744_v63 = vpop.xlane.xlu1 %801  ;;  %v10746_v7 = vpop.xlane.xlu0 %798  ;;  %v10760_v13 = vsub.f32 %v8568_v53, %v877_v10  ;;  %v10773_v46 = vsub.f32 %v8569_v56, %v880_v15  ;;  %v8570_v10 = vld [vmem:[%s15528_s0 + $0x260] sm:$0xff]  ;;  %v882_v53 = vmul.f32 0.020408163, %v15941_v51  ;;  %v1610_v5 = vsel %vm214_vm0, %v1268_v35, 0.0  ;;  %v8572_v35 = vld [vmem:[%s15528_s0 + $0x270] sm:$0xff] }
 0x215   :  { %15931 = vst [vmem:[#allocation25_spill] sm:$0xff] %v10744_v63  ;;  %15932 = vst [vmem:[#allocation26_spill] sm:$0xff] %v10746_v7  ;;  %v10778_v0 = vsub.f32 %v8570_v10, %v879_v45  ;;  %v1607_v16 = vsel %vm214_vm0, %v1267_v29, 0.0  ;;  %v8571_v10 = vld [vmem:[%s15528_s0 + $0x278] sm:$0xff] }
 0x216   :  { %15936 = vst [vmem:[#allocation28_spill] sm:$0xff] %v10760_v13  ;;  %15939 = vst [vmem:[#allocation154_spill] sm:$0xff] %v10773_v46  ;;  %v1269_v15 = vmul.f32 %v10760_v13, %v10760_v13  ;;  %v10795_v51 = vsub.f32 %v8571_v10, %v882_v53 }
 0x217   :  { %1605 = vadd.xlane.f32.xlu1 %v1604_v1  ;;  %1602 = vadd.xlane.f32.xlu0 %v1601_v57  ;;  %15940 = vst [vmem:[#allocation155_spill] sm:$0xff] %v10778_v0  ;;  %v15942_v1 = vld [vmem:[#allocation30_spill] sm:$0xff] }
 0x218   :  { %v10766_v39 = vpop.xlane.xlu1 %1395  ;;  %v10768_v17 = vpop.xlane.xlu0 %1392  ;;  %v881_v57 = vmul.f32 0.020408163, %v15942_v1  ;;  %15945 = vst [vmem:[#allocation156_spill] sm:$0xff] %v10795_v51  ;;  %v15947_v1 = vld [vmem:[#allocation31_spill] sm:$0xff]  ;;  %v1613_v53 = vsel %vm214_vm0, %v1269_v15, 0.0 }
 0x219   :  { %15937 = vst [vmem:[#allocation152_spill] sm:$0xff] %v10766_v39  ;;  %15938 = vst [vmem:[#allocation153_spill] sm:$0xff] %v10768_v17  ;;  %v1270_v17 = vmul.f32 %v10755_v34, %v10755_v34  ;;  %v884_v13 = vmul.f32 0.020408163, %v15947_v1  ;;  %v15948_v34 = vld [vmem:[#allocation32_spill] sm:$0xff] }
 0x21a   :  { %v10800_v29 = vsub.f32 %v8572_v35, %v881_v57 }
 0x21b   :  { %1611 = vadd.xlane.f32.xlu1 %v1610_v5  ;;  %1608 = vadd.xlane.f32.xlu0 %v1607_v16  ;;  %v1272_v5 = vmul.f32 %v10773_v46, %v10773_v46  ;;  %v1271_v16 = vmul.f32 %v10778_v0, %v10778_v0  ;;  %v1274_v0 = vmul.f32 %v10795_v51, %v10795_v51 }
 0x21c   :  { %v10788_v56 = vpop.xlane.xlu1 %1401  ;;  %v10790_v45 = vpop.xlane.xlu0 %1398  ;;  %15946 = vst [vmem:[#allocation157_spill] sm:$0xff] %v10800_v29 }
 0x21d   :  { %15943 = vst [vmem:[#allocation29_spill] sm:$0xff] %v10788_v56  ;;  %15944 = vst [vmem:[#allocation30_spill] sm:$0xff] %v10790_v45  ;;  %v883_v56 = vmul.f32 0.020408163, %v15948_v34  ;;  %v1616_v45 = vsel %vm214_vm0, %v1270_v17, 0.0  ;;  %v1622_v35 = vsel %vm214_vm0, %v1272_v5, 0.0  ;;  %v1273_v34 = vmul.f32 %v10800_v29, %v10800_v29 }
 0x21e   :  { %v1619_v46 = vsel %vm214_vm0, %v1271_v16, 0.0  ;;  %v8573_v17 = vld [vmem:[%s15528_s0 + $0x288] sm:$0xff]  ;;  %v15953_v5 = vld [vmem:[#allocation33_spill] sm:$0xff]  ;;  %v1628_v7 = vsel %vm214_vm0, %v1274_v0, 0.0 }
 0x21f   :  { %1617 = vadd.xlane.f32.xlu1 %v1616_v45  ;;  %1614 = vadd.xlane.f32.xlu0 %v1613_v53  ;;  %v10823_v15 = vsub.f32 %v8573_v17, %v884_v13  ;;  %v8574_v45 = vld [vmem:[%s15528_s0 + $0x280] sm:$0xff]  ;;  %v886_v16 = vmul.f32 0.020408163, %v15953_v5  ;;  %v15958_v13 = vld [vmem:[#allocation36_spill] sm:$0xff]  ;;  %v1625_v63 = vsel %vm214_vm0, %v1273_v34, 0.0 }
 0x220   :  { %v10810_v10 = vpop.xlane.xlu1 %1407  ;;  %v10812_v57 = vpop.xlane.xlu0 %1404  ;;  %v10828_v1 = vsub.f32 %v8574_v45, %v883_v56  ;;  %v15954_v53 = vld [vmem:[#allocation34_spill] sm:$0xff]  ;;  %v887_v17 = vmul.f32 0.020408163, %v15958_v13  ;;  %v8575_v56 = vld [vmem:[%s15528_s0 + $0x298] sm:$0xff] }
 0x221   :  { %15949 = vst [vmem:[#allocation31_spill] sm:$0xff] %v10810_v10  ;;  %15950 = vst [vmem:[#allocation32_spill] sm:$0xff] %v10812_v57  ;;  %v885_v10 = vmul.f32 0.020408163, %v15954_v53  ;;  %v15957_v57 = vld [vmem:[#allocation35_spill] sm:$0xff]  ;;  %v10843_v45 = vsub.f32 %v8575_v56, %v886_v16  ;;  %v15965_v56 = vld [vmem:[#allocation37_spill] sm:$0xff] }
 0x222   :  { %15951 = vst [vmem:[#allocation158_spill] sm:$0xff] %v10823_v15  ;;  %15952 = vst [vmem:[#allocation159_spill] sm:$0xff] %v10828_v1  ;;  %v888_v39 = vmul.f32 0.020408163, %v15957_v57  ;;  %v1276_v57 = vmul.f32 %v10823_v15, %v10823_v15  ;;  %v1275_v0 = vmul.f32 %v10828_v1, %v10828_v1  ;;  %v8577_v16 = vld [vmem:[%s15528_s0 + $0x2a8] sm:$0xff] }
 0x223   :  { %1623 = vadd.xlane.f32.xlu1 %v1622_v35  ;;  %1620 = vadd.xlane.f32.xlu0 %v1619_v46  ;;  %15959 = vst [vmem:[#allocation35_spill] sm:$0xff] %v10843_v45  ;;  %v8576_v46 = vld [vmem:[%s15528_s0 + $0x290] sm:$0xff] }
 0x224   :  { %v10832_v51 = vpop.xlane.xlu1 %1413  ;;  %v10834_v29 = vpop.xlane.xlu0 %1410  ;;  %v10848_v35 = vsub.f32 %v8576_v46, %v885_v10  ;;  %v10861_v53 = vsub.f32 %v8577_v16, %v888_v39  ;;  %v8578_v10 = vld [vmem:[%s15528_s0 + $0x2a0] sm:$0xff]  ;;  %v890_v46 = vmul.f32 0.020408163, %v15965_v56  ;;  %v1634_v1 = vsel %vm214_vm0, %v1276_v57, 0.0  ;;  %v8580_v57 = vld [vmem:[%s15528_s0 + $0x2b0] sm:$0xff] }
 0x225   :  { %15955 = vst [vmem:[#allocation33_spill] sm:$0xff] %v10832_v51  ;;  %15956 = vst [vmem:[#allocation34_spill] sm:$0xff] %v10834_v29  ;;  %v10866_v13 = vsub.f32 %v8578_v10, %v887_v17  ;;  %v1631_v15 = vsel %vm214_vm0, %v1275_v0, 0.0  ;;  %v8579_v10 = vld [vmem:[%s15528_s0 + $0x2b8] sm:$0xff]  ;;  %v15981_v29 = vld [vmem:[#allocation43_spill] sm:$0xff] }
 0x226   :  { %15960 = vst [vmem:[#allocation36_spill] sm:$0xff] %v10848_v35  ;;  %15963 = vst [vmem:[#allocation162_spill] sm:$0xff] %v10861_v53  ;;  %v1277_v39 = vmul.f32 %v10848_v35, %v10848_v35  ;;  %v10883_v56 = vsub.f32 %v8579_v10, %v890_v46 }
 0x227   :  { %1629 = vadd.xlane.f32.xlu1 %v1628_v7  ;;  %1626 = vadd.xlane.f32.xlu0 %v1625_v63  ;;  %15964 = vst [vmem:[#allocation163_spill] sm:$0xff] %v10866_v13  ;;  %v15966_v7 = vld [vmem:[#allocation38_spill] sm:$0xff] }
 0x228   :  { %v10854_v34 = vpop.xlane.xlu1 %1419  ;;  %v10856_v5 = vpop.xlane.xlu0 %1416  ;;  %v889_v63 = vmul.f32 0.020408163, %v15966_v7  ;;  %15969 = vst [vmem:[#allocation164_spill] sm:$0xff] %v10883_v56  ;;  %v15971_v7 = vld [vmem:[#allocation39_spill] sm:$0xff]  ;;  %v1637_v46 = vsel %vm214_vm0, %v1277_v39, 0.0  ;;  %v8582_v39 = vld [vmem:[%s15528_s0 + $0x2c0] sm:$0xff] }
 0x229   :  { %15961 = vst [vmem:[#allocation160_spill] sm:$0xff] %v10854_v34  ;;  %15962 = vst [vmem:[#allocation161_spill] sm:$0xff] %v10856_v5  ;;  %v1278_v5 = vmul.f32 %v10843_v45, %v10843_v45  ;;  %v892_v35 = vmul.f32 0.020408163, %v15971_v7  ;;  %v15972_v45 = vld [vmem:[#allocation40_spill] sm:$0xff] }
 0x22a   :  { %v10888_v0 = vsub.f32 %v8580_v57, %v889_v63 }
 0x22b   :  { %1635 = vadd.xlane.f32.xlu1 %v1634_v1  ;;  %1632 = vadd.xlane.f32.xlu0 %v1631_v15  ;;  %v1280_v1 = vmul.f32 %v10861_v53, %v10861_v53  ;;  %v1279_v15 = vmul.f32 %v10866_v13, %v10866_v13  ;;  %v1640_v51 = vsel %vm214_vm0, %v1278_v5, 0.0  ;;  %v1282_v13 = vmul.f32 %v10883_v56, %v10883_v56  ;;  %v8581_v5 = vld [vmem:[%s15528_s0 + $0x2c8] sm:$0xff] }
 0x22c   :  { %v10876_v16 = vpop.xlane.xlu1 %1425  ;;  %v10878_v17 = vpop.xlane.xlu0 %1422  ;;  %15970 = vst [vmem:[#allocation165_spill] sm:$0xff] %v10888_v0 }
 0x22d   :  { %15967 = vst [vmem:[#allocation37_spill] sm:$0xff] %v10876_v16  ;;  %15968 = vst [vmem:[#allocation38_spill] sm:$0xff] %v10878_v17  ;;  %v891_v17 = vmul.f32 0.020408163, %v15972_v45  ;;  %v1646_v57 = vsel %vm214_vm0, %v1280_v1, 0.0  ;;  %v1643_v53 = vsel %vm214_vm0, %v1279_v15, 0.0  ;;  %v1281_v45 = vmul.f32 %v10888_v0, %v10888_v0 }
 0x22e   :  { %v15977_v1 = vld [vmem:[#allocation41_spill] sm:$0xff]  ;;  %v1652_v16 = vsel %vm214_vm0, %v1282_v13, 0.0 }
 0x22f   :  { %1641 = vadd.xlane.f32.xlu1 %v1640_v51  ;;  %1638 = vadd.xlane.f32.xlu0 %v1637_v46  ;;  %v10911_v51 = vsub.f32 %v8581_v5, %v892_v35  ;;  %v10916_v7 = vsub.f32 %v8582_v39, %v891_v17  ;;  %v894_v15 = vmul.f32 0.020408163, %v15977_v1  ;;  %v15978_v46 = vld [vmem:[#allocation42_spill] sm:$0xff]  ;;  %v15982_v35 = vld [vmem:[#allocation44_spill] sm:$0xff]  ;;  %v1649_v34 = vsel %vm214_vm0, %v1281_v45, 0.0  ;;  %v8583_v17 = vld [vmem:[%s15528_s0 + $0x2d8] sm:$0xff] }
 0x230   :  { %v10898_v10 = vpop.xlane.xlu1 %1431  ;;  %v10900_v63 = vpop.xlane.xlu0 %1428  ;;  %v895_v5 = vmul.f32 0.020408163, %v15982_v35 }
 0x231   :  { %15973 = vst [vmem:[#allocation39_spill] sm:$0xff] %v10898_v10  ;;  %15974 = vst [vmem:[#allocation40_spill] sm:$0xff] %v10900_v63  ;;  %v893_v63 = vmul.f32 0.020408163, %v15978_v46  ;;  %v896_v10 = vmul.f32 0.020408163, %v15981_v29  ;;  %v10931_v39 = vsub.f32 %v8583_v17, %v894_v15  ;;  %v1284_v29 = vmul.f32 %v10911_v51, %v10911_v51 }
 0x232   :  { %15975 = vst [vmem:[#allocation166_spill] sm:$0xff] %v10911_v51  ;;  %15976 = vst [vmem:[#allocation167_spill] sm:$0xff] %v10916_v7  ;;  %v1283_v13 = vmul.f32 %v10916_v7, %v10916_v7  ;;  %v8585_v15 = vld [vmem:[%s15528_s0 + $0x2e8] sm:$0xff]  ;;  %v15989_v17 = vld [vmem:[#allocation45_spill] sm:$0xff] }
 0x233   :  { %1647 = vadd.xlane.f32.xlu1 %v1646_v57  ;;  %1644 = vadd.xlane.f32.xlu0 %v1643_v53  ;;  %15983 = vst [vmem:[#allocation43_spill] sm:$0xff] %v10931_v39  ;;  %v8584_v53 = vld [vmem:[%s15528_s0 + $0x2d0] sm:$0xff]  ;;  %v10949_v46 = vsub.f32 %v8585_v15, %v896_v10  ;;  %v1658_v7 = vsel %vm214_vm0, %v1284_v29, 0.0 }
 0x234   :  { %v10920_v56 = vpop.xlane.xlu1 %1437  ;;  %v10922_v0 = vpop.xlane.xlu0 %1434  ;;  %v10936_v57 = vsub.f32 %v8584_v53, %v893_v63  ;;  %v8586_v63 = vld [vmem:[%s15528_s0 + $0x2e0] sm:$0xff]  ;;  %v898_v53 = vmul.f32 0.020408163, %v15989_v17  ;;  %v1655_v51 = vsel %vm214_vm0, %v1283_v13, 0.0  ;;  %v8588_v29 = vld [vmem:[%s15528_s0 + $0x2f0] sm:$0xff] }
 0x235   :  { %15979 = vst [vmem:[#allocation41_spill] sm:$0xff] %v10920_v56  ;;  %15980 = vst [vmem:[#allocation42_spill] sm:$0xff] %v10922_v0  ;;  %v10954_v35 = vsub.f32 %v8586_v63, %v895_v5  ;;  %v8587_v63 = vld [vmem:[%s15528_s0 + $0x2f8] sm:$0xff] }
 0x236   :  { %15984 = vst [vmem:[#allocation44_spill] sm:$0xff] %v10936_v57  ;;  %15987 = vst [vmem:[#allocation170_spill] sm:$0xff] %v10949_v46  ;;  %v1285_v10 = vmul.f32 %v10936_v57, %v10936_v57  ;;  %v10971_v17 = vsub.f32 %v8587_v63, %v898_v53 }
 0x237   :  { %1653 = vadd.xlane.f32.xlu1 %v1652_v16  ;;  %1650 = vadd.xlane.f32.xlu0 %v1649_v34  ;;  %15988 = vst [vmem:[#allocation171_spill] sm:$0xff] %v10954_v35  ;;  %v15990_v16 = vld [vmem:[#allocation46_spill] sm:$0xff] }
 0x238   :  { %v10942_v45 = vpop.xlane.xlu1 %1443  ;;  %v10944_v1 = vpop.xlane.xlu0 %1440  ;;  %v897_v34 = vmul.f32 0.020408163, %v15990_v16  ;;  %15993 = vst [vmem:[#allocation172_spill] sm:$0xff] %v10971_v17  ;;  %v15995_v16 = vld [vmem:[#allocation47_spill] sm:$0xff]  ;;  %v1661_v53 = vsel %vm214_vm0, %v1285_v10, 0.0  ;;  %v8590_v10 = vld [vmem:[%s15528_s0 + $0x300] sm:$0xff] }
 0x239   :  { %15985 = vst [vmem:[#allocation168_spill] sm:$0xff] %v10942_v45  ;;  %15986 = vst [vmem:[#allocation169_spill] sm:$0xff] %v10944_v1  ;;  %v1286_v1 = vmul.f32 %v10931_v39, %v10931_v39  ;;  %v900_v57 = vmul.f32 0.020408163, %v15995_v16  ;;  %v15996_v39 = vld [vmem:[#allocation48_spill] sm:$0xff] }
 0x23a   :  { %v10976_v13 = vsub.f32 %v8588_v29, %v897_v34 }
 0x23b   :  { %1659 = vadd.xlane.f32.xlu1 %v1658_v7  ;;  %1656 = vadd.xlane.f32.xlu0 %v1655_v51  ;;  %v1288_v7 = vmul.f32 %v10949_v46, %v10949_v46  ;;  %v1287_v51 = vmul.f32 %v10954_v35, %v10954_v35  ;;  %v1664_v0 = vsel %vm214_vm0, %v1286_v1, 0.0  ;;  %v1290_v35 = vmul.f32 %v10971_v17, %v10971_v17  ;;  %v8589_v1 = vld [vmem:[%s15528_s0 + $0x308] sm:$0xff] }
 0x23c   :  { %v10964_v15 = vpop.xlane.xlu1 %1449  ;;  %v10966_v5 = vpop.xlane.xlu0 %1446  ;;  %15994 = vst [vmem:[#allocation173_spill] sm:$0xff] %v10976_v13 }
 0x23d   :  { %15991 = vst [vmem:[#allocation45_spill] sm:$0xff] %v10964_v15  ;;  %15992 = vst [vmem:[#allocation46_spill] sm:$0xff] %v10966_v5  ;;  %v899_v5 = vmul.f32 0.020408163, %v15996_v39  ;;  %v1670_v29 = vsel %vm214_vm0, %v1288_v7, 0.0  ;;  %v1667_v46 = vsel %vm214_vm0, %v1287_v51, 0.0  ;;  %v1289_v39 = vmul.f32 %v10976_v13, %v10976_v13 }
 0x23e   :  { %v16001_v7 = vld [vmem:[#allocation49_spill] sm:$0xff]  ;;  %v1676_v45 = vsel %vm214_vm0, %v1290_v35, 0.0 }
 0x23f   :  { %1665 = vadd.xlane.f32.xlu1 %v1664_v0  ;;  %1662 = vadd.xlane.f32.xlu0 %v1661_v53  ;;  %v10999_v0 = vsub.f32 %v8589_v1, %v900_v57  ;;  %v11004_v16 = vsub.f32 %v8590_v10, %v899_v5  ;;  %v902_v51 = vmul.f32 0.020408163, %v16001_v7  ;;  %v16002_v53 = vld [vmem:[#allocation50_spill] sm:$0xff]  ;;  %v16006_v57 = vld [vmem:[#allocation52_spill] sm:$0xff]  ;;  %v1673_v56 = vsel %vm214_vm0, %v1289_v39, 0.0  ;;  %v8591_v5 = vld [vmem:[%s15528_s0 + $0x318] sm:$0xff] }
 0x240   :  { %v10986_v63 = vpop.xlane.xlu1 %1455  ;;  %v10988_v34 = vpop.xlane.xlu0 %1452  ;;  %v903_v1 = vmul.f32 0.020408163, %v16006_v57 }
 0x241   :  { %15997 = vst [vmem:[#allocation47_spill] sm:$0xff] %v10986_v63  ;;  %15998 = vst [vmem:[#allocation48_spill] sm:$0xff] %v10988_v34  ;;  %v901_v34 = vmul.f32 0.020408163, %v16002_v53  ;;  %v16005_v63 = vld [vmem:[#allocation51_spill] sm:$0xff]  ;;  %v11019_v10 = vsub.f32 %v8591_v5, %v902_v51  ;;  %v1291_v35 = vmul.f32 %v11004_v16, %v11004_v16  ;;  %v16013_v5 = vld [vmem:[#allocation53_spill] sm:$0xff] }
 0x242   :  { %15999 = vst [vmem:[#allocation174_spill] sm:$0xff] %v10999_v0  ;;  %16000 = vst [vmem:[#allocation175_spill] sm:$0xff] %v11004_v16  ;;  %v904_v15 = vmul.f32 0.020408163, %v16005_v63  ;;  %v1292_v63 = vmul.f32 %v10999_v0, %v10999_v0  ;;  %v8593_v51 = vld [vmem:[%s15528_s0 + $0x328] sm:$0xff] }
 0x243   :  { %1671 = vadd.xlane.f32.xlu1 %v1670_v29  ;;  %1668 = vadd.xlane.f32.xlu0 %v1667_v46  ;;  %16007 = vst [vmem:[#allocation51_spill] sm:$0xff] %v11019_v10  ;;  %v8592_v46 = vld [vmem:[%s15528_s0 + $0x310] sm:$0xff]  ;;  %v1679_v0 = vsel %vm214_vm0, %v1291_v35, 0.0 }
 0x244   :  { %v11008_v17 = vpop.xlane.xlu1 %1461  ;;  %v11010_v13 = vpop.xlane.xlu0 %1458  ;;  %v11024_v29 = vsub.f32 %v8592_v46, %v901_v34  ;;  %v11037_v53 = vsub.f32 %v8593_v51, %v904_v15  ;;  %v8594_v34 = vld [vmem:[%s15528_s0 + $0x320] sm:$0xff]  ;;  %v906_v46 = vmul.f32 0.020408163, %v16013_v5  ;;  %v1682_v16 = vsel %vm214_vm0, %v1292_v63, 0.0  ;;  %v8596_v63 = vld [vmem:[%s15528_s0 + $0x330] sm:$0xff] }
 0x245   :  { %16003 = vst [vmem:[#allocation49_spill] sm:$0xff] %v11008_v17  ;;  %16004 = vst [vmem:[#allocation50_spill] sm:$0xff] %v11010_v13  ;;  %v11042_v57 = vsub.f32 %v8594_v34, %v903_v1  ;;  %v8595_v34 = vld [vmem:[%s15528_s0 + $0x338] sm:$0xff] }
 0x246   :  { %16008 = vst [vmem:[#allocation52_spill] sm:$0xff] %v11024_v29  ;;  %16011 = vst [vmem:[#allocation178_spill] sm:$0xff] %v11037_v53  ;;  %v1293_v15 = vmul.f32 %v11024_v29, %v11024_v29  ;;  %v11059_v5 = vsub.f32 %v8595_v34, %v906_v46 }
 0x247   :  { %1677 = vadd.xlane.f32.xlu1 %v1676_v45  ;;  %1674 = vadd.xlane.f32.xlu0 %v1673_v56  ;;  %16012 = vst [vmem:[#allocation179_spill] sm:$0xff] %v11042_v57  ;;  %v16014_v45 = vld [vmem:[#allocation54_spill] sm:$0xff] }
 0x248   :  { %v11030_v39 = vpop.xlane.xlu1 %1467  ;;  %v11032_v7 = vpop.xlane.xlu0 %1464  ;;  %v905_v56 = vmul.f32 0.020408163, %v16014_v45  ;;  %16017 = vst [vmem:[#allocation180_spill] sm:$0xff] %v11059_v5  ;;  %v16019_v45 = vld [vmem:[#allocation55_spill] sm:$0xff]  ;;  %v1685_v46 = vsel %vm214_vm0, %v1293_v15, 0.0  ;;  %v8598_v15 = vld [vmem:[%s15528_s0 + $0x340] sm:$0xff] }
 0x249   :  { %16009 = vst [vmem:[#allocation176_spill] sm:$0xff] %v11030_v39  ;;  %16010 = vst [vmem:[#allocation177_spill] sm:$0xff] %v11032_v7  ;;  %v1294_v7 = vmul.f32 %v11019_v10, %v11019_v10  ;;  %v908_v29 = vmul.f32 0.020408163, %v16019_v45  ;;  %v16020_v10 = vld [vmem:[#allocation56_spill] sm:$0xff] }
 0x24a   :  { %v11064_v35 = vsub.f32 %v8596_v63, %v905_v56 }
 0x24b   :  { %1683 = vadd.xlane.f32.xlu1 %v1682_v16  ;;  %1680 = vadd.xlane.f32.xlu0 %v1679_v0  ;;  %v1296_v16 = vmul.f32 %v11037_v53, %v11037_v53  ;;  %v1295_v0 = vmul.f32 %v11042_v57, %v11042_v57  ;;  %v1688_v13 = vsel %vm214_vm0, %v1294_v7, 0.0  ;;  %v1298_v57 = vmul.f32 %v11059_v5, %v11059_v5  ;;  %v8597_v7 = vld [vmem:[%s15528_s0 + $0x348] sm:$0xff] }
 0x24c   :  { %v11052_v51 = vpop.xlane.xlu1 %1473  ;;  %v11054_v1 = vpop.xlane.xlu0 %1470  ;;  %16018 = vst [vmem:[#allocation181_spill] sm:$0xff] %v11064_v35 }
 0x24d   :  { %16015 = vst [vmem:[#allocation53_spill] sm:$0xff] %v11052_v51  ;;  %16016 = vst [vmem:[#allocation54_spill] sm:$0xff] %v11054_v1  ;;  %v907_v1 = vmul.f32 0.020408163, %v16020_v10  ;;  %v1694_v63 = vsel %vm214_vm0, %v1296_v16, 0.0  ;;  %v1691_v53 = vsel %vm214_vm0, %v1295_v0, 0.0  ;;  %v1297_v10 = vmul.f32 %v11064_v35, %v11064_v35 }
 0x24e   :  { %v16025_v16 = vld [vmem:[#allocation57_spill] sm:$0xff]  ;;  %v1700_v39 = vsel %vm214_vm0, %v1298_v57, 0.0 }
 0x24f   :  { %1689 = vadd.xlane.f32.xlu1 %v1688_v13  ;;  %1686 = vadd.xlane.f32.xlu0 %v1685_v46  ;;  %v11087_v13 = vsub.f32 %v8597_v7, %v908_v29  ;;  %v11092_v45 = vsub.f32 %v8598_v15, %v907_v1  ;;  %v910_v0 = vmul.f32 0.020408163, %v16025_v16  ;;  %v16026_v46 = vld [vmem:[#allocation58_spill] sm:$0xff]  ;;  %v16030_v29 = vld [vmem:[#allocation60_spill] sm:$0xff]  ;;  %v1697_v17 = vsel %vm214_vm0, %v1297_v10, 0.0  ;;  %v8599_v1 = vld [vmem:[%s15528_s0 + $0x358] sm:$0xff] }
 0x250   :  { %v11074_v34 = vpop.xlane.xlu1 %1479  ;;  %v11076_v56 = vpop.xlane.xlu0 %1476  ;;  %v911_v7 = vmul.f32 0.020408163, %v16030_v29 }
 0x251   :  { %16021 = vst [vmem:[#allocation55_spill] sm:$0xff] %v11074_v34  ;;  %16022 = vst [vmem:[#allocation56_spill] sm:$0xff] %v11076_v56  ;;  %v909_v56 = vmul.f32 0.020408163, %v16026_v46  ;;  %v16029_v34 = vld [vmem:[#allocation59_spill] sm:$0xff]  ;;  %v11107_v15 = vsub.f32 %v8599_v1, %v910_v0  ;;  %v1299_v57 = vmul.f32 %v11092_v45, %v11092_v45  ;;  %v16037_v1 = vld [vmem:[#allocation61_spill] sm:$0xff] }
 0x252   :  { %16023 = vst [vmem:[#allocation182_spill] sm:$0xff] %v11087_v13  ;;  %16024 = vst [vmem:[#allocation183_spill] sm:$0xff] %v11092_v45  ;;  %v912_v51 = vmul.f32 0.020408163, %v16029_v34  ;;  %v1300_v34 = vmul.f32 %v11087_v13, %v11087_v13  ;;  %v8601_v0 = vld [vmem:[%s15528_s0 + $0x368] sm:$0xff] }
 0x253   :  { %1695 = vadd.xlane.f32.xlu1 %v1694_v63  ;;  %1692 = vadd.xlane.f32.xlu0 %v1691_v53  ;;  %16031 = vst [vmem:[#allocation59_spill] sm:$0xff] %v11107_v15  ;;  %v8600_v53 = vld [vmem:[%s15528_s0 + $0x350] sm:$0xff]  ;;  %v1703_v13 = vsel %vm214_vm0, %v1299_v57, 0.0 }
 0x254   :  { %v11096_v5 = vpop.xlane.xlu1 %1485  ;;  %v11098_v35 = vpop.xlane.xlu0 %1482  ;;  %v11112_v63 = vsub.f32 %v8600_v53, %v909_v56  ;;  %v11125_v46 = vsub.f32 %v8601_v0, %v912_v51  ;;  %v8602_v56 = vld [vmem:[%s15528_s0 + $0x360] sm:$0xff]  ;;  %v914_v53 = vmul.f32 0.020408163, %v16037_v1  ;;  %v1706_v45 = vsel %vm214_vm0, %v1300_v34, 0.0  ;;  %v8604_v34 = vld [vmem:[%s15528_s0 + $0x370] sm:$0xff] }
 0x255   :  { %16027 = vst [vmem:[#allocation57_spill] sm:$0xff] %v11096_v5  ;;  %16028 = vst [vmem:[#allocation58_spill] sm:$0xff] %v11098_v35  ;;  %v11130_v29 = vsub.f32 %v8602_v56, %v911_v7  ;;  %v8603_v56 = vld [vmem:[%s15528_s0 + $0x378] sm:$0xff] }
 0x256   :  { %16032 = vst [vmem:[#allocation60_spill] sm:$0xff] %v11112_v63  ;;  %16035 = vst [vmem:[#allocation186_spill] sm:$0xff] %v11125_v46  ;;  %v1301_v51 = vmul.f32 %v11112_v63, %v11112_v63  ;;  %v11147_v1 = vsub.f32 %v8603_v56, %v914_v53 }
 0x257   :  { %1701 = vadd.xlane.f32.xlu1 %v1700_v39  ;;  %1698 = vadd.xlane.f32.xlu0 %v1697_v17  ;;  %16036 = vst [vmem:[#allocation187_spill] sm:$0xff] %v11130_v29  ;;  %v16038_v39 = vld [vmem:[#allocation62_spill] sm:$0xff] }
 0x258   :  { %v11118_v10 = vpop.xlane.xlu1 %1491  ;;  %v11120_v16 = vpop.xlane.xlu0 %1488  ;;  %v913_v17 = vmul.f32 0.020408163, %v16038_v39  ;;  %16041 = vst [vmem:[#allocation188_spill] sm:$0xff] %v11147_v1  ;;  %v16043_v39 = vld [vmem:[#allocation63_spill] sm:$0xff]  ;;  %v1709_v53 = vsel %vm214_vm0, %v1301_v51, 0.0  ;;  %v8606_v51 = vld [vmem:[%s15528_s0 + $0x380] sm:$0xff] }
 0x259   :  { %16033 = vst [vmem:[#allocation184_spill] sm:$0xff] %v11118_v10  ;;  %16034 = vst [vmem:[#allocation185_spill] sm:$0xff] %v11120_v16  ;;  %v1302_v16 = vmul.f32 %v11107_v15, %v11107_v15  ;;  %v916_v63 = vmul.f32 0.020408163, %v16043_v39  ;;  %v16044_v15 = vld [vmem:[#allocation64_spill] sm:$0xff] }
 0x25a   :  { %v11152_v57 = vsub.f32 %v8604_v34, %v913_v17 }
 0x25b   :  { %1707 = vadd.xlane.f32.xlu1 %v1706_v45  ;;  %1704 = vadd.xlane.f32.xlu0 %v1703_v13  ;;  %v1304_v45 = vmul.f32 %v11125_v46, %v11125_v46  ;;  %v1303_v13 = vmul.f32 %v11130_v29, %v11130_v29  ;;  %v1712_v35 = vsel %vm214_vm0, %v1302_v16, 0.0  ;;  %v1306_v29 = vmul.f32 %v11147_v1, %v11147_v1  ;;  %v8605_v16 = vld [vmem:[%s15528_s0 + $0x388] sm:$0xff] }
 0x25c   :  { %v11140_v0 = vpop.xlane.xlu1 %1497  ;;  %v11142_v7 = vpop.xlane.xlu0 %1494  ;;  %16042 = vst [vmem:[#allocation189_spill] sm:$0xff] %v11152_v57 }
 0x25d   :  { %16039 = vst [vmem:[#allocation61_spill] sm:$0xff] %v11140_v0  ;;  %16040 = vst [vmem:[#allocation62_spill] sm:$0xff] %v11142_v7  ;;  %v915_v7 = vmul.f32 0.020408163, %v16044_v15  ;;  %v1718_v34 = vsel %vm214_vm0, %v1304_v45, 0.0  ;;  %v1715_v46 = vsel %vm214_vm0, %v1303_v13, 0.0  ;;  %v1305_v15 = vmul.f32 %v11152_v57, %v11152_v57 }
 0x25e   :  { %v16049_v45 = vld [vmem:[#allocation65_spill] sm:$0xff]  ;;  %v1724_v10 = vsel %vm214_vm0, %v1306_v29, 0.0 }
 0x25f   :  { %1713 = vadd.xlane.f32.xlu1 %v1712_v35  ;;  %1710 = vadd.xlane.f32.xlu0 %v1709_v53  ;;  %v11175_v35 = vsub.f32 %v8605_v16, %v916_v63  ;;  %v11180_v39 = vsub.f32 %v8606_v51, %v915_v7  ;;  %v918_v13 = vmul.f32 0.020408163, %v16049_v45  ;;  %v16050_v53 = vld [vmem:[#allocation66_spill] sm:$0xff]  ;;  %v16053_v63 = vld [vmem:[#allocation68_spill] sm:$0xff]  ;;  %v1721_v5 = vsel %vm214_vm0, %v1305_v15, 0.0  ;;  %v8607_v7 = vld [vmem:[%s15528_s0 + $0x398] sm:$0xff] }
 0x260   :  { %v11162_v56 = vpop.xlane.xlu1 %1503  ;;  %v11164_v17 = vpop.xlane.xlu0 %1500  ;;  %v919_v16 = vmul.f32 0.020408163, %v16053_v63 }
 0x261   :  { %16045 = vst [vmem:[#allocation63_spill] sm:$0xff] %v11162_v56  ;;  %16046 = vst [vmem:[#allocation64_spill] sm:$0xff] %v11164_v17  ;;  %v917_v17 = vmul.f32 0.020408163, %v16050_v53  ;;  %v16052_v56 = vld [vmem:[#allocation67_spill] sm:$0xff]  ;;  %v11195_v51 = vsub.f32 %v8607_v7, %v918_v13  ;;  %v1307_v29 = vmul.f32 %v11180_v39, %v11180_v39  ;;  %v16059_v7 = vld [vmem:[#allocation69_spill] sm:$0xff] }
 0x262   :  { %16047 = vst [vmem:[#allocation190_spill] sm:$0xff] %v11175_v35  ;;  %16048 = vst [vmem:[#allocation191_spill] sm:$0xff] %v11180_v39  ;;  %v920_v0 = vmul.f32 0.020408163, %v16052_v56  ;;  %v1308_v56 = vmul.f32 %v11175_v35, %v11175_v35  ;;  %v8609_v13 = vld [vmem:[%s15528_s0 + $0x3a8] sm:$0xff] }
 0x263   :  { %1719 = vadd.xlane.f32.xlu1 %v1718_v34  ;;  %1716 = vadd.xlane.f32.xlu0 %v1715_v46  ;;  %16054 = vst [vmem:[#allocation66_spill] sm:$0xff] %v11195_v51  ;;  %v8608_v46 = vld [vmem:[%s15528_s0 + $0x390] sm:$0xff]  ;;  %v1727_v35 = vsel %vm214_vm0, %v1307_v29, 0.0 }
 0x264   :  { %v11184_v1 = vpop.xlane.xlu1 %1509  ;;  %v11186_v57 = vpop.xlane.xlu0 %1506  ;;  %v11200_v34 = vsub.f32 %v8608_v46, %v917_v17  ;;  %v11213_v53 = vsub.f32 %v8609_v13, %v920_v0  ;;  %v8610_v17 = vld [vmem:[%s15528_s0 + $0x3a0] sm:$0xff]  ;;  %v922_v46 = vmul.f32 0.020408163, %v16059_v7  ;;  %v1730_v39 = vsel %vm214_vm0, %v1308_v56, 0.0  ;;  %v8612_v56 = vld [vmem:[%s15528_s0 + $0x3b0] sm:$0xff] }
 0x265   :  { %16051 = vst [vmem:[#allocation65_spill] sm:$0xff] %v11186_v57  ;;  %v11218_v63 = vsub.f32 %v8610_v17, %v919_v16  ;;  %v8611_v17 = vld [vmem:[%s15528_s0 + $0x3b8] sm:$0xff] }
 0x266   :  { %16055 = vst [vmem:[#allocation67_spill] sm:$0xff] %v11200_v34  ;;  %16057 = vst [vmem:[#allocation192_spill] sm:$0xff] %v11213_v53  ;;  %v1309_v0 = vmul.f32 %v11200_v34, %v11200_v34  ;;  %v11235_v7 = vsub.f32 %v8611_v17, %v922_v46 }
 0x267   :  { %1725 = vadd.xlane.f32.xlu1 %v1724_v10  ;;  %1722 = vadd.xlane.f32.xlu0 %v1721_v5  ;;  %16058 = vst [vmem:[#allocation193_spill] sm:$0xff] %v11218_v63  ;;  %v16060_v10 = vld [vmem:[#allocation70_spill] sm:$0xff] }
 0x268   :  { %v11206_v15 = vpop.xlane.xlu1 %1515  ;;  %v11208_v45 = vpop.xlane.xlu0 %1512  ;;  %v921_v5 = vmul.f32 0.020408163, %v16060_v10  ;;  %16062 = vst [vmem:[#allocation70_spill] sm:$0xff] %v11235_v7  ;;  %v16064_v10 = vld [vmem:[#allocation71_spill] sm:$0xff]  ;;  %v1733_v46 = vsel %vm214_vm0, %v1309_v0, 0.0  ;;  %v8614_v0 = vld [vmem:[%s15528_s0 + $0x3c0] sm:$0xff] }
 0x269   :  { %16056 = vst [vmem:[#allocation68_spill] sm:$0xff] %v11208_v45  ;;  %v1310_v45 = vmul.f32 %v11195_v51, %v11195_v51  ;;  %v924_v34 = vmul.f32 0.020408163, %v16064_v10  ;;  %v16065_v51 = vld [vmem:[#allocation72_spill] sm:$0xff] }
 0x26a   :  { %v11240_v29 = vsub.f32 %v8612_v56, %v921_v5 }
 0x26b   :  { %1731 = vadd.xlane.f32.xlu1 %v1730_v39  ;;  %1728 = vadd.xlane.f32.xlu0 %v1727_v35  ;;  %v1312_v39 = vmul.f32 %v11213_v53, %v11213_v53  ;;  %v1311_v35 = vmul.f32 %v11218_v63, %v11218_v63  ;;  %v1736_v57 = vsel %vm214_vm0, %v1310_v45, 0.0  ;;  %v1314_v63 = vmul.f32 %v11235_v7, %v11235_v7  ;;  %v8613_v45 = vld [vmem:[%s15528_s0 + $0x3c8] sm:$0xff] }
 0x26c   :  { %v11228_v13 = vpop.xlane.xlu1 %1521  ;;  %v11230_v16 = vpop.xlane.xlu0 %1518  ;;  %16063 = vst [vmem:[#allocation194_spill] sm:$0xff] %v11240_v29  ;;  %v928_v7 = vmul.f32 0.020408163, %v9974_v31 }
 0x26d   :  { %16061 = vst [vmem:[#allocation69_spill] sm:$0xff] %v11230_v16  ;;  %v923_v16 = vmul.f32 0.020408163, %v16065_v51  ;;  %v1742_v56 = vsel %vm214_vm0, %v1312_v39, 0.0  ;;  %v1739_v53 = vsel %vm214_vm0, %v1311_v35, 0.0  ;;  %v1313_v51 = vmul.f32 %v11240_v29, %v11240_v29 }
 0x26e   :  { %v926_v39 = vmul.f32 0.020408163, %v9952_v62  ;;  %v925_v35 = vmul.f32 0.020408163, %v9954_v44  ;;  %v8615_v62 = vld [vmem:[%s15528_s0 + $0x3d8] sm:$0xff]  ;;  %v8616_v44 = vld [vmem:[%s15528_s0 + $0x3d0] sm:$0xff] }
 0x26f   :  { %1737 = vadd.xlane.f32.xlu1 %v1736_v57  ;;  %1734 = vadd.xlane.f32.xlu0 %v1733_v46  ;;  %v11263_v57 = vsub.f32 %v8613_v45, %v924_v34  ;;  %v11268_v10 = vsub.f32 %v8614_v0, %v923_v16  ;;  %v927_v34 = vmul.f32 0.020408163, %v9976_v19  ;;  %v1748_v45 = vsel %vm214_vm0, %v1314_v63, 0.0 }
 0x270   :  { %v11250_v17 = vpop.xlane.xlu1 %1527  ;;  %v11252_v5 = vpop.xlane.xlu0 %1524  ;;  %v11283_v16 = vsub.f32 %v8615_v62, %v926_v39  ;;  %v8618_v39 = vld [vmem:[%s15528_s0 + $0x3e0] sm:$0xff]  ;;  %v930_v62 = vmul.f32 0.020408163, %v9996_v25  ;;  %v8619_v25 = vld [vmem:[%s15528_s0 + $0x3f8] sm:$0xff] }
 0x271   :  { %16066 = vst [vmem:[#allocation71_spill] sm:$0xff] %v11252_v5  ;;  %16067 = vst [vmem:[#allocation72_spill] sm:$0xff] %v11263_v57  ;;  %v1745_v5 = vsel %vm214_vm0, %v1313_v51, 0.0  ;;  %v1316_v31 = vmul.f32 %v11263_v57, %v11263_v57  ;;  %v1315_v19 = vmul.f32 %v11268_v10, %v11268_v10  ;;  %v8617_v51 = vld [vmem:[%s15528_s0 + $0x3e8] sm:$0xff] }
 0x272   :  { %16068 = vst [vmem:[#allocation195_spill] sm:$0xff] %v11268_v10  ;;  %16069 = vst [vmem:[#allocation196_spill] sm:$0xff] %v11283_v16  ;;  %v11301_v0 = vsub.f32 %v8617_v51, %v928_v7  ;;  %v1318_v10 = vmul.f32 %v11283_v16, %v11283_v16 }
 0x273   :  { %1743 = vadd.xlane.f32.xlu1 %v1742_v56  ;;  %1740 = vadd.xlane.f32.xlu0 %v1739_v53  ;;  %v11288_v53 = vsub.f32 %v8616_v44, %v925_v35  ;;  %v11306_v35 = vsub.f32 %v8618_v39, %v927_v34  ;;  %v1751_v44 = vsel %vm214_vm0, %v1315_v19, 0.0 }
 0x274   :  { %v11272_v46 = vpop.xlane.xlu1 %1533  ;;  %v11274_v29 = vpop.xlane.xlu0 %1530  ;;  %16071 = vst [vmem:[#allocation198_spill] sm:$0xff] %v11301_v0  ;;  %v1320_v39 = vmul.f32 %v11301_v0, %v11301_v0  ;;  %v1760_v57 = vsel %vm214_vm0, %v1318_v10, 0.0  ;;  %v8621_v10 = vld [vmem:[%s15528_s0 + $0x408] sm:$0xff] }
 0x275   :  { %16070 = vst [vmem:[#allocation197_spill] sm:$0xff] %v11288_v53  ;;  %16072 = vst [vmem:[#allocation199_spill] sm:$0xff] %v11306_v35  ;;  %v1317_v7 = vmul.f32 %v11288_v53, %v11288_v53  ;;  %v16075_v53 = vld [vmem:[#allocation81_spill] sm:$0xff] }
 0x276   :  { %v931_v16 = vmul.f32 0.020408163, %v16075_v53  ;;  %v8622_v53 = vld [vmem:[%s15528_s0 + $0x400] sm:$0xff] }
 0x277   :  { %1749 = vadd.xlane.f32.xlu1 %v1748_v45  ;;  %1746 = vadd.xlane.f32.xlu0 %v1745_v5  ;;  %v929_v5 = vmul.f32 0.020408163, %v9998_v24  ;;  %v1754_v45 = vsel %vm214_vm0, %v1316_v31, 0.0  ;;  %v11323_v24 = vsub.f32 %v8619_v25, %v930_v62  ;;  %v8620_v31 = vld [vmem:[%s15528_s0 + $0x3f0] sm:$0xff]  ;;  %v1757_v62 = vsel %vm214_vm0, %v1317_v7, 0.0 }
 0x278   :  { %v11294_v63 = vpop.xlane.xlu1 %1539  ;;  %v11296_v56 = vpop.xlane.xlu0 %1536  ;;  %v11356_v7 = vsub.f32 %v8622_v53, %v931_v16 }
 0x279   :  { %16073 = vst [vmem:[#allocation200_spill] sm:$0xff] %v11323_v24  ;;  %v11328_v19 = vsub.f32 %v8620_v31, %v929_v5  ;;  %v1766_v31 = vsel %vm214_vm0, %v1320_v39, 0.0  ;;  %v934_v39 = vmul.f32 0.020408163, %v10040_v6  ;;  %v8623_v6 = vld [vmem:[%s15528_s0 + $0x418] sm:$0xff] }
 0x27a   :  { %16078 = vst [vmem:[#allocation203_spill] sm:$0xff] %v11356_v7 }
 0x27b   :  { %1755 = vadd.xlane.f32.xlu1 %v1754_v45  ;;  %1752 = vadd.xlane.f32.xlu0 %v1751_v44  ;;  %16074 = vst [vmem:[#allocation201_spill] sm:$0xff] %v11328_v19  ;;  %v1319_v45 = vmul.f32 %v11306_v35, %v11306_v35  ;;  %v932_v44 = vmul.f32 0.020408163, %v10018_v36  ;;  %v1322_v35 = vmul.f32 %v11323_v24, %v11323_v24  ;;  %v936_v24 = vmul.f32 0.020408163, %v10062_v47 }
 0x27c   :  { %v11316_v51 = vpop.xlane.xlu1 %1545  ;;  %v11318_v34 = vpop.xlane.xlu0 %1542  ;;  %v1321_v36 = vmul.f32 %v11328_v19, %v11328_v19  ;;  %v11371_v16 = vsub.f32 %v8623_v6, %v934_v39  ;;  %v8626_v39 = vld [vmem:[%s15528_s0 + $0x420] sm:$0xff]  ;;  %v938_v6 = vmul.f32 0.020408163, %v10084_v42  ;;  %v8627_v42 = vld [vmem:[%s15528_s0 + $0x438] sm:$0xff] }
 0x27d   :  { %v1763_v0 = vsel %vm214_vm0, %v1319_v45, 0.0  ;;  %v933_v45 = vmul.f32 0.020408163, %v10042_v30  ;;  %v8624_v30 = vld [vmem:[%s15528_s0 + $0x410] sm:$0xff] }
 0x27e   :  { %16079 = vst [vmem:[#allocation204_spill] sm:$0xff] %v11371_v16 }
 0x27f   :  { %1761 = vadd.xlane.f32.xlu1 %v1760_v57  ;;  %1758 = vadd.xlane.f32.xlu0 %v1757_v62  ;;  %v11351_v57 = vsub.f32 %v8621_v10, %v932_v44  ;;  %v935_v44 = vmul.f32 0.020408163, %v10064_v20  ;;  %v1772_v10 = vsel %vm214_vm0, %v1322_v35, 0.0  ;;  %v1323_v20 = vmul.f32 %v11356_v7, %v11356_v7 }
 0x280   :  { %v11338_v25 = vpop.xlane.xlu1 %1551  ;;  %v11340_v5 = vpop.xlane.xlu0 %1548 }
 0x281   :  { %16076 = vst [vmem:[#allocation81_spill] sm:$0xff] %v11340_v5  ;;  %16077 = vst [vmem:[#allocation202_spill] sm:$0xff] %v11351_v57  ;;  %v1769_v5 = vsel %vm214_vm0, %v1321_v36, 0.0  ;;  %v1324_v47 = vmul.f32 %v11351_v57, %v11351_v57  ;;  %v8625_v36 = vld [vmem:[%s15528_s0 + $0x428] sm:$0xff]  ;;  %v1326_v57 = vmul.f32 %v11371_v16, %v11371_v16  ;;  %v939_v16 = vmul.f32 0.020408163, %v10108_v11 }
 0x282   :  { %v11389_v53 = vsub.f32 %v8625_v36, %v936_v24  ;;  %v8629_v11 = vld [vmem:[%s15528_s0 + $0x448] sm:$0xff] }
 0x283   :  { %1767 = vadd.xlane.f32.xlu1 %v1766_v31  ;;  %1764 = vadd.xlane.f32.xlu0 %v1763_v0  ;;  %v11376_v0 = vsub.f32 %v8624_v30, %v933_v45  ;;  %v11394_v45 = vsub.f32 %v8626_v39, %v935_v44  ;;  %v1775_v30 = vsel %vm214_vm0, %v1323_v20, 0.0 }
 0x284   :  { %v11360_v62 = vpop.xlane.xlu1 %1557  ;;  %v11362_v19 = vpop.xlane.xlu0 %1554  ;;  %16081 = vst [vmem:[#allocation206_spill] sm:$0xff] %v11389_v53  ;;  %v1328_v39 = vmul.f32 %v11389_v53, %v11389_v53 }
 0x285   :  { %16080 = vst [vmem:[#allocation205_spill] sm:$0xff] %v11376_v0  ;;  %16082 = vst [vmem:[#allocation207_spill] sm:$0xff] %v11394_v45  ;;  %v1325_v24 = vmul.f32 %v11376_v0, %v11376_v0  ;;  %v1784_v0 = vsel %vm214_vm0, %v1326_v57, 0.0 }
 0x287   :  { %1773 = vadd.xlane.f32.xlu1 %v1772_v10  ;;  %1770 = vadd.xlane.f32.xlu0 %v1769_v5  ;;  %v937_v5 = vmul.f32 0.020408163, %v10086_v18  ;;  %v1778_v10 = vsel %vm214_vm0, %v1324_v47, 0.0  ;;  %v11411_v18 = vsub.f32 %v8627_v42, %v938_v6  ;;  %v8628_v47 = vld [vmem:[%s15528_s0 + $0x430] sm:$0xff]  ;;  %v1781_v6 = vsel %vm214_vm0, %v1325_v24, 0.0 }
 0x288   :  { %v11382_v35 = vpop.xlane.xlu1 %1563  ;;  %v11384_v31 = vpop.xlane.xlu0 %1560 }
 0x289   :  { %16083 = vst [vmem:[#allocation208_spill] sm:$0xff] %v11411_v18  ;;  %v11416_v20 = vsub.f32 %v8628_v47, %v937_v5  ;;  %v1790_v47 = vsel %vm214_vm0, %v1328_v39, 0.0  ;;  %v942_v39 = vmul.f32 0.020408163, %v10128_v48  ;;  %v8631_v48 = vld [vmem:[%s15528_s0 + $0x458] sm:$0xff] }
 0x28b   :  { %1779 = vadd.xlane.f32.xlu1 %v1778_v10  ;;  %1776 = vadd.xlane.f32.xlu0 %v1775_v30  ;;  %16084 = vst [vmem:[#allocation209_spill] sm:$0xff] %v11416_v20  ;;  %v1327_v10 = vmul.f32 %v11394_v45, %v11394_v45  ;;  %v940_v30 = vmul.f32 0.020408163, %v10106_v60  ;;  %v1330_v45 = vmul.f32 %v11411_v18, %v11411_v18 }
 0x28c   :  { %v11404_v36 = vpop.xlane.xlu1 %1569  ;;  %v11406_v44 = vpop.xlane.xlu0 %1566  ;;  %v1329_v60 = vmul.f32 %v11416_v20, %v11416_v20  ;;  %v944_v20 = vmul.f32 0.020408163, %v10150_v21 }
 0x28d   :  { %v1787_v53 = vsel %vm214_vm0, %v1327_v10, 0.0  ;;  %v11439_v57 = vsub.f32 %v8629_v11, %v940_v30  ;;  %v941_v10 = vmul.f32 0.020408163, %v10130_v55  ;;  %v943_v30 = vmul.f32 0.020408163, %v10152_v54  ;;  %v8632_v55 = vld [vmem:[%s15528_s0 + $0x450] sm:$0xff] }
 0x28e   :  { %v1796_v11 = vsel %vm214_vm0, %v1330_v45, 0.0  ;;  %v1793_v7 = vsel %vm214_vm0, %v1329_v60, 0.0  ;;  %v8633_v60 = vld [vmem:[%s15528_s0 + $0x468] sm:$0xff] }
 0x28f   :  { %1785 = vadd.xlane.f32.xlu1 %v1784_v0  ;;  %1782 = vadd.xlane.f32.xlu0 %v1781_v6  ;;  %16085 = vst [vmem:[#allocation210_spill] sm:$0xff] %v11439_v57  ;;  %v8630_v0 = vld [vmem:[%s15528_s0 + $0x440] sm:$0xff]  ;;  %v1332_v21 = vmul.f32 %v11439_v57, %v11439_v57 }
 0x290   :  { %v11426_v42 = vpop.xlane.xlu1 %1575  ;;  %v11428_v5 = vpop.xlane.xlu0 %1572  ;;  %v11444_v24 = vsub.f32 %v8630_v0, %v939_v16  ;;  %v11459_v16 = vsub.f32 %v8631_v48, %v942_v39  ;;  %v11477_v0 = vsub.f32 %v8633_v60, %v944_v20  ;;  %v8634_v39 = vld [vmem:[%s15528_s0 + $0x460] sm:$0xff]  ;;  %v946_v48 = vmul.f32 0.020408163, %v10172_v2  ;;  %v8635_v2 = vld [vmem:[%s15528_s0 + $0x478] sm:$0xff] }
 0x292   :  { %16086 = vst [vmem:[#allocation211_spill] sm:$0xff] %v11444_v24  ;;  %16087 = vst [vmem:[#allocation212_spill] sm:$0xff] %v11459_v16  ;;  %v1331_v54 = vmul.f32 %v11444_v24, %v11444_v24  ;;  %v1334_v57 = vmul.f32 %v11459_v16, %v11459_v16  ;;  %v947_v16 = vmul.f32 0.020408163, %v10196_v28 }
 0x293   :  { %1791 = vadd.xlane.f32.xlu1 %v1790_v47  ;;  %1788 = vadd.xlane.f32.xlu0 %v1787_v53  ;;  %v11464_v53 = vsub.f32 %v8632_v55, %v941_v10  ;;  %16089 = vst [vmem:[#allocation214_spill] sm:$0xff] %v11477_v0  ;;  %v11482_v10 = vsub.f32 %v8634_v39, %v943_v30 }
 0x294   :  { %v11448_v6 = vpop.xlane.xlu1 %1581  ;;  %v11450_v18 = vpop.xlane.xlu0 %1578  ;;  %v1799_v55 = vsel %vm214_vm0, %v1331_v54, 0.0  ;;  %v1336_v39 = vmul.f32 %v11477_v0, %v11477_v0 }
 0x295   :  { %16088 = vst [vmem:[#allocation213_spill] sm:$0xff] %v11464_v53  ;;  %16090 = vst [vmem:[#allocation215_spill] sm:$0xff] %v11482_v10  ;;  %v1333_v20 = vmul.f32 %v11464_v53, %v11464_v53  ;;  %v1808_v53 = vsel %vm214_vm0, %v1334_v57, 0.0 }
 0x296   :  { %v1814_v0 = vsel %vm214_vm0, %v1336_v39, 0.0  ;;  %v950_v39 = vmul.f32 0.020408163, %v10216_v8  ;;  %v8639_v8 = vld [vmem:[%s15528_s0 + $0x498] sm:$0xff] }
 0x297   :  { %1797 = vadd.xlane.f32.xlu1 %v1796_v11  ;;  %1794 = vadd.xlane.f32.xlu0 %v1793_v7  ;;  %v945_v7 = vmul.f32 0.020408163, %v10174_v49  ;;  %v1802_v11 = vsel %vm214_vm0, %v1332_v21, 0.0  ;;  %v11499_v49 = vsub.f32 %v8635_v2, %v946_v48  ;;  %v8636_v21 = vld [vmem:[%s15528_s0 + $0x470] sm:$0xff]  ;;  %v1805_v48 = vsel %vm214_vm0, %v1333_v20, 0.0 }
 0x298   :  { %v11470_v45 = vpop.xlane.xlu1 %1587  ;;  %v11472_v47 = vpop.xlane.xlu0 %1584 }
 0x299   :  { %16091 = vst [vmem:[#allocation216_spill] sm:$0xff] %v11499_v49  ;;  %v11504_v54 = vsub.f32 %v8636_v21, %v945_v7  ;;  %v15673_v21 = vmov 0   ;;  %v1338_v28 = vmul.f32 %v11499_v49, %v11499_v49 }
 0x29a   :  { %7910 = vset.pattern.permute.xlu1 %v15673_v21  ;;  %7909 = vset.pattern.permute.xlu0 %v15673_v21 }
 0x29b   :  { %1803 = vadd.xlane.f32.xlu1 %v1802_v11  ;;  %1800 = vadd.xlane.f32.xlu0 %v1799_v55  ;;  %16092 = vst [vmem:[#allocation217_spill] sm:$0xff] %v11504_v54  ;;  %v1335_v11 = vmul.f32 %v11482_v10, %v11482_v10  ;;  %v948_v55 = vmul.f32 0.020408163, %v10194_v22  ;;  %v1337_v57 = vmul.f32 %v11504_v54, %v11504_v54  ;;  %v952_v10 = vmul.f32 0.020408163, %v10238_v43 }
 0x29c   :  { %v11492_v60 = vpop.xlane.xlu1 %1593  ;;  %v11494_v30 = vpop.xlane.xlu0 %1590 }
 0x29d   :  { %v1811_v22 = vsel %vm214_vm0, %v1335_v11, 0.0  ;;  %v949_v11 = vmul.f32 0.020408163, %v10218_v23  ;;  %v1817_v24 = vsel %vm214_vm0, %v1337_v57, 0.0  ;;  %v8640_v23 = vld [vmem:[%s15528_s0 + $0x490] sm:$0xff]  ;;  %v8641_v57 = vld [vmem:[%s15528_s0 + $0x4a8] sm:$0xff] }
 0x29f   :  { %1809 = vadd.xlane.f32.xlu1 %v1808_v53  ;;  %1806 = vadd.xlane.f32.xlu0 %v1805_v48  ;;  %v8637_v53 = vld [vmem:[%s15528_s0 + $0x488] sm:$0xff]  ;;  %v8638_v48 = vld [vmem:[%s15528_s0 + $0x480] sm:$0xff] }
 0x2a0   :  { %v11514_v2 = vpop.xlane.xlu1 %1599  ;;  %v11516_v7 = vpop.xlane.xlu0 %1596  ;;  %v11529_v20 = vsub.f32 %v8637_v53, %v948_v55  ;;  %v11534_v21 = vsub.f32 %v8638_v48, %v947_v16  ;;  %v951_v55 = vmul.f32 0.020408163, %v10240_v14  ;;  %v1820_v53 = vsel %vm214_vm0, %v1338_v28, 0.0 }
 0x2a1   :  { %v11549_v16 = vsub.f32 %v8639_v8, %v950_v39  ;;  %v11567_v48 = vsub.f32 %v8641_v57, %v952_v10  ;;  %v8642_v39 = vld [vmem:[%s15528_s0 + $0x4a0] sm:$0xff]  ;;  %v954_v8 = vmul.f32 0.020408163, %v10260_v32  ;;  %v8643_v32 = vld [vmem:[%s15528_s0 + $0x4b8] sm:$0xff] }
 0x2a2   :  { %16093 = vst [vmem:[#allocation218_spill] sm:$0xff] %v11529_v20  ;;  %16094 = vst [vmem:[#allocation219_spill] sm:$0xff] %v11534_v21  ;;  %v1340_v43 = vmul.f32 %v11529_v20, %v11529_v20  ;;  %v1339_v14 = vmul.f32 %v11534_v21, %v11534_v21 }
 0x2a3   :  { %1815 = vadd.xlane.f32.xlu1 %v1814_v0  ;;  %1812 = vadd.xlane.f32.xlu0 %v1811_v22  ;;  %16095 = vst [vmem:[#allocation220_spill] sm:$0xff] %v11549_v16  ;;  %v11554_v0 = vsub.f32 %v8640_v23, %v949_v11  ;;  %16097 = vst [vmem:[#allocation222_spill] sm:$0xff] %v11567_v48  ;;  %v11572_v11 = vsub.f32 %v8642_v39, %v951_v55 }
 0x2a4   :  { %v11538_v49 = vpop.xlane.xlu1 %1605  ;;  %v11540_v54 = vpop.xlane.xlu0 %1602  ;;  %v1823_v23 = vsel %vm214_vm0, %v1339_v14, 0.0  ;;  %v1342_v20 = vmul.f32 %v11549_v16, %v11549_v16  ;;  %v1344_v39 = vmul.f32 %v11567_v48, %v11567_v48  ;;  %v955_v16 = vmul.f32 0.020408163, %v10284_v37  ;;  %v8645_v37 = vld [vmem:[%s15528_s0 + $0x4c8] sm:$0xff] }
 0x2a5   :  { %16096 = vst [vmem:[#allocation221_spill] sm:$0xff] %v11554_v0  ;;  %16098 = vst [vmem:[#allocation223_spill] sm:$0xff] %v11572_v11  ;;  %v1341_v10 = vmul.f32 %v11554_v0, %v11554_v0 }
 0x2a6   :  { %v1832_v0 = vsel %vm214_vm0, %v1342_v20, 0.0 }
 0x2a7   :  { %1821 = vadd.xlane.f32.xlu1 %v1820_v53  ;;  %1818 = vadd.xlane.f32.xlu0 %v1817_v24  ;;  %v953_v24 = vmul.f32 0.020408163, %v10262_v9  ;;  %v1826_v53 = vsel %vm214_vm0, %v1340_v43, 0.0  ;;  %v11589_v9 = vsub.f32 %v8643_v32, %v954_v8  ;;  %v8644_v43 = vld [vmem:[%s15528_s0 + $0x4b0] sm:$0xff]  ;;  %v1829_v8 = vsel %vm214_vm0, %v1341_v10, 0.0 }
 0x2a8   :  { %v11560_v22 = vpop.xlane.xlu1 %1611  ;;  %v11562_v28 = vpop.xlane.xlu0 %1608 }
 0x2a9   :  { %16099 = vst [vmem:[#allocation224_spill] sm:$0xff] %v11589_v9  ;;  %v11594_v14 = vsub.f32 %v8644_v43, %v953_v24  ;;  %v1838_v43 = vsel %vm214_vm0, %v1344_v39, 0.0  ;;  %v958_v39 = vmul.f32 0.020408163, %v10304_v40  ;;  %v8647_v40 = vld [vmem:[%s15528_s0 + $0x4d8] sm:$0xff] }
 0x2ab   :  { %1827 = vadd.xlane.f32.xlu1 %v1826_v53  ;;  %1824 = vadd.xlane.f32.xlu0 %v1823_v23  ;;  %16100 = vst [vmem:[#allocation225_spill] sm:$0xff] %v11594_v14  ;;  %v1343_v53 = vmul.f32 %v11572_v11, %v11572_v11  ;;  %v956_v23 = vmul.f32 0.020408163, %v10282_v58  ;;  %v1346_v11 = vmul.f32 %v11589_v9, %v11589_v9 }
 0x2ac   :  { %v11582_v57 = vpop.xlane.xlu1 %1617  ;;  %v11584_v55 = vpop.xlane.xlu0 %1614  ;;  %v1345_v58 = vmul.f32 %v11594_v14, %v11594_v14  ;;  %v960_v14 = vmul.f32 0.020408163, %v10326_v3 }
 0x2ad   :  { %v1835_v48 = vsel %vm214_vm0, %v1343_v53, 0.0  ;;  %v11617_v20 = vsub.f32 %v8645_v37, %v956_v23  ;;  %v957_v53 = vmul.f32 0.020408163, %v10306_v59  ;;  %v959_v23 = vmul.f32 0.020408163, %v10328_v50  ;;  %v8648_v59 = vld [vmem:[%s15528_s0 + $0x4d0] sm:$0xff] }
 0x2ae   :  { %v1844_v37 = vsel %vm214_vm0, %v1346_v11, 0.0  ;;  %v1841_v21 = vsel %vm214_vm0, %v1345_v58, 0.0  ;;  %v8649_v58 = vld [vmem:[%s15528_s0 + $0x4e8] sm:$0xff] }
 0x2af   :  { %1833 = vadd.xlane.f32.xlu1 %v1832_v0  ;;  %1830 = vadd.xlane.f32.xlu0 %v1829_v8  ;;  %16101 = vst [vmem:[#allocation226_spill] sm:$0xff] %v11617_v20  ;;  %v8646_v0 = vld [vmem:[%s15528_s0 + $0x4c0] sm:$0xff]  ;;  %v1348_v3 = vmul.f32 %v11617_v20, %v11617_v20 }
 0x2b0   :  { %v11604_v32 = vpop.xlane.xlu1 %1623  ;;  %v11606_v24 = vpop.xlane.xlu0 %1620  ;;  %v11622_v10 = vsub.f32 %v8646_v0, %v955_v16  ;;  %v11637_v16 = vsub.f32 %v8647_v40, %v958_v39  ;;  %v11655_v0 = vsub.f32 %v8649_v58, %v960_v14  ;;  %v8650_v39 = vld [vmem:[%s15528_s0 + $0x4e0] sm:$0xff]  ;;  %v962_v40 = vmul.f32 0.020408163, %v10348_v4  ;;  %v8651_v4 = vld [vmem:[%s15528_s0 + $0x4f8] sm:$0xff] }
 0x2b2   :  { %16102 = vst [vmem:[#allocation227_spill] sm:$0xff] %v11622_v10  ;;  %16103 = vst [vmem:[#allocation228_spill] sm:$0xff] %v11637_v16  ;;  %v1347_v50 = vmul.f32 %v11622_v10, %v11622_v10  ;;  %v1350_v20 = vmul.f32 %v11637_v16, %v11637_v16  ;;  %v963_v16 = vmul.f32 0.020408163, %v10372_v61  ;;  %v8653_v61 = vld [vmem:[%s15528_s0 + $0x508] sm:$0xff] }
 0x2b3   :  { %1839 = vadd.xlane.f32.xlu1 %v1838_v43  ;;  %1836 = vadd.xlane.f32.xlu0 %v1835_v48  ;;  %v11642_v48 = vsub.f32 %v8648_v59, %v957_v53  ;;  %16105 = vst [vmem:[#allocation230_spill] sm:$0xff] %v11655_v0  ;;  %v11660_v53 = vsub.f32 %v8650_v39, %v959_v23 }
 0x2b4   :  { %v11626_v8 = vpop.xlane.xlu1 %1629  ;;  %v11628_v9 = vpop.xlane.xlu0 %1626  ;;  %v1847_v59 = vsel %vm214_vm0, %v1347_v50, 0.0  ;;  %v1352_v39 = vmul.f32 %v11655_v0, %v11655_v0 }
 0x2b5   :  { %16104 = vst [vmem:[#allocation229_spill] sm:$0xff] %v11642_v48  ;;  %16106 = vst [vmem:[#allocation231_spill] sm:$0xff] %v11660_v53  ;;  %v1349_v14 = vmul.f32 %v11642_v48, %v11642_v48  ;;  %v1856_v48 = vsel %vm214_vm0, %v1350_v20, 0.0 }
 0x2b7   :  { %1845 = vadd.xlane.f32.xlu1 %v1844_v37  ;;  %1842 = vadd.xlane.f32.xlu0 %v1841_v21  ;;  %v961_v21 = vmul.f32 0.020408163, %v10350_v41  ;;  %v1850_v37 = vsel %vm214_vm0, %v1348_v3, 0.0  ;;  %v11677_v41 = vsub.f32 %v8651_v4, %v962_v40  ;;  %v8652_v3 = vld [vmem:[%s15528_s0 + $0x4f0] sm:$0xff]  ;;  %v1853_v40 = vsel %vm214_vm0, %v1349_v14, 0.0 }
 0x2b8   :  { %v11648_v11 = vpop.xlane.xlu1 %1635  ;;  %v11650_v43 = vpop.xlane.xlu0 %1632 }
 0x2b9   :  { %16108 = vst [vmem:[#allocation233_spill] sm:$0xff] %v11677_v41  ;;  %v11682_v50 = vsub.f32 %v8652_v3, %v961_v21  ;;  %v1862_v3 = vsel %vm214_vm0, %v1352_v39, 0.0  ;;  %v966_v39 = vmul.f32 0.020408163, %v10392_v12  ;;  %v8655_v12 = vld [vmem:[%s15528_s0 + $0x518] sm:$0xff] }
 0x2bb   :  { %1851 = vadd.xlane.f32.xlu1 %v1850_v37  ;;  %1848 = vadd.xlane.f32.xlu0 %v1847_v59  ;;  %16109 = vst [vmem:[#allocation234_spill] sm:$0xff] %v11682_v50  ;;  %v1351_v37 = vmul.f32 %v11660_v53, %v11660_v53  ;;  %v964_v59 = vmul.f32 0.020408163, %v10370_v38  ;;  %v1354_v53 = vmul.f32 %v11677_v41, %v11677_v41 }
 0x2bc   :  { %v11670_v58 = vpop.xlane.xlu1 %1641  ;;  %v11672_v23 = vpop.xlane.xlu0 %1638  ;;  %v1353_v38 = vmul.f32 %v11682_v50, %v11682_v50  ;;  %v968_v50 = vmul.f32 0.020408163, %v10414_v33 }
 0x2bd   :  { %16107 = vst [vmem:[#allocation232_spill] sm:$0xff] %v11672_v23  ;;  %v1859_v0 = vsel %vm214_vm0, %v1351_v37, 0.0  ;;  %v11705_v20 = vsub.f32 %v8653_v61, %v964_v59  ;;  %v965_v37 = vmul.f32 0.020408163, %v10394_v27  ;;  %v967_v59 = vmul.f32 0.020408163, %v10416_v26 }
 0x2be   :  { %v1868_v61 = vsel %vm214_vm0, %v1354_v53, 0.0  ;;  %v1865_v10 = vsel %vm214_vm0, %v1353_v38, 0.0  ;;  %v8656_v27 = vld [vmem:[%s15528_s0 + $0x510] sm:$0xff]  ;;  %v8657_v38 = vld [vmem:[%s15528_s0 + $0x528] sm:$0xff] }
 0x2bf   :  { %1857 = vadd.xlane.f32.xlu1 %v1856_v48  ;;  %1854 = vadd.xlane.f32.xlu0 %v1853_v40  ;;  %16111 = vst [vmem:[#allocation236_spill] sm:$0xff] %v11705_v20  ;;  %v8654_v48 = vld [vmem:[%s15528_s0 + $0x500] sm:$0xff]  ;;  %v1356_v33 = vmul.f32 %v11705_v20, %v11705_v20 }
 0x2c0   :  { %v11692_v4 = vpop.xlane.xlu1 %1647  ;;  %v11694_v21 = vpop.xlane.xlu0 %1644  ;;  %v11710_v14 = vsub.f32 %v8654_v48, %v963_v16  ;;  %v11725_v16 = vsub.f32 %v8655_v12, %v966_v39  ;;  %v11743_v48 = vsub.f32 %v8657_v38, %v968_v50  ;;  %v8658_v39 = vld [vmem:[%s15528_s0 + $0x520] sm:$0xff]  ;;  %v970_v12 = vmul.f32 0.020408163, %v10436_v52  ;;  %v8659_v52 = vld [vmem:[%s15528_s0 + $0x538] sm:$0xff] }
 0x2c1   :  { %16110 = vst [vmem:[#allocation235_spill] sm:$0xff] %v11694_v21 }
 0x2c2   :  { %16112 = vst [vmem:[#allocation237_spill] sm:$0xff] %v11710_v14  ;;  %16114 = vst [vmem:[#allocation239_spill] sm:$0xff] %v11725_v16  ;;  %v1355_v26 = vmul.f32 %v11710_v14, %v11710_v14  ;;  %v1358_v14 = vmul.f32 %v11725_v16, %v11725_v16 }
 0x2c3   :  { %1863 = vadd.xlane.f32.xlu1 %v1862_v3  ;;  %1860 = vadd.xlane.f32.xlu0 %v1859_v0  ;;  %v11730_v0 = vsub.f32 %v8656_v27, %v965_v37  ;;  %16117 = vst [vmem:[#allocation242_spill] sm:$0xff] %v11743_v48  ;;  %v11748_v37 = vsub.f32 %v8658_v39, %v967_v59  ;;  %v1874_v27 = vsel %vm214_vm0, %v1356_v33, 0.0  ;;  %v8660_v33 = vld [vmem:[%s15528_s0 + $0x530] sm:$0xff] }
 0x2c4   :  { %v11714_v40 = vpop.xlane.xlu1 %1653  ;;  %v11716_v41 = vpop.xlane.xlu0 %1650  ;;  %v1871_v20 = vsel %vm214_vm0, %v1355_v26, 0.0  ;;  %v11765_v39 = vsub.f32 %v8659_v52, %v970_v12 }
 0x2c5   :  { %16113 = vst [vmem:[#allocation238_spill] sm:$0xff] %v11716_v41  ;;  %16115 = vst [vmem:[#allocation240_spill] sm:$0xff] %v11730_v0  ;;  %v1357_v50 = vmul.f32 %v11730_v0, %v11730_v0  ;;  %v16125_v0 = vld [vmem:[#allocation124_spill] sm:$0xff] }
 0x2c6   :  { %16118 = vst [vmem:[#allocation243_spill] sm:$0xff] %v11748_v37  ;;  %16122 = vst [vmem:[#allocation245_spill] sm:$0xff] %v11765_v39  ;;  %v16134_v41 = vld [vmem:[#allocation128_spill] sm:$0xff] }
 0x2c7   :  { %1869 = vadd.xlane.f32.xlu1 %v1868_v61  ;;  %1866 = vadd.xlane.f32.xlu0 %v1865_v10  ;;  %v16119_v61 = vld [vmem:[#allocation120_spill] sm:$0xff]  ;;  %v1877_v12 = vsel %vm214_vm0, %v1357_v50, 0.0  ;;  %v8662_v50 = vld [vmem:[%s15528_s0 + $0x540] sm:$0xff]  ;;  %v976_v21 = vmul.f32 0.020408163, %v16134_v41 }
 0x2c8   :  { %v11736_v53 = vpop.xlane.xlu1 %1659  ;;  %v11738_v3 = vpop.xlane.xlu0 %1656  ;;  %v969_v10 = vmul.f32 0.020408163, %v16119_v61  ;;  %v1360_v61 = vmul.f32 %v11743_v48, %v11743_v48 }
 0x2c9   :  { %16116 = vst [vmem:[#allocation241_spill] sm:$0xff] %v11738_v3  ;;  %v1880_v3 = vsel %vm214_vm0, %v1358_v14, 0.0  ;;  %v8661_v14 = vld [vmem:[%s15528_s0 + $0x548] sm:$0xff] }
 0x2ca   :  { %v11770_v26 = vsub.f32 %v8660_v33, %v969_v10  ;;  %v1886_v33 = vsel %vm214_vm0, %v1360_v61, 0.0  ;;  %v16130_v61 = vld [vmem:[#allocation2_spill] sm:$0xff] }
 0x2cb   :  { %1875 = vadd.xlane.f32.xlu1 %v1874_v27  ;;  %1872 = vadd.xlane.f32.xlu0 %v1871_v20  ;;  %v1359_v20 = vmul.f32 %v11748_v37, %v11748_v37  ;;  %v16124_v27 = vld [vmem:[#allocation123_spill] sm:$0xff]  ;;  %v1362_v37 = vmul.f32 %v11765_v39, %v11765_v39 }
 0x2cc   :  { %v11758_v38 = vpop.xlane.xlu1 %1665  ;;  %v11760_v59 = vpop.xlane.xlu0 %1662  ;;  %16123 = vst [vmem:[#allocation246_spill] sm:$0xff] %v11770_v26  ;;  %v972_v16 = vmul.f32 0.020408163, %v16124_v27 }
 0x2cd   :  { %16120 = vst [vmem:[#allocation120_spill] sm:$0xff] %v11758_v38  ;;  %16121 = vst [vmem:[#allocation244_spill] sm:$0xff] %v11760_v59  ;;  %v971_v59 = vmul.f32 0.020408163, %v16125_v0  ;;  %v1883_v48 = vsel %vm214_vm0, %v1359_v20, 0.0  ;;  %v1361_v0 = vmul.f32 %v11770_v26, %v11770_v26 }
 0x2ce   :  { %v974_v20 = vmul.f32 0.020408163, %v16130_v61 }
 0x2cf   :  { %1881 = vadd.xlane.f32.xlu1 %v1880_v3  ;;  %1878 = vadd.xlane.f32.xlu0 %v1877_v12  ;;  %v11793_v3 = vsub.f32 %v8661_v14, %v972_v16  ;;  %v11798_v27 = vsub.f32 %v8662_v50, %v971_v59  ;;  %v16131_v12 = vld [vmem:[#allocation127_spill] sm:$0xff]  ;;  %v16135_v16 = vld [vmem:[#allocation129_spill] sm:$0xff]  ;;  %v1889_v23 = vsel %vm214_vm0, %v1361_v0, 0.0 }
 0x2d0   :  { %v11780_v52 = vpop.xlane.xlu1 %1671  ;;  %v11782_v10 = vpop.xlane.xlu0 %1668  ;;  %v975_v14 = vmul.f32 0.020408163, %v16135_v16  ;;  %v8663_v59 = vld [vmem:[%s15528_s0 + $0x558] sm:$0xff] }
 0x2d1   :  { %16126 = vst [vmem:[#allocation123_spill] sm:$0xff] %v11780_v52  ;;  %16127 = vst [vmem:[#allocation124_spill] sm:$0xff] %v11782_v10  ;;  %v973_v10 = vmul.f32 0.020408163, %v16131_v12  ;;  %v1892_v52 = vsel %vm214_vm0, %v1362_v37, 0.0  ;;  %v11813_v50 = vsub.f32 %v8663_v59, %v974_v20  ;;  %v1364_v41 = vmul.f32 %v11793_v3, %v11793_v3  ;;  %v8665_v20 = vld [vmem:[%s15528_s0 + $0x568] sm:$0xff] }
 0x2d2   :  { %16128 = vst [vmem:[#allocation247_spill] sm:$0xff] %v11793_v3  ;;  %16129 = vst [vmem:[#allocation248_spill] sm:$0xff] %v11798_v27  ;;  %v1363_v37 = vmul.f32 %v11798_v27, %v11798_v27  ;;  %v11831_v12 = vsub.f32 %v8665_v20, %v976_v21  ;;  %v16142_v59 = vld [vmem:[#allocation5_spill] sm:$0xff] }
 0x2d3   :  { %1887 = vadd.xlane.f32.xlu1 %v1886_v33  ;;  %1884 = vadd.xlane.f32.xlu0 %v1883_v48  ;;  %16136 = vst [vmem:[#allocation128_spill] sm:$0xff] %v11813_v50  ;;  %v8664_v48 = vld [vmem:[%s15528_s0 + $0x550] sm:$0xff]  ;;  %v1898_v3 = vsel %vm214_vm0, %v1364_v41, 0.0 }
 0x2d4   :  { %v11802_v39 = vpop.xlane.xlu1 %1677  ;;  %v11804_v26 = vpop.xlane.xlu0 %1674  ;;  %v11818_v33 = vsub.f32 %v8664_v48, %v973_v10  ;;  %16140 = vst [vmem:[#allocation251_spill] sm:$0xff] %v11831_v12  ;;  %v8666_v10 = vld [vmem:[%s15528_s0 + $0x560] sm:$0xff]  ;;  %v978_v48 = vmul.f32 0.020408163, %v16142_v59  ;;  %v1895_v27 = vsel %vm214_vm0, %v1363_v37, 0.0  ;;  %v8668_v41 = vld [vmem:[%s15528_s0 + $0x570] sm:$0xff] }
 0x2d5   :  { %16132 = vst [vmem:[#allocation2_spill] sm:$0xff] %v11802_v39  ;;  %16133 = vst [vmem:[#allocation127_spill] sm:$0xff] %v11804_v26  ;;  %v11836_v16 = vsub.f32 %v8666_v10, %v975_v14  ;;  %v8667_v10 = vld [vmem:[%s15528_s0 + $0x578] sm:$0xff] }
 0x2d6   :  { %16137 = vst [vmem:[#allocation129_spill] sm:$0xff] %v11818_v33  ;;  %v1365_v21 = vmul.f32 %v11818_v33, %v11818_v33  ;;  %v11853_v59 = vsub.f32 %v8667_v10, %v978_v48  ;;  %v16149_v33 = vld [vmem:[#allocation8_spill] sm:$0xff] }
 0x2d7   :  { %1893 = vadd.xlane.f32.xlu1 %v1892_v52  ;;  %1890 = vadd.xlane.f32.xlu0 %v1889_v23  ;;  %16141 = vst [vmem:[#allocation252_spill] sm:$0xff] %v11836_v16  ;;  %v16143_v52 = vld [vmem:[#allocation6_spill] sm:$0xff] }
 0x2d8   :  { %v11824_v0 = vpop.xlane.xlu1 %1683  ;;  %v11826_v61 = vpop.xlane.xlu0 %1680  ;;  %v977_v23 = vmul.f32 0.020408163, %v16143_v52  ;;  %16146 = vst [vmem:[#allocation253_spill] sm:$0xff] %v11853_v59  ;;  %v16148_v52 = vld [vmem:[#allocation7_spill] sm:$0xff]  ;;  %v1901_v48 = vsel %vm214_vm0, %v1365_v21, 0.0  ;;  %v8670_v21 = vld [vmem:[%s15528_s0 + $0x580] sm:$0xff] }
 0x2d9   :  { %16138 = vst [vmem:[#allocation249_spill] sm:$0xff] %v11824_v0  ;;  %16139 = vst [vmem:[#allocation250_spill] sm:$0xff] %v11826_v61  ;;  %v1366_v61 = vmul.f32 %v11813_v50, %v11813_v50  ;;  %v980_v50 = vmul.f32 0.020408163, %v16148_v52 }
 0x2da   :  { %v11858_v37 = vsub.f32 %v8668_v41, %v977_v23 }
 0x2db   :  { %1899 = vadd.xlane.f32.xlu1 %v1898_v3  ;;  %1896 = vadd.xlane.f32.xlu0 %v1895_v27  ;;  %v1368_v3 = vmul.f32 %v11831_v12, %v11831_v12  ;;  %v1367_v27 = vmul.f32 %v11836_v16, %v11836_v16  ;;  %v1904_v26 = vsel %vm214_vm0, %v1366_v61, 0.0  ;;  %v1370_v16 = vmul.f32 %v11853_v59, %v11853_v59  ;;  %v8669_v61 = vld [vmem:[%s15528_s0 + $0x588] sm:$0xff] }
 0x2dc   :  { %v11846_v20 = vpop.xlane.xlu1 %1689  ;;  %v11848_v14 = vpop.xlane.xlu0 %1686  ;;  %16147 = vst [vmem:[#allocation254_spill] sm:$0xff] %v11858_v37 }
 0x2dd   :  { %16144 = vst [vmem:[#allocation5_spill] sm:$0xff] %v11846_v20  ;;  %16145 = vst [vmem:[#allocation6_spill] sm:$0xff] %v11848_v14  ;;  %v979_v14 = vmul.f32 0.020408163, %v16149_v33  ;;  %v1910_v41 = vsel %vm214_vm0, %v1368_v3, 0.0  ;;  %v1907_v12 = vsel %vm214_vm0, %v1367_v27, 0.0  ;;  %v1369_v33 = vmul.f32 %v11858_v37, %v11858_v37 }
 0x2de   :  { %v16154_v3 = vld [vmem:[#allocation9_spill] sm:$0xff]  ;;  %v1916_v0 = vsel %vm214_vm0, %v1370_v16, 0.0 }
 0x2df   :  { %1905 = vadd.xlane.f32.xlu1 %v1904_v26  ;;  %1902 = vadd.xlane.f32.xlu0 %v1901_v48  ;;  %v11881_v26 = vsub.f32 %v8669_v61, %v980_v50  ;;  %v11886_v52 = vsub.f32 %v8670_v21, %v979_v14  ;;  %v982_v27 = vmul.f32 0.020408163, %v16154_v3  ;;  %v16155_v48 = vld [vmem:[#allocation10_spill] sm:$0xff]  ;;  %v16159_v50 = vld [vmem:[#allocation137_spill] sm:$0xff]  ;;  %v1913_v39 = vsel %vm214_vm0, %v1369_v33, 0.0 }
 0x2e0   :  { %v11868_v10 = vpop.xlane.xlu1 %1695  ;;  %v11870_v23 = vpop.xlane.xlu0 %1692  ;;  %v983_v61 = vmul.f32 0.020408163, %v16159_v50  ;;  %v8671_v14 = vld [vmem:[%s15528_s0 + $0x598] sm:$0xff] }
 0x2e1   :  { %16150 = vst [vmem:[#allocation7_spill] sm:$0xff] %v11868_v10  ;;  %16151 = vst [vmem:[#allocation8_spill] sm:$0xff] %v11870_v23  ;;  %v981_v23 = vmul.f32 0.020408163, %v16155_v48  ;;  %v16158_v10 = vld [vmem:[#allocation136_spill] sm:$0xff]  ;;  %v11901_v21 = vsub.f32 %v8671_v14, %v982_v27  ;;  %v1371_v16 = vmul.f32 %v11886_v52, %v11886_v52  ;;  %v8673_v27 = vld [vmem:[%s15528_s0 + $0x5a8] sm:$0xff] }
 0x2e2   :  { %16152 = vst [vmem:[#allocation255_spill] sm:$0xff] %v11881_v26  ;;  %16153 = vst [vmem:[#allocation256_spill] sm:$0xff] %v11886_v52  ;;  %v984_v20 = vmul.f32 0.020408163, %v16158_v10  ;;  %v1372_v10 = vmul.f32 %v11881_v26, %v11881_v26  ;;  %v16166_v14 = vld [vmem:[#allocation13_spill] sm:$0xff] }
 0x2e3   :  { %1911 = vadd.xlane.f32.xlu1 %v1910_v41  ;;  %1908 = vadd.xlane.f32.xlu0 %v1907_v12  ;;  %16160 = vst [vmem:[#allocation136_spill] sm:$0xff] %v11901_v21  ;;  %v8672_v12 = vld [vmem:[%s15528_s0 + $0x590] sm:$0xff]  ;;  %v1919_v52 = vsel %vm214_vm0, %v1371_v16, 0.0 }
 0x2e4   :  { %v11890_v59 = vpop.xlane.xlu1 %1701  ;;  %v11892_v37 = vpop.xlane.xlu0 %1698  ;;  %v11906_v41 = vsub.f32 %v8672_v12, %v981_v23  ;;  %v11919_v48 = vsub.f32 %v8673_v27, %v984_v20  ;;  %v8674_v23 = vld [vmem:[%s15528_s0 + $0x5a0] sm:$0xff]  ;;  %v986_v12 = vmul.f32 0.020408163, %v16166_v14  ;;  %v1922_v26 = vsel %vm214_vm0, %v1372_v10, 0.0  ;;  %v8676_v10 = vld [vmem:[%s15528_s0 + $0x5b0] sm:$0xff] }
 0x2e5   :  { %16156 = vst [vmem:[#allocation9_spill] sm:$0xff] %v11890_v59  ;;  %16157 = vst [vmem:[#allocation10_spill] sm:$0xff] %v11892_v37  ;;  %v11924_v50 = vsub.f32 %v8674_v23, %v983_v61  ;;  %v8675_v23 = vld [vmem:[%s15528_s0 + $0x5b8] sm:$0xff] }
 0x2e6   :  { %16161 = vst [vmem:[#allocation137_spill] sm:$0xff] %v11906_v41  ;;  %16164 = vst [vmem:[#allocation259_spill] sm:$0xff] %v11919_v48  ;;  %v1373_v20 = vmul.f32 %v11906_v41, %v11906_v41  ;;  %v11941_v14 = vsub.f32 %v8675_v23, %v986_v12  ;;  %v16173_v41 = vld [vmem:[#allocation16_spill] sm:$0xff] }
 0x2e7   :  { %1917 = vadd.xlane.f32.xlu1 %v1916_v0  ;;  %1914 = vadd.xlane.f32.xlu0 %v1913_v39  ;;  %16165 = vst [vmem:[#allocation260_spill] sm:$0xff] %v11924_v50  ;;  %v16167_v0 = vld [vmem:[#allocation14_spill] sm:$0xff] }
 0x2e8   :  { %v11912_v33 = vpop.xlane.xlu1 %1707  ;;  %v11914_v3 = vpop.xlane.xlu0 %1704  ;;  %v985_v39 = vmul.f32 0.020408163, %v16167_v0  ;;  %16170 = vst [vmem:[#allocation261_spill] sm:$0xff] %v11941_v14  ;;  %v16172_v0 = vld [vmem:[#allocation15_spill] sm:$0xff]  ;;  %v1925_v12 = vsel %vm214_vm0, %v1373_v20, 0.0  ;;  %v8678_v20 = vld [vmem:[%s15528_s0 + $0x5c0] sm:$0xff] }
 0x2e9   :  { %16162 = vst [vmem:[#allocation257_spill] sm:$0xff] %v11912_v33  ;;  %16163 = vst [vmem:[#allocation258_spill] sm:$0xff] %v11914_v3  ;;  %v1374_v3 = vmul.f32 %v11901_v21, %v11901_v21  ;;  %v988_v21 = vmul.f32 0.020408163, %v16172_v0 }
 0x2ea   :  { %v11946_v16 = vsub.f32 %v8676_v10, %v985_v39 }
 0x2eb   :  { %1923 = vadd.xlane.f32.xlu1 %v1922_v26  ;;  %1920 = vadd.xlane.f32.xlu0 %v1919_v52  ;;  %v1376_v26 = vmul.f32 %v11919_v48, %v11919_v48  ;;  %v1375_v52 = vmul.f32 %v11924_v50, %v11924_v50  ;;  %v1928_v37 = vsel %vm214_vm0, %v1374_v3, 0.0  ;;  %v1378_v50 = vmul.f32 %v11941_v14, %v11941_v14  ;;  %v8677_v3 = vld [vmem:[%s15528_s0 + $0x5c8] sm:$0xff] }
 0x2ec   :  { %v11934_v27 = vpop.xlane.xlu1 %1713  ;;  %v11936_v61 = vpop.xlane.xlu0 %1710  ;;  %16171 = vst [vmem:[#allocation262_spill] sm:$0xff] %v11946_v16 }
 0x2ed   :  { %16168 = vst [vmem:[#allocation13_spill] sm:$0xff] %v11934_v27  ;;  %16169 = vst [vmem:[#allocation14_spill] sm:$0xff] %v11936_v61  ;;  %v987_v61 = vmul.f32 0.020408163, %v16173_v41  ;;  %v1934_v10 = vsel %vm214_vm0, %v1376_v26, 0.0  ;;  %v1931_v48 = vsel %vm214_vm0, %v1375_v52, 0.0  ;;  %v1377_v41 = vmul.f32 %v11946_v16, %v11946_v16 }
 0x2ee   :  { %v16178_v26 = vld [vmem:[#allocation17_spill] sm:$0xff]  ;;  %v1940_v33 = vsel %vm214_vm0, %v1378_v50, 0.0 }
 0x2ef   :  { %1929 = vadd.xlane.f32.xlu1 %v1928_v37  ;;  %1926 = vadd.xlane.f32.xlu0 %v1925_v12  ;;  %v11969_v37 = vsub.f32 %v8677_v3, %v988_v21  ;;  %v11974_v0 = vsub.f32 %v8678_v20, %v987_v61  ;;  %v990_v52 = vmul.f32 0.020408163, %v16178_v26  ;;  %v16179_v12 = vld [vmem:[#allocation18_spill] sm:$0xff]  ;;  %v16183_v21 = vld [vmem:[#allocation145_spill] sm:$0xff]  ;;  %v1937_v59 = vsel %vm214_vm0, %v1377_v41, 0.0 }
 0x2f0   :  { %v11956_v23 = vpop.xlane.xlu1 %1719  ;;  %v11958_v39 = vpop.xlane.xlu0 %1716  ;;  %v991_v3 = vmul.f32 0.020408163, %v16183_v21  ;;  %v8679_v61 = vld [vmem:[%s15528_s0 + $0x5d8] sm:$0xff] }
 0x2f1   :  { %16174 = vst [vmem:[#allocation15_spill] sm:$0xff] %v11956_v23  ;;  %16175 = vst [vmem:[#allocation16_spill] sm:$0xff] %v11958_v39  ;;  %v989_v39 = vmul.f32 0.020408163, %v16179_v12  ;;  %v16182_v23 = vld [vmem:[#allocation144_spill] sm:$0xff]  ;;  %v11989_v20 = vsub.f32 %v8679_v61, %v990_v52  ;;  %v1379_v50 = vmul.f32 %v11974_v0, %v11974_v0  ;;  %v8681_v52 = vld [vmem:[%s15528_s0 + $0x5e8] sm:$0xff] }
 0x2f2   :  { %16176 = vst [vmem:[#allocation263_spill] sm:$0xff] %v11969_v37  ;;  %16177 = vst [vmem:[#allocation264_spill] sm:$0xff] %v11974_v0  ;;  %v992_v27 = vmul.f32 0.020408163, %v16182_v23  ;;  %v1380_v23 = vmul.f32 %v11969_v37, %v11969_v37  ;;  %v16190_v61 = vld [vmem:[#allocation21_spill] sm:$0xff] }
 0x2f3   :  { %1935 = vadd.xlane.f32.xlu1 %v1934_v10  ;;  %1932 = vadd.xlane.f32.xlu0 %v1931_v48  ;;  %16184 = vst [vmem:[#allocation144_spill] sm:$0xff] %v11989_v20  ;;  %v8680_v48 = vld [vmem:[%s15528_s0 + $0x5d0] sm:$0xff]  ;;  %v1943_v0 = vsel %vm214_vm0, %v1379_v50, 0.0 }
 0x2f4   :  { %v11978_v14 = vpop.xlane.xlu1 %1725  ;;  %v11980_v16 = vpop.xlane.xlu0 %1722  ;;  %v11994_v10 = vsub.f32 %v8680_v48, %v989_v39  ;;  %v12007_v12 = vsub.f32 %v8681_v52, %v992_v27  ;;  %v8682_v39 = vld [vmem:[%s15528_s0 + $0x5e0] sm:$0xff]  ;;  %v994_v48 = vmul.f32 0.020408163, %v16190_v61  ;;  %v1946_v37 = vsel %vm214_vm0, %v1380_v23, 0.0  ;;  %v8684_v23 = vld [vmem:[%s15528_s0 + $0x5f0] sm:$0xff] }
 0x2f5   :  { %16180 = vst [vmem:[#allocation17_spill] sm:$0xff] %v11978_v14  ;;  %16181 = vst [vmem:[#allocation18_spill] sm:$0xff] %v11980_v16  ;;  %v12012_v21 = vsub.f32 %v8682_v39, %v991_v3  ;;  %v8683_v39 = vld [vmem:[%s15528_s0 + $0x5f8] sm:$0xff] }
 0x2f6   :  { %16185 = vst [vmem:[#allocation145_spill] sm:$0xff] %v11994_v10  ;;  %16188 = vst [vmem:[#allocation267_spill] sm:$0xff] %v12007_v12  ;;  %v1381_v27 = vmul.f32 %v11994_v10, %v11994_v10  ;;  %v12029_v61 = vsub.f32 %v8683_v39, %v994_v48  ;;  %v16197_v10 = vld [vmem:[#allocation24_spill] sm:$0xff] }
 0x2f7   :  { %1941 = vadd.xlane.f32.xlu1 %v1940_v33  ;;  %1938 = vadd.xlane.f32.xlu0 %v1937_v59  ;;  %16189 = vst [vmem:[#allocation268_spill] sm:$0xff] %v12012_v21  ;;  %v16191_v33 = vld [vmem:[#allocation22_spill] sm:$0xff] }
 0x2f8   :  { %v12000_v41 = vpop.xlane.xlu1 %1731  ;;  %v12002_v26 = vpop.xlane.xlu0 %1728  ;;  %v993_v59 = vmul.f32 0.020408163, %v16191_v33  ;;  %16194 = vst [vmem:[#allocation269_spill] sm:$0xff] %v12029_v61  ;;  %v16196_v33 = vld [vmem:[#allocation23_spill] sm:$0xff]  ;;  %v1949_v48 = vsel %vm214_vm0, %v1381_v27, 0.0  ;;  %v8686_v27 = vld [vmem:[%s15528_s0 + $0x600] sm:$0xff] }
 0x2f9   :  { %16186 = vst [vmem:[#allocation265_spill] sm:$0xff] %v12000_v41  ;;  %16187 = vst [vmem:[#allocation266_spill] sm:$0xff] %v12002_v26  ;;  %v1382_v26 = vmul.f32 %v11989_v20, %v11989_v20  ;;  %v996_v20 = vmul.f32 0.020408163, %v16196_v33 }
 0x2fa   :  { %v12034_v50 = vsub.f32 %v8684_v23, %v993_v59 }
 0x2fb   :  { %1947 = vadd.xlane.f32.xlu1 %v1946_v37  ;;  %1944 = vadd.xlane.f32.xlu0 %v1943_v0  ;;  %v1384_v37 = vmul.f32 %v12007_v12, %v12007_v12  ;;  %v1383_v0 = vmul.f32 %v12012_v21, %v12012_v21  ;;  %v1952_v16 = vsel %vm214_vm0, %v1382_v26, 0.0  ;;  %v1386_v21 = vmul.f32 %v12029_v61, %v12029_v61  ;;  %v8685_v26 = vld [vmem:[%s15528_s0 + $0x608] sm:$0xff] }
 0x2fc   :  { %v12022_v52 = vpop.xlane.xlu1 %1737  ;;  %v12024_v3 = vpop.xlane.xlu0 %1734  ;;  %16195 = vst [vmem:[#allocation270_spill] sm:$0xff] %v12034_v50 }
 0x2fd   :  { %16192 = vst [vmem:[#allocation21_spill] sm:$0xff] %v12022_v52  ;;  %16193 = vst [vmem:[#allocation22_spill] sm:$0xff] %v12024_v3  ;;  %v995_v3 = vmul.f32 0.020408163, %v16197_v10  ;;  %v1958_v23 = vsel %vm214_vm0, %v1384_v37, 0.0  ;;  %v1955_v12 = vsel %vm214_vm0, %v1383_v0, 0.0  ;;  %v1385_v10 = vmul.f32 %v12034_v50, %v12034_v50 }
 0x2fe   :  { %v16202_v37 = vld [vmem:[#allocation25_spill] sm:$0xff] }
 0x2ff   :  { %1953 = vadd.xlane.f32.xlu1 %v1952_v16  ;;  %1950 = vadd.xlane.f32.xlu0 %v1949_v48  ;;  %v12057_v16 = vsub.f32 %v8685_v26, %v996_v20  ;;  %v12062_v33 = vsub.f32 %v8686_v27, %v995_v3  ;;  %v998_v0 = vmul.f32 0.020408163, %v16202_v37  ;;  %v16203_v48 = vld [vmem:[#allocation26_spill] sm:$0xff]  ;;  %v1961_v20 = vsel %vm214_vm0, %v1385_v10, 0.0  ;;  %v8687_v26 = vld [vmem:[%s15528_s0 + $0x618] sm:$0xff]  ;;  %v8688_v27 = vld [vmem:[%s15528_s0 + $0x610] sm:$0xff] }
 0x300   :  { %v12044_v39 = vpop.xlane.xlu1 %1743  ;;  %v12046_v59 = vpop.xlane.xlu0 %1740 }
 0x301   :  { %16198 = vst [vmem:[#allocation23_spill] sm:$0xff] %v12044_v39  ;;  %16199 = vst [vmem:[#allocation24_spill] sm:$0xff] %v12046_v59  ;;  %v997_v59 = vmul.f32 0.020408163, %v16203_v48  ;;  %v1964_v39 = vsel %vm214_vm0, %v1386_v21, 0.0  ;;  %v12075_v3 = vsub.f32 %v8687_v26, %v998_v0  ;;  %v1387_v21 = vmul.f32 %v12062_v33, %v12062_v33  ;;  %v16210_v0 = vld [vmem:[#allocation152_spill] sm:$0xff] }
 0x302   :  { %16200 = vst [vmem:[#allocation271_spill] sm:$0xff] %v12057_v16  ;;  %16201 = vst [vmem:[#allocation272_spill] sm:$0xff] %v12062_v33  ;;  %v1980_v48 = vmul.f32 0.020408163, %v16210_v0  ;;  %v16213_v33 = vld [vmem:[#allocation30_spill] sm:$0xff]  ;;  %v16214_v0 = vld [vmem:[#allocation153_spill] sm:$0xff] }
 0x303   :  { %1959 = vadd.xlane.f32.xlu1 %v1958_v23  ;;  %1956 = vadd.xlane.f32.xlu0 %v1955_v12  ;;  %16206 = vst [vmem:[#allocation273_spill] sm:$0xff] %v12075_v3  ;;  %v12080_v23 = vsub.f32 %v8688_v27, %v997_v59  ;;  %v1388_v12 = vmul.f32 %v12057_v16, %v12057_v16 }
 0x304   :  { %v12066_v61 = vpop.xlane.xlu1 %1749  ;;  %v12068_v50 = vpop.xlane.xlu0 %1746  ;;  %v1390_v59 = vmul.f32 %v12075_v3, %v12075_v3  ;;  %v2372_v16 = vadd.f32 1e-05, %v1980_v48  ;;  %v16218_v48 = vld [vmem:[#allocation160_spill] sm:$0xff] }
 0x305   :  { %16204 = vst [vmem:[#allocation25_spill] sm:$0xff] %v12066_v61  ;;  %16205 = vst [vmem:[#allocation26_spill] sm:$0xff] %v12068_v50  ;;  %v1970_v26 = vsel %vm214_vm0, %v1388_v12, 0.0  ;;  %v1967_v50 = vsel %vm214_vm0, %v1387_v21, 0.0  ;;  %v1389_v27 = vmul.f32 %v12080_v23, %v12080_v23  ;;  %v1988_v61 = vmul.f32 0.020408163, %v16218_v48 }
 0x306   :  { %16207 = vst [vmem:[#allocation274_spill] sm:$0xff] %v12080_v23  ;;  %v1976_v12 = vsel %vm214_vm0, %v1390_v59, 0.0  ;;  %8069 = vrsqrt.f32 %v2372_v16 }
 0x307   :  { %1965 = vadd.xlane.f32.xlu1 %v1964_v39  ;;  %1962 = vadd.xlane.f32.xlu0 %v1961_v20  ;;  %v1973_v21 = vsel %vm214_vm0, %v1389_v27, 0.0  ;;  %v16221_v27 = vld [vmem:[#allocation32_spill] sm:$0xff] }
 0x308   :  { %v12086_v10 = vpop.xlane.xlu1 %1755  ;;  %v12088_v37 = vpop.xlane.xlu0 %1752 }
 0x309   :  { %16208 = vst [vmem:[#allocation275_spill] sm:$0xff] %v12086_v10  ;;  %16209 = vst [vmem:[#allocation276_spill] sm:$0xff] %v12088_v37  ;;  %v1981_v37 = vmul.f32 0.020408163, %v16213_v33  ;;  %v1979_v10 = vmul.f32 0.020408163, %v16214_v0 }
 0x30b   :  { %1971 = vadd.xlane.f32.xlu1 %v1970_v26  ;;  %1968 = vadd.xlane.f32.xlu0 %v1967_v50  ;;  %v16217_v50 = vld [vmem:[#allocation29_spill] sm:$0xff] }
 0x30c   :  { %v12097_v39 = vpop.xlane.xlu1 %1761  ;;  %v12099_v20 = vpop.xlane.xlu0 %1758  ;;  %v1982_v26 = vmul.f32 0.020408163, %v16217_v50 }
 0x30d   :  { %16211 = vst [vmem:[#allocation152_spill] sm:$0xff] %v12097_v39  ;;  %16212 = vst [vmem:[#allocation277_spill] sm:$0xff] %v12099_v20  ;;  %v2373_v39 = vadd.f32 1e-05, %v1981_v37  ;;  %v2371_v20 = vadd.f32 1e-05, %v1979_v10 }
 0x30e   :  { %v2374_v59 = vadd.f32 1e-05, %v1982_v26  ;;  %v16225_v10 = vld [vmem:[#allocation31_spill] sm:$0xff] }
 0x30f   :  { %1977 = vadd.xlane.f32.xlu1 %v1976_v12  ;;  %1974 = vadd.xlane.f32.xlu0 %v1973_v21  ;;  %8071 = vrsqrt.f32 %v2373_v39  ;;  %v1983_v12 = vmul.f32 0.020408163, %v16221_v27  ;;  %v2380_v21 = vadd.f32 1e-05, %v1988_v61  ;;  %v1984_v37 = vmul.f32 0.020408163, %v16225_v10 }
 0x310   :  { %v12105_v3 = vpop.xlane.xlu1 %1767  ;;  %v12107_v23 = vpop.xlane.xlu0 %1764  ;;  %8073 = vrsqrt.f32 %v2371_v20  ;;  %v2176_v39 = vld [vmem:[%s15529_s2 + $0x8] sm:$0xff]  ;;  %v16229_v27 = vld [vmem:[#allocation34_spill] sm:$0xff] }
 0x311   :  { %16215 = vst [vmem:[#allocation30_spill] sm:$0xff] %v12105_v3  ;;  %16216 = vst [vmem:[#allocation153_spill] sm:$0xff] %v12107_v23  ;;  %v16222_v3 = vld [vmem:[#allocation37_spill] sm:$0xff]  ;;  %8075 = vrsqrt.f32 %v2374_v59  ;;  %v2375_v50 = vadd.f32 1e-05, %v1983_v12  ;;  %v8070_v26 = vpop.eup %8069 }
 0x312   :  { %v1990_v52 = vmul.f32 0.020408163, %v16222_v3  ;;  %8077 = vrsqrt.f32 %v2380_v21  ;;  %v2376_v20 = vadd.f32 1e-05, %v1984_v37  ;;  %v1985_v59 = vmul.f32 0.020408163, %v16229_v27 }
 0x313   :  { %8079 = vrsqrt.f32 %v2375_v50  ;;  %v16230_v12 = vld [vmem:[#allocation41_spill] sm:$0xff]  ;;  %v2175_v37 = vld [vmem:[%s15529_s2] sm:$0xff] }
 0x314   :  { %v12111_v33 = vpop.xlane.xlu1 %1773  ;;  %v12113_v0 = vpop.xlane.xlu0 %1770  ;;  %v2382_v48 = vadd.f32 1e-05, %v1990_v52  ;;  %v1994_v21 = vmul.f32 0.020408163, %v16230_v12  ;;  %v2764_v52 = vmul.f32 %v8070_v26, %v2176_v39  ;;  %v16234_v39 = vld [vmem:[#allocation168_spill] sm:$0xff] }
 0x315   :  { %16219 = vst [vmem:[#allocation29_spill] sm:$0xff] %v12111_v33  ;;  %16220 = vst [vmem:[#allocation160_spill] sm:$0xff] %v12113_v0  ;;  %v16226_v33 = vld [vmem:[#allocation39_spill] sm:$0xff]  ;;  %v1996_v27 = vmul.f32 0.020408163, %v16234_v39 }
 0x316   :  { %v1992_v0 = vmul.f32 0.020408163, %v16226_v33  ;;  %8081 = vrsqrt.f32 %v2382_v48  ;;  %v2177_v33 = vld [vmem:[%s15529_s2 + $0x10] sm:$0xff]  ;;  %v2377_v48 = vadd.f32 1e-05, %v1985_v59 }
 0x317   :  { %8083 = vrsqrt.f32 %v2376_v20  ;;  %v2386_v26 = vadd.f32 1e-05, %v1994_v21  ;;  %v2184_v20 = vld [vmem:[%s15529_s2 + $0x48] sm:$0xff]  ;;  %v16238_v21 = vld [vmem:[#allocation45_spill] sm:$0xff] }
 0x318   :  { %v12117_v23 = vpop.xlane.xlu1 %1779  ;;  %v12119_v16 = vpop.xlane.xlu0 %1776  ;;  %v2384_v10 = vadd.f32 1e-05, %v1992_v0  ;;  %v16233_v0 = vld [vmem:[#allocation33_spill] sm:$0xff] }
 0x319   :  { %16223 = vst [vmem:[#allocation32_spill] sm:$0xff] %v12117_v23  ;;  %16224 = vst [vmem:[#allocation37_spill] sm:$0xff] %v12119_v16  ;;  %v8072_v16 = vpop.eup %8071  ;;  %v1986_v50 = vmul.f32 0.020408163, %v16233_v0 }
 0x31a   :  { %v8074_v23 = vpop.eup %8073  ;;  %8085 = vrsqrt.f32 %v2384_v10  ;;  %v2765_v12 = vmul.f32 %v8072_v16, %v2177_v33  ;;  %v16237_v10 = vld [vmem:[#allocation161_spill] sm:$0xff]  ;;  %v1998_v33 = vmul.f32 0.020408163, %v16238_v21 }
 0x31b   :  { %v2763_v14 = vmul.f32 %v8074_v23, %v2175_v37  ;;  %v2378_v59 = vadd.f32 1e-05, %v1986_v50  ;;  %8087 = vrsqrt.f32 %v2377_v48  ;;  %v1987_v16 = vmul.f32 0.020408163, %v16237_v10 }
 0x31c   :  { %v12126_v61 = vpop.xlane.xlu1 %1785  ;;  %v12128_v3 = vpop.xlane.xlu0 %1782  ;;  %8089 = vrsqrt.f32 %v2386_v26  ;;  %v2388_v23 = vadd.f32 1e-05, %v1996_v27  ;;  %v16241_v26 = vld [vmem:[#allocation38_spill] sm:$0xff]  ;;  %v16242_v27 = vld [vmem:[#allocation47_spill] sm:$0xff] }
 0x31d   :  { %16227 = vst [vmem:[#allocation31_spill] sm:$0xff] %v12126_v61  ;;  %16228 = vst [vmem:[#allocation39_spill] sm:$0xff] %v12128_v3  ;;  %v8076_v3 = vpop.eup %8075  ;;  %8091 = vrsqrt.f32 %v2378_v59  ;;  %v2379_v48 = vadd.f32 1e-05, %v1987_v16  ;;  %v2188_v16 = vld [vmem:[%s15529_s2 + $0x68] sm:$0xff] }
 0x31e   :  { %8093 = vrsqrt.f32 %v2388_v23 }
 0x31f   :  { %8095 = vrsqrt.f32 %v2379_v48 }
 0x320   :  { %2966 = vperm.xlu1 %7910, %v2764_v52   ;;  %v12135_v41 = vpop.xlane.xlu1 %1791  ;;  %v12137_v61 = vpop.xlane.xlu0 %1788  ;;  %v2178_v52 = vld [vmem:[%s15529_s2 + $0x18] sm:$0xff] }
 0x321   :  { %16231 = vst [vmem:[#allocation34_spill] sm:$0xff] %v12135_v41  ;;  %16232 = vst [vmem:[#allocation41_spill] sm:$0xff] %v12137_v61  ;;  %v8078_v61 = vpop.eup %8077  ;;  %v2766_v37 = vmul.f32 %v8076_v3, %v2178_v52  ;;  %v1989_v3 = vmul.f32 0.020408163, %v16241_v26  ;;  %v2000_v52 = vmul.f32 0.020408163, %v16242_v27 }
 0x322   :  { %v8080_v0 = vpop.eup %8079  ;;  %v2772_v39 = vmul.f32 %v8078_v61, %v2184_v20  ;;  %v2390_v61 = vadd.f32 1e-05, %v1998_v33  ;;  %v16245_v33 = vld [vmem:[#allocation40_spill] sm:$0xff] }
 0x323   :  { %v2381_v23 = vadd.f32 1e-05, %v1989_v3  ;;  %v2190_v3 = vld [vmem:[%s15529_s2 + $0x78] sm:$0xff] }
 0x324   :  { %v12147_v41 = vpop.xlane.xlu1 %1797  ;;  %2971 = vperm.xlu1 %7910, %v2765_v12   ;;  %v12149_v38 = vpop.xlane.xlu0 %1794  ;;  %v2179_v12 = vld [vmem:[%s15529_s2 + $0x20] sm:$0xff]  ;;  %8097 = vrsqrt.f32 %v2390_v61 }
 0x325   :  { %16235 = vst [vmem:[#allocation33_spill] sm:$0xff] %v12147_v41  ;;  %16236 = vst [vmem:[#allocation168_spill] sm:$0xff] %v12149_v38  ;;  %2961 = vperm.xlu0 %7909, %v2763_v14   ;;  %v8082_v38 = vpop.eup %8081  ;;  %v2186_v14 = vld [vmem:[%s15529_s2 + $0x58] sm:$0xff]  ;;  %v2767_v20 = vmul.f32 %v8080_v0, %v2179_v12  ;;  %v1991_v0 = vmul.f32 0.020408163, %v16245_v33  ;;  %8099 = vrsqrt.f32 %v2381_v23 }
 0x326   :  { %v8084_v10 = vpop.eup %8083  ;;  %v2774_v21 = vmul.f32 %v8082_v38, %v2186_v14  ;;  %v2392_v38 = vadd.f32 1e-05, %v2000_v52  ;;  %v16249_v52 = vld [vmem:[#allocation42_spill] sm:$0xff] }
 0x327   :  { %v2383_v61 = vadd.f32 1e-05, %v1991_v0  ;;  %v2192_v0 = vld [vmem:[%s15529_s2 + $0x88] sm:$0xff] }
 0x328   :  { %v12159_v41 = vpop.xlane.xlu1 %1803  ;;  %2976 = vperm.xlu1 %7910, %v2766_v37   ;;  %v12161_v50 = vpop.xlane.xlu0 %1800  ;;  %v2180_v37 = vld [vmem:[%s15529_s2 + $0x28] sm:$0xff]  ;;  %8101 = vrsqrt.f32 %v2392_v38 }
 0x329   :  { %16239 = vst [vmem:[#allocation161_spill] sm:$0xff] %v12159_v41  ;;  %16240 = vst [vmem:[#allocation45_spill] sm:$0xff] %v12161_v50  ;;  %3006 = vperm.xlu0 %7909, %v2772_v39   ;;  %v8086_v50 = vpop.eup %8085  ;;  %v16246_v39 = vld [vmem:[#allocation49_spill] sm:$0xff]  ;;  %v2768_v14 = vmul.f32 %v8084_v10, %v2180_v37  ;;  %v1993_v10 = vmul.f32 0.020408163, %v16249_v52  ;;  %8103 = vrsqrt.f32 %v2383_v61 }
 0x32a   :  { %v2002_v12 = vmul.f32 0.020408163, %v16246_v39  ;;  %v8088_v26 = vpop.eup %8087  ;;  %v2776_v27 = vmul.f32 %v8086_v50, %v2188_v16 }
 0x32b   :  { %v2385_v38 = vadd.f32 1e-05, %v1993_v10  ;;  %v2194_v10 = vld [vmem:[%s15529_s2 + $0x98] sm:$0xff] }
 0x32c   :  { %v12171_v41 = vpop.xlane.xlu1 %1809  ;;  %2981 = vperm.xlu1 %7910, %v2767_v20   ;;  %v12173_v59 = vpop.xlane.xlu0 %1806  ;;  %v2181_v20 = vld [vmem:[%s15529_s2 + $0x30] sm:$0xff]  ;;  %v2394_v50 = vadd.f32 1e-05, %v2002_v12  ;;  %v16253_v12 = vld [vmem:[#allocation169_spill] sm:$0xff] }
 0x32d   :  { %16243 = vst [vmem:[#allocation38_spill] sm:$0xff] %v12171_v41  ;;  %16244 = vst [vmem:[#allocation47_spill] sm:$0xff] %v12173_v59  ;;  %3016 = vperm.xlu0 %7909, %v2774_v21   ;;  %v8090_v59 = vpop.eup %8089  ;;  %v16250_v21 = vld [vmem:[#allocation176_spill] sm:$0xff]  ;;  %v2769_v16 = vmul.f32 %v8088_v26, %v2181_v20  ;;  %v1995_v26 = vmul.f32 0.020408163, %v16253_v12 }
 0x32e   :  { %v2004_v37 = vmul.f32 0.020408163, %v16250_v21  ;;  %v8092_v33 = vpop.eup %8091  ;;  %v2778_v39 = vmul.f32 %v8090_v59, %v2190_v3  ;;  %8105 = vrsqrt.f32 %v2394_v50 }
 0x32f   :  { %8107 = vrsqrt.f32 %v2385_v38  ;;  %v2387_v50 = vadd.f32 1e-05, %v1995_v26  ;;  %v2196_v26 = vld [vmem:[%s15529_s2 + $0xa8] sm:$0xff] }
 0x330   :  { %v12183_v41 = vpop.xlane.xlu1 %1815  ;;  %2986 = vperm.xlu1 %7910, %v2768_v14   ;;  %v12185_v48 = vpop.xlane.xlu0 %1812  ;;  %v2182_v14 = vld [vmem:[%s15529_s2 + $0x38] sm:$0xff]  ;;  %v2396_v59 = vadd.f32 1e-05, %v2004_v37  ;;  %v16257_v37 = vld [vmem:[#allocation46_spill] sm:$0xff] }
 0x331   :  { %16247 = vst [vmem:[#allocation40_spill] sm:$0xff] %v12183_v41  ;;  %16248 = vst [vmem:[#allocation49_spill] sm:$0xff] %v12185_v48  ;;  %3026 = vperm.xlu0 %7909, %v2776_v27   ;;  %v8094_v48 = vpop.eup %8093  ;;  %v16254_v27 = vld [vmem:[#allocation53_spill] sm:$0xff]  ;;  %v2770_v3 = vmul.f32 %v8092_v33, %v2182_v14  ;;  %v1997_v33 = vmul.f32 0.020408163, %v16257_v37 }
 0x332   :  { %v2006_v20 = vmul.f32 0.020408163, %v16254_v27  ;;  %v8096_v52 = vpop.eup %8095  ;;  %v2780_v21 = vmul.f32 %v8094_v48, %v2192_v0  ;;  %8109 = vrsqrt.f32 %v2396_v59 }
 0x333   :  { %8111 = vrsqrt.f32 %v2387_v50  ;;  %v2389_v59 = vadd.f32 1e-05, %v1997_v33  ;;  %v2198_v33 = vld [vmem:[%s15529_s2 + $0xb8] sm:$0xff] }
 0x334   :  { %v12195_v41 = vpop.xlane.xlu1 %1821  ;;  %2991 = vperm.xlu1 %7910, %v2769_v16   ;;  %v12197_v23 = vpop.xlane.xlu0 %1818  ;;  %v2183_v16 = vld [vmem:[%s15529_s2 + $0x40] sm:$0xff]  ;;  %v2398_v48 = vadd.f32 1e-05, %v2006_v20  ;;  %v16261_v20 = vld [vmem:[#allocation48_spill] sm:$0xff] }
 0x335   :  { %16251 = vst [vmem:[#allocation42_spill] sm:$0xff] %v12195_v41  ;;  %16252 = vst [vmem:[#allocation176_spill] sm:$0xff] %v12197_v23  ;;  %3036 = vperm.xlu0 %7909, %v2778_v39   ;;  %v8098_v23 = vpop.eup %8097  ;;  %v16258_v39 = vld [vmem:[#allocation55_spill] sm:$0xff]  ;;  %v2771_v0 = vmul.f32 %v8096_v52, %v2183_v16  ;;  %v1999_v52 = vmul.f32 0.020408163, %v16261_v20 }
 0x336   :  { %v2008_v14 = vmul.f32 0.020408163, %v16258_v39  ;;  %v8100_v12 = vpop.eup %8099  ;;  %v2782_v27 = vmul.f32 %v8098_v23, %v2194_v10  ;;  %8113 = vrsqrt.f32 %v2398_v48 }
 0x337   :  { %8115 = vrsqrt.f32 %v2389_v59  ;;  %v2391_v48 = vadd.f32 1e-05, %v1999_v52  ;;  %v2200_v52 = vld [vmem:[%s15529_s2 + $0xc8] sm:$0xff] }
 0x338   :  { %v12207_v41 = vpop.xlane.xlu1 %1827  ;;  %2996 = vperm.xlu1 %7910, %v2770_v3   ;;  %v12209_v61 = vpop.xlane.xlu0 %1824  ;;  %v2185_v3 = vld [vmem:[%s15529_s2 + $0x50] sm:$0xff]  ;;  %v2400_v23 = vadd.f32 1e-05, %v2008_v14  ;;  %v16265_v14 = vld [vmem:[#allocation50_spill] sm:$0xff] }
 0x339   :  { %16255 = vst [vmem:[#allocation169_spill] sm:$0xff] %v12207_v41  ;;  %16256 = vst [vmem:[#allocation53_spill] sm:$0xff] %v12209_v61  ;;  %3046 = vperm.xlu0 %7909, %v2780_v21   ;;  %v8102_v61 = vpop.eup %8101  ;;  %v16262_v21 = vld [vmem:[#allocation57_spill] sm:$0xff]  ;;  %v2773_v10 = vmul.f32 %v8100_v12, %v2185_v3  ;;  %v2001_v12 = vmul.f32 0.020408163, %v16265_v14 }
 0x33a   :  { %v2010_v16 = vmul.f32 0.020408163, %v16262_v21  ;;  %v8104_v37 = vpop.eup %8103  ;;  %v2784_v39 = vmul.f32 %v8102_v61, %v2196_v26  ;;  %8117 = vrsqrt.f32 %v2400_v23 }
 0x33b   :  { %8119 = vrsqrt.f32 %v2391_v48  ;;  %v2393_v23 = vadd.f32 1e-05, %v2001_v12  ;;  %v2202_v12 = vld [vmem:[%s15529_s2 + $0xd8] sm:$0xff] }
 0x33c   :  { %v12219_v41 = vpop.xlane.xlu1 %1833  ;;  %3001 = vperm.xlu1 %7910, %v2771_v0   ;;  %v12221_v38 = vpop.xlane.xlu0 %1830  ;;  %v2187_v0 = vld [vmem:[%s15529_s2 + $0x60] sm:$0xff]  ;;  %v2402_v61 = vadd.f32 1e-05, %v2010_v16  ;;  %v16269_v16 = vld [vmem:[#allocation177_spill] sm:$0xff] }
 0x33d   :  { %16259 = vst [vmem:[#allocation46_spill] sm:$0xff] %v12219_v41  ;;  %16260 = vst [vmem:[#allocation55_spill] sm:$0xff] %v12221_v38  ;;  %3056 = vperm.xlu0 %7909, %v2782_v27   ;;  %v8106_v38 = vpop.eup %8105  ;;  %v16266_v27 = vld [vmem:[#allocation184_spill] sm:$0xff]  ;;  %v2775_v26 = vmul.f32 %v8104_v37, %v2187_v0  ;;  %v2003_v37 = vmul.f32 0.020408163, %v16269_v16 }
 0x33e   :  { %v2012_v3 = vmul.f32 0.020408163, %v16266_v27  ;;  %v8108_v20 = vpop.eup %8107  ;;  %v2786_v21 = vmul.f32 %v8106_v38, %v2198_v33  ;;  %8121 = vrsqrt.f32 %v2402_v61 }
 0x33f   :  { %8123 = vrsqrt.f32 %v2393_v23  ;;  %v2395_v61 = vadd.f32 1e-05, %v2003_v37  ;;  %v2204_v37 = vld [vmem:[%s15529_s2 + $0xe8] sm:$0xff] }
 0x340   :  { %v12231_v41 = vpop.xlane.xlu1 %1839  ;;  %3011 = vperm.xlu1 %7910, %v2773_v10   ;;  %v12233_v50 = vpop.xlane.xlu0 %1836  ;;  %v2189_v10 = vld [vmem:[%s15529_s2 + $0x70] sm:$0xff]  ;;  %v2404_v38 = vadd.f32 1e-05, %v2012_v3  ;;  %v16273_v3 = vld [vmem:[#allocation54_spill] sm:$0xff] }
 0x341   :  { %16263 = vst [vmem:[#allocation48_spill] sm:$0xff] %v12231_v41  ;;  %16264 = vst [vmem:[#allocation57_spill] sm:$0xff] %v12233_v50  ;;  %3066 = vperm.xlu0 %7909, %v2784_v39   ;;  %v8110_v50 = vpop.eup %8109  ;;  %v16270_v39 = vld [vmem:[#allocation61_spill] sm:$0xff]  ;;  %v2777_v33 = vmul.f32 %v8108_v20, %v2189_v10  ;;  %v2005_v20 = vmul.f32 0.020408163, %v16273_v3 }
 0x342   :  { %v2014_v0 = vmul.f32 0.020408163, %v16270_v39  ;;  %v8112_v14 = vpop.eup %8111  ;;  %v2788_v27 = vmul.f32 %v8110_v50, %v2200_v52  ;;  %8125 = vrsqrt.f32 %v2404_v38 }
 0x343   :  { %8127 = vrsqrt.f32 %v2395_v61  ;;  %v2397_v38 = vadd.f32 1e-05, %v2005_v20  ;;  %v2206_v20 = vld [vmem:[%s15529_s2 + $0xf8] sm:$0xff] }
 0x344   :  { %v12243_v41 = vpop.xlane.xlu1 %1845  ;;  %3021 = vperm.xlu1 %7910, %v2775_v26   ;;  %v12245_v59 = vpop.xlane.xlu0 %1842  ;;  %v2191_v26 = vld [vmem:[%s15529_s2 + $0x80] sm:$0xff]  ;;  %v2406_v50 = vadd.f32 1e-05, %v2014_v0  ;;  %v16276_v0 = vld [vmem:[#allocation56_spill] sm:$0xff] }
 0x345   :  { %16267 = vst [vmem:[#allocation50_spill] sm:$0xff] %v12243_v41  ;;  %16268 = vst [vmem:[#allocation184_spill] sm:$0xff] %v12245_v59  ;;  %3076 = vperm.xlu0 %7909, %v2786_v21   ;;  %v8114_v59 = vpop.eup %8113  ;;  %v16274_v21 = vld [vmem:[#allocation63_spill] sm:$0xff]  ;;  %v2779_v52 = vmul.f32 %v8112_v14, %v2191_v26  ;;  %v2007_v14 = vmul.f32 0.020408163, %v16276_v0  ;;  %v2197_v0 = vld [vmem:[%s15529_s2 + $0xb0] sm:$0xff] }
 0x346   :  { %v2016_v10 = vmul.f32 0.020408163, %v16274_v21  ;;  %v8116_v16 = vpop.eup %8115  ;;  %v2790_v39 = vmul.f32 %v8114_v59, %v2202_v12  ;;  %8129 = vrsqrt.f32 %v2406_v50  ;;  %v2195_v21 = vld [vmem:[%s15529_s2 + $0xa0] sm:$0xff] }
 0x347   :  { %8131 = vrsqrt.f32 %v2397_v38  ;;  %v2399_v50 = vadd.f32 1e-05, %v2007_v14  ;;  %v2208_v14 = vld [vmem:[%s15529_s2 + $0x108] sm:$0xff] }
 0x348   :  { %v12255_v41 = vpop.xlane.xlu1 %1851  ;;  %3031 = vperm.xlu1 %7910, %v2777_v33   ;;  %v12257_v48 = vpop.xlane.xlu0 %1848  ;;  %v2193_v33 = vld [vmem:[%s15529_s2 + $0x90] sm:$0xff]  ;;  %v2408_v59 = vadd.f32 1e-05, %v2016_v10 }
 0x349   :  { %16271 = vst [vmem:[#allocation177_spill] sm:$0xff] %v12255_v41  ;;  %16272 = vst [vmem:[#allocation61_spill] sm:$0xff] %v12257_v48  ;;  %3086 = vperm.xlu0 %7909, %v2788_v27   ;;  %v8118_v48 = vpop.eup %8117  ;;  %v2018_v27 = vmul.f32 0.020408163, %v11184_v1  ;;  %v2781_v26 = vmul.f32 %v8116_v16, %v2193_v33  ;;  %v16278_v1 = vld [vmem:[#allocation58_spill] sm:$0xff] }
 0x34a   :  { %v8120_v12 = vpop.eup %8119  ;;  %v2792_v3 = vmul.f32 %v8118_v48, %v2204_v37  ;;  %v2009_v10 = vmul.f32 0.020408163, %v16278_v1  ;;  %8133 = vrsqrt.f32 %v2408_v59  ;;  %v2020_v16 = vmul.f32 0.020408163, %v11206_v15  ;;  %v16280_v15 = vld [vmem:[#allocation185_spill] sm:$0xff]  ;;  %v2199_v1 = vld [vmem:[%s15529_s2 + $0xc0] sm:$0xff] }
 0x34b   :  { %v2410_v48 = vadd.f32 1e-05, %v2018_v27  ;;  %8135 = vrsqrt.f32 %v2399_v50  ;;  %v2011_v27 = vmul.f32 0.020408163, %v16280_v15  ;;  %v2201_v15 = vld [vmem:[%s15529_s2 + $0xd0] sm:$0xff] }
 0x34c   :  { %v12267_v41 = vpop.xlane.xlu1 %1857  ;;  %3041 = vperm.xlu1 %7910, %v2779_v52   ;;  %v12269_v23 = vpop.xlane.xlu0 %1854  ;;  %v2401_v59 = vadd.f32 1e-05, %v2009_v10  ;;  %v2210_v10 = vld [vmem:[%s15529_s2 + $0x118] sm:$0xff] }
 0x34d   :  { %16275 = vst [vmem:[#allocation54_spill] sm:$0xff] %v12269_v23  ;;  %3096 = vperm.xlu0 %7909, %v2790_v39   ;;  %v8122_v52 = vpop.eup %8121  ;;  %v2783_v39 = vmul.f32 %v8120_v12, %v2195_v21  ;;  %8137 = vrsqrt.f32 %v2410_v48  ;;  %v2412_v12 = vadd.f32 1e-05, %v2020_v16  ;;  %v2403_v48 = vadd.f32 1e-05, %v2011_v27  ;;  %v2212_v27 = vld [vmem:[%s15529_s2 + $0x128] sm:$0xff] }
 0x34e   :  { %v8124_v33 = vpop.eup %8123  ;;  %v2794_v37 = vmul.f32 %v8122_v52, %v2206_v20  ;;  %8139 = vrsqrt.f32 %v2401_v59 }
 0x34f   :  { %v2785_v21 = vmul.f32 %v8124_v33, %v2197_v0  ;;  %8141 = vrsqrt.f32 %v2412_v12 }
 0x350   :  { %v12279_v23 = vpop.xlane.xlu1 %1863  ;;  %3051 = vperm.xlu1 %7910, %v2781_v26   ;;  %v12281_v61 = vpop.xlane.xlu0 %1860  ;;  %8143 = vrsqrt.f32 %v2403_v48 }
 0x351   :  { %16277 = vst [vmem:[#allocation63_spill] sm:$0xff] %v12281_v61  ;;  %3106 = vperm.xlu0 %7909, %v2792_v3   ;;  %v8126_v26 = vpop.eup %8125  ;;  %v2022_v3 = vmul.f32 0.020408163, %v11228_v13  ;;  %v16282_v13 = vld [vmem:[#allocation62_spill] sm:$0xff] }
 0x352   :  { %v8128_v52 = vpop.eup %8127  ;;  %v2796_v20 = vmul.f32 %v8126_v26, %v2208_v14  ;;  %v2013_v16 = vmul.f32 0.020408163, %v16282_v13  ;;  %v2203_v13 = vld [vmem:[%s15529_s2 + $0xe0] sm:$0xff] }
 0x353   :  { %v2414_v33 = vadd.f32 1e-05, %v2022_v3  ;;  %v2787_v0 = vmul.f32 %v8128_v52, %v2199_v1 }
 0x354   :  { %v12291_v61 = vpop.xlane.xlu1 %1869  ;;  %3061 = vperm.xlu1 %7910, %v2783_v39   ;;  %v12293_v38 = vpop.xlane.xlu0 %1866  ;;  %v2405_v12 = vadd.f32 1e-05, %v2013_v16  ;;  %v2214_v16 = vld [vmem:[%s15529_s2 + $0x138] sm:$0xff] }
 0x355   :  { %16279 = vst [vmem:[#allocation56_spill] sm:$0xff] %v12293_v38  ;;  %3116 = vperm.xlu0 %7909, %v2794_v37   ;;  %v8130_v39 = vpop.eup %8129  ;;  %v2024_v37 = vmul.f32 0.020408163, %v11250_v17  ;;  %v16284_v17 = vld [vmem:[#allocation64_spill] sm:$0xff]  ;;  %8145 = vrsqrt.f32 %v2414_v33 }
 0x356   :  { %v8132_v26 = vpop.eup %8131  ;;  %v2798_v14 = vmul.f32 %v8130_v39, %v2210_v10  ;;  %v2015_v3 = vmul.f32 0.020408163, %v16284_v17  ;;  %8147 = vrsqrt.f32 %v2405_v12  ;;  %v2205_v17 = vld [vmem:[%s15529_s2 + $0xf0] sm:$0xff] }
 0x357   :  { %v2416_v52 = vadd.f32 1e-05, %v2024_v37  ;;  %v2789_v1 = vmul.f32 %v8132_v26, %v2201_v15 }
 0x358   :  { %v12303_v38 = vpop.xlane.xlu1 %1875  ;;  %3071 = vperm.xlu1 %7910, %v2785_v21   ;;  %v12305_v50 = vpop.xlane.xlu0 %1872  ;;  %v2407_v33 = vadd.f32 1e-05, %v2015_v3  ;;  %v2216_v3 = vld [vmem:[%s15529_s2 + $0x148] sm:$0xff] }
 0x359   :  { %16281 = vst [vmem:[#allocation58_spill] sm:$0xff] %v12305_v50  ;;  %3126 = vperm.xlu0 %7909, %v2796_v20   ;;  %v8134_v21 = vpop.eup %8133  ;;  %v2026_v20 = vmul.f32 0.020408163, %v11272_v46  ;;  %v16286_v46 = vld [vmem:[#allocation65_spill] sm:$0xff]  ;;  %8149 = vrsqrt.f32 %v2416_v52 }
 0x35a   :  { %v8136_v39 = vpop.eup %8135  ;;  %v2800_v10 = vmul.f32 %v8134_v21, %v2212_v27  ;;  %v2017_v37 = vmul.f32 0.020408163, %v16286_v46  ;;  %8151 = vrsqrt.f32 %v2407_v33  ;;  %v2207_v46 = vld [vmem:[%s15529_s2 + $0x100] sm:$0xff] }
 0x35b   :  { %v2418_v26 = vadd.f32 1e-05, %v2026_v20  ;;  %v2791_v15 = vmul.f32 %v8136_v39, %v2203_v13 }
 0x35c   :  { %v12315_v50 = vpop.xlane.xlu1 %1881  ;;  %3081 = vperm.xlu1 %7910, %v2787_v0   ;;  %v12317_v59 = vpop.xlane.xlu0 %1878  ;;  %v2409_v52 = vadd.f32 1e-05, %v2017_v37  ;;  %v2218_v37 = vld [vmem:[%s15529_s2 + $0x158] sm:$0xff] }
 0x35d   :  { %16283 = vst [vmem:[#allocation185_spill] sm:$0xff] %v12317_v59  ;;  %3136 = vperm.xlu0 %7909, %v2798_v14   ;;  %v8138_v0 = vpop.eup %8137  ;;  %v2028_v14 = vmul.f32 0.020408163, %v11294_v63  ;;  %v16288_v63 = vld [vmem:[#allocation68_spill] sm:$0xff]  ;;  %8153 = vrsqrt.f32 %v2418_v26 }
 0x35e   :  { %v8140_v21 = vpop.eup %8139  ;;  %v2802_v27 = vmul.f32 %v8138_v0, %v2214_v16  ;;  %v2019_v20 = vmul.f32 0.020408163, %v16288_v63  ;;  %8155 = vrsqrt.f32 %v2409_v52  ;;  %v2209_v63 = vld [vmem:[%s15529_s2 + $0x110] sm:$0xff] }
 0x35f   :  { %v2420_v39 = vadd.f32 1e-05, %v2028_v14  ;;  %v2793_v13 = vmul.f32 %v8140_v21, %v2205_v17 }
 0x360   :  { %v12327_v59 = vpop.xlane.xlu1 %1887  ;;  %3091 = vperm.xlu1 %7910, %v2789_v1   ;;  %v12329_v48 = vpop.xlane.xlu0 %1884  ;;  %v2411_v26 = vadd.f32 1e-05, %v2019_v20  ;;  %v2220_v20 = vld [vmem:[%s15529_s2 + $0x168] sm:$0xff] }
 0x361   :  { %16285 = vst [vmem:[#allocation62_spill] sm:$0xff] %v12329_v48  ;;  %3146 = vperm.xlu0 %7909, %v2800_v10   ;;  %v8142_v1 = vpop.eup %8141  ;;  %v2030_v10 = vmul.f32 0.020408163, %v11316_v51  ;;  %v16290_v51 = vld [vmem:[#allocation69_spill] sm:$0xff]  ;;  %8157 = vrsqrt.f32 %v2420_v39 }
 0x362   :  { %v8144_v0 = vpop.eup %8143  ;;  %v2804_v16 = vmul.f32 %v8142_v1, %v2216_v3  ;;  %v2021_v14 = vmul.f32 0.020408163, %v16290_v51  ;;  %8159 = vrsqrt.f32 %v2411_v26  ;;  %v2211_v51 = vld [vmem:[%s15529_s2 + $0x120] sm:$0xff] }
 0x363   :  { %v2422_v21 = vadd.f32 1e-05, %v2030_v10  ;;  %v2795_v17 = vmul.f32 %v8144_v0, %v2207_v46 }
 0x364   :  { %v12339_v48 = vpop.xlane.xlu1 %1893  ;;  %3101 = vperm.xlu1 %7910, %v2791_v15   ;;  %v12341_v12 = vpop.xlane.xlu0 %1890  ;;  %v2413_v39 = vadd.f32 1e-05, %v2021_v14  ;;  %v2222_v14 = vld [vmem:[%s15529_s2 + $0x178] sm:$0xff] }
 0x365   :  { %16287 = vst [vmem:[#allocation64_spill] sm:$0xff] %v12341_v12  ;;  %3156 = vperm.xlu0 %7909, %v2802_v27   ;;  %v8146_v15 = vpop.eup %8145  ;;  %v2032_v27 = vmul.f32 0.020408163, %v11338_v25  ;;  %v16292_v25 = vld [vmem:[#allocation71_spill] sm:$0xff]  ;;  %8161 = vrsqrt.f32 %v2422_v21 }
 0x366   :  { %v8148_v1 = vpop.eup %8147  ;;  %v2806_v3 = vmul.f32 %v8146_v15, %v2218_v37  ;;  %v2023_v10 = vmul.f32 0.020408163, %v16292_v25  ;;  %8163 = vrsqrt.f32 %v2413_v39 }
 0x367   :  { %v2424_v0 = vadd.f32 1e-05, %v2032_v27  ;;  %v2797_v46 = vmul.f32 %v8148_v1, %v2209_v63  ;;  %v2036_v1 = vmul.f32 0.020408163, %v11382_v35  ;;  %v2027_v35 = vmul.f32 0.020408163, %v11296_v56 }
 0x368   :  { %v12351_v12 = vpop.xlane.xlu1 %1899  ;;  %3111 = vperm.xlu1 %7910, %v2793_v13   ;;  %v12353_v33 = vpop.xlane.xlu0 %1896  ;;  %v2415_v21 = vadd.f32 1e-05, %v2023_v10  ;;  %v2226_v56 = vld [vmem:[%s15529_s2 + $0x198] sm:$0xff] }
 0x369   :  { %16289 = vst [vmem:[#allocation65_spill] sm:$0xff] %v12353_v33  ;;  %3166 = vperm.xlu0 %7909, %v2804_v16   ;;  %v8150_v13 = vpop.eup %8149  ;;  %v2034_v16 = vmul.f32 0.020408163, %v11360_v62  ;;  %v2025_v62 = vmul.f32 0.020408163, %v11274_v29  ;;  %8165 = vrsqrt.f32 %v2424_v0  ;;  %v2224_v29 = vld [vmem:[%s15529_s2 + $0x188] sm:$0xff] }
 0x36a   :  { %v8152_v15 = vpop.eup %8151  ;;  %v2808_v37 = vmul.f32 %v8150_v13, %v2220_v20  ;;  %v2213_v20 = vld [vmem:[%s15529_s2 + $0x130] sm:$0xff]  ;;  %8167 = vrsqrt.f32 %v2415_v21  ;;  %v2428_v0 = vadd.f32 1e-05, %v2036_v1  ;;  %v2040_v1 = vmul.f32 0.020408163, %v11426_v42  ;;  %v16294_v42 = vld [vmem:[#allocation81_spill] sm:$0xff] }
 0x36b   :  { %v2426_v27 = vadd.f32 1e-05, %v2034_v16  ;;  %v2417_v10 = vadd.f32 1e-05, %v2025_v62  ;;  %v2038_v16 = vmul.f32 0.020408163, %v11404_v36 }
 0x36c   :  { %v12363_v33 = vpop.xlane.xlu1 %1905  ;;  %3121 = vperm.xlu1 %7910, %v2795_v17   ;;  %v12365_v52 = vpop.xlane.xlu0 %1902  ;;  %v2419_v62 = vadd.f32 1e-05, %v2027_v35  ;;  %v2029_v36 = vmul.f32 0.020408163, %v11318_v34  ;;  %v2228_v34 = vld [vmem:[%s15529_s2 + $0x1a8] sm:$0xff] }
 0x36d   :  { %16291 = vst [vmem:[#allocation68_spill] sm:$0xff] %v12365_v52  ;;  %3176 = vperm.xlu0 %7909, %v2806_v3   ;;  %v8154_v17 = vpop.eup %8153  ;;  %v2799_v3 = vmul.f32 %v8152_v15, %v2211_v51  ;;  %8169 = vrsqrt.f32 %v2426_v27  ;;  %v2430_v27 = vadd.f32 1e-05, %v2038_v16  ;;  %v2432_v16 = vadd.f32 1e-05, %v2040_v1 }
 0x36e   :  { %v8156_v63 = vpop.eup %8155  ;;  %v2810_v13 = vmul.f32 %v8154_v17, %v2222_v14  ;;  %v2215_v17 = vld [vmem:[%s15529_s2 + $0x140] sm:$0xff]  ;;  %8171 = vrsqrt.f32 %v2417_v10  ;;  %v2421_v35 = vadd.f32 1e-05, %v2029_v36  ;;  %v2230_v36 = vld [vmem:[%s15529_s2 + $0x1b8] sm:$0xff] }
 0x36f   :  { %v8158_v25 = vpop.eup %8157  ;;  %v2801_v15 = vmul.f32 %v8156_v63, %v2213_v20  ;;  %8173 = vrsqrt.f32 %v2428_v0  ;;  %v2031_v0 = vmul.f32 0.020408163, %v16294_v42 }
 0x370   :  { %v12375_v52 = vpop.xlane.xlu1 %1911  ;;  %3131 = vperm.xlu1 %7910, %v2797_v46   ;;  %v12377_v26 = vpop.xlane.xlu0 %1908  ;;  %v2812_v51 = vmul.f32 %v8158_v25, %v2224_v29  ;;  %v2217_v25 = vld [vmem:[%s15529_s2 + $0x150] sm:$0xff]  ;;  %8175 = vrsqrt.f32 %v2419_v62 }
 0x371   :  { %3186 = vperm.xlu0 %7909, %v2808_v37   ;;  %v8160_v37 = vpop.eup %8159  ;;  %8177 = vrsqrt.f32 %v2430_v27  ;;  %v2423_v27 = vadd.f32 1e-05, %v2031_v0 }
 0x372   :  { %v8162_v14 = vpop.eup %8161  ;;  %v2803_v63 = vmul.f32 %v8160_v37, %v2215_v17  ;;  %v2042_v37 = vmul.f32 0.020408163, %v11448_v6  ;;  %8179 = vrsqrt.f32 %v2421_v35  ;;  %v2033_v6 = vmul.f32 0.020408163, %v11362_v19  ;;  %v2232_v19 = vld [vmem:[%s15529_s2 + $0x1c8] sm:$0xff] }
 0x373   :  { %v2814_v20 = vmul.f32 %v8162_v14, %v2226_v56  ;;  %v2219_v56 = vld [vmem:[%s15529_s2 + $0x160] sm:$0xff]  ;;  %8181 = vrsqrt.f32 %v2432_v16 }
 0x374   :  { %v12387_v46 = vpop.xlane.xlu1 %1917  ;;  %3141 = vperm.xlu1 %7910, %v2799_v3   ;;  %v12389_v39 = vpop.xlane.xlu0 %1914  ;;  %v2434_v1 = vadd.f32 1e-05, %v2042_v37  ;;  %8183 = vrsqrt.f32 %v2423_v27  ;;  %v2425_v0 = vadd.f32 1e-05, %v2033_v6  ;;  %v2046_v37 = vmul.f32 0.020408163, %v11492_v60 }
 0x375   :  { %3196 = vperm.xlu0 %7909, %v2810_v13   ;;  %v8164_v13 = vpop.eup %8163  ;;  %v2037_v60 = vmul.f32 0.020408163, %v11406_v44  ;;  %v2236_v44 = vld [vmem:[%s15529_s2 + $0x1e8] sm:$0xff] }
 0x376   :  { %v8166_v29 = vpop.eup %8165  ;;  %8185 = vrsqrt.f32 %v2434_v1  ;;  %v2438_v1 = vadd.f32 1e-05, %v2046_v37  ;;  %v2050_v37 = vmul.f32 0.020408163, %v11538_v49  ;;  %v2041_v49 = vmul.f32 0.020408163, %v11450_v18 }
 0x377   :  { %v8168_v17 = vpop.eup %8167  ;;  %v2816_v14 = vmul.f32 %v8166_v29, %v2228_v34  ;;  %v2221_v34 = vld [vmem:[%s15529_s2 + $0x170] sm:$0xff]  ;;  %8187 = vrsqrt.f32 %v2425_v0  ;;  %v2240_v18 = vld [vmem:[%s15529_s2 + $0x208] sm:$0xff] }
 0x378   :  { %v12399_v3 = vpop.xlane.xlu1 %1923  ;;  %3151 = vperm.xlu1 %7910, %v2801_v15   ;;  %v12401_v21 = vpop.xlane.xlu0 %1920 }
 0x379   :  { %3206 = vperm.xlu0 %7909, %v2812_v51   ;;  %v2805_v51 = vmul.f32 %v8164_v13, %v2217_v25  ;;  %v2044_v13 = vmul.f32 0.020408163, %v11470_v45  ;;  %v2035_v45 = vmul.f32 0.020408163, %v11384_v31  ;;  %v2234_v31 = vld [vmem:[%s15529_s2 + $0x1d8] sm:$0xff] }
 0x37b   :  { %v2436_v16 = vadd.f32 1e-05, %v2044_v13  ;;  %v2427_v6 = vadd.f32 1e-05, %v2035_v45  ;;  %v2048_v13 = vmul.f32 0.020408163, %v11514_v2 }
 0x37c   :  { %v12411_v15 = vpop.xlane.xlu1 %1929  ;;  %3161 = vperm.xlu1 %7910, %v2803_v63   ;;  %v12413_v10 = vpop.xlane.xlu0 %1926  ;;  %v2429_v45 = vadd.f32 1e-05, %v2037_v60  ;;  %v2039_v2 = vmul.f32 0.020408163, %v11428_v5  ;;  %v2238_v5 = vld [vmem:[%s15529_s2 + $0x1f8] sm:$0xff] }
 0x37d   :  { %16293 = vst [vmem:[#allocation69_spill] sm:$0xff] %v12413_v10  ;;  %3216 = vperm.xlu0 %7909, %v2814_v20   ;;  %v8170_v63 = vpop.eup %8169  ;;  %v2807_v20 = vmul.f32 %v8168_v17, %v2219_v56  ;;  %8189 = vrsqrt.f32 %v2436_v16  ;;  %v2440_v16 = vadd.f32 1e-05, %v2048_v13  ;;  %v2052_v13 = vmul.f32 0.020408163, %v11560_v22 }
 0x37e   :  { %v8172_v25 = vpop.eup %8171  ;;  %v2818_v29 = vmul.f32 %v8170_v63, %v2230_v36  ;;  %v2223_v63 = vld [vmem:[%s15529_s2 + $0x180] sm:$0xff]  ;;  %8191 = vrsqrt.f32 %v2427_v6  ;;  %v2431_v60 = vadd.f32 1e-05, %v2039_v2  ;;  %v2433_v2 = vadd.f32 1e-05, %v2041_v49 }
 0x37f   :  { %v8174_v42 = vpop.eup %8173  ;;  %v2809_v17 = vmul.f32 %v8172_v25, %v2221_v34  ;;  %8193 = vrsqrt.f32 %v2438_v1  ;;  %v2442_v1 = vadd.f32 1e-05, %v2050_v37  ;;  %v2043_v22 = vmul.f32 0.020408163, %v11472_v47  ;;  %v2242_v47 = vld [vmem:[%s15529_s2 + $0x218] sm:$0xff] }
 0x380   :  { %v12423_v10 = vpop.xlane.xlu1 %1935  ;;  %3171 = vperm.xlu1 %7910, %v2805_v51   ;;  %v12425_v62 = vpop.xlane.xlu0 %1932  ;;  %v2820_v56 = vmul.f32 %v8174_v42, %v2232_v19  ;;  %v2225_v42 = vld [vmem:[%s15529_s2 + $0x190] sm:$0xff]  ;;  %8195 = vrsqrt.f32 %v2429_v45  ;;  %v2054_v37 = vmul.f32 0.020408163, %v11582_v57  ;;  %v2045_v49 = vmul.f32 0.020408163, %v11494_v30  ;;  %v2244_v30 = vld [vmem:[%s15529_s2 + $0x228] sm:$0xff] }
 0x381   :  { %3226 = vperm.xlu0 %7909, %v2816_v14   ;;  %v8176_v14 = vpop.eup %8175  ;;  %8197 = vrsqrt.f32 %v2440_v16  ;;  %v2444_v16 = vadd.f32 1e-05, %v2052_v13 }
 0x382   :  { %v8178_v36 = vpop.eup %8177  ;;  %v2811_v25 = vmul.f32 %v8176_v14, %v2223_v63  ;;  %8199 = vrsqrt.f32 %v2431_v60  ;;  %v2435_v60 = vadd.f32 1e-05, %v2043_v22  ;;  %v2446_v57 = vadd.f32 1e-05, %v2054_v37 }
 0x383   :  { %v2822_v34 = vmul.f32 %v8178_v36, %v2234_v31  ;;  %v2227_v36 = vld [vmem:[%s15529_s2 + $0x1a0] sm:$0xff]  ;;  %8201 = vrsqrt.f32 %v2442_v1  ;;  %v2056_v1 = vmul.f32 0.020408163, %v11604_v32  ;;  %v2047_v32 = vmul.f32 0.020408163, %v11516_v7  ;;  %v2246_v7 = vld [vmem:[%s15529_s2 + $0x238] sm:$0xff] }
 0x384   :  { %v12435_v51 = vpop.xlane.xlu1 %1941  ;;  %3181 = vperm.xlu1 %7910, %v2807_v20   ;;  %v12437_v35 = vpop.xlane.xlu0 %1938  ;;  %8203 = vrsqrt.f32 %v2433_v2  ;;  %v2437_v2 = vadd.f32 1e-05, %v2045_v49 }
 0x385   :  { %3236 = vperm.xlu0 %7909, %v2818_v29   ;;  %v8180_v29 = vpop.eup %8179  ;;  %8205 = vrsqrt.f32 %v2444_v16  ;;  %v2448_v22 = vadd.f32 1e-05, %v2056_v1  ;;  %v2058_v16 = vmul.f32 0.020408163, %v11626_v8  ;;  %v2049_v8 = vmul.f32 0.020408163, %v11540_v54 }
 0x386   :  { %v8182_v19 = vpop.eup %8181  ;;  %v2813_v14 = vmul.f32 %v8180_v29, %v2225_v42  ;;  %8207 = vrsqrt.f32 %v2435_v60  ;;  %v2439_v60 = vadd.f32 1e-05, %v2047_v32  ;;  %v2248_v54 = vld [vmem:[%s15529_s2 + $0x248] sm:$0xff] }
 0x387   :  { %v2824_v63 = vmul.f32 %v8182_v19, %v2236_v44  ;;  %v2229_v19 = vld [vmem:[%s15529_s2 + $0x1b0] sm:$0xff]  ;;  %8209 = vrsqrt.f32 %v2446_v57  ;;  %v2450_v49 = vadd.f32 1e-05, %v2058_v16  ;;  %v2060_v57 = vmul.f32 0.020408163, %v11648_v11 }
 0x388   :  { %v12447_v20 = vpop.xlane.xlu1 %1947  ;;  %3191 = vperm.xlu1 %7910, %v2809_v17   ;;  %v12449_v27 = vpop.xlane.xlu0 %1944  ;;  %8211 = vrsqrt.f32 %v2437_v2  ;;  %v2441_v32 = vadd.f32 1e-05, %v2049_v8  ;;  %v2051_v11 = vmul.f32 0.020408163, %v11562_v28  ;;  %v2062_v16 = vmul.f32 0.020408163, %v11670_v58 }
 0x389   :  { %3246 = vperm.xlu0 %7909, %v2820_v56   ;;  %v8184_v56 = vpop.eup %8183  ;;  %8213 = vrsqrt.f32 %v2448_v22  ;;  %v2452_v22 = vadd.f32 1e-05, %v2060_v57  ;;  %v2250_v28 = vld [vmem:[%s15529_s2 + $0x258] sm:$0xff]  ;;  %v2053_v58 = vmul.f32 0.020408163, %v11584_v55  ;;  %v2252_v55 = vld [vmem:[%s15529_s2 + $0x268] sm:$0xff] }
 0x38a   :  { %v8186_v31 = vpop.eup %8185  ;;  %v2815_v29 = vmul.f32 %v8184_v56, %v2227_v36  ;;  %8215 = vrsqrt.f32 %v2439_v60  ;;  %v2443_v8 = vadd.f32 1e-05, %v2051_v11  ;;  %v2064_v57 = vmul.f32 0.020408163, %v11692_v4 }
 0x38b   :  { %v2826_v42 = vmul.f32 %v8186_v31, %v2238_v5  ;;  %v2231_v31 = vld [vmem:[%s15529_s2 + $0x1c0] sm:$0xff]  ;;  %8217 = vrsqrt.f32 %v2450_v49  ;;  %v2454_v49 = vadd.f32 1e-05, %v2062_v16  ;;  %v2445_v11 = vadd.f32 1e-05, %v2053_v58 }
 0x38c   :  { %v12459_v17 = vpop.xlane.xlu1 %1953  ;;  %3201 = vperm.xlu1 %7910, %v2811_v25   ;;  %v12461_v0 = vpop.xlane.xlu0 %1950  ;;  %v2055_v4 = vmul.f32 0.020408163, %v11606_v24  ;;  %v2066_v16 = vmul.f32 0.020408163, %v11714_v40  ;;  %v2254_v24 = vld [vmem:[%s15529_s2 + $0x278] sm:$0xff] }
 0x38d   :  { %3256 = vperm.xlu0 %7909, %v2822_v34   ;;  %v8188_v34 = vpop.eup %8187  ;;  %8219 = vrsqrt.f32 %v2441_v32  ;;  %v2057_v40 = vmul.f32 0.020408163, %v11628_v9  ;;  %v2256_v9 = vld [vmem:[%s15529_s2 + $0x288] sm:$0xff] }
 0x38e   :  { %v8190_v44 = vpop.eup %8189  ;;  %v2817_v56 = vmul.f32 %v8188_v34, %v2229_v19  ;;  %8221 = vrsqrt.f32 %v2452_v22  ;;  %v2456_v22 = vadd.f32 1e-05, %v2064_v57  ;;  %v2447_v58 = vadd.f32 1e-05, %v2055_v4 }
 0x38f   :  { %v2828_v36 = vmul.f32 %v8190_v44, %v2240_v18  ;;  %v2233_v44 = vld [vmem:[%s15529_s2 + $0x1d0] sm:$0xff]  ;;  %v2068_v57 = vmul.f32 0.020408163, %v11736_v53  ;;  %v2449_v4 = vadd.f32 1e-05, %v2057_v40 }
 0x390   :  { %v12471_v25 = vpop.xlane.xlu1 %1959  ;;  %3211 = vperm.xlu1 %7910, %v2813_v14   ;;  %v12473_v6 = vpop.xlane.xlu0 %1956  ;;  %v2059_v53 = vmul.f32 0.020408163, %v11650_v43  ;;  %v2258_v43 = vld [vmem:[%s15529_s2 + $0x298] sm:$0xff] }
 0x391   :  { %3266 = vperm.xlu0 %7909, %v2824_v63   ;;  %v8192_v63 = vpop.eup %8191  ;;  %8223 = vrsqrt.f32 %v2443_v8 }
 0x392   :  { %v8194_v5 = vpop.eup %8193  ;;  %v2819_v34 = vmul.f32 %v8192_v63, %v2231_v31  ;;  %v2235_v31 = vld [vmem:[%s15529_s2 + $0x1e0] sm:$0xff]  ;;  %8225 = vrsqrt.f32 %v2454_v49  ;;  %v2458_v49 = vadd.f32 1e-05, %v2066_v16  ;;  %v16300_v16 = vld [vmem:[#allocation120_spill] sm:$0xff]  ;;  %v2451_v40 = vadd.f32 1e-05, %v2059_v53 }
 0x393   :  { %v2830_v19 = vmul.f32 %v8194_v5, %v2242_v47  ;;  %v2260_v53 = vld [vmem:[%s15529_s2 + $0x2a8] sm:$0xff] }
 0x394   :  { %v12483_v14 = vpop.xlane.xlu1 %1965  ;;  %3221 = vperm.xlu1 %7910, %v2815_v29   ;;  %v12485_v45 = vpop.xlane.xlu0 %1962 }
 0x395   :  { %3276 = vperm.xlu0 %7909, %v2826_v42   ;;  %v8196_v42 = vpop.eup %8195  ;;  %8227 = vrsqrt.f32 %v2445_v11 }
 0x396   :  { %v8198_v18 = vpop.eup %8197  ;;  %v2821_v37 = vmul.f32 %v8196_v42, %v2233_v44  ;;  %v2237_v44 = vld [vmem:[%s15529_s2 + $0x1f0] sm:$0xff]  ;;  %8229 = vrsqrt.f32 %v2456_v22  ;;  %v2460_v22 = vadd.f32 1e-05, %v2068_v57 }
 0x397   :  { %v8200_v63 = vpop.eup %8199  ;;  %8231 = vrsqrt.f32 %v2447_v58 }
 0x398   :  { %v12495_v29 = vpop.xlane.xlu1 %1971  ;;  %3231 = vperm.xlu1 %7910, %v2817_v56   ;;  %v12502_v13 = vpop.xlane.xlu0 %1968  ;;  %v2823_v1 = vmul.f32 %v8200_v63, %v2235_v31  ;;  %v2239_v31 = vld [vmem:[%s15529_s2 + $0x200] sm:$0xff] }
 0x399   :  { %3286 = vperm.xlu0 %7909, %v2828_v36   ;;  %v2832_v36 = vmul.f32 %v8198_v18, %v2244_v30  ;;  %v8202_v5 = vpop.eup %8201  ;;  %8233 = vrsqrt.f32 %v2458_v49  ;;  %v16302_v49 = vld [vmem:[#allocation232_spill] sm:$0xff] }
 0x39a   :  { %v8204_v42 = vpop.eup %8203  ;;  %8235 = vrsqrt.f32 %v2449_v4  ;;  %v2061_v57 = vmul.f32 0.020408163, %v16302_v49 }
 0x39b   :  { %v8206_v18 = vpop.eup %8205  ;;  %8237 = vrsqrt.f32 %v2460_v22 }
 0x39c   :  { %v12507_v56 = vpop.xlane.xlu1 %1977  ;;  %3241 = vperm.xlu1 %7910, %v2819_v34   ;;  %v12517_v47 = vpop.xlane.xlu0 %1974  ;;  %v2453_v22 = vadd.f32 1e-05, %v2061_v57  ;;  %v2262_v57 = vld [vmem:[%s15529_s2 + $0x2b8] sm:$0xff] }
 0x39d   :  { %3296 = vperm.xlu0 %7909, %v2830_v19   ;;  %v2834_v19 = vmul.f32 %v8202_v5, %v2246_v7  ;;  %v8208_v63 = vpop.eup %8207  ;;  %8239 = vrsqrt.f32 %v2451_v40 }
 0x39e   :  { %v8210_v5 = vpop.eup %8209 }
 0x3a0   :  { %v12519_v34 = vpop.permute.xlu1 %2966  ;;  %3251 = vperm.xlu1 %7910, %v2821_v37   ;;  %v2825_v37 = vmul.f32 %v8204_v42, %v2237_v44  ;;  %v8212_v42 = vpop.eup %8211  ;;  %v2241_v44 = vld [vmem:[%s15529_s2 + $0x210] sm:$0xff] }
 0x3a1   :  { %3306 = vperm.xlu0 %7909, %v2832_v36   ;;  %v2836_v36 = vmul.f32 %v8206_v18, %v2248_v54  ;;  %v8214_v18 = vpop.eup %8213 }
 0x3a4   :  { %v12529_v30 = vpop.permute.xlu1 %2971  ;;  %3261 = vperm.xlu1 %7910, %v2823_v1   ;;  %v12531_v2 = vpop.permute.xlu0 %2961  ;;  %v2827_v1 = vmul.f32 %v8208_v63, %v2239_v31  ;;  %v2243_v31 = vld [vmem:[%s15529_s2 + $0x220] sm:$0xff] }
 0x3a5   :  { %3316 = vperm.xlu0 %7909, %v2834_v19   ;;  %v2838_v19 = vmul.f32 %v8210_v5, %v2250_v28  ;;  %v8216_v63 = vpop.eup %8215 }
 0x3a6   :  { %v8218_v5 = vpop.eup %8217 }
 0x3a8   :  { %v12541_v7 = vpop.permute.xlu1 %2976  ;;  %3271 = vperm.xlu1 %7910, %v2825_v37   ;;  %v12543_v60 = vpop.permute.xlu0 %3006  ;;  %v2829_v37 = vmul.f32 %v8212_v42, %v2241_v44  ;;  %v2245_v44 = vld [vmem:[%s15529_s2 + $0x230] sm:$0xff] }
 0x3a9   :  { %16295 = vst [vmem:[#allocation71_spill] sm:$0xff] %v12543_v60  ;;  %3326 = vperm.xlu0 %7909, %v2836_v36   ;;  %v2840_v36 = vmul.f32 %v8214_v18, %v2252_v55  ;;  %v8220_v42 = vpop.eup %8219 }
 0x3aa   :  { %v8222_v18 = vpop.eup %8221 }
 0x3ac   :  { %v12553_v54 = vpop.permute.xlu1 %2981  ;;  %3281 = vperm.xlu1 %7910, %v2827_v1   ;;  %v12555_v32 = vpop.permute.xlu0 %3016  ;;  %v2831_v1 = vmul.f32 %v8216_v63, %v2243_v31  ;;  %v2833_v63 = vmul.f32 %v8220_v42, %v2245_v44  ;;  %v2844_v31 = vmul.f32 %v8222_v18, %v2256_v9 }
 0x3ad   :  { %16296 = vst [vmem:[#allocation81_spill] sm:$0xff] %v12555_v32  ;;  %3336 = vperm.xlu0 %7909, %v2838_v19   ;;  %v2842_v19 = vmul.f32 %v8218_v5, %v2254_v24  ;;  %v2247_v5 = vld [vmem:[%s15529_s2 + $0x240] sm:$0xff] }
 0x3b0   :  { %v12565_v28 = vpop.permute.xlu1 %2986  ;;  %3291 = vperm.xlu1 %7910, %v2829_v37   ;;  %v12567_v8 = vpop.permute.xlu0 %3026  ;;  %v2070_v37 = vmul.f32 0.020408163, %v16300_v16 }
 0x3b1   :  { %16297 = vst [vmem:[#allocation278_spill] sm:$0xff] %v12567_v8  ;;  %3346 = vperm.xlu0 %7909, %v2840_v36   ;;  %v8224_v36 = vpop.eup %8223 }
 0x3b2   :  { %v8226_v24 = vpop.eup %8225  ;;  %v2462_v42 = vadd.f32 1e-05, %v2070_v37  ;;  %v2835_v18 = vmul.f32 %v8224_v36, %v2247_v5  ;;  %v16305_v37 = vld [vmem:[#allocation235_spill] sm:$0xff]  ;;  %v16306_v5 = vld [vmem:[#allocation2_spill] sm:$0xff] }
 0x3b3   :  { %v8228_v9 = vpop.eup %8227  ;;  %v2846_v16 = vmul.f32 %v8226_v24, %v2258_v43  ;;  %v2063_v36 = vmul.f32 0.020408163, %v16305_v37  ;;  %v2074_v24 = vmul.f32 0.020408163, %v16306_v5 }
 0x3b4   :  { %v12577_v55 = vpop.permute.xlu1 %2991  ;;  %3301 = vperm.xlu1 %7910, %v2831_v1   ;;  %v12579_v11 = vpop.permute.xlu0 %3036  ;;  %8241 = vrsqrt.f32 %v2462_v42 }
 0x3b5   :  { %16298 = vst [vmem:[#allocation279_spill] sm:$0xff] %v12577_v55  ;;  %16299 = vst [vmem:[#allocation280_spill] sm:$0xff] %v12579_v11  ;;  %3356 = vperm.xlu0 %7909, %v2842_v19   ;;  %v16303_v19 = vld [vmem:[#allocation123_spill] sm:$0xff]  ;;  %v8230_v11 = vpop.eup %8229  ;;  %8243 = vrsqrt.f32 %v2453_v22  ;;  %v2455_v42 = vadd.f32 1e-05, %v2063_v36 }
 0x3b6   :  { %v2072_v44 = vmul.f32 0.020408163, %v16303_v19  ;;  %v8232_v49 = vpop.eup %8231  ;;  %v2848_v19 = vmul.f32 %v8230_v11, %v2260_v53  ;;  %v2466_v11 = vadd.f32 1e-05, %v2074_v24  ;;  %v2264_v36 = vld [vmem:[%s15529_s2 + $0x2c8] sm:$0xff]  ;;  %v16313_v24 = vld [vmem:[#allocation241_spill] sm:$0xff] }
 0x3b7   :  { %v8234_v32 = vpop.eup %8233 }
 0x3b8   :  { %v12589_v1 = vpop.permute.xlu1 %2996  ;;  %3311 = vperm.xlu1 %7910, %v2833_v63   ;;  %v12591_v58 = vpop.permute.xlu0 %3046  ;;  %v2249_v63 = vld [vmem:[%s15529_s2 + $0x250] sm:$0xff]  ;;  %v2850_v5 = vmul.f32 %v8234_v32, %v2262_v57 }
 0x3b9   :  { %16301 = vst [vmem:[#allocation120_spill] sm:$0xff] %v12589_v1  ;;  %3366 = vperm.xlu0 %7909, %v2844_v31   ;;  %v2464_v31 = vadd.f32 1e-05, %v2072_v44  ;;  %v2837_v43 = vmul.f32 %v8228_v9, %v2249_v63  ;;  %v16309_v44 = vld [vmem:[#allocation238_spill] sm:$0xff]  ;;  %v8236_v37 = vpop.eup %8235 }
 0x3ba   :  { %v2065_v9 = vmul.f32 0.020408163, %v16309_v44 }
 0x3bb   :  { %8245 = vrsqrt.f32 %v2464_v31 }
 0x3bc   :  { %v12601_v8 = vpop.permute.xlu1 %3001  ;;  %3321 = vperm.xlu1 %7910, %v2835_v18   ;;  %v12603_v4 = vpop.permute.xlu0 %3056  ;;  %v2251_v18 = vld [vmem:[%s15529_s2 + $0x260] sm:$0xff]  ;;  %8247 = vrsqrt.f32 %v2455_v42  ;;  %v2457_v31 = vadd.f32 1e-05, %v2065_v9  ;;  %v2266_v9 = vld [vmem:[%s15529_s2 + $0x2d8] sm:$0xff] }
 0x3bd   :  { %16304 = vst [vmem:[#allocation232_spill] sm:$0xff] %v12601_v8  ;;  %3376 = vperm.xlu0 %7909, %v2846_v16   ;;  %v16310_v16 = vld [vmem:[#allocation249_spill] sm:$0xff]  ;;  %v2839_v53 = vmul.f32 %v8232_v49, %v2251_v18  ;;  %v2067_v49 = vmul.f32 0.020408163, %v16313_v24  ;;  %8249 = vrsqrt.f32 %v2466_v11 }
 0x3be   :  { %v2076_v63 = vmul.f32 0.020408163, %v16310_v16  ;;  %8251 = vrsqrt.f32 %v2457_v31 }
 0x3bf   :  { %v2459_v11 = vadd.f32 1e-05, %v2067_v49  ;;  %v2268_v49 = vld [vmem:[%s15529_s2 + $0x2e8] sm:$0xff] }
 0x3c0   :  { %v12613_v8 = vpop.permute.xlu1 %3011  ;;  %3331 = vperm.xlu1 %7910, %v2837_v43   ;;  %v12615_v40 = vpop.permute.xlu0 %3066  ;;  %v2253_v43 = vld [vmem:[%s15529_s2 + $0x270] sm:$0xff]  ;;  %v2468_v32 = vadd.f32 1e-05, %v2076_v63 }
 0x3c1   :  { %16307 = vst [vmem:[#allocation123_spill] sm:$0xff] %v12613_v8  ;;  %16308 = vst [vmem:[#allocation235_spill] sm:$0xff] %v12615_v40  ;;  %3386 = vperm.xlu0 %7909, %v2848_v19   ;;  %v8238_v8 = vpop.eup %8237  ;;  %v16314_v19 = vld [vmem:[#allocation5_spill] sm:$0xff]  ;;  %v2841_v57 = vmul.f32 %v8236_v37, %v2253_v43  ;;  %v16317_v63 = vld [vmem:[#allocation244_spill] sm:$0xff] }
 0x3c2   :  { %v2078_v18 = vmul.f32 0.020408163, %v16314_v19  ;;  %v8240_v44 = vpop.eup %8239  ;;  %v2852_v16 = vmul.f32 %v8238_v8, %v2264_v36  ;;  %v2069_v37 = vmul.f32 0.020408163, %v16317_v63  ;;  %8253 = vrsqrt.f32 %v2468_v32 }
 0x3c3   :  { %8255 = vrsqrt.f32 %v2459_v11 }
 0x3c4   :  { %v12625_v60 = vpop.permute.xlu1 %3021  ;;  %3341 = vperm.xlu1 %7910, %v2839_v53   ;;  %v12627_v22 = vpop.permute.xlu0 %3076  ;;  %v2255_v53 = vld [vmem:[%s15529_s2 + $0x280] sm:$0xff]  ;;  %v2470_v8 = vadd.f32 1e-05, %v2078_v18  ;;  %v2461_v32 = vadd.f32 1e-05, %v2069_v37  ;;  %v16320_v18 = vld [vmem:[#allocation124_spill] sm:$0xff] }
 0x3c5   :  { %16311 = vst [vmem:[#allocation2_spill] sm:$0xff] %v12625_v60  ;;  %16312 = vst [vmem:[#allocation238_spill] sm:$0xff] %v12627_v22  ;;  %3396 = vperm.xlu0 %7909, %v2850_v5   ;;  %v8242_v60 = vpop.eup %8241  ;;  %v16318_v5 = vld [vmem:[#allocation7_spill] sm:$0xff]  ;;  %v2843_v36 = vmul.f32 %v8240_v44, %v2255_v53  ;;  %v2071_v44 = vmul.f32 0.020408163, %v16320_v18  ;;  %v2270_v37 = vld [vmem:[%s15529_s2 + $0x2f8] sm:$0xff] }
 0x3c6   :  { %v2080_v43 = vmul.f32 0.020408163, %v16318_v5  ;;  %v8244_v24 = vpop.eup %8243  ;;  %v2854_v19 = vmul.f32 %v8242_v60, %v2266_v9  ;;  %8257 = vrsqrt.f32 %v2470_v8 }
 0x3c7   :  { %8259 = vrsqrt.f32 %v2461_v32  ;;  %v2463_v8 = vadd.f32 1e-05, %v2071_v44  ;;  %v2272_v44 = vld [vmem:[%s15529_s2 + $0x308] sm:$0xff] }
 0x3c8   :  { %v12637_v22 = vpop.permute.xlu1 %3031  ;;  %3351 = vperm.xlu1 %7910, %v2841_v57   ;;  %v12639_v42 = vpop.permute.xlu0 %3086  ;;  %v2257_v57 = vld [vmem:[%s15529_s2 + $0x290] sm:$0xff]  ;;  %v2472_v60 = vadd.f32 1e-05, %v2080_v43  ;;  %v16323_v43 = vld [vmem:[#allocation127_spill] sm:$0xff] }
 0x3c9   :  { %16315 = vst [vmem:[#allocation249_spill] sm:$0xff] %v12637_v22  ;;  %16316 = vst [vmem:[#allocation241_spill] sm:$0xff] %v12639_v42  ;;  %3406 = vperm.xlu0 %7909, %v2852_v16   ;;  %v8246_v22 = vpop.eup %8245  ;;  %v16321_v16 = vld [vmem:[#allocation9_spill] sm:$0xff]  ;;  %v2845_v9 = vmul.f32 %v8244_v24, %v2257_v57  ;;  %v2073_v24 = vmul.f32 0.020408163, %v16323_v43 }
 0x3ca   :  { %v2082_v53 = vmul.f32 0.020408163, %v16321_v16  ;;  %v8248_v63 = vpop.eup %8247  ;;  %v2856_v5 = vmul.f32 %v8246_v22, %v2268_v49  ;;  %8261 = vrsqrt.f32 %v2472_v60 }
 0x3cb   :  { %8263 = vrsqrt.f32 %v2463_v8  ;;  %v2465_v60 = vadd.f32 1e-05, %v2073_v24  ;;  %v2274_v24 = vld [vmem:[%s15529_s2 + $0x318] sm:$0xff] }
 0x3cc   :  { %v12649_v42 = vpop.permute.xlu1 %3041  ;;  %3361 = vperm.xlu1 %7910, %v2843_v36   ;;  %v12651_v31 = vpop.permute.xlu0 %3096  ;;  %v2259_v36 = vld [vmem:[%s15529_s2 + $0x2a0] sm:$0xff]  ;;  %v2474_v22 = vadd.f32 1e-05, %v2082_v53 }
 0x3cd   :  { %16319 = vst [vmem:[#allocation5_spill] sm:$0xff] %v12651_v31  ;;  %3416 = vperm.xlu0 %7909, %v2854_v19   ;;  %v8250_v31 = vpop.eup %8249  ;;  %v16324_v19 = vld [vmem:[#allocation257_spill] sm:$0xff]  ;;  %v2847_v49 = vmul.f32 %v8248_v63, %v2259_v36  ;;  %v16326_v53 = vld [vmem:[#allocation250_spill] sm:$0xff] }
 0x3ce   :  { %v2084_v57 = vmul.f32 0.020408163, %v16324_v19  ;;  %v8252_v18 = vpop.eup %8251  ;;  %v2858_v16 = vmul.f32 %v8250_v31, %v2270_v37  ;;  %v2075_v63 = vmul.f32 0.020408163, %v16326_v53  ;;  %8265 = vrsqrt.f32 %v2474_v22 }
 0x3cf   :  { %8267 = vrsqrt.f32 %v2465_v60 }
 0x3d0   :  { %v12661_v55 = vpop.permute.xlu1 %3051  ;;  %3371 = vperm.xlu1 %7910, %v2845_v9   ;;  %v12663_v11 = vpop.permute.xlu0 %3106  ;;  %v2261_v9 = vld [vmem:[%s15529_s2 + $0x2b0] sm:$0xff]  ;;  %v2476_v31 = vadd.f32 1e-05, %v2084_v57  ;;  %v2467_v22 = vadd.f32 1e-05, %v2075_v63  ;;  %v16330_v57 = vld [vmem:[#allocation6_spill] sm:$0xff] }
 0x3d1   :  { %16322 = vst [vmem:[#allocation244_spill] sm:$0xff] %v12663_v11  ;;  %3426 = vperm.xlu0 %7909, %v2856_v5   ;;  %v8254_v11 = vpop.eup %8253  ;;  %v16327_v5 = vld [vmem:[#allocation13_spill] sm:$0xff]  ;;  %v2849_v37 = vmul.f32 %v8252_v18, %v2261_v9  ;;  %v2077_v18 = vmul.f32 0.020408163, %v16330_v57  ;;  %v2276_v63 = vld [vmem:[%s15529_s2 + $0x328] sm:$0xff] }
 0x3d2   :  { %v2086_v36 = vmul.f32 0.020408163, %v16327_v5  ;;  %v8256_v43 = vpop.eup %8255  ;;  %v2860_v19 = vmul.f32 %v8254_v11, %v2272_v44  ;;  %8269 = vrsqrt.f32 %v2476_v31 }
 0x3d3   :  { %8271 = vrsqrt.f32 %v2467_v22  ;;  %v2469_v31 = vadd.f32 1e-05, %v2077_v18  ;;  %v2278_v18 = vld [vmem:[%s15529_s2 + $0x338] sm:$0xff] }
 0x3d4   :  { %v12673_v1 = vpop.permute.xlu1 %3061  ;;  %3381 = vperm.xlu1 %7910, %v2847_v49   ;;  %v12675_v32 = vpop.permute.xlu0 %3116  ;;  %v2263_v49 = vld [vmem:[%s15529_s2 + $0x2c0] sm:$0xff]  ;;  %v2478_v11 = vadd.f32 1e-05, %v2086_v36  ;;  %v16334_v36 = vld [vmem:[#allocation8_spill] sm:$0xff] }
 0x3d5   :  { %16325 = vst [vmem:[#allocation7_spill] sm:$0xff] %v12675_v32  ;;  %3436 = vperm.xlu0 %7909, %v2858_v16   ;;  %v8258_v32 = vpop.eup %8257  ;;  %v16331_v16 = vld [vmem:[#allocation15_spill] sm:$0xff]  ;;  %v2851_v44 = vmul.f32 %v8256_v43, %v2263_v49  ;;  %v2079_v43 = vmul.f32 0.020408163, %v16334_v36 }
 0x3d6   :  { %v2088_v9 = vmul.f32 0.020408163, %v16331_v16  ;;  %v8260_v53 = vpop.eup %8259  ;;  %v2862_v5 = vmul.f32 %v8258_v32, %v2274_v24  ;;  %8273 = vrsqrt.f32 %v2478_v11 }
 0x3d7   :  { %8275 = vrsqrt.f32 %v2469_v31  ;;  %v2471_v11 = vadd.f32 1e-05, %v2079_v43  ;;  %v2280_v43 = vld [vmem:[%s15529_s2 + $0x348] sm:$0xff] }
 0x3d8   :  { %v12685_v40 = vpop.permute.xlu1 %3071  ;;  %3391 = vperm.xlu1 %7910, %v2849_v37   ;;  %v12687_v8 = vpop.permute.xlu0 %3126  ;;  %v2265_v37 = vld [vmem:[%s15529_s2 + $0x2d0] sm:$0xff]  ;;  %v2480_v32 = vadd.f32 1e-05, %v2088_v9  ;;  %v16338_v9 = vld [vmem:[#allocation10_spill] sm:$0xff] }
 0x3d9   :  { %16328 = vst [vmem:[#allocation124_spill] sm:$0xff] %v12685_v40  ;;  %16329 = vst [vmem:[#allocation9_spill] sm:$0xff] %v12687_v8  ;;  %3446 = vperm.xlu0 %7909, %v2860_v19   ;;  %v8262_v8 = vpop.eup %8261  ;;  %v16335_v19 = vld [vmem:[#allocation17_spill] sm:$0xff]  ;;  %v2853_v24 = vmul.f32 %v8260_v53, %v2265_v37  ;;  %v2081_v53 = vmul.f32 0.020408163, %v16338_v9 }
 0x3da   :  { %v2090_v49 = vmul.f32 0.020408163, %v16335_v19  ;;  %v8264_v57 = vpop.eup %8263  ;;  %v2864_v16 = vmul.f32 %v8262_v8, %v2276_v63  ;;  %8277 = vrsqrt.f32 %v2480_v32 }
 0x3db   :  { %8279 = vrsqrt.f32 %v2471_v11  ;;  %v2473_v32 = vadd.f32 1e-05, %v2081_v53  ;;  %v2282_v53 = vld [vmem:[%s15529_s2 + $0x358] sm:$0xff] }
 0x3dc   :  { %v12697_v40 = vpop.permute.xlu1 %3081  ;;  %3401 = vperm.xlu1 %7910, %v2851_v44   ;;  %v12699_v60 = vpop.permute.xlu0 %3136  ;;  %v2267_v44 = vld [vmem:[%s15529_s2 + $0x2e0] sm:$0xff]  ;;  %v2482_v8 = vadd.f32 1e-05, %v2090_v49 }
 0x3dd   :  { %16332 = vst [vmem:[#allocation127_spill] sm:$0xff] %v12697_v40  ;;  %16333 = vst [vmem:[#allocation257_spill] sm:$0xff] %v12699_v60  ;;  %3456 = vperm.xlu0 %7909, %v2862_v5   ;;  %v8266_v60 = vpop.eup %8265  ;;  %v16339_v5 = vld [vmem:[#allocation265_spill] sm:$0xff]  ;;  %v2855_v63 = vmul.f32 %v8264_v57, %v2267_v44  ;;  %v16342_v49 = vld [vmem:[#allocation258_spill] sm:$0xff] }
 0x3de   :  { %v2092_v37 = vmul.f32 0.020408163, %v16339_v5  ;;  %v8268_v36 = vpop.eup %8267  ;;  %v2866_v19 = vmul.f32 %v8266_v60, %v2278_v18  ;;  %v2083_v57 = vmul.f32 0.020408163, %v16342_v49  ;;  %8281 = vrsqrt.f32 %v2482_v8 }
 0x3df   :  { %8283 = vrsqrt.f32 %v2473_v32 }
 0x3e0   :  { %v12709_v40 = vpop.permute.xlu1 %3091  ;;  %3411 = vperm.xlu1 %7910, %v2853_v24   ;;  %v12711_v22 = vpop.permute.xlu0 %3146  ;;  %v2269_v24 = vld [vmem:[%s15529_s2 + $0x2f0] sm:$0xff]  ;;  %v2484_v60 = vadd.f32 1e-05, %v2092_v37  ;;  %v2475_v8 = vadd.f32 1e-05, %v2083_v57  ;;  %v16346_v37 = vld [vmem:[#allocation14_spill] sm:$0xff] }
 0x3e1   :  { %16336 = vst [vmem:[#allocation250_spill] sm:$0xff] %v12709_v40  ;;  %16337 = vst [vmem:[#allocation13_spill] sm:$0xff] %v12711_v22  ;;  %3466 = vperm.xlu0 %7909, %v2864_v16   ;;  %v8270_v22 = vpop.eup %8269  ;;  %v16343_v16 = vld [vmem:[#allocation21_spill] sm:$0xff]  ;;  %v2857_v18 = vmul.f32 %v8268_v36, %v2269_v24  ;;  %v2085_v36 = vmul.f32 0.020408163, %v16346_v37  ;;  %v2284_v57 = vld [vmem:[%s15529_s2 + $0x368] sm:$0xff] }
 0x3e2   :  { %v2094_v44 = vmul.f32 0.020408163, %v16343_v16  ;;  %v8272_v9 = vpop.eup %8271  ;;  %v2868_v5 = vmul.f32 %v8270_v22, %v2280_v43  ;;  %8285 = vrsqrt.f32 %v2484_v60 }
 0x3e3   :  { %8287 = vrsqrt.f32 %v2475_v8  ;;  %v2477_v60 = vadd.f32 1e-05, %v2085_v36  ;;  %v2286_v36 = vld [vmem:[%s15529_s2 + $0x378] sm:$0xff] }
 0x3e4   :  { %v12721_v40 = vpop.permute.xlu1 %3101  ;;  %3421 = vperm.xlu1 %7910, %v2855_v63   ;;  %v12723_v31 = vpop.permute.xlu0 %3156  ;;  %v2271_v63 = vld [vmem:[%s15529_s2 + $0x300] sm:$0xff]  ;;  %v2486_v22 = vadd.f32 1e-05, %v2094_v44  ;;  %v16350_v44 = vld [vmem:[#allocation16_spill] sm:$0xff] }
 0x3e5   :  { %16340 = vst [vmem:[#allocation6_spill] sm:$0xff] %v12721_v40  ;;  %16341 = vst [vmem:[#allocation15_spill] sm:$0xff] %v12723_v31  ;;  %3476 = vperm.xlu0 %7909, %v2866_v19   ;;  %v8274_v31 = vpop.eup %8273  ;;  %v16347_v19 = vld [vmem:[#allocation23_spill] sm:$0xff]  ;;  %v2859_v43 = vmul.f32 %v8272_v9, %v2271_v63  ;;  %v2087_v9 = vmul.f32 0.020408163, %v16350_v44 }
 0x3e6   :  { %v2096_v24 = vmul.f32 0.020408163, %v16347_v19  ;;  %v8276_v49 = vpop.eup %8275  ;;  %v2870_v16 = vmul.f32 %v8274_v31, %v2282_v53  ;;  %8289 = vrsqrt.f32 %v2486_v22 }
 0x3e7   :  { %8291 = vrsqrt.f32 %v2477_v60  ;;  %v2479_v22 = vadd.f32 1e-05, %v2087_v9  ;;  %v2288_v9 = vld [vmem:[%s15529_s2 + $0x388] sm:$0xff] }
 0x3e8   :  { %v12733_v40 = vpop.permute.xlu1 %3111  ;;  %3431 = vperm.xlu1 %7910, %v2857_v18   ;;  %v12735_v11 = vpop.permute.xlu0 %3166  ;;  %v2273_v18 = vld [vmem:[%s15529_s2 + $0x310] sm:$0xff]  ;;  %v2488_v31 = vadd.f32 1e-05, %v2096_v24  ;;  %v16354_v24 = vld [vmem:[#allocation18_spill] sm:$0xff] }
 0x3e9   :  { %16344 = vst [vmem:[#allocation8_spill] sm:$0xff] %v12733_v40  ;;  %16345 = vst [vmem:[#allocation17_spill] sm:$0xff] %v12735_v11  ;;  %3486 = vperm.xlu0 %7909, %v2868_v5   ;;  %v8278_v11 = vpop.eup %8277  ;;  %v16351_v5 = vld [vmem:[#allocation25_spill] sm:$0xff]  ;;  %v2861_v53 = vmul.f32 %v8276_v49, %v2273_v18  ;;  %v2089_v49 = vmul.f32 0.020408163, %v16354_v24 }
 0x3ea   :  { %v2098_v63 = vmul.f32 0.020408163, %v16351_v5  ;;  %v8280_v37 = vpop.eup %8279  ;;  %v2872_v19 = vmul.f32 %v8278_v11, %v2284_v57  ;;  %8293 = vrsqrt.f32 %v2488_v31 }
 0x3eb   :  { %8295 = vrsqrt.f32 %v2479_v22  ;;  %v2481_v31 = vadd.f32 1e-05, %v2089_v49  ;;  %v2290_v49 = vld [vmem:[%s15529_s2 + $0x398] sm:$0xff] }
 0x3ec   :  { %v12745_v40 = vpop.permute.xlu1 %3121  ;;  %3441 = vperm.xlu1 %7910, %v2859_v43   ;;  %v12747_v32 = vpop.permute.xlu0 %3176  ;;  %v2275_v43 = vld [vmem:[%s15529_s2 + $0x320] sm:$0xff]  ;;  %v2490_v11 = vadd.f32 1e-05, %v2098_v63 }
 0x3ed   :  { %16348 = vst [vmem:[#allocation10_spill] sm:$0xff] %v12745_v40  ;;  %16349 = vst [vmem:[#allocation265_spill] sm:$0xff] %v12747_v32  ;;  %3496 = vperm.xlu0 %7909, %v2870_v16   ;;  %v8282_v32 = vpop.eup %8281  ;;  %v16355_v16 = vld [vmem:[#allocation275_spill] sm:$0xff]  ;;  %v2863_v57 = vmul.f32 %v8280_v37, %v2275_v43  ;;  %v16358_v63 = vld [vmem:[#allocation266_spill] sm:$0xff] }
 0x3ee   :  { %v2100_v18 = vmul.f32 0.020408163, %v16355_v16  ;;  %v8284_v44 = vpop.eup %8283  ;;  %v2874_v5 = vmul.f32 %v8282_v32, %v2286_v36  ;;  %v2091_v37 = vmul.f32 0.020408163, %v16358_v63  ;;  %8297 = vrsqrt.f32 %v2490_v11 }
 0x3ef   :  { %8299 = vrsqrt.f32 %v2481_v31 }
 0x3f0   :  { %v12757_v40 = vpop.permute.xlu1 %3131  ;;  %3451 = vperm.xlu1 %7910, %v2861_v53   ;;  %v12759_v8 = vpop.permute.xlu0 %3186  ;;  %v2277_v53 = vld [vmem:[%s15529_s2 + $0x330] sm:$0xff]  ;;  %v2492_v32 = vadd.f32 1e-05, %v2100_v18  ;;  %v2483_v11 = vadd.f32 1e-05, %v2091_v37  ;;  %v16362_v18 = vld [vmem:[#allocation22_spill] sm:$0xff] }
 0x3f1   :  { %16352 = vst [vmem:[#allocation258_spill] sm:$0xff] %v12757_v40  ;;  %16353 = vst [vmem:[#allocation21_spill] sm:$0xff] %v12759_v8  ;;  %3506 = vperm.xlu0 %7909, %v2872_v19   ;;  %v8286_v8 = vpop.eup %8285  ;;  %v16359_v19 = vld [vmem:[#allocation152_spill] sm:$0xff]  ;;  %v2865_v36 = vmul.f32 %v8284_v44, %v2277_v53  ;;  %v2093_v44 = vmul.f32 0.020408163, %v16362_v18  ;;  %v2292_v37 = vld [vmem:[%s15529_s2 + $0x3a8] sm:$0xff] }
 0x3f2   :  { %v2102_v43 = vmul.f32 0.020408163, %v16359_v19  ;;  %v8288_v24 = vpop.eup %8287  ;;  %v2876_v16 = vmul.f32 %v8286_v8, %v2288_v9  ;;  %8301 = vrsqrt.f32 %v2492_v32 }
 0x3f3   :  { %8303 = vrsqrt.f32 %v2483_v11  ;;  %v2485_v32 = vadd.f32 1e-05, %v2093_v44  ;;  %v2294_v44 = vld [vmem:[%s15529_s2 + $0x3b8] sm:$0xff] }
 0x3f4   :  { %v12769_v40 = vpop.permute.xlu1 %3141  ;;  %3461 = vperm.xlu1 %7910, %v2863_v57   ;;  %v12771_v60 = vpop.permute.xlu0 %3196  ;;  %v2279_v57 = vld [vmem:[%s15529_s2 + $0x340] sm:$0xff]  ;;  %v2494_v8 = vadd.f32 1e-05, %v2102_v43  ;;  %v16366_v43 = vld [vmem:[#allocation24_spill] sm:$0xff] }
 0x3f5   :  { %16356 = vst [vmem:[#allocation14_spill] sm:$0xff] %v12769_v40  ;;  %16357 = vst [vmem:[#allocation23_spill] sm:$0xff] %v12771_v60  ;;  %3516 = vperm.xlu0 %7909, %v2874_v5   ;;  %v8290_v60 = vpop.eup %8289  ;;  %v16363_v5 = vld [vmem:[#allocation30_spill] sm:$0xff]  ;;  %v2867_v9 = vmul.f32 %v8288_v24, %v2279_v57  ;;  %v2095_v24 = vmul.f32 0.020408163, %v16366_v43 }
 0x3f6   :  { %v2104_v53 = vmul.f32 0.020408163, %v16363_v5  ;;  %v8292_v63 = vpop.eup %8291  ;;  %v2878_v19 = vmul.f32 %v8290_v60, %v2290_v49  ;;  %8305 = vrsqrt.f32 %v2494_v8 }
 0x3f7   :  { %8307 = vrsqrt.f32 %v2485_v32  ;;  %v2487_v8 = vadd.f32 1e-05, %v2095_v24  ;;  %v2296_v24 = vld [vmem:[%s15529_s2 + $0x3c8] sm:$0xff] }
 0x3f8   :  { %v12781_v40 = vpop.permute.xlu1 %3151  ;;  %3471 = vperm.xlu1 %7910, %v2865_v36   ;;  %v12783_v22 = vpop.permute.xlu0 %3206  ;;  %v2281_v36 = vld [vmem:[%s15529_s2 + $0x350] sm:$0xff]  ;;  %v2496_v60 = vadd.f32 1e-05, %v2104_v53  ;;  %v16370_v53 = vld [vmem:[#allocation26_spill] sm:$0xff] }
 0x3f9   :  { %16360 = vst [vmem:[#allocation16_spill] sm:$0xff] %v12781_v40  ;;  %16361 = vst [vmem:[#allocation25_spill] sm:$0xff] %v12783_v22  ;;  %3526 = vperm.xlu0 %7909, %v2876_v16   ;;  %v8294_v40 = vpop.eup %8293  ;;  %v16367_v16 = vld [vmem:[#allocation29_spill] sm:$0xff]  ;;  %v2869_v49 = vmul.f32 %v8292_v63, %v2281_v36  ;;  %v2097_v63 = vmul.f32 0.020408163, %v16370_v53 }
 0x3fa   :  { %v2106_v57 = vmul.f32 0.020408163, %v16367_v16  ;;  %v8296_v18 = vpop.eup %8295  ;;  %v2880_v5 = vmul.f32 %v8294_v40, %v2292_v37  ;;  %8309 = vrsqrt.f32 %v2496_v60 }
 0x3fb   :  { %8311 = vrsqrt.f32 %v2487_v8  ;;  %v2489_v60 = vadd.f32 1e-05, %v2097_v63  ;;  %v2298_v63 = vld [vmem:[%s15529_s2 + $0x3d8] sm:$0xff] }
 0x3fc   :  { %v12793_v22 = vpop.permute.xlu1 %3161  ;;  %3481 = vperm.xlu1 %7910, %v2867_v9   ;;  %v12795_v31 = vpop.permute.xlu0 %3216  ;;  %v2283_v9 = vld [vmem:[%s15529_s2 + $0x360] sm:$0xff]  ;;  %v2498_v40 = vadd.f32 1e-05, %v2106_v57  ;;  %v16374_v57 = vld [vmem:[#allocation276_spill] sm:$0xff] }
 0x3fd   :  { %16364 = vst [vmem:[#allocation18_spill] sm:$0xff] %v12793_v22  ;;  %16365 = vst [vmem:[#allocation275_spill] sm:$0xff] %v12795_v31  ;;  %3536 = vperm.xlu0 %7909, %v2878_v19   ;;  %v8298_v22 = vpop.eup %8297  ;;  %v16371_v19 = vld [vmem:[#allocation32_spill] sm:$0xff]  ;;  %v2871_v37 = vmul.f32 %v8296_v18, %v2283_v9  ;;  %v2099_v18 = vmul.f32 0.020408163, %v16374_v57 }
 0x3fe   :  { %v2108_v36 = vmul.f32 0.020408163, %v16371_v19  ;;  %v8300_v43 = vpop.eup %8299  ;;  %v2882_v16 = vmul.f32 %v8298_v22, %v2294_v44  ;;  %8313 = vrsqrt.f32 %v2498_v40 }
 0x3ff   :  { %8315 = vrsqrt.f32 %v2489_v60  ;;  %v2491_v40 = vadd.f32 1e-05, %v2099_v18  ;;  %v2300_v18 = vld [vmem:[%s15529_s2 + $0x3e8] sm:$0xff] }
 0x400   :  { %v12805_v31 = vpop.permute.xlu1 %3171  ;;  %3491 = vperm.xlu1 %7910, %v2869_v49   ;;  %v12807_v11 = vpop.permute.xlu0 %3226  ;;  %v2285_v49 = vld [vmem:[%s15529_s2 + $0x370] sm:$0xff]  ;;  %v2500_v22 = vadd.f32 1e-05, %v2108_v36  ;;  %v16378_v36 = vld [vmem:[#allocation277_spill] sm:$0xff] }
 0x401   :  { %16368 = vst [vmem:[#allocation266_spill] sm:$0xff] %v12805_v31  ;;  %16369 = vst [vmem:[#allocation152_spill] sm:$0xff] %v12807_v11  ;;  %3546 = vperm.xlu0 %7909, %v2880_v5   ;;  %v8302_v31 = vpop.eup %8301  ;;  %v16375_v5 = vld [vmem:[#allocation31_spill] sm:$0xff]  ;;  %v2873_v44 = vmul.f32 %v8300_v43, %v2285_v49  ;;  %v2101_v43 = vmul.f32 0.020408163, %v16378_v36 }
 0x402   :  { %v2110_v9 = vmul.f32 0.020408163, %v16375_v5  ;;  %v8304_v53 = vpop.eup %8303  ;;  %v2884_v19 = vmul.f32 %v8302_v31, %v2296_v24  ;;  %8317 = vrsqrt.f32 %v2500_v22 }
 0x403   :  { %8319 = vrsqrt.f32 %v2491_v40  ;;  %v2493_v22 = vadd.f32 1e-05, %v2101_v43  ;;  %v2302_v43 = vld [vmem:[%s15529_s2 + $0x3f8] sm:$0xff] }
 0x404   :  { %v12817_v11 = vpop.permute.xlu1 %3181  ;;  %3501 = vperm.xlu1 %7910, %v2871_v37   ;;  %v12819_v32 = vpop.permute.xlu0 %3236  ;;  %v2287_v37 = vld [vmem:[%s15529_s2 + $0x380] sm:$0xff]  ;;  %v2502_v31 = vadd.f32 1e-05, %v2110_v9  ;;  %v16382_v9 = vld [vmem:[#allocation153_spill] sm:$0xff] }
 0x405   :  { %16372 = vst [vmem:[#allocation22_spill] sm:$0xff] %v12817_v11  ;;  %16373 = vst [vmem:[#allocation30_spill] sm:$0xff] %v12819_v32  ;;  %3556 = vperm.xlu0 %7909, %v2882_v16   ;;  %v8306_v11 = vpop.eup %8305  ;;  %v16379_v16 = vld [vmem:[#allocation34_spill] sm:$0xff]  ;;  %v2875_v24 = vmul.f32 %v8304_v53, %v2287_v37  ;;  %v2103_v53 = vmul.f32 0.020408163, %v16382_v9 }
 0x406   :  { %v2112_v49 = vmul.f32 0.020408163, %v16379_v16  ;;  %v8308_v57 = vpop.eup %8307  ;;  %v2886_v5 = vmul.f32 %v8306_v11, %v2298_v63  ;;  %8321 = vrsqrt.f32 %v2502_v31 }
 0x407   :  { %8323 = vrsqrt.f32 %v2493_v22  ;;  %v2495_v31 = vadd.f32 1e-05, %v2103_v53  ;;  %v2304_v53 = vld [vmem:[%s15529_s2 + $0x408] sm:$0xff] }
 0x408   :  { %v12829_v32 = vpop.permute.xlu1 %3191  ;;  %3511 = vperm.xlu1 %7910, %v2873_v44   ;;  %v12831_v8 = vpop.permute.xlu0 %3246  ;;  %v2289_v44 = vld [vmem:[%s15529_s2 + $0x390] sm:$0xff]  ;;  %v2504_v11 = vadd.f32 1e-05, %v2112_v49 }
 0x409   :  { %16376 = vst [vmem:[#allocation24_spill] sm:$0xff] %v12829_v32  ;;  %16377 = vst [vmem:[#allocation29_spill] sm:$0xff] %v12831_v8  ;;  %3566 = vperm.xlu0 %7909, %v2884_v19   ;;  %v8310_v32 = vpop.eup %8309  ;;  %v16383_v19 = vld [vmem:[#allocation33_spill] sm:$0xff]  ;;  %v2877_v63 = vmul.f32 %v8308_v57, %v2289_v44  ;;  %v16386_v49 = vld [vmem:[#allocation160_spill] sm:$0xff] }
 0x40a   :  { %v2114_v37 = vmul.f32 0.020408163, %v16383_v19  ;;  %v8312_v36 = vpop.eup %8311  ;;  %v2888_v16 = vmul.f32 %v8310_v32, %v2300_v18  ;;  %v2105_v57 = vmul.f32 0.020408163, %v16386_v49  ;;  %8325 = vrsqrt.f32 %v2504_v11 }
 0x40b   :  { %8327 = vrsqrt.f32 %v2495_v31 }
 0x40c   :  { %v12841_v8 = vpop.permute.xlu1 %3201  ;;  %3521 = vperm.xlu1 %7910, %v2875_v24   ;;  %v12843_v60 = vpop.permute.xlu0 %3256  ;;  %v2291_v24 = vld [vmem:[%s15529_s2 + $0x3a0] sm:$0xff]  ;;  %v2506_v32 = vadd.f32 1e-05, %v2114_v37  ;;  %v2497_v11 = vadd.f32 1e-05, %v2105_v57  ;;  %v16390_v37 = vld [vmem:[#allocation37_spill] sm:$0xff] }
 0x40d   :  { %16380 = vst [vmem:[#allocation26_spill] sm:$0xff] %v12841_v8  ;;  %16381 = vst [vmem:[#allocation32_spill] sm:$0xff] %v12843_v60  ;;  %3576 = vperm.xlu0 %7909, %v2886_v5   ;;  %v8314_v60 = vpop.eup %8313  ;;  %v16387_v5 = vld [vmem:[#allocation161_spill] sm:$0xff]  ;;  %v2879_v18 = vmul.f32 %v8312_v36, %v2291_v24  ;;  %v2107_v36 = vmul.f32 0.020408163, %v16390_v37 }
 0x40e   :  { %v2116_v44 = vmul.f32 0.020408163, %v16387_v5  ;;  %v8316_v9 = vpop.eup %8315  ;;  %v2890_v19 = vmul.f32 %v8314_v60, %v2302_v43  ;;  %8329 = vrsqrt.f32 %v2506_v32  ;;  %v2306_v57 = vld [vmem:[%s15529_s2 + $0x418] sm:$0xff] }
 0x40f   :  { %8331 = vrsqrt.f32 %v2497_v11  ;;  %v2499_v32 = vadd.f32 1e-05, %v2107_v36  ;;  %v2308_v36 = vld [vmem:[%s15529_s2 + $0x428] sm:$0xff] }
 0x410   :  { %v12853_v8 = vpop.permute.xlu1 %3211  ;;  %3531 = vperm.xlu1 %7910, %v2877_v63   ;;  %v12855_v40 = vpop.permute.xlu0 %3266  ;;  %v2293_v63 = vld [vmem:[%s15529_s2 + $0x3b0] sm:$0xff]  ;;  %v2508_v60 = vadd.f32 1e-05, %v2116_v44  ;;  %v16394_v44 = vld [vmem:[#allocation39_spill] sm:$0xff] }
 0x411   :  { %16384 = vst [vmem:[#allocation276_spill] sm:$0xff] %v12853_v8  ;;  %16385 = vst [vmem:[#allocation31_spill] sm:$0xff] %v12855_v40  ;;  %3586 = vperm.xlu0 %7909, %v2888_v16   ;;  %v8318_v40 = vpop.eup %8317  ;;  %v16391_v16 = vld [vmem:[#allocation38_spill] sm:$0xff]  ;;  %v2881_v43 = vmul.f32 %v8316_v9, %v2293_v63  ;;  %v2109_v9 = vmul.f32 0.020408163, %v16394_v44 }
 0x412   :  { %v2118_v24 = vmul.f32 0.020408163, %v16391_v16  ;;  %v8320_v49 = vpop.eup %8319  ;;  %v2892_v5 = vmul.f32 %v8318_v40, %v2304_v53  ;;  %8333 = vrsqrt.f32 %v2508_v60 }
 0x413   :  { %8335 = vrsqrt.f32 %v2499_v32  ;;  %v2501_v60 = vadd.f32 1e-05, %v2109_v9  ;;  %v2310_v9 = vld [vmem:[%s15529_s2 + $0x438] sm:$0xff] }
 0x414   :  { %v12865_v8 = vpop.permute.xlu1 %3221  ;;  %3541 = vperm.xlu1 %7910, %v2879_v18   ;;  %v12867_v22 = vpop.permute.xlu0 %3276  ;;  %v2295_v18 = vld [vmem:[%s15529_s2 + $0x3c0] sm:$0xff]  ;;  %v2510_v40 = vadd.f32 1e-05, %v2118_v24  ;;  %v16398_v24 = vld [vmem:[#allocation41_spill] sm:$0xff] }
 0x415   :  { %16388 = vst [vmem:[#allocation277_spill] sm:$0xff] %v12865_v8  ;;  %16389 = vst [vmem:[#allocation34_spill] sm:$0xff] %v12867_v22  ;;  %3596 = vperm.xlu0 %7909, %v2890_v19   ;;  %v8322_v22 = vpop.eup %8321  ;;  %v16395_v19 = vld [vmem:[#allocation40_spill] sm:$0xff]  ;;  %v2883_v53 = vmul.f32 %v8320_v49, %v2295_v18  ;;  %v2111_v49 = vmul.f32 0.020408163, %v16398_v24 }
 0x416   :  { %v2120_v63 = vmul.f32 0.020408163, %v16395_v19  ;;  %v8324_v37 = vpop.eup %8323  ;;  %v2894_v16 = vmul.f32 %v8322_v22, %v2306_v57  ;;  %8337 = vrsqrt.f32 %v2510_v40 }
 0x417   :  { %8339 = vrsqrt.f32 %v2501_v60  ;;  %v2503_v40 = vadd.f32 1e-05, %v2111_v49  ;;  %v2312_v49 = vld [vmem:[%s15529_s2 + $0x448] sm:$0xff] }
 0x418   :  { %v12877_v8 = vpop.permute.xlu1 %3231  ;;  %3551 = vperm.xlu1 %7910, %v2881_v43   ;;  %v12879_v31 = vpop.permute.xlu0 %3286  ;;  %v2297_v43 = vld [vmem:[%s15529_s2 + $0x3d0] sm:$0xff]  ;;  %v2512_v22 = vadd.f32 1e-05, %v2120_v63 }
 0x419   :  { %16392 = vst [vmem:[#allocation153_spill] sm:$0xff] %v12877_v8  ;;  %16393 = vst [vmem:[#allocation33_spill] sm:$0xff] %v12879_v31  ;;  %3606 = vperm.xlu0 %7909, %v2892_v5   ;;  %v8326_v31 = vpop.eup %8325  ;;  %v16399_v5 = vld [vmem:[#allocation42_spill] sm:$0xff]  ;;  %v2885_v57 = vmul.f32 %v8324_v37, %v2297_v43  ;;  %v16402_v63 = vld [vmem:[#allocation168_spill] sm:$0xff] }
 0x41a   :  { %v2122_v18 = vmul.f32 0.020408163, %v16399_v5  ;;  %v8328_v44 = vpop.eup %8327  ;;  %v2896_v19 = vmul.f32 %v8326_v31, %v2308_v36  ;;  %v2113_v37 = vmul.f32 0.020408163, %v16402_v63  ;;  %8341 = vrsqrt.f32 %v2512_v22 }
 0x41b   :  { %8343 = vrsqrt.f32 %v2503_v40 }
 0x41c   :  { %v12889_v8 = vpop.permute.xlu1 %3241  ;;  %3561 = vperm.xlu1 %7910, %v2883_v53   ;;  %v12891_v11 = vpop.permute.xlu0 %3296  ;;  %v2299_v53 = vld [vmem:[%s15529_s2 + $0x3e0] sm:$0xff]  ;;  %v2514_v31 = vadd.f32 1e-05, %v2122_v18  ;;  %v2505_v22 = vadd.f32 1e-05, %v2113_v37  ;;  %v16406_v18 = vld [vmem:[#allocation45_spill] sm:$0xff] }
 0x41d   :  { %16396 = vst [vmem:[#allocation160_spill] sm:$0xff] %v12889_v8  ;;  %16397 = vst [vmem:[#allocation161_spill] sm:$0xff] %v12891_v11  ;;  %3616 = vperm.xlu0 %7909, %v2894_v16   ;;  %v8330_v11 = vpop.eup %8329  ;;  %v16403_v16 = vld [vmem:[#allocation169_spill] sm:$0xff]  ;;  %v2887_v36 = vmul.f32 %v8328_v44, %v2299_v53  ;;  %v2115_v44 = vmul.f32 0.020408163, %v16406_v18 }
 0x41e   :  { %v2124_v43 = vmul.f32 0.020408163, %v16403_v16  ;;  %v8332_v24 = vpop.eup %8331  ;;  %v2898_v5 = vmul.f32 %v8330_v11, %v2310_v9  ;;  %8345 = vrsqrt.f32 %v2514_v31  ;;  %v2314_v37 = vld [vmem:[%s15529_s2 + $0x458] sm:$0xff] }
 0x41f   :  { %8347 = vrsqrt.f32 %v2505_v22  ;;  %v2507_v31 = vadd.f32 1e-05, %v2115_v44  ;;  %v2316_v44 = vld [vmem:[%s15529_s2 + $0x468] sm:$0xff] }
 0x420   :  { %v12901_v8 = vpop.permute.xlu1 %3251  ;;  %3571 = vperm.xlu1 %7910, %v2885_v57   ;;  %v12903_v32 = vpop.permute.xlu0 %3306  ;;  %v2301_v57 = vld [vmem:[%s15529_s2 + $0x3f0] sm:$0xff]  ;;  %v2516_v11 = vadd.f32 1e-05, %v2124_v43  ;;  %v16410_v43 = vld [vmem:[#allocation47_spill] sm:$0xff] }
 0x421   :  { %16400 = vst [vmem:[#allocation37_spill] sm:$0xff] %v12901_v8  ;;  %16401 = vst [vmem:[#allocation38_spill] sm:$0xff] %v12903_v32  ;;  %3626 = vperm.xlu0 %7909, %v2896_v19   ;;  %v8334_v32 = vpop.eup %8333  ;;  %v16407_v19 = vld [vmem:[#allocation46_spill] sm:$0xff]  ;;  %v2889_v9 = vmul.f32 %v8332_v24, %v2301_v57  ;;  %v2117_v24 = vmul.f32 0.020408163, %v16410_v43 }
 0x422   :  { %v2126_v53 = vmul.f32 0.020408163, %v16407_v19  ;;  %v8336_v63 = vpop.eup %8335  ;;  %v2900_v16 = vmul.f32 %v8334_v32, %v2312_v49  ;;  %8349 = vrsqrt.f32 %v2516_v11 }
 0x423   :  { %8351 = vrsqrt.f32 %v2507_v31  ;;  %v2509_v11 = vadd.f32 1e-05, %v2117_v24  ;;  %v2318_v24 = vld [vmem:[%s15529_s2 + $0x478] sm:$0xff] }
 0x424   :  { %v12913_v8 = vpop.permute.xlu1 %3261  ;;  %3581 = vperm.xlu1 %7910, %v2887_v36   ;;  %v12915_v60 = vpop.permute.xlu0 %3316  ;;  %v2303_v36 = vld [vmem:[%s15529_s2 + $0x400] sm:$0xff]  ;;  %v2518_v32 = vadd.f32 1e-05, %v2126_v53  ;;  %v16414_v53 = vld [vmem:[#allocation49_spill] sm:$0xff] }
 0x425   :  { %16404 = vst [vmem:[#allocation39_spill] sm:$0xff] %v12913_v8  ;;  %16405 = vst [vmem:[#allocation40_spill] sm:$0xff] %v12915_v60  ;;  %3636 = vperm.xlu0 %7909, %v2898_v5   ;;  %v8338_v60 = vpop.eup %8337  ;;  %v16411_v5 = vld [vmem:[#allocation48_spill] sm:$0xff]  ;;  %v2891_v49 = vmul.f32 %v8336_v63, %v2303_v36  ;;  %v2119_v63 = vmul.f32 0.020408163, %v16414_v53 }
 0x426   :  { %v2128_v57 = vmul.f32 0.020408163, %v16411_v5  ;;  %v8340_v18 = vpop.eup %8339  ;;  %v2902_v19 = vmul.f32 %v8338_v60, %v2314_v37  ;;  %8353 = vrsqrt.f32 %v2518_v32 }
 0x427   :  { %8355 = vrsqrt.f32 %v2509_v11  ;;  %v2511_v32 = vadd.f32 1e-05, %v2119_v63  ;;  %v2320_v63 = vld [vmem:[%s15529_s2 + $0x488] sm:$0xff] }
 0x428   :  { %v12925_v8 = vpop.permute.xlu1 %3271  ;;  %3591 = vperm.xlu1 %7910, %v2889_v9   ;;  %v12927_v40 = vpop.permute.xlu0 %3326  ;;  %v2305_v9 = vld [vmem:[%s15529_s2 + $0x410] sm:$0xff]  ;;  %v2520_v60 = vadd.f32 1e-05, %v2128_v57 }
 0x429   :  { %16408 = vst [vmem:[#allocation41_spill] sm:$0xff] %v12925_v8  ;;  %16409 = vst [vmem:[#allocation42_spill] sm:$0xff] %v12927_v40  ;;  %3646 = vperm.xlu0 %7909, %v2900_v16   ;;  %v8342_v40 = vpop.eup %8341  ;;  %v16415_v16 = vld [vmem:[#allocation50_spill] sm:$0xff]  ;;  %v2893_v37 = vmul.f32 %v8340_v18, %v2305_v9  ;;  %v16418_v57 = vld [vmem:[#allocation176_spill] sm:$0xff] }
 0x42a   :  { %v2130_v36 = vmul.f32 0.020408163, %v16415_v16  ;;  %v8344_v43 = vpop.eup %8343  ;;  %v2904_v5 = vmul.f32 %v8342_v40, %v2316_v44  ;;  %v2121_v18 = vmul.f32 0.020408163, %v16418_v57  ;;  %8357 = vrsqrt.f32 %v2520_v60 }
 0x42b   :  { %8359 = vrsqrt.f32 %v2511_v32 }
 0x42c   :  { %v12937_v8 = vpop.permute.xlu1 %3281  ;;  %3601 = vperm.xlu1 %7910, %v2891_v49   ;;  %v12939_v22 = vpop.permute.xlu0 %3336  ;;  %v2307_v49 = vld [vmem:[%s15529_s2 + $0x420] sm:$0xff]  ;;  %v2522_v40 = vadd.f32 1e-05, %v2130_v36  ;;  %v2513_v60 = vadd.f32 1e-05, %v2121_v18  ;;  %v16421_v36 = vld [vmem:[#allocation53_spill] sm:$0xff] }
 0x42d   :  { %16412 = vst [vmem:[#allocation168_spill] sm:$0xff] %v12937_v8  ;;  %16413 = vst [vmem:[#allocation169_spill] sm:$0xff] %v12939_v22  ;;  %3656 = vperm.xlu0 %7909, %v2902_v19   ;;  %v8346_v22 = vpop.eup %8345  ;;  %v16419_v19 = vld [vmem:[#allocation177_spill] sm:$0xff]  ;;  %v2895_v44 = vmul.f32 %v8344_v43, %v2307_v49  ;;  %v2123_v43 = vmul.f32 0.020408163, %v16421_v36  ;;  %v2313_v36 = vld [vmem:[%s15529_s2 + $0x450] sm:$0xff] }
 0x42e   :  { %v2132_v9 = vmul.f32 0.020408163, %v16419_v19  ;;  %v8348_v53 = vpop.eup %8347  ;;  %v2906_v16 = vmul.f32 %v8346_v22, %v2318_v24  ;;  %8361 = vrsqrt.f32 %v2522_v40  ;;  %v2311_v19 = vld [vmem:[%s15529_s2 + $0x440] sm:$0xff]  ;;  %v2322_v18 = vld [vmem:[%s15529_s2 + $0x498] sm:$0xff] }
 0x42f   :  { %8363 = vrsqrt.f32 %v2513_v60  ;;  %v2515_v40 = vadd.f32 1e-05, %v2123_v43  ;;  %v2324_v43 = vld [vmem:[%s15529_s2 + $0x4a8] sm:$0xff] }
 0x430   :  { %v12949_v8 = vpop.permute.xlu1 %3291  ;;  %3611 = vperm.xlu1 %7910, %v2893_v37   ;;  %v12951_v31 = vpop.permute.xlu0 %3346  ;;  %v2309_v37 = vld [vmem:[%s15529_s2 + $0x430] sm:$0xff]  ;;  %v2524_v22 = vadd.f32 1e-05, %v2132_v9 }
 0x431   :  { %16416 = vst [vmem:[#allocation45_spill] sm:$0xff] %v12949_v8  ;;  %16417 = vst [vmem:[#allocation46_spill] sm:$0xff] %v12951_v31  ;;  %3666 = vperm.xlu0 %7909, %v2904_v5   ;;  %v8350_v31 = vpop.eup %8349  ;;  %v2134_v5 = vmul.f32 0.020408163, %v12267_v41  ;;  %v2897_v49 = vmul.f32 %v8348_v53, %v2309_v37  ;;  %v16423_v41 = vld [vmem:[#allocation55_spill] sm:$0xff] }
 0x432   :  { %v8352_v24 = vpop.eup %8351  ;;  %v2908_v57 = vmul.f32 %v8350_v31, %v2320_v63  ;;  %v2125_v9 = vmul.f32 0.020408163, %v16423_v41  ;;  %8365 = vrsqrt.f32 %v2524_v22  ;;  %v2136_v53 = vmul.f32 0.020408163, %v12279_v23  ;;  %v16425_v23 = vld [vmem:[#allocation57_spill] sm:$0xff]  ;;  %v2315_v41 = vld [vmem:[%s15529_s2 + $0x460] sm:$0xff] }
 0x433   :  { %v2526_v31 = vadd.f32 1e-05, %v2134_v5  ;;  %8367 = vrsqrt.f32 %v2515_v40  ;;  %v2127_v5 = vmul.f32 0.020408163, %v16425_v23  ;;  %v2317_v23 = vld [vmem:[%s15529_s2 + $0x470] sm:$0xff] }
 0x434   :  { %v12961_v8 = vpop.permute.xlu1 %3301  ;;  %3621 = vperm.xlu1 %7910, %v2895_v44   ;;  %v12963_v11 = vpop.permute.xlu0 %3356  ;;  %v2517_v22 = vadd.f32 1e-05, %v2125_v9  ;;  %v2326_v9 = vld [vmem:[%s15529_s2 + $0x4b8] sm:$0xff] }
 0x435   :  { %16420 = vst [vmem:[#allocation47_spill] sm:$0xff] %v12963_v11  ;;  %3676 = vperm.xlu0 %7909, %v2906_v16   ;;  %v8354_v44 = vpop.eup %8353  ;;  %v2899_v16 = vmul.f32 %v8352_v24, %v2311_v19  ;;  %8369 = vrsqrt.f32 %v2526_v31  ;;  %v2528_v24 = vadd.f32 1e-05, %v2136_v53  ;;  %v2519_v31 = vadd.f32 1e-05, %v2127_v5  ;;  %v2328_v5 = vld [vmem:[%s15529_s2 + $0x4c8] sm:$0xff] }
 0x436   :  { %v8356_v37 = vpop.eup %8355  ;;  %v2910_v63 = vmul.f32 %v8354_v44, %v2322_v18  ;;  %8371 = vrsqrt.f32 %v2517_v22 }
 0x437   :  { %v2901_v19 = vmul.f32 %v8356_v37, %v2313_v36  ;;  %8373 = vrsqrt.f32 %v2528_v24 }
 0x438   :  { %v12973_v11 = vpop.permute.xlu1 %3311  ;;  %3631 = vperm.xlu1 %7910, %v2897_v49   ;;  %v12975_v32 = vpop.permute.xlu0 %3366  ;;  %8375 = vrsqrt.f32 %v2519_v31 }
 0x439   :  { %16422 = vst [vmem:[#allocation48_spill] sm:$0xff] %v12973_v11  ;;  %3686 = vperm.xlu0 %7909, %v2908_v57   ;;  %v8358_v49 = vpop.eup %8357  ;;  %v2138_v57 = vmul.f32 0.020408163, %v12291_v61  ;;  %v16427_v61 = vld [vmem:[#allocation184_spill] sm:$0xff] }
 0x43a   :  { %v8360_v44 = vpop.eup %8359  ;;  %v2912_v18 = vmul.f32 %v8358_v49, %v2324_v43  ;;  %v2129_v53 = vmul.f32 0.020408163, %v16427_v61  ;;  %v2319_v61 = vld [vmem:[%s15529_s2 + $0x480] sm:$0xff] }
 0x43b   :  { %v2530_v37 = vadd.f32 1e-05, %v2138_v57  ;;  %v2903_v36 = vmul.f32 %v8360_v44, %v2315_v41 }
 0x43c   :  { %v12985_v11 = vpop.permute.xlu1 %3321  ;;  %3641 = vperm.xlu1 %7910, %v2899_v16   ;;  %v12987_v60 = vpop.permute.xlu0 %3376  ;;  %v2521_v24 = vadd.f32 1e-05, %v2129_v53  ;;  %v2330_v53 = vld [vmem:[%s15529_s2 + $0x4d8] sm:$0xff] }
 0x43d   :  { %16424 = vst [vmem:[#allocation49_spill] sm:$0xff] %v12985_v11  ;;  %3696 = vperm.xlu0 %7909, %v2910_v63   ;;  %v8362_v16 = vpop.eup %8361  ;;  %v2140_v63 = vmul.f32 0.020408163, %v12303_v38  ;;  %v16430_v38 = vld [vmem:[#allocation61_spill] sm:$0xff]  ;;  %8377 = vrsqrt.f32 %v2530_v37 }
 0x43e   :  { %v8364_v49 = vpop.eup %8363  ;;  %v2914_v43 = vmul.f32 %v8362_v16, %v2326_v9  ;;  %v2131_v57 = vmul.f32 0.020408163, %v16430_v38  ;;  %8379 = vrsqrt.f32 %v2521_v24  ;;  %v2321_v38 = vld [vmem:[%s15529_s2 + $0x490] sm:$0xff] }
 0x43f   :  { %v2532_v44 = vadd.f32 1e-05, %v2140_v63  ;;  %v2905_v41 = vmul.f32 %v8364_v49, %v2317_v23 }
 0x440   :  { %v12997_v11 = vpop.permute.xlu1 %3331  ;;  %3651 = vperm.xlu1 %7910, %v2901_v19   ;;  %v12999_v40 = vpop.permute.xlu0 %3386  ;;  %v2523_v37 = vadd.f32 1e-05, %v2131_v57  ;;  %v2332_v57 = vld [vmem:[%s15529_s2 + $0x4e8] sm:$0xff] }
 0x441   :  { %16426 = vst [vmem:[#allocation50_spill] sm:$0xff] %v12997_v11  ;;  %3706 = vperm.xlu0 %7909, %v2912_v18   ;;  %v8366_v19 = vpop.eup %8365  ;;  %v2142_v18 = vmul.f32 0.020408163, %v12315_v50  ;;  %v16433_v50 = vld [vmem:[#allocation54_spill] sm:$0xff]  ;;  %8381 = vrsqrt.f32 %v2532_v44 }
 0x442   :  { %v8368_v16 = vpop.eup %8367  ;;  %v2916_v9 = vmul.f32 %v8366_v19, %v2328_v5  ;;  %v2133_v63 = vmul.f32 0.020408163, %v16433_v50  ;;  %8383 = vrsqrt.f32 %v2523_v37  ;;  %v2323_v50 = vld [vmem:[%s15529_s2 + $0x4a0] sm:$0xff] }
 0x443   :  { %v2534_v49 = vadd.f32 1e-05, %v2142_v18  ;;  %v2907_v23 = vmul.f32 %v8368_v16, %v2319_v61 }
 0x444   :  { %v13009_v11 = vpop.permute.xlu1 %3341  ;;  %3661 = vperm.xlu1 %7910, %v2903_v36   ;;  %v13011_v22 = vpop.permute.xlu0 %3396  ;;  %v2525_v44 = vadd.f32 1e-05, %v2133_v63  ;;  %v2334_v63 = vld [vmem:[%s15529_s2 + $0x4f8] sm:$0xff] }
 0x445   :  { %16428 = vst [vmem:[#allocation176_spill] sm:$0xff] %v13009_v11  ;;  %16429 = vst [vmem:[#allocation177_spill] sm:$0xff] %v13011_v22  ;;  %3716 = vperm.xlu0 %7909, %v2914_v43   ;;  %v8370_v36 = vpop.eup %8369  ;;  %v2144_v43 = vmul.f32 0.020408163, %v12327_v59  ;;  %v16435_v59 = vld [vmem:[#allocation63_spill] sm:$0xff]  ;;  %8385 = vrsqrt.f32 %v2534_v49 }
 0x446   :  { %v8372_v19 = vpop.eup %8371  ;;  %v2918_v5 = vmul.f32 %v8370_v36, %v2330_v53  ;;  %v2135_v18 = vmul.f32 0.020408163, %v16435_v59  ;;  %8387 = vrsqrt.f32 %v2525_v44  ;;  %v2325_v59 = vld [vmem:[%s15529_s2 + $0x4b0] sm:$0xff] }
 0x447   :  { %v2536_v16 = vadd.f32 1e-05, %v2144_v43  ;;  %v2909_v61 = vmul.f32 %v8372_v19, %v2321_v38 }
 0x448   :  { %v13021_v11 = vpop.permute.xlu1 %3351  ;;  %3671 = vperm.xlu1 %7910, %v2905_v41   ;;  %v13023_v31 = vpop.permute.xlu0 %3406  ;;  %v2527_v49 = vadd.f32 1e-05, %v2135_v18  ;;  %v2336_v18 = vld [vmem:[%s15529_s2 + $0x508] sm:$0xff] }
 0x449   :  { %16431 = vst [vmem:[#allocation53_spill] sm:$0xff] %v13021_v11  ;;  %16432 = vst [vmem:[#allocation55_spill] sm:$0xff] %v13023_v31  ;;  %3726 = vperm.xlu0 %7909, %v2916_v9   ;;  %v8374_v41 = vpop.eup %8373  ;;  %v2146_v9 = vmul.f32 0.020408163, %v12339_v48  ;;  %v16437_v48 = vld [vmem:[#allocation56_spill] sm:$0xff]  ;;  %8389 = vrsqrt.f32 %v2536_v16 }
 0x44a   :  { %v8376_v36 = vpop.eup %8375  ;;  %v2920_v53 = vmul.f32 %v8374_v41, %v2332_v57  ;;  %v2137_v43 = vmul.f32 0.020408163, %v16437_v48  ;;  %8391 = vrsqrt.f32 %v2527_v49  ;;  %v2327_v48 = vld [vmem:[%s15529_s2 + $0x4c0] sm:$0xff] }
 0x44b   :  { %v2538_v19 = vadd.f32 1e-05, %v2146_v9  ;;  %v2911_v38 = vmul.f32 %v8376_v36, %v2323_v50 }
 0x44c   :  { %v13033_v11 = vpop.permute.xlu1 %3361  ;;  %3681 = vperm.xlu1 %7910, %v2907_v23   ;;  %v13035_v24 = vpop.permute.xlu0 %3416  ;;  %v2529_v16 = vadd.f32 1e-05, %v2137_v43  ;;  %v2338_v43 = vld [vmem:[%s15529_s2 + $0x518] sm:$0xff] }
 0x44d   :  { %16434 = vst [vmem:[#allocation57_spill] sm:$0xff] %v13035_v24  ;;  %3736 = vperm.xlu0 %7909, %v2918_v5   ;;  %v8378_v23 = vpop.eup %8377  ;;  %v2148_v5 = vmul.f32 0.020408163, %v12351_v12  ;;  %v16439_v12 = vld [vmem:[#allocation58_spill] sm:$0xff]  ;;  %8393 = vrsqrt.f32 %v2538_v19 }
 0x44e   :  { %v8380_v41 = vpop.eup %8379  ;;  %v2922_v57 = vmul.f32 %v8378_v23, %v2334_v63  ;;  %v2139_v9 = vmul.f32 0.020408163, %v16439_v12  ;;  %8395 = vrsqrt.f32 %v2529_v16  ;;  %v2329_v12 = vld [vmem:[%s15529_s2 + $0x4d0] sm:$0xff] }
 0x44f   :  { %v2540_v36 = vadd.f32 1e-05, %v2148_v5  ;;  %v2913_v50 = vmul.f32 %v8380_v41, %v2325_v59 }
 0x450   :  { %v13045_v24 = vpop.permute.xlu1 %3371  ;;  %3691 = vperm.xlu1 %7910, %v2909_v61   ;;  %v13047_v37 = vpop.permute.xlu0 %3426  ;;  %v2531_v19 = vadd.f32 1e-05, %v2139_v9  ;;  %v2340_v9 = vld [vmem:[%s15529_s2 + $0x528] sm:$0xff] }
 0x451   :  { %16436 = vst [vmem:[#allocation184_spill] sm:$0xff] %v13047_v37  ;;  %3746 = vperm.xlu0 %7909, %v2920_v53   ;;  %v8382_v61 = vpop.eup %8381  ;;  %v2150_v53 = vmul.f32 0.020408163, %v12363_v33  ;;  %v16441_v33 = vld [vmem:[#allocation185_spill] sm:$0xff]  ;;  %8397 = vrsqrt.f32 %v2540_v36 }
 0x452   :  { %v8384_v23 = vpop.eup %8383  ;;  %v2924_v63 = vmul.f32 %v8382_v61, %v2336_v18  ;;  %v2141_v5 = vmul.f32 0.020408163, %v16441_v33  ;;  %8399 = vrsqrt.f32 %v2531_v19  ;;  %v2331_v33 = vld [vmem:[%s15529_s2 + $0x4e0] sm:$0xff] }
 0x453   :  { %v2542_v41 = vadd.f32 1e-05, %v2150_v53  ;;  %v2915_v59 = vmul.f32 %v8384_v23, %v2327_v48 }
 0x454   :  { %v13057_v37 = vpop.permute.xlu1 %3381  ;;  %3701 = vperm.xlu1 %7910, %v2911_v38   ;;  %v13059_v44 = vpop.permute.xlu0 %3436  ;;  %v2533_v36 = vadd.f32 1e-05, %v2141_v5  ;;  %v2342_v5 = vld [vmem:[%s15529_s2 + $0x538] sm:$0xff] }
 0x455   :  { %16438 = vst [vmem:[#allocation61_spill] sm:$0xff] %v13059_v44  ;;  %3756 = vperm.xlu0 %7909, %v2922_v57   ;;  %v8386_v38 = vpop.eup %8385  ;;  %v2152_v57 = vmul.f32 0.020408163, %v12375_v52  ;;  %v16443_v52 = vld [vmem:[#allocation62_spill] sm:$0xff]  ;;  %8401 = vrsqrt.f32 %v2542_v41 }
 0x456   :  { %v8388_v61 = vpop.eup %8387  ;;  %v2926_v18 = vmul.f32 %v8386_v38, %v2338_v43  ;;  %v2143_v53 = vmul.f32 0.020408163, %v16443_v52  ;;  %8403 = vrsqrt.f32 %v2533_v36  ;;  %v2333_v52 = vld [vmem:[%s15529_s2 + $0x4f0] sm:$0xff] }
 0x457   :  { %v2544_v23 = vadd.f32 1e-05, %v2152_v57  ;;  %v2917_v48 = vmul.f32 %v8388_v61, %v2329_v12 }
 0x458   :  { %v13069_v44 = vpop.permute.xlu1 %3391  ;;  %3711 = vperm.xlu1 %7910, %v2913_v50   ;;  %v13071_v49 = vpop.permute.xlu0 %3446  ;;  %v2535_v41 = vadd.f32 1e-05, %v2143_v53  ;;  %v2344_v53 = vld [vmem:[%s15529_s2 + $0x548] sm:$0xff] }
 0x459   :  { %16440 = vst [vmem:[#allocation54_spill] sm:$0xff] %v13069_v44  ;;  %3766 = vperm.xlu0 %7909, %v2924_v63   ;;  %v8390_v50 = vpop.eup %8389  ;;  %v2154_v63 = vmul.f32 0.020408163, %v12387_v46  ;;  %v16446_v46 = vld [vmem:[#allocation64_spill] sm:$0xff]  ;;  %8405 = vrsqrt.f32 %v2544_v23 }
 0x45a   :  { %v8392_v38 = vpop.eup %8391  ;;  %v2928_v43 = vmul.f32 %v8390_v50, %v2340_v9  ;;  %v2145_v57 = vmul.f32 0.020408163, %v16446_v46  ;;  %8407 = vrsqrt.f32 %v2535_v41  ;;  %v2335_v46 = vld [vmem:[%s15529_s2 + $0x500] sm:$0xff] }
 0x45b   :  { %v2546_v61 = vadd.f32 1e-05, %v2154_v63  ;;  %v2919_v12 = vmul.f32 %v8392_v38, %v2331_v33 }
 0x45c   :  { %v13081_v31 = vpop.permute.xlu1 %3401  ;;  %3721 = vperm.xlu1 %7910, %v2915_v59   ;;  %v13083_v16 = vpop.permute.xlu0 %3456  ;;  %v2537_v23 = vadd.f32 1e-05, %v2145_v57  ;;  %v2346_v57 = vld [vmem:[%s15529_s2 + $0x558] sm:$0xff] }
 0x45d   :  { %16442 = vst [vmem:[#allocation63_spill] sm:$0xff] %v13081_v31  ;;  %3776 = vperm.xlu0 %7909, %v2926_v18   ;;  %v8394_v59 = vpop.eup %8393  ;;  %v2156_v18 = vmul.f32 0.020408163, %v12399_v3  ;;  %v16449_v3 = vld [vmem:[#allocation65_spill] sm:$0xff]  ;;  %8409 = vrsqrt.f32 %v2546_v61 }
 0x45e   :  { %v8396_v50 = vpop.eup %8395  ;;  %v2930_v9 = vmul.f32 %v8394_v59, %v2342_v5  ;;  %v2147_v63 = vmul.f32 0.020408163, %v16449_v3  ;;  %8411 = vrsqrt.f32 %v2537_v23  ;;  %v2337_v3 = vld [vmem:[%s15529_s2 + $0x510] sm:$0xff] }
 0x45f   :  { %v2548_v38 = vadd.f32 1e-05, %v2156_v18  ;;  %v2921_v33 = vmul.f32 %v8396_v50, %v2333_v52 }
 0x460   :  { %v13093_v31 = vpop.permute.xlu1 %3411  ;;  %3731 = vperm.xlu1 %7910, %v2917_v48   ;;  %v13095_v19 = vpop.permute.xlu0 %3466  ;;  %v2539_v61 = vadd.f32 1e-05, %v2147_v63  ;;  %v2348_v63 = vld [vmem:[%s15529_s2 + $0x568] sm:$0xff] }
 0x461   :  { %16444 = vst [vmem:[#allocation56_spill] sm:$0xff] %v13093_v31  ;;  %16445 = vst [vmem:[#allocation58_spill] sm:$0xff] %v13095_v19  ;;  %3786 = vperm.xlu0 %7909, %v2928_v43   ;;  %v8398_v48 = vpop.eup %8397  ;;  %v2158_v43 = vmul.f32 0.020408163, %v12411_v15  ;;  %v16452_v15 = vld [vmem:[#allocation68_spill] sm:$0xff]  ;;  %8413 = vrsqrt.f32 %v2548_v38 }
 0x462   :  { %v8400_v59 = vpop.eup %8399  ;;  %v2932_v5 = vmul.f32 %v8398_v48, %v2344_v53  ;;  %v2149_v18 = vmul.f32 0.020408163, %v16452_v15  ;;  %8415 = vrsqrt.f32 %v2539_v61 }
 0x463   :  { %v2550_v50 = vadd.f32 1e-05, %v2158_v43  ;;  %v2923_v52 = vmul.f32 %v8400_v59, %v2335_v46  ;;  %v2162_v59 = vmul.f32 0.020408163, %v12435_v51  ;;  %v2153_v51 = vmul.f32 0.020408163, %v12389_v39 }
 0x464   :  { %v13105_v31 = vpop.permute.xlu1 %3421  ;;  %3741 = vperm.xlu1 %7910, %v2919_v12   ;;  %v13107_v36 = vpop.permute.xlu0 %3476  ;;  %v2541_v38 = vadd.f32 1e-05, %v2149_v18  ;;  %v2352_v39 = vld [vmem:[%s15529_s2 + $0x588] sm:$0xff] }
 0x465   :  { %16447 = vst [vmem:[#allocation185_spill] sm:$0xff] %v13105_v31  ;;  %16448 = vst [vmem:[#allocation62_spill] sm:$0xff] %v13107_v36  ;;  %3796 = vperm.xlu0 %7909, %v2930_v9   ;;  %v8402_v12 = vpop.eup %8401  ;;  %v2160_v9 = vmul.f32 0.020408163, %v12423_v10  ;;  %v2151_v10 = vmul.f32 0.020408163, %v12377_v26  ;;  %8417 = vrsqrt.f32 %v2550_v50 }
 0x466   :  { %v8404_v48 = vpop.eup %8403  ;;  %v2934_v53 = vmul.f32 %v8402_v12, %v2346_v57  ;;  %v2339_v57 = vld [vmem:[%s15529_s2 + $0x520] sm:$0xff]  ;;  %v2350_v26 = vld [vmem:[%s15529_s2 + $0x578] sm:$0xff]  ;;  %8419 = vrsqrt.f32 %v2541_v38  ;;  %v2554_v50 = vadd.f32 1e-05, %v2162_v59  ;;  %v2166_v59 = vmul.f32 0.020408163, %v12459_v17 }
 0x467   :  { %v2552_v43 = vadd.f32 1e-05, %v2160_v9  ;;  %v2543_v18 = vadd.f32 1e-05, %v2151_v10  ;;  %v2164_v9 = vmul.f32 0.020408163, %v12447_v20 }
 0x468   :  { %v13117_v31 = vpop.permute.xlu1 %3431  ;;  %3751 = vperm.xlu1 %7910, %v2921_v33   ;;  %v13119_v41 = vpop.permute.xlu0 %3486  ;;  %v2545_v10 = vadd.f32 1e-05, %v2153_v51  ;;  %v2155_v20 = vmul.f32 0.020408163, %v12401_v21  ;;  %v2354_v21 = vld [vmem:[%s15529_s2 + $0x598] sm:$0xff]  ;;  %v16544_v36 = vld [vmem:[#allocation74_spill] sm:$0xff] }
 0x469   :  { %16450 = vst [vmem:[#allocation64_spill] sm:$0xff] %v13117_v31  ;;  %16451 = vst [vmem:[#allocation65_spill] sm:$0xff] %v13119_v41  ;;  %3806 = vperm.xlu0 %7909, %v2932_v5   ;;  %v8406_v33 = vpop.eup %8405  ;;  %v2925_v5 = vmul.f32 %v8404_v48, %v2337_v3  ;;  %8421 = vrsqrt.f32 %v2552_v43  ;;  %v2556_v43 = vadd.f32 1e-05, %v2164_v9  ;;  %v16458_v17 = vld [vmem:[#allocation69_spill] sm:$0xff] }
 0x46a   :  { %v8408_v46 = vpop.eup %8407  ;;  %v2936_v12 = vmul.f32 %v8406_v33, %v2348_v63  ;;  %v2341_v33 = vld [vmem:[%s15529_s2 + $0x530] sm:$0xff]  ;;  %8423 = vrsqrt.f32 %v2543_v18  ;;  %v2547_v51 = vadd.f32 1e-05, %v2155_v20  ;;  %v2558_v9 = vadd.f32 1e-05, %v2166_v59  ;;  %v2356_v20 = vld [vmem:[%s15529_s2 + $0x5a8] sm:$0xff] }
 0x46b   :  { %v8410_v15 = vpop.eup %8409  ;;  %v2927_v48 = vmul.f32 %v8408_v46, %v2339_v57  ;;  %8425 = vrsqrt.f32 %v2554_v50  ;;  %v2157_v50 = vmul.f32 0.020408163, %v16458_v17 }
 0x46c   :  { %v13129_v31 = vpop.permute.xlu1 %3441  ;;  %3761 = vperm.xlu1 %7910, %v2923_v52   ;;  %v13131_v23 = vpop.permute.xlu0 %3496  ;;  %v2938_v3 = vmul.f32 %v8410_v15, %v2350_v26  ;;  %v2343_v15 = vld [vmem:[%s15529_s2 + $0x540] sm:$0xff]  ;;  %8427 = vrsqrt.f32 %v2545_v10 }
 0x46d   :  { %16453 = vst [vmem:[#allocation68_spill] sm:$0xff] %v13131_v23  ;;  %3816 = vperm.xlu0 %7909, %v2934_v53   ;;  %v8412_v53 = vpop.eup %8411  ;;  %8429 = vrsqrt.f32 %v2556_v43  ;;  %v2549_v43 = vadd.f32 1e-05, %v2157_v50 }
 0x46e   :  { %v8414_v63 = vpop.eup %8413  ;;  %v2929_v46 = vmul.f32 %v8412_v53, %v2341_v33  ;;  %v2168_v53 = vmul.f32 0.020408163, %v12471_v25  ;;  %8431 = vrsqrt.f32 %v2547_v51  ;;  %v2159_v25 = vmul.f32 0.020408163, %v12425_v62  ;;  %v2358_v62 = vld [vmem:[%s15529_s2 + $0x5b8] sm:$0xff] }
 0x46f   :  { %v2940_v57 = vmul.f32 %v8414_v63, %v2352_v39  ;;  %v2345_v39 = vld [vmem:[%s15529_s2 + $0x550] sm:$0xff]  ;;  %8433 = vrsqrt.f32 %v2558_v9 }
 0x470   :  { %v13141_v52 = vpop.permute.xlu1 %3451  ;;  %3771 = vperm.xlu1 %7910, %v2925_v5   ;;  %v13143_v61 = vpop.permute.xlu0 %3506  ;;  %v2560_v59 = vadd.f32 1e-05, %v2168_v53  ;;  %8435 = vrsqrt.f32 %v2549_v43  ;;  %v2551_v50 = vadd.f32 1e-05, %v2159_v25  ;;  %v2172_v53 = vmul.f32 0.020408163, %v12495_v29 }
 0x471   :  { %16454 = vst [vmem:[#allocation281_spill] sm:$0xff] %v13143_v61  ;;  %3826 = vperm.xlu0 %7909, %v2936_v12   ;;  %v8416_v12 = vpop.eup %8415  ;;  %v2163_v29 = vmul.f32 0.020408163, %v12449_v27  ;;  %v2362_v27 = vld [vmem:[%s15529_s2 + $0x5d8] sm:$0xff] }
 0x472   :  { %v8418_v26 = vpop.eup %8417  ;;  %8437 = vrsqrt.f32 %v2560_v59  ;;  %v2564_v59 = vadd.f32 1e-05, %v2172_v53  ;;  %v8766_v61 = vld [vmem:[%s15529_s2 + $0x238] sm:$0xff] }
 0x473   :  { %v8420_v33 = vpop.eup %8419  ;;  %v2942_v63 = vmul.f32 %v8418_v26, %v2354_v21  ;;  %v2347_v21 = vld [vmem:[%s15529_s2 + $0x560] sm:$0xff]  ;;  %8439 = vrsqrt.f32 %v2551_v50 }
 0x474   :  { %v13153_v5 = vpop.permute.xlu1 %3461  ;;  %3781 = vperm.xlu1 %7910, %v2927_v48   ;;  %v13155_v38 = vpop.permute.xlu0 %3516 }
 0x475   :  { %16455 = vst [vmem:[#allocation282_spill] sm:$0xff] %v13153_v5  ;;  %16456 = vst [vmem:[#allocation283_spill] sm:$0xff] %v13155_v38  ;;  %3836 = vperm.xlu0 %7909, %v2938_v3   ;;  %v2931_v3 = vmul.f32 %v8416_v12, %v2343_v15  ;;  %v2170_v12 = vmul.f32 0.020408163, %v12483_v14  ;;  %v2161_v14 = vmul.f32 0.020408163, %v12437_v35 }
 0x476   :  { %v2360_v35 = vld [vmem:[%s15529_s2 + $0x5c8] sm:$0xff]  ;;  %v16547_v5 = vld [vmem:[#allocation93_spill] sm:$0xff] }
 0x477   :  { %v2562_v9 = vadd.f32 1e-05, %v2170_v12  ;;  %v2553_v25 = vadd.f32 1e-05, %v2161_v14  ;;  %v2174_v12 = vmul.f32 0.020408163, %v12507_v56  ;;  %v3957_v19 = vmul.f32 %v12661_v55, %v16547_v5 }
 0x478   :  { %v13165_v48 = vpop.permute.xlu1 %3471  ;;  %3791 = vperm.xlu1 %7910, %v2929_v46   ;;  %v13167_v18 = vpop.permute.xlu0 %3526  ;;  %v2555_v14 = vadd.f32 1e-05, %v2163_v29  ;;  %v2165_v56 = vmul.f32 0.020408163, %v12461_v0  ;;  %v2364_v0 = vld [vmem:[%s15529_s2 + $0x5e8] sm:$0xff] }
 0x479   :  { %16457 = vst [vmem:[#allocation284_spill] sm:$0xff] %v13165_v48  ;;  %3846 = vperm.xlu0 %7909, %v2940_v57   ;;  %v8422_v46 = vpop.eup %8421  ;;  %v2933_v57 = vmul.f32 %v8420_v33, %v2345_v39  ;;  %8441 = vrsqrt.f32 %v2562_v9  ;;  %v2566_v9 = vadd.f32 1e-05, %v2174_v12  ;;  %v2167_v29 = vmul.f32 0.020408163, %v12473_v6  ;;  %v8774_v48 = vld [vmem:[%s15529_s2 + $0x280] sm:$0xff] }
 0x47a   :  { %v8424_v15 = vpop.eup %8423  ;;  %v2944_v26 = vmul.f32 %v8422_v46, %v2356_v20  ;;  %v2349_v46 = vld [vmem:[%s15529_s2 + $0x570] sm:$0xff]  ;;  %8443 = vrsqrt.f32 %v2553_v25  ;;  %v2557_v25 = vadd.f32 1e-05, %v2165_v56  ;;  %v2169_v56 = vmul.f32 0.020408163, %v12485_v45 }
 0x47b   :  { %v8426_v17 = vpop.eup %8425  ;;  %v2935_v33 = vmul.f32 %v8424_v15, %v2347_v21  ;;  %8445 = vrsqrt.f32 %v2564_v59  ;;  %v2559_v6 = vadd.f32 1e-05, %v2167_v29  ;;  %v2171_v29 = vmul.f32 0.020408163, %v12502_v13  ;;  %v7919_v55 = vld [vmem:[%s15530_s1 + $0x4] ss:$52 sps:$4 sm:$0xff]  }
 0x47c   :  { %v13177_v38 = vpop.permute.xlu1 %3481  ;;  %3801 = vperm.xlu1 %7910, %v2931_v3   ;;  %v13179_v10 = vpop.permute.xlu0 %3536  ;;  %v2946_v39 = vmul.f32 %v8426_v17, %v2358_v62  ;;  %v2351_v17 = vld [vmem:[%s15529_s2 + $0x580] sm:$0xff]  ;;  %8447 = vrsqrt.f32 %v2555_v14  ;;  %v2366_v14 = vld [vmem:[%s15529_s2 + $0x5f8] sm:$0xff]  ;;  %v2561_v45 = vadd.f32 1e-05, %v2169_v56  ;;  %v2173_v56 = vmul.f32 0.020408163, %v12517_v47  ;;  %6294 = vmatprep.mubr.bf16.mxu0 %v7919_v55 }
 0x47d   :  { %16459 = vst [vmem:[#allocation69_spill] sm:$0xff] %v13177_v38  ;;  %3856 = vperm.xlu0 %7909, %v2942_v63   ;;  %v8428_v63 = vpop.eup %8427  ;;  %8449 = vrsqrt.f32 %v2566_v9  ;;  %v2563_v13 = vadd.f32 1e-05, %v2171_v29  ;;  %v2363_v47 = vld [vmem:[%s15529_s2 + $0x5e0] sm:$0xff]  ;;  %v16542_v38 = vld [vmem:[#allocation73_spill] sm:$0xff] }
 0x47e   :  { %v8430_v20 = vpop.eup %8429  ;;  %v2937_v15 = vmul.f32 %v8428_v63, %v2349_v46  ;;  %v2353_v46 = vld [vmem:[%s15529_s2 + $0x590] sm:$0xff]  ;;  %8451 = vrsqrt.f32 %v2557_v25  ;;  %v2368_v25 = vld [vmem:[%s15529_s2 + $0x608] sm:$0xff]  ;;  %v3939_v41 = vmul.f32 %v12531_v2, %v16542_v38  ;;  %v16545_v38 = vld [vmem:[#allocation90_spill] sm:$0xff] }
 0x47f   :  { %v2948_v21 = vmul.f32 %v8430_v20, %v2360_v35  ;;  %8453 = vrsqrt.f32 %v2559_v6  ;;  %v2370_v6 = vld [vmem:[%s15529_s2 + $0x618] sm:$0xff]  ;;  %v8775_v2 = vld [vmem:[%s15529_s2 + $0x2a8] sm:$0xff] }
 0x480   :  { %v13189_v3 = vpop.permute.xlu1 %3491  ;;  %3811 = vperm.xlu1 %7910, %v2933_v57   ;;  %v13191_v51 = vpop.permute.xlu0 %3546  ;;  %8455 = vrsqrt.f32 %v2561_v45 }
 0x481   :  { %16460 = vst [vmem:[#allocation285_spill] sm:$0xff] %v13189_v3  ;;  %3866 = vperm.xlu0 %7909, %v2944_v26   ;;  %v8432_v26 = vpop.eup %8431  ;;  %8457 = vrsqrt.f32 %v2563_v13 }
 0x482   :  { %v8434_v62 = vpop.eup %8433  ;;  %v2939_v53 = vmul.f32 %v8432_v26, %v2351_v17 }
 0x483   :  { %v8436_v63 = vpop.eup %8435 }
 0x484   :  { %v13201_v57 = vpop.permute.xlu1 %3501  ;;  %3821 = vperm.xlu1 %7910, %v2935_v33   ;;  %v13203_v43 = vpop.permute.xlu0 %3556  ;;  %v2941_v59 = vmul.f32 %v8436_v63, %v2353_v46 }
 0x485   :  { %16461 = vst [vmem:[#allocation286_spill] sm:$0xff] %v13201_v57  ;;  %16462 = vst [vmem:[#allocation287_spill] sm:$0xff] %v13203_v43  ;;  %3876 = vperm.xlu0 %7909, %v2946_v39   ;;  %v2950_v39 = vmul.f32 %v8434_v62, %v2362_v27  ;;  %v8438_v20 = vpop.eup %8437  ;;  %v8765_v57 = vld [vmem:[%s15529_s2 + $0x388] sm:$0xff] }
 0x486   :  { %v8440_v12 = vpop.eup %8439  ;;  %v2952_v26 = vmul.f32 %v8438_v20, %v2364_v0 }
 0x487   :  { %v8442_v17 = vpop.eup %8441 }
 0x488   :  { %v13213_v33 = vpop.permute.xlu1 %3511  ;;  %3831 = vperm.xlu1 %7910, %v2937_v15   ;;  %v13215_v50 = vpop.permute.xlu0 %3566  ;;  %v2954_v63 = vmul.f32 %v8442_v17, %v2366_v14 }
 0x489   :  { %16463 = vst [vmem:[#allocation288_spill] sm:$0xff] %v13213_v33  ;;  %16464 = vst [vmem:[#allocation289_spill] sm:$0xff] %v13215_v50  ;;  %3886 = vperm.xlu0 %7909, %v2948_v21   ;;  %v2355_v21 = vld [vmem:[%s15529_s2 + $0x5a0] sm:$0xff]  ;;  %v8762_v33 = vld [vmem:[%s15529_s2 + $0x218] sm:$0xff] }
 0x48a   :  { %v2943_v9 = vmul.f32 %v8440_v12, %v2355_v21  ;;  %v2359_v21 = vld [vmem:[%s15529_s2 + $0x5c0] sm:$0xff] }
 0x48c   :  { %v13224_v35 = vpop.permute.xlu1 %3521  ;;  %3841 = vperm.xlu1 %7910, %v2939_v53   ;;  %v13226_v15 = vpop.permute.xlu0 %3576 }
 0x48d   :  { %16465 = vst [vmem:[#allocation290_spill] sm:$0xff] %v13226_v15  ;;  %3896 = vperm.xlu0 %7909, %v2950_v39   ;;  %v8444_v53 = vpop.eup %8443  ;;  %v2357_v39 = vld [vmem:[%s15529_s2 + $0x5b0] sm:$0xff] }
 0x48e   :  { %v8446_v46 = vpop.eup %8445 }
 0x48f   :  { %v8448_v12 = vpop.eup %8447 }
 0x490   :  { %v13235_v62 = vpop.permute.xlu1 %3531  ;;  %3851 = vperm.xlu1 %7910, %v2941_v59   ;;  %v13237_v27 = vpop.permute.xlu0 %3586  ;;  %v2945_v59 = vmul.f32 %v8444_v53, %v2357_v39  ;;  %v2947_v53 = vmul.f32 %v8448_v12, %v2359_v21  ;;  %v15731_v21 = vmov 1  }
 0x491   :  { %16466 = vst [vmem:[#allocation291_spill] sm:$0xff] %v13237_v27  ;;  %3906 = vperm.xlu0 %7909, %v2952_v26   ;;  %v2956_v26 = vmul.f32 %v8446_v46, %v2368_v25  ;;  %v8450_v17 = vpop.eup %8449  ;;  %v2361_v46 = vld [vmem:[%s15529_s2 + $0x5d0] sm:$0xff] }
 0x492   :  { %v2958_v39 = vmul.f32 %v8450_v17, %v2370_v6  ;;  %v8689_v17 = vld [vmem:[%s15529_s2 + $0x8] sm:$0xff] }
 0x494   :  { %v13246_v20 = vpop.permute.xlu1 %3541  ;;  %3861 = vperm.xlu1 %7910, %v2943_v9   ;;  %v13248_v0 = vpop.permute.xlu0 %3596 }
 0x495   :  { %16467 = vst [vmem:[#allocation292_spill] sm:$0xff] %v13248_v0  ;;  %3916 = vperm.xlu0 %7909, %v2954_v63   ;;  %v8452_v63 = vpop.eup %8451  ;;  %v8764_v0 = vld [vmem:[%s15529_s2 + $0x228] sm:$0xff] }
 0x496   :  { %v2949_v45 = vmul.f32 %v8452_v63, %v2361_v46  ;;  %v8454_v29 = vpop.eup %8453 }
 0x497   :  { %v2951_v6 = vmul.f32 %v8454_v29, %v2363_v47  ;;  %v8456_v13 = vpop.eup %8455 }
 0x498   :  { %v13257_v14 = vpop.permute.xlu1 %3551  ;;  %3871 = vperm.xlu1 %7910, %v2945_v59   ;;  %v13259_v9 = vpop.permute.xlu0 %3606 }
 0x499   :  { %16468 = vst [vmem:[#allocation293_spill] sm:$0xff] %v13257_v14  ;;  %16469 = vst [vmem:[#allocation294_spill] sm:$0xff] %v13259_v9  ;;  %3926 = vperm.xlu0 %7909, %v2956_v26   ;;  %v2565_v9 = vadd.f32 1e-05, %v2173_v56  ;;  %v2365_v56 = vld [vmem:[%s15529_s2 + $0x5f0] sm:$0xff]  ;;  %v8458_v46 = vpop.eup %8457  ;;  %v3940_v14 = vmul.f32 %v12519_v34, %v16544_v36  ;;  %v8776_v36 = vld [vmem:[%s15529_s2 + $0x380] sm:$0xff] }
 0x49b   :  { %8459 = vrsqrt.f32 %v2565_v9  ;;  %v8690_v9 = vld [vmem:[%s15529_s2 + $0x20] sm:$0xff] }
 0x49c   :  { %v13268_v25 = vpop.permute.xlu1 %3561  ;;  %3881 = vperm.xlu1 %7910, %v2947_v53   ;;  %v13270_v59 = vpop.permute.xlu0 %3616 }
 0x49d   :  { %16470 = vst [vmem:[#allocation295_spill] sm:$0xff] %v13268_v25  ;;  %16471 = vst [vmem:[#allocation296_spill] sm:$0xff] %v13270_v59  ;;  %3936 = vperm.xlu0 %7909, %v2958_v39   ;;  %v2953_v39 = vmul.f32 %v8456_v13, %v2365_v56  ;;  %v2369_v13 = vld [vmem:[%s15529_s2 + $0x610] sm:$0xff] }
 0x4a0   :  { %v13275_v12 = vpop.permute.xlu1 %3571  ;;  %3891 = vperm.xlu1 %7910, %v2949_v45   ;;  %v13277_v26 = vpop.permute.xlu0 %3626  ;;  %v2367_v45 = vld [vmem:[%s15529_s2 + $0x600] sm:$0xff] }
 0x4a1   :  { %16472 = vst [vmem:[#allocation297_spill] sm:$0xff] %v13275_v12  ;;  %16473 = vst [vmem:[#allocation298_spill] sm:$0xff] %v13277_v26  ;;  %7912 = vset.pattern.permute.xlu0 %v15731_v21 }
 0x4a2   :  { %4142 = vperm.xlu0 %7912, %v8689_v17   ;;  %v8691_v17 = vld [vmem:[%s15529_s2 + $0x30] sm:$0xff] }
 0x4a4   :  { %v13286_v53 = vpop.permute.xlu1 %3581  ;;  %3901 = vperm.xlu1 %7910, %v2951_v6   ;;  %v13288_v63 = vpop.permute.xlu0 %3636  ;;  %v2955_v6 = vmul.f32 %v8458_v46, %v2367_v45  ;;  %v8693_v45 = vld [vmem:[%s15529_s2 + $0x50] sm:$0xff] }
 0x4a5   :  { %16474 = vst [vmem:[#allocation299_spill] sm:$0xff] %v13286_v53  ;;  %16475 = vst [vmem:[#allocation300_spill] sm:$0xff] %v13288_v63  ;;  %v8460_v21 = vpop.eup %8459  ;;  %v8767_v53 = vld [vmem:[%s15529_s2 + $0x308] sm:$0xff] }
 0x4a6   :  { %4157 = vperm.xlu0 %7912, %v8690_v9  }
 0x4a8   :  { %v13296_v29 = vpop.permute.xlu1 %3591  ;;  %3911 = vperm.xlu1 %7910, %v2953_v39   ;;  %v13298_v47 = vpop.permute.xlu0 %3646  ;;  %v8692_v39 = vld [vmem:[%s15529_s2 + $0x40] sm:$0xff] }
 0x4a9   :  { %16476 = vst [vmem:[#allocation301_spill] sm:$0xff] %v13296_v29  ;;  %16477 = vst [vmem:[#allocation302_spill] sm:$0xff] %v13298_v47  ;;  %v2957_v47 = vmul.f32 %v8460_v21, %v2369_v13  ;;  %v8694_v21 = vld [vmem:[%s15529_s2] sm:$0xff]  ;;  %v8763_v29 = vld [vmem:[%s15529_s2 + $0x288] sm:$0xff] }
 0x4aa   :  { %4167 = vperm.xlu0 %7912, %v8691_v17  }
 0x4ac   :  { %v13306_v56 = vpop.permute.xlu1 %3601  ;;  %3921 = vperm.xlu1 %7910, %v2955_v6   ;;  %v13308_v9 = vpop.permute.xlu0 %3656  ;;  %v16483_v6 = vmov 1  }
 0x4ad   :  { %16478 = vst [vmem:[#allocation303_spill] sm:$0xff] %v13306_v56  ;;  %16479 = vst [vmem:[#allocation304_spill] sm:$0xff] %v13308_v9 }
 0x4ae   :  { %4177 = vperm.xlu0 %7912, %v8692_v39  }
 0x4b0   :  { %v13313_v63 = vpop.permute.xlu1 %3611  ;;  %3931 = vperm.xlu1 %7910, %v2957_v47   ;;  %v13315_v46 = vpop.permute.xlu0 %3666  ;;  %v8695_v47 = vld [vmem:[%s15529_s2 + $0x60] sm:$0xff] }
 0x4b1   :  { %16480 = vst [vmem:[#allocation305_spill] sm:$0xff] %v13313_v63  ;;  %16481 = vst [vmem:[#allocation306_spill] sm:$0xff] %v13315_v46  ;;  %v8699_v46 = vld [vmem:[%s15529_s2 + $0x80] sm:$0xff] }
 0x4b2   :  { %4187 = vperm.xlu0 %7912, %v8693_v45   ;;  %v8696_v45 = vld [vmem:[%s15529_s2 + $0x10] sm:$0xff] }
 0x4b4   :  { %v13320_v17 = vpop.permute.xlu1 %3621  ;;  %7911 = vset.pattern.permute.xlu1 %v16483_v6  ;;  %v13323_v9 = vpop.permute.xlu0 %3676  ;;  %v8697_v6 = vld [vmem:[%s15529_s2 + $0x70] sm:$0xff] }
 0x4b5   :  { %16482 = vst [vmem:[#allocation307_spill] sm:$0xff] %v13320_v17  ;;  %16484 = vst [vmem:[#allocation308_spill] sm:$0xff] %v13323_v9  ;;  %4137 = vperm.xlu1 %7911, %v8694_v21  }
 0x4b6   :  { %4197 = vperm.xlu0 %7912, %v8695_v47   ;;  %v8698_v47 = vld [vmem:[%s15529_s2 + $0x18] sm:$0xff] }
 0x4b8   :  { %v13331_v13 = vpop.permute.xlu1 %3631  ;;  %v13333_v39 = vpop.permute.xlu0 %3686 }
 0x4b9   :  { %16485 = vst [vmem:[#allocation309_spill] sm:$0xff] %v13331_v13  ;;  %16486 = vst [vmem:[#allocation310_spill] sm:$0xff] %v13333_v39  ;;  %4147 = vperm.xlu1 %7911, %v8696_v45   ;;  %v8760_v39 = vld [vmem:[%s15529_s2 + $0x208] sm:$0xff] }
 0x4ba   :  { %4207 = vperm.xlu0 %7912, %v8697_v6   ;;  %v8700_v6 = vld [vmem:[%s15529_s2 + $0x28] sm:$0xff] }
 0x4bc   :  { %v13341_v21 = vpop.permute.xlu1 %3641  ;;  %v13343_v9 = vpop.permute.xlu0 %3696 }
 0x4bd   :  { %16487 = vst [vmem:[#allocation311_spill] sm:$0xff] %v13341_v21  ;;  %16488 = vst [vmem:[#allocation312_spill] sm:$0xff] %v13343_v9  ;;  %4152 = vperm.xlu1 %7911, %v8698_v47   ;;  %v8701_v21 = vld [vmem:[%s15529_s2 + $0x90] sm:$0xff] }
 0x4be   :  { %4217 = vperm.xlu0 %7912, %v8699_v46   ;;  %v8702_v46 = vld [vmem:[%s15529_s2 + $0x38] sm:$0xff] }
 0x4c0   :  { %v13351_v45 = vpop.permute.xlu1 %3651  ;;  %v13353_v13 = vpop.permute.xlu0 %3706 }
 0x4c1   :  { %16489 = vst [vmem:[#allocation313_spill] sm:$0xff] %v13351_v45  ;;  %16490 = vst [vmem:[#allocation314_spill] sm:$0xff] %v13353_v13  ;;  %4162 = vperm.xlu1 %7911, %v8700_v6   ;;  %v8703_v45 = vld [vmem:[%s15529_s2 + $0xa0] sm:$0xff] }
 0x4c2   :  { %4227 = vperm.xlu0 %7912, %v8701_v21   ;;  %v8704_v21 = vld [vmem:[%s15529_s2 + $0x48] sm:$0xff] }
 0x4c4   :  { %v13361_v47 = vpop.permute.xlu1 %3661  ;;  %v13363_v26 = vpop.permute.xlu0 %3716 }
 0x4c5   :  { %16491 = vst [vmem:[#allocation315_spill] sm:$0xff] %v13361_v47  ;;  %16492 = vst [vmem:[#allocation316_spill] sm:$0xff] %v13363_v26  ;;  %4172 = vperm.xlu1 %7911, %v8702_v46   ;;  %v8705_v47 = vld [vmem:[%s15529_s2 + $0xb0] sm:$0xff] }
 0x4c6   :  { %4237 = vperm.xlu0 %7912, %v8703_v45   ;;  %v8706_v45 = vld [vmem:[%s15529_s2 + $0x58] sm:$0xff] }
 0x4c8   :  { %v13371_v6 = vpop.permute.xlu1 %3671  ;;  %v13373_v17 = vpop.permute.xlu0 %3726 }
 0x4c9   :  { %16493 = vst [vmem:[#allocation317_spill] sm:$0xff] %v13371_v6  ;;  %16494 = vst [vmem:[#allocation318_spill] sm:$0xff] %v13373_v17  ;;  %4182 = vperm.xlu1 %7911, %v8704_v21   ;;  %v8707_v6 = vld [vmem:[%s15529_s2 + $0xc0] sm:$0xff] }
 0x4ca   :  { %4247 = vperm.xlu0 %7912, %v8705_v47   ;;  %v8708_v47 = vld [vmem:[%s15529_s2 + $0x68] sm:$0xff] }
 0x4cc   :  { %v13381_v46 = vpop.permute.xlu1 %3681  ;;  %v13383_v26 = vpop.permute.xlu0 %3736 }
 0x4cd   :  { %16495 = vst [vmem:[#allocation319_spill] sm:$0xff] %v13381_v46  ;;  %16496 = vst [vmem:[#allocation320_spill] sm:$0xff] %v13383_v26  ;;  %4192 = vperm.xlu1 %7911, %v8706_v45   ;;  %v8709_v26 = vld [vmem:[%s15529_s2 + $0xd0] sm:$0xff] }
 0x4ce   :  { %4257 = vperm.xlu0 %7912, %v8707_v6   ;;  %v8710_v6 = vld [vmem:[%s15529_s2 + $0x78] sm:$0xff] }
 0x4d0   :  { %v13391_v21 = vpop.permute.xlu1 %3691  ;;  %v13393_v17 = vpop.permute.xlu0 %3746 }
 0x4d1   :  { %16497 = vst [vmem:[#allocation321_spill] sm:$0xff] %v13391_v21  ;;  %16498 = vst [vmem:[#allocation322_spill] sm:$0xff] %v13393_v17  ;;  %4202 = vperm.xlu1 %7911, %v8708_v47   ;;  %v8711_v17 = vld [vmem:[%s15529_s2 + $0xe0] sm:$0xff] }
 0x4d2   :  { %4267 = vperm.xlu0 %7912, %v8709_v26   ;;  %v8712_v26 = vld [vmem:[%s15529_s2 + $0x88] sm:$0xff] }
 0x4d4   :  { %v13401_v45 = vpop.permute.xlu1 %3701  ;;  %v13403_v13 = vpop.permute.xlu0 %3756 }
 0x4d5   :  { %16499 = vst [vmem:[#allocation323_spill] sm:$0xff] %v13401_v45  ;;  %16500 = vst [vmem:[#allocation324_spill] sm:$0xff] %v13403_v13  ;;  %4212 = vperm.xlu1 %7911, %v8710_v6   ;;  %v8713_v13 = vld [vmem:[%s15529_s2 + $0xf0] sm:$0xff] }
 0x4d6   :  { %4277 = vperm.xlu0 %7912, %v8711_v17   ;;  %v8714_v17 = vld [vmem:[%s15529_s2 + $0x98] sm:$0xff] }
 0x4d8   :  { %v13411_v47 = vpop.permute.xlu1 %3711  ;;  %v13413_v59 = vpop.permute.xlu0 %3766 }
 0x4d9   :  { %16501 = vst [vmem:[#allocation325_spill] sm:$0xff] %v13411_v47  ;;  %16502 = vst [vmem:[#allocation326_spill] sm:$0xff] %v13413_v59  ;;  %4222 = vperm.xlu1 %7911, %v8712_v26   ;;  %v8715_v47 = vld [vmem:[%s15529_s2 + $0x100] sm:$0xff] }
 0x4da   :  { %4287 = vperm.xlu0 %7912, %v8713_v13   ;;  %v8716_v13 = vld [vmem:[%s15529_s2 + $0xa8] sm:$0xff] }
 0x4dc   :  { %v13421_v6 = vpop.permute.xlu1 %3721  ;;  %v13423_v45 = vpop.permute.xlu0 %3776 }
 0x4dd   :  { %16503 = vst [vmem:[#allocation327_spill] sm:$0xff] %v13421_v6  ;;  %16504 = vst [vmem:[#allocation328_spill] sm:$0xff] %v13423_v45  ;;  %4232 = vperm.xlu1 %7911, %v8714_v17   ;;  %v8717_v6 = vld [vmem:[%s15529_s2 + $0x110] sm:$0xff] }
 0x4de   :  { %4297 = vperm.xlu0 %7912, %v8715_v47   ;;  %v8718_v47 = vld [vmem:[%s15529_s2 + $0xb8] sm:$0xff] }
 0x4e0   :  { %v13431_v26 = vpop.permute.xlu1 %3731  ;;  %v13433_v63 = vpop.permute.xlu0 %3786 }
 0x4e1   :  { %16505 = vst [vmem:[#allocation329_spill] sm:$0xff] %v13431_v26  ;;  %16506 = vst [vmem:[#allocation330_spill] sm:$0xff] %v13433_v63  ;;  %4242 = vperm.xlu1 %7911, %v8716_v13   ;;  %v8719_v26 = vld [vmem:[%s15529_s2 + $0x120] sm:$0xff] }
 0x4e2   :  { %4307 = vperm.xlu0 %7912, %v8717_v6   ;;  %v8720_v6 = vld [vmem:[%s15529_s2 + $0xc8] sm:$0xff] }
 0x4e4   :  { %v13441_v17 = vpop.permute.xlu1 %3741  ;;  %v13443_v45 = vpop.permute.xlu0 %3796 }
 0x4e5   :  { %16507 = vst [vmem:[#allocation331_spill] sm:$0xff] %v13441_v17  ;;  %16508 = vst [vmem:[#allocation332_spill] sm:$0xff] %v13443_v45  ;;  %4252 = vperm.xlu1 %7911, %v8718_v47   ;;  %v8721_v17 = vld [vmem:[%s15529_s2 + $0x130] sm:$0xff] }
 0x4e6   :  { %4317 = vperm.xlu0 %7912, %v8719_v26   ;;  %v8722_v26 = vld [vmem:[%s15529_s2 + $0xd8] sm:$0xff] }
 0x4e8   :  { %v13451_v13 = vpop.permute.xlu1 %3751  ;;  %v13453_v63 = vpop.permute.xlu0 %3806 }
 0x4e9   :  { %16509 = vst [vmem:[#allocation333_spill] sm:$0xff] %v13451_v13  ;;  %16510 = vst [vmem:[#allocation334_spill] sm:$0xff] %v13453_v63  ;;  %4262 = vperm.xlu1 %7911, %v8720_v6   ;;  %v8723_v13 = vld [vmem:[%s15529_s2 + $0x140] sm:$0xff] }
 0x4ea   :  { %4327 = vperm.xlu0 %7912, %v8721_v17   ;;  %v8724_v17 = vld [vmem:[%s15529_s2 + $0xe8] sm:$0xff] }
 0x4ec   :  { %v13461_v47 = vpop.permute.xlu1 %3761  ;;  %v13463_v45 = vpop.permute.xlu0 %3816 }
 0x4ed   :  { %16511 = vst [vmem:[#allocation335_spill] sm:$0xff] %v13461_v47  ;;  %16512 = vst [vmem:[#allocation336_spill] sm:$0xff] %v13463_v45  ;;  %4272 = vperm.xlu1 %7911, %v8722_v26   ;;  %v8725_v45 = vld [vmem:[%s15529_s2 + $0x150] sm:$0xff] }
 0x4ee   :  { %4337 = vperm.xlu0 %7912, %v8723_v13   ;;  %v8726_v13 = vld [vmem:[%s15529_s2 + $0xf8] sm:$0xff] }
 0x4f0   :  { %v13471_v6 = vpop.permute.xlu1 %3771  ;;  %v13473_v63 = vpop.permute.xlu0 %3826 }
 0x4f1   :  { %16513 = vst [vmem:[#allocation337_spill] sm:$0xff] %v13471_v6  ;;  %16514 = vst [vmem:[#allocation338_spill] sm:$0xff] %v13473_v63  ;;  %4282 = vperm.xlu1 %7911, %v8724_v17   ;;  %v8727_v63 = vld [vmem:[%s15529_s2 + $0x160] sm:$0xff] }
 0x4f2   :  { %4347 = vperm.xlu0 %7912, %v8725_v45   ;;  %v8728_v45 = vld [vmem:[%s15529_s2 + $0x108] sm:$0xff] }
 0x4f4   :  { %v13481_v26 = vpop.permute.xlu1 %3781  ;;  %v13483_v9 = vpop.permute.xlu0 %3836 }
 0x4f5   :  { %16515 = vst [vmem:[#allocation339_spill] sm:$0xff] %v13481_v26  ;;  %16516 = vst [vmem:[#allocation340_spill] sm:$0xff] %v13483_v9  ;;  %4292 = vperm.xlu1 %7911, %v8726_v13   ;;  %v8729_v9 = vld [vmem:[%s15529_s2 + $0x170] sm:$0xff] }
 0x4f6   :  { %4357 = vperm.xlu0 %7912, %v8727_v63   ;;  %v8730_v63 = vld [vmem:[%s15529_s2 + $0x118] sm:$0xff] }
 0x4f8   :  { %v13491_v17 = vpop.permute.xlu1 %3791  ;;  %v13493_v6 = vpop.permute.xlu0 %3846 }
 0x4f9   :  { %16517 = vst [vmem:[#allocation341_spill] sm:$0xff] %v13491_v17  ;;  %16518 = vst [vmem:[#allocation342_spill] sm:$0xff] %v13493_v6  ;;  %4302 = vperm.xlu1 %7911, %v8728_v45   ;;  %v8731_v17 = vld [vmem:[%s15529_s2 + $0x180] sm:$0xff] }
 0x4fa   :  { %4367 = vperm.xlu0 %7912, %v8729_v9   ;;  %v8732_v9 = vld [vmem:[%s15529_s2 + $0x128] sm:$0xff] }
 0x4fc   :  { %v13501_v13 = vpop.permute.xlu1 %3801  ;;  %v13503_v26 = vpop.permute.xlu0 %3856 }
 0x4fd   :  { %16519 = vst [vmem:[#allocation343_spill] sm:$0xff] %v13501_v13  ;;  %16520 = vst [vmem:[#allocation344_spill] sm:$0xff] %v13503_v26  ;;  %4312 = vperm.xlu1 %7911, %v8730_v63   ;;  %v8733_v13 = vld [vmem:[%s15529_s2 + $0x190] sm:$0xff] }
 0x4fe   :  { %4377 = vperm.xlu0 %7912, %v8731_v17   ;;  %v8734_v17 = vld [vmem:[%s15529_s2 + $0x138] sm:$0xff] }
 0x500   :  { %v13511_v45 = vpop.permute.xlu1 %3811  ;;  %v13513_v21 = vpop.permute.xlu0 %3866 }
 0x501   :  { %16521 = vst [vmem:[#allocation345_spill] sm:$0xff] %v13511_v45  ;;  %16522 = vst [vmem:[#allocation346_spill] sm:$0xff] %v13513_v21  ;;  %4322 = vperm.xlu1 %7911, %v8732_v9   ;;  %v8735_v45 = vld [vmem:[%s15529_s2 + $0x1a0] sm:$0xff] }
 0x502   :  { %4387 = vperm.xlu0 %7912, %v8733_v13   ;;  %v8736_v13 = vld [vmem:[%s15529_s2 + $0x148] sm:$0xff] }
 0x504   :  { %v13521_v63 = vpop.permute.xlu1 %3821  ;;  %v13523_v26 = vpop.permute.xlu0 %3876 }
 0x505   :  { %16523 = vst [vmem:[#allocation347_spill] sm:$0xff] %v13521_v63  ;;  %16524 = vst [vmem:[#allocation348_spill] sm:$0xff] %v13523_v26  ;;  %4332 = vperm.xlu1 %7911, %v8734_v17   ;;  %v8737_v63 = vld [vmem:[%s15529_s2 + $0x1b0] sm:$0xff] }
 0x506   :  { %4397 = vperm.xlu0 %7912, %v8735_v45   ;;  %v8738_v45 = vld [vmem:[%s15529_s2 + $0x158] sm:$0xff] }
 0x508   :  { %v13531_v9 = vpop.permute.xlu1 %3831  ;;  %v13533_v21 = vpop.permute.xlu0 %3886 }
 0x509   :  { %16525 = vst [vmem:[#allocation349_spill] sm:$0xff] %v13531_v9  ;;  %16526 = vst [vmem:[#allocation350_spill] sm:$0xff] %v13533_v21  ;;  %4342 = vperm.xlu1 %7911, %v8736_v13   ;;  %v8739_v9 = vld [vmem:[%s15529_s2 + $0x1c0] sm:$0xff] }
 0x50a   :  { %4407 = vperm.xlu0 %7912, %v8737_v63   ;;  %v8740_v63 = vld [vmem:[%s15529_s2 + $0x168] sm:$0xff] }
 0x50c   :  { %v13541_v17 = vpop.permute.xlu1 %3841  ;;  %v13543_v26 = vpop.permute.xlu0 %3896 }
 0x50d   :  { %16527 = vst [vmem:[#allocation351_spill] sm:$0xff] %v13541_v17  ;;  %16528 = vst [vmem:[#allocation352_spill] sm:$0xff] %v13543_v26  ;;  %4352 = vperm.xlu1 %7911, %v8738_v45   ;;  %v8741_v26 = vld [vmem:[%s15529_s2 + $0x1d0] sm:$0xff]  ;;  %v8758_v17 = vld [vmem:[%s15529_s2 + $0x1f8] sm:$0xff] }
 0x50e   :  { %4417 = vperm.xlu0 %7912, %v8739_v9   ;;  %v8742_v9 = vld [vmem:[%s15529_s2 + $0x178] sm:$0xff] }
 0x510   :  { %v13551_v13 = vpop.permute.xlu1 %3851  ;;  %v13553_v21 = vpop.permute.xlu0 %3906 }
 0x511   :  { %16529 = vst [vmem:[#allocation353_spill] sm:$0xff] %v13551_v13  ;;  %16530 = vst [vmem:[#allocation354_spill] sm:$0xff] %v13553_v21  ;;  %4362 = vperm.xlu1 %7911, %v8740_v63   ;;  %v8743_v21 = vld [vmem:[%s15529_s2 + $0x1e0] sm:$0xff] }
 0x512   :  { %4427 = vperm.xlu0 %7912, %v8741_v26   ;;  %v8744_v26 = vld [vmem:[%s15529_s2 + $0x188] sm:$0xff] }
 0x514   :  { %v13561_v45 = vpop.permute.xlu1 %3861  ;;  %v13563_v59 = vpop.permute.xlu0 %3916 }
 0x515   :  { %16531 = vst [vmem:[#allocation355_spill] sm:$0xff] %v13561_v45  ;;  %16532 = vst [vmem:[#allocation356_spill] sm:$0xff] %v13563_v59  ;;  %4372 = vperm.xlu1 %7911, %v8742_v9   ;;  %v8745_v59 = vld [vmem:[%s15529_s2 + $0x1f0] sm:$0xff] }
 0x516   :  { %4437 = vperm.xlu0 %7912, %v8743_v21   ;;  %v8746_v21 = vld [vmem:[%s15529_s2 + $0x198] sm:$0xff] }
 0x518   :  { %v13571_v63 = vpop.permute.xlu1 %3871  ;;  %v13573_v13 = vpop.permute.xlu0 %3926 }
 0x519   :  { %16533 = vst [vmem:[#allocation357_spill] sm:$0xff] %v13571_v63  ;;  %16534 = vst [vmem:[#allocation358_spill] sm:$0xff] %v13573_v13  ;;  %4382 = vperm.xlu1 %7911, %v8744_v26   ;;  %v8747_v13 = vld [vmem:[%s15529_s2 + $0x200] sm:$0xff] }
 0x51a   :  { %4447 = vperm.xlu0 %7912, %v8745_v59   ;;  %v8748_v59 = vld [vmem:[%s15529_s2 + $0x1a8] sm:$0xff] }
 0x51c   :  { %v13581_v9 = vpop.permute.xlu1 %3881  ;;  %v13583_v45 = vpop.permute.xlu0 %3936 }
 0x51d   :  { %16535 = vst [vmem:[#allocation359_spill] sm:$0xff] %v13581_v9  ;;  %16536 = vst [vmem:[#allocation360_spill] sm:$0xff] %v13583_v45  ;;  %4392 = vperm.xlu1 %7911, %v8746_v21   ;;  %v8749_v45 = vld [vmem:[%s15529_s2 + $0x210] sm:$0xff] }
 0x51e   :  { %4457 = vperm.xlu0 %7912, %v8747_v13   ;;  %v8750_v13 = vld [vmem:[%s15529_s2 + $0x1b8] sm:$0xff] }
 0x520   :  { %v13591_v26 = vpop.permute.xlu1 %3891 }
 0x521   :  { %16537 = vst [vmem:[#allocation361_spill] sm:$0xff] %v13591_v26  ;;  %4402 = vperm.xlu1 %7911, %v8748_v59   ;;  %v13596_v9 = vpop.permute.xlu0 %4142  ;;  %v8751_v59 = vld [vmem:[%s15529_s2 + $0x220] sm:$0xff] }
 0x522   :  { %4467 = vperm.xlu0 %7912, %v8749_v45   ;;  %v8752_v45 = vld [vmem:[%s15529_s2 + $0x1c8] sm:$0xff] }
 0x524   :  { %v13601_v21 = vpop.permute.xlu1 %3901 }
 0x525   :  { %16538 = vst [vmem:[#allocation362_spill] sm:$0xff] %v13601_v21  ;;  %4412 = vperm.xlu1 %7911, %v8750_v13   ;;  %v13606_v26 = vpop.permute.xlu0 %4157  ;;  %v8753_v13 = vld [vmem:[%s15529_s2 + $0x230] sm:$0xff] }
 0x526   :  { %4477 = vperm.xlu0 %7912, %v8751_v59   ;;  %v8754_v59 = vld [vmem:[%s15529_s2 + $0x1d8] sm:$0xff] }
 0x528   :  { %v13611_v63 = vpop.permute.xlu1 %3911 }
 0x529   :  { %16539 = vst [vmem:[#allocation363_spill] sm:$0xff] %v13611_v63  ;;  %4422 = vperm.xlu1 %7911, %v8752_v45   ;;  %v13616_v21 = vpop.permute.xlu0 %4167  ;;  %v8755_v45 = vld [vmem:[%s15529_s2 + $0x240] sm:$0xff] }
 0x52a   :  { %4487 = vperm.xlu0 %7912, %v8753_v13   ;;  %v8756_v13 = vld [vmem:[%s15529_s2 + $0x1e8] sm:$0xff] }
 0x52c   :  { %v13621_v47 = vpop.permute.xlu1 %3921 }
 0x52d   :  { %16540 = vst [vmem:[#allocation364_spill] sm:$0xff] %v13621_v47  ;;  %4432 = vperm.xlu1 %7911, %v8754_v59   ;;  %v13626_v63 = vpop.permute.xlu0 %4177  ;;  %v8757_v59 = vld [vmem:[%s15529_s2 + $0x250] sm:$0xff] }
 0x52e   :  { %4497 = vperm.xlu0 %7912, %v8755_v45  }
 0x530   :  { %v13631_v56 = vpop.permute.xlu1 %3931 }
 0x531   :  { %16541 = vst [vmem:[#allocation365_spill] sm:$0xff] %v13631_v56  ;;  %4442 = vperm.xlu1 %7911, %v8756_v13   ;;  %v13636_v47 = vpop.permute.xlu0 %4187  ;;  %v8759_v56 = vld [vmem:[%s15529_s2 + $0x260] sm:$0xff] }
 0x532   :  { %4507 = vperm.xlu0 %7912, %v8757_v59  }
 0x534   :  { %v4138_v6 = vpop.permute.xlu1 %4137 }
 0x535   :  { %4452 = vperm.xlu1 %7911, %v8758_v17   ;;  %v13644_v45 = vpop.permute.xlu0 %4197  ;;  %v8761_v17 = vld [vmem:[%s15529_s2 + $0x270] sm:$0xff]  ;;  %v5115_v43 = vadd.f32 %v4138_v6, %v3939_v41  ;;  %v16548_v6 = vld [vmem:[#allocation75_spill] sm:$0xff] }
 0x536   :  { %4517 = vperm.xlu0 %7912, %v8759_v56  }
 0x538   :  { %v13649_v13 = vpop.permute.xlu1 %4147 }
 0x539   :  { %4462 = vperm.xlu1 %7911, %v8760_v39   ;;  %v13654_v59 = vpop.permute.xlu0 %4207 }
 0x53a   :  { %4527 = vperm.xlu0 %7912, %v8761_v17  }
 0x53c   :  { %v4153_v46 = vpop.permute.xlu1 %4152 }
 0x53d   :  { %4472 = vperm.xlu1 %7911, %v8762_v33   ;;  %v4218_v56 = vpop.permute.xlu0 %4217 }
 0x53e   :  { %4542 = vperm.xlu0 %7912, %v8763_v29  }
 0x540   :  { %v13665_v39 = vpop.permute.xlu1 %4162 }
 0x541   :  { %4482 = vperm.xlu1 %7911, %v8764_v0   ;;  %v4228_v17 = vpop.permute.xlu0 %4227 }
 0x542   :  { %4702 = vperm.xlu0 %7912, %v8765_v57   ;;  %v8768_v57 = vld [vmem:[%s15529_s2 + $0x248] sm:$0xff] }
 0x544   :  { %v13673_v33 = vpop.permute.xlu1 %4172 }
 0x545   :  { %4492 = vperm.xlu1 %7911, %v8766_v61   ;;  %v13678_v29 = vpop.permute.xlu0 %4237  ;;  %v8769_v61 = vld [vmem:[%s15529_s2 + $0x298] sm:$0xff] }
 0x546   :  { %4622 = vperm.xlu0 %7912, %v8767_v53   ;;  %v8770_v53 = vld [vmem:[%s15529_s2 + $0x258] sm:$0xff] }
 0x548   :  { %v13683_v0 = vpop.permute.xlu1 %4182 }
 0x549   :  { %4502 = vperm.xlu1 %7911, %v8768_v57   ;;  %v13688_v27 = vpop.permute.xlu0 %4247  ;;  %v8771_v57 = vld [vmem:[%s15529_s2 + $0x398] sm:$0xff] }
 0x54a   :  { %4552 = vperm.xlu0 %7912, %v8769_v61   ;;  %v8772_v61 = vld [vmem:[%s15529_s2 + $0x268] sm:$0xff] }
 0x54c   :  { %v13693_v3 = vpop.permute.xlu1 %4192 }
 0x54d   :  { %4512 = vperm.xlu1 %7911, %v8770_v53   ;;  %v13698_v23 = vpop.permute.xlu0 %4257  ;;  %v8773_v53 = vld [vmem:[%s15529_s2 + $0x318] sm:$0xff] }
 0x54e   :  { %4712 = vperm.xlu0 %7912, %v8771_v57   ;;  %v16543_v57 = vld [vmem:[#allocation91_spill] sm:$0xff] }
 0x54f   :  { %v3955_v50 = vmul.f32 %v12649_v42, %v16543_v57  ;;  %v16546_v57 = vld [vmem:[#allocation76_spill] sm:$0xff] }
 0x550   :  { %v13703_v12 = vpop.permute.xlu1 %4202  ;;  %v3942_v44 = vmul.f32 %v12541_v7, %v16546_v57  ;;  %v8777_v7 = vld [vmem:[%s15529_s2 + $0x3a8] sm:$0xff] }
 0x551   :  { %4522 = vperm.xlu1 %7911, %v8772_v61   ;;  %v13708_v15 = vpop.permute.xlu0 %4267  ;;  %v5131_v42 = vadd.f32 %v4218_v56, %v3955_v50  ;;  %v5311_v50 = vmax.f32 %v5115_v43, 0.0 }
 0x552   :  { %4632 = vperm.xlu0 %7912, %v8773_v53   ;;  %v3956_v53 = vmul.f32 %v12591_v58, %v16545_v38  ;;  %v3941_v58 = vmul.f32 %v12529_v30, %v16548_v6  ;;  %v5118_v56 = vadd.f32 %v4153_v46, %v3942_v44  ;;  %v16550_v38 = vld [vmem:[#allocation77_spill] sm:$0xff]  ;;  %v8778_v6 = vld [vmem:[%s15529_s2 + $0x300] sm:$0xff] }
 0x553   :  { %v3944_v30 = vmul.f32 %v12565_v28, %v16550_v38 }
 0x554   :  { %v13715_v25 = vpop.permute.xlu1 %4212  ;;  %v5117_v44 = vadd.f32 %v13649_v13, %v3941_v58  ;;  %v16554_v58 = vld [vmem:[#allocation235_spill] sm:$0xff] }
 0x555   :  { %4537 = vperm.xlu1 %7911, %v8774_v48   ;;  %v13722_v61 = vpop.permute.xlu0 %4277  ;;  %v5116_v48 = vadd.f32 %v13596_v9, %v3940_v14  ;;  %v5133_v14 = vadd.f32 %v4228_v17, %v3957_v19  ;;  %v5327_v9 = vmax.f32 %v5131_v42, 0.0  ;;  %v16552_v17 = vld [vmem:[#allocation78_spill] sm:$0xff]  ;;  %v5314_v42 = vmax.f32 %v5118_v56, 0.0 }
 0x556   :  { %4562 = vperm.xlu0 %7912, %v8775_v2   ;;  %v3943_v28 = vmul.f32 %v12553_v54, %v16552_v17  ;;  %v5120_v13 = vadd.f32 %v13665_v39, %v3944_v30  ;;  %v5313_v39 = vmax.f32 %v5117_v44, 0.0  ;;  %v16557_v30 = vld [vmem:[#allocation97_spill] sm:$0xff]  ;;  %v16560_v44 = vld [vmem:[#allocation279_spill] sm:$0xff] }
 0x557   :  { %v5312_v43 = vmax.f32 %v5116_v48, 0.0  ;;  %v8779_v48 = vld [vmem:[%s15529_s2 + $0x328] sm:$0xff]  ;;  %v5329_v55 = vmax.f32 %v5133_v14, 0.0  ;;  %v8780_v14 = vld [vmem:[%s15529_s2 + $0x290] sm:$0xff]  ;;  %v8781_v17 = vld [vmem:[%s15529_s2 + $0x2b8] sm:$0xff] }
 0x558   :  { %v4223_v22 = vpop.permute.xlu1 %4222  ;;  %v5119_v56 = vadd.f32 %v13606_v26, %v3943_v28  ;;  %v16559_v26 = vld [vmem:[#allocation80_spill] sm:$0xff]  ;;  %v5620_v28 = vpack.c.bf16 %v5314_v42, %v5313_v39 }
 0x559   :  { %v5132_v34 = vadd.f32 %v4223_v22, %v3956_v53  ;;  %4697 = vperm.xlu1 %7911, %v8776_v36   ;;  %v13739_v41 = vpop.permute.xlu0 %4287  ;;  %v16549_v22 = vld [vmem:[#allocation92_spill] sm:$0xff]  ;;  %v16551_v53 = vld [vmem:[#allocation95_spill] sm:$0xff] }
 0x55a   :  { %4722 = vperm.xlu0 %7912, %v8777_v7   ;;  %v3958_v5 = vmul.f32 %v12603_v4, %v16549_v22  ;;  %v3959_v57 = vmul.f32 %v12673_v1, %v16551_v53  ;;  %v5619_v1 = vpack.c.bf16 %v5312_v43, %v5311_v50 }
 0x55b   :  { %v5328_v2 = vmax.f32 %v5132_v34, 0.0  ;;  %v16553_v34 = vld [vmem:[#allocation94_spill] sm:$0xff] }
 0x55c   :  { %v4233_v46 = vpop.permute.xlu1 %4232  ;;  %v3960_v7 = vmul.f32 %v16554_v58, %v16553_v34  ;;  %v5135_v22 = vadd.f32 %v13678_v29, %v3959_v57  ;;  %v7922_v57 = vld [vmem:[%s15530_s1 + $0xc] ss:$52 sps:$4 sm:$0xff]  }
 0x55d   :  { %v5134_v36 = vadd.f32 %v4233_v46, %v3958_v5  ;;  %4617 = vperm.xlu1 %7911, %v8778_v6   ;;  %v13759_v4 = vpop.permute.xlu0 %4297  ;;  %v5627_v19 = vpack.c.bf16 %v5328_v2, %v5327_v9  ;;  %v16555_v9 = vld [vmem:[#allocation79_spill] sm:$0xff]  ;;  %v16556_v2 = vld [vmem:[#allocation120_spill] sm:$0xff]  ;;  %v5316_v6 = vmax.f32 %v5120_v13, 0.0  ;;  %6391 = vmatprep.mubr.bf16.mxu1 %v7922_v57 }
 0x55e   :  { %4642 = vperm.xlu0 %7912, %v8779_v48   ;;  %v3946_v54 = vmul.f32 %v16556_v2, %v16555_v9  ;;  %v16558_v46 = vld [vmem:[#allocation124_spill] sm:$0xff]  ;;  %v5331_v58 = vmax.f32 %v5135_v22, 0.0  ;;  %v16564_v9 = vld [vmem:[#allocation71_spill] sm:$0xff]  ;;  %v5315_v2 = vmax.f32 %v5119_v56, 0.0 }
 0x55f   :  { %v5330_v5 = vmax.f32 %v5134_v36, 0.0  ;;  %7489 = vmatprep.subr.bf16.mxu0 %v5627_v19  ;;  %v3961_v53 = vmul.f32 %v16558_v46, %v16557_v30  ;;  %v3945_v36 = vmul.f32 %v16560_v44, %v16559_v26  ;;  %v16561_v48 = vld [vmem:[#allocation96_spill] sm:$0xff]  ;;  %v16566_v30 = vld [vmem:[#allocation127_spill] sm:$0xff]  ;;  %v16569_v26 = vld [vmem:[#allocation98_spill] sm:$0xff] }
 0x560   :  { %v4243_v38 = vpop.permute.xlu1 %4242  ;;  %7490 = vmatpush3.bf16.msra.mxu0 %v5619_v1  ;;  %v5122_v19 = vadd.f32 %v13673_v33, %v3946_v54  ;;  %v16562_v1 = vld [vmem:[#allocation238_spill] sm:$0xff]  ;;  %v8782_v22 = vld [vmem:[%s15529_s2 + $0x390] sm:$0xff]  ;;  %v5621_v57 = vpack.c.bf16 %v5316_v6, %v5315_v2  ;;  %v16570_v44 = vld [vmem:[#allocation241_spill] sm:$0xff] }
 0x561   :  { %v5136_v50 = vadd.f32 %v4243_v38, %v3960_v7  ;;  %4547 = vperm.xlu1 %7911, %v8780_v14   ;;  %v13778_v29 = vpop.permute.xlu0 %4307  ;;  %v5628_v43 = vpack.c.bf16 %v5330_v5, %v5329_v55  ;;  %v3962_v34 = vmul.f32 %v16562_v1, %v16561_v48  ;;  %v5137_v7 = vadd.f32 %v13688_v27, %v3961_v53  ;;  %v16563_v5 = vld [vmem:[#allocation82_spill] sm:$0xff]  ;;  %v16565_v38 = vld [vmem:[#allocation99_spill] sm:$0xff]  ;;  %v16571_v1 = vld [vmem:[#allocation84_spill] sm:$0xff] }
 0x562   :  { %4572 = vperm.xlu0 %7912, %v8781_v17   ;;  %v3948_v13 = vmul.f32 %v16564_v9, %v16563_v5  ;;  %v5121_v33 = vadd.f32 %v13616_v21, %v3945_v36  ;;  %v3963_v42 = vmul.f32 %v16566_v30, %v16565_v38  ;;  %v16567_v53 = vld [vmem:[#allocation83_spill] sm:$0xff]  ;;  %v5318_v56 = vmax.f32 %v5122_v19, 0.0  ;;  %v16573_v5 = vld [vmem:[#allocation101_spill] sm:$0xff]  ;;  %v16574_v9 = vld [vmem:[#allocation250_spill] sm:$0xff] }
 0x563   :  { %v5332_v55 = vmax.f32 %v5136_v50, 0.0  ;;  %7491 = vmatprep.subr.bf16.mxu0 %v5628_v43  ;;  %v16568_v50 = vld [vmem:[#allocation232_spill] sm:$0xff]  ;;  %v8783_v43 = vld [vmem:[%s15529_s2 + $0x3b8] sm:$0xff]  ;;  %v3964_v36 = vmul.f32 %v16570_v44, %v16569_v26  ;;  %v5333_v17 = vmax.f32 %v5137_v7, 0.0  ;;  %v16576_v38 = vld [vmem:[#allocation123_spill] sm:$0xff] }
 0x564   :  { %v4253_v54 = vpop.permute.xlu1 %4252  ;;  %7492 = vmatpush3.bf16.msra.mxu0 %v5620_v28  ;;  %v3947_v14 = vmul.f32 %v16568_v50, %v16567_v53  ;;  %v5124_v21 = vadd.f32 %v13683_v0, %v3948_v13  ;;  %v5139_v28 = vadd.f32 %v13698_v23, %v3963_v42  ;;  %v5317_v19 = vmax.f32 %v5121_v33, 0.0  ;;  %v8784_v7 = vld [vmem:[%s15529_s2 + $0x310] sm:$0xff]  ;;  %v8785_v42 = vld [vmem:[%s15529_s2 + $0x338] sm:$0xff]  ;;  %v16580_v26 = vld [vmem:[#allocation278_spill] sm:$0xff] }
 0x565   :  { %v5138_v39 = vadd.f32 %v4253_v54, %v3962_v34  ;;  %4707 = vperm.xlu1 %7911, %v8782_v22   ;;  %v13800_v27 = vpop.permute.xlu0 %4317  ;;  %v5629_v46 = vpack.c.bf16 %v5332_v55, %v5331_v58  ;;  %v16572_v34 = vld [vmem:[#allocation81_spill] sm:$0xff]  ;;  %v3965_v13 = vmul.f32 %v16574_v9, %v16573_v5  ;;  %v16577_v22 = vld [vmem:[#allocation100_spill] sm:$0xff]  ;;  %v8787_v5 = vld [vmem:[%s15529_s2 + $0x2c8] sm:$0xff] }
 0x566   :  { %4732 = vperm.xlu0 %7912, %v8783_v43   ;;  %v3950_v58 = vmul.f32 %v16572_v34, %v16571_v1  ;;  %v5123_v0 = vadd.f32 %v13626_v63, %v3947_v14  ;;  %v16575_v54 = vld [vmem:[#allocation85_spill] sm:$0xff]  ;;  %v5320_v33 = vmax.f32 %v5124_v21, 0.0  ;;  %v5335_v50 = vmax.f32 %v5139_v28, 0.0  ;;  %v8786_v28 = vld [vmem:[%s15529_s2 + $0x2a0] sm:$0xff] }
 0x567   :  { %v5334_v48 = vmax.f32 %v5138_v39, 0.0  ;;  %7493 = vmatprep.subr.bf16.mxu0 %v5629_v46  ;;  %v3949_v30 = vmul.f32 %v16576_v38, %v16575_v54  ;;  %v5622_v39 = vpack.c.bf16 %v5318_v56, %v5317_v19  ;;  %v16578_v46 = vld [vmem:[#allocation5_spill] sm:$0xff]  ;;  %v5141_v14 = vadd.f32 %v13708_v15, %v3965_v13  ;;  %v16584_v19 = vld [vmem:[#allocation2_spill] sm:$0xff] }
 0x568   :  { %v4263_v55 = vpop.permute.xlu1 %4262  ;;  %7494 = vmatpush3.bf16.msra.mxu0 %v5621_v57  ;;  %v5126_v63 = vadd.f32 %v13693_v3, %v3950_v58  ;;  %v3966_v53 = vmul.f32 %v16578_v46, %v16577_v22  ;;  %v16579_v57 = vld [vmem:[#allocation86_spill] sm:$0xff]  ;;  %v5319_v21 = vmax.f32 %v5123_v0, 0.0  ;;  %v16583_v58 = vld [vmem:[#allocation87_spill] sm:$0xff]  ;;  %v16589_v46 = vld [vmem:[#allocation105_spill] sm:$0xff] }
 0x569   :  { %v5140_v6 = vadd.f32 %v4263_v55, %v3964_v36  ;;  %4627 = vperm.xlu1 %7911, %v8784_v7   ;;  %v13819_v23 = vpop.permute.xlu0 %4327  ;;  %v5630_v2 = vpack.c.bf16 %v5334_v48, %v5333_v17  ;;  %v3952_v44 = vmul.f32 %v16580_v26, %v16579_v57  ;;  %v5125_v3 = vadd.f32 %v13636_v47, %v3949_v30  ;;  %v16581_v17 = vld [vmem:[#allocation103_spill] sm:$0xff]  ;;  %v16582_v48 = vld [vmem:[#allocation6_spill] sm:$0xff]  ;;  %v16587_v30 = vld [vmem:[#allocation88_spill] sm:$0xff] }
 0x56a   :  { %4652 = vperm.xlu0 %7912, %v8785_v42   ;;  %v3967_v1 = vmul.f32 %v16582_v48, %v16581_v17  ;;  %v3951_v55 = vmul.f32 %v16584_v19, %v16583_v58  ;;  %v5322_v0 = vmax.f32 %v5126_v63, 0.0  ;;  %v5623_v9 = vpack.c.bf16 %v5320_v33, %v5319_v21  ;;  %v16585_v13 = vld [vmem:[#allocation102_spill] sm:$0xff]  ;;  %v16588_v42 = vld [vmem:[#allocation280_spill] sm:$0xff]  ;;  %v16591_v57 = vld [vmem:[#allocation89_spill] sm:$0xff] }
 0x56b   :  { %v5336_v43 = vmax.f32 %v5140_v6, 0.0  ;;  %7495 = vmatprep.subr.bf16.mxu0 %v5630_v2  ;;  %v5128_v47 = vadd.f32 %v13703_v12, %v3952_v44  ;;  %v16586_v6 = vld [vmem:[#allocation244_spill] sm:$0xff]  ;;  %v5337_v2 = vmax.f32 %v5141_v14, 0.0  ;;  %v5321_v63 = vmax.f32 %v5125_v3, 0.0  ;;  %v8788_v14 = vld [vmem:[%s15529_s2 + $0x3a0] sm:$0xff]  ;;  %v16592_v26 = vld [vmem:[#allocation249_spill] sm:$0xff] }
 0x56c   :  { %v4273_v36 = vpop.permute.xlu1 %4272  ;;  %7496 = vmatpush3.bf16.msra.mxu0 %v5622_v39  ;;  %v3968_v7 = vmul.f32 %v16586_v6, %v16585_v13  ;;  %v5143_v54 = vadd.f32 %v13722_v61, %v3967_v1  ;;  %v3954_v39 = vmul.f32 %v16588_v42, %v16587_v30  ;;  %v5127_v12 = vadd.f32 %v13644_v45, %v3951_v55  ;;  %v8789_v3 = vld [vmem:[%s15529_s2 + $0x3c8] sm:$0xff]  ;;  %v16593_v17 = vld [vmem:[#allocation104_spill] sm:$0xff] }
 0x56d   :  { %v5142_v56 = vadd.f32 %v4273_v36, %v3966_v53  ;;  %4557 = vperm.xlu1 %7911, %v8786_v28   ;;  %v13838_v15 = vpop.permute.xlu0 %4337  ;;  %v5631_v34 = vpack.c.bf16 %v5336_v43, %v5335_v50  ;;  %v16590_v53 = vld [vmem:[#allocation8_spill] sm:$0xff]  ;;  %v3953_v44 = vmul.f32 %v16592_v26, %v16591_v57  ;;  %v5324_v21 = vmax.f32 %v5128_v47, 0.0  ;;  %v16594_v48 = vld [vmem:[#allocation7_spill] sm:$0xff]  ;;  %v8790_v47 = vld [vmem:[%s15529_s2 + $0x320] sm:$0xff] }
 0x56e   :  { %4582 = vperm.xlu0 %7912, %v8787_v5   ;;  %v3969_v50 = vmul.f32 %v16590_v53, %v16589_v46  ;;  %v5130_v45 = vadd.f32 %v13715_v25, %v3954_v39  ;;  %v5624_v36 = vpack.c.bf16 %v5322_v0, %v5321_v63  ;;  %v3970_v1 = vmul.f32 %v16594_v48, %v16593_v17  ;;  %v7917_v42 = vld [vmem:[%s15530_s1] ss:$52 sps:$4 sm:$0xff]   ;;  %v8793_v39 = vld [vmem:[%s15529_s2 + $0x2d8] sm:$0xff] }
 0x56f   :  { %v5338_v38 = vmax.f32 %v5142_v56, 0.0  ;;  %7497 = vmatprep.subr.bf16.mxu0 %v5631_v34  ;;  %v5339_v56 = vmax.f32 %v5143_v54, 0.0  ;;  %v5323_v58 = vmax.f32 %v5127_v12, 0.0  ;;  %v5129_v19 = vadd.f32 %v13654_v59, %v3953_v44  ;;  %v8792_v54 = vld [vmem:[%s15529_s2 + $0x2b0] sm:$0xff]  ;;  %v8795_v53 = vld [vmem:[%s15529_s2 + $0x3d8] sm:$0xff]  ;;  %v8800_v48 = vld [vmem:[%s15529_s2 + $0x3c0] sm:$0xff] }
 0x570   :  { %v4283_v22 = vpop.permute.xlu1 %4282  ;;  %7498 = vmatpush3.bf16.msra.mxu0 %v5623_v9  ;;  %v5145_v28 = vadd.f32 %v13739_v41, %v3969_v50  ;;  %v5326_v9 = vmax.f32 %v5130_v45, 0.0  ;;  %v8791_v41 = vld [vmem:[%s15529_s2 + $0x348] sm:$0xff]  ;;  %v8797_v57 = vld [vmem:[%s15529_s2 + $0x358] sm:$0xff] }
 0x571   :  { %v5144_v33 = vadd.f32 %v4283_v22, %v3968_v7  ;;  %4717 = vperm.xlu1 %7911, %v8788_v14   ;;  %v13857_v61 = vpop.permute.xlu0 %4347  ;;  %v5632_v43 = vpack.c.bf16 %v5338_v38, %v5337_v2  ;;  %v5625_v13 = vpack.c.bf16 %v5324_v21, %v5323_v58  ;;  %v5325_v7 = vmax.f32 %v5129_v19, 0.0  ;;  %v8794_v22 = vld [vmem:[%s15529_s2 + $0x3b0] sm:$0xff]  ;;  %v7925_v26 = vld [vmem:[%s15530_s1 + $0x68] ss:$52 sps:$4 sm:$0xff]   ;;  %v8798_v21 = vld [vmem:[%s15529_s2 + $0x2c0] sm:$0xff] }
 0x572   :  { %4742 = vperm.xlu0 %7912, %v8789_v3   ;;  %v5341_v6 = vmax.f32 %v5145_v28, 0.0  ;;  %v8796_v14 = vld [vmem:[%s15529_s2 + $0x330] sm:$0xff]  ;;  %v8799_v3 = vld [vmem:[%s15529_s2 + $0x2e8] sm:$0xff]  ;;  %v8802_v58 = vld [vmem:[%s15529_s2 + $0x340] sm:$0xff] }
 0x573   :  { %v5340_v34 = vmax.f32 %v5144_v33, 0.0  ;;  %7499 = vmatprep.subr.bf16.mxu0 %v5632_v43  ;;  %v5626_v63 = vpack.c.bf16 %v5326_v9, %v5325_v7  ;;  %v7923_v33 = vld [vmem:[%s15530_s1 + $0x6c] ss:$52 sps:$4 sm:$0xff]   ;;  %v7929_v17 = vld [vmem:[%s15530_s1 + $0xd4] ss:$52 sps:$4 sm:$0xff]  }
 0x574   :  { %v4293_v55 = vpop.permute.xlu1 %4292  ;;  %7500 = vmatpush3.bf16.msra.mxu0 %v5624_v36  ;;  %v7931_v28 = vld [vmem:[%s15530_s1 + $0xd0] ss:$52 sps:$4 sm:$0xff]  }
 0x575   :  { %v5146_v25 = vadd.f32 %v4293_v55, %v3970_v1  ;;  %4637 = vperm.xlu1 %7911, %v8790_v47   ;;  %v13872_v0 = vpop.permute.xlu0 %4357  ;;  %v5633_v5 = vpack.c.bf16 %v5340_v34, %v5339_v56  ;;  %v8801_v56 = vld [vmem:[%s15529_s2 + $0x3e8] sm:$0xff]  ;;  %v7935_v47 = vld [vmem:[%s15530_s1 + $0x13c] ss:$52 sps:$4 sm:$0xff]  }
 0x576   :  { %4662 = vperm.xlu0 %7912, %v8791_v41   ;;  %v8803_v55 = vld [vmem:[%s15529_s2 + $0x368] sm:$0xff]  ;;  %v8805_v41 = vld [vmem:[%s15529_s2 + $0x2f8] sm:$0xff] }
 0x577   :  { %v5342_v59 = vmax.f32 %v5146_v25, 0.0  ;;  %7501 = vmatprep.subr.bf16.mxu0 %v5633_v5  ;;  %v8804_v5 = vld [vmem:[%s15529_s2 + $0x2d0] sm:$0xff] }
 0x578   :  { %v13877_v2 = vpop.permute.xlu1 %4302  ;;  %7502 = vmatpush3.bf16.msra.mxu0 %v5625_v13  ;;  %v7937_v13 = vld [vmem:[%s15530_s1 + $0x138] ss:$52 sps:$4 sm:$0xff]  }
 0x579   :  { %4567 = vperm.xlu1 %7911, %v8792_v54   ;;  %v13882_v38 = vpop.permute.xlu0 %4367  ;;  %v5634_v30 = vpack.c.bf16 %v5342_v59, %v5341_v6  ;;  %v16595_v6 = vld [vmem:[#allocation106_spill] sm:$0xff]  ;;  %v16596_v59 = vld [vmem:[#allocation9_spill] sm:$0xff] }
 0x57a   :  { %4592 = vperm.xlu0 %7912, %v8793_v39   ;;  %v3972_v7 = vmul.f32 %v16596_v59, %v16595_v6 }
 0x57b   :  { %7503 = vmatprep.subr.bf16.mxu0 %v5634_v30  ;;  %v16597_v30 = vld [vmem:[#allocation126_spill] sm:$0xff] }
 0x57c   :  { %v13890_v12 = vpop.permute.xlu1 %4312  ;;  %7504 = vmatpush3.bf16.msra.mxu0 %v5626_v63  ;;  %v8806_v63 = vld [vmem:[%s15529_s2 + $0x3d0] sm:$0xff] }
 0x57d   :  { %4727 = vperm.xlu1 %7911, %v8794_v22   ;;  %v4378_v46 = vpop.permute.xlu0 %4377 }
 0x57e   :  { %4752 = vperm.xlu0 %7912, %v8795_v53   ;;  %v16599_v53 = vld [vmem:[#allocation107_spill] sm:$0xff] }
 0x57f   :  { %6295 = vmatmul.mubr.bf16.vlgmr.msra.gmra.mrb[0].mxu0 %v7917_v42  ;;  %v16598_v42 = vld [vmem:[#allocation26_spill] sm:$0xff] }
 0x580   :  { %v13898_v50 = vpop.permute.xlu1 %4322  ;;  %6302 = vmatprep.mubr.bf16.mxu0 %v7923_v33  ;;  %v3987_v39 = vmul.f32 %v16598_v42, %v16597_v30  ;;  %v16600_v33 = vld [vmem:[#allocation10_spill] sm:$0xff] }
 0x581   :  { %4647 = vperm.xlu1 %7911, %v8796_v14   ;;  %v13906_v43 = vpop.permute.xlu0 %4387  ;;  %v3971_v14 = vmul.f32 %v16600_v33, %v16599_v53  ;;  %v16608_v30 = vld [vmem:[#allocation258_spill] sm:$0xff]  ;;  %v16609_v53 = vld [vmem:[#allocation3_spill] sm:$0xff] }
 0x582   :  { %4672 = vperm.xlu0 %7912, %v8797_v57   ;;  %v5148_v57 = vadd.f32 %v13877_v2, %v3972_v7  ;;  %v7941_v2 = vld [vmem:[%s15530_s1 + $0x1a4] ss:$52 sps:$4 sm:$0xff]   ;;  %v8808_v7 = vld [vmem:[%s15529_s2 + $0x350] sm:$0xff]  ;;  %v16610_v33 = vld [vmem:[#allocation275_spill] sm:$0xff] }
 0x584   :  { %v13914_v44 = vpop.permute.xlu1 %4332 }
 0x585   :  { %4577 = vperm.xlu1 %7911, %v8798_v21   ;;  %v13919_v45 = vpop.permute.xlu0 %4397  ;;  %v16601_v21 = vld [vmem:[#allocation125_spill] sm:$0xff] }
 0x586   :  { %4602 = vperm.xlu0 %7912, %v8799_v3   ;;  %v16602_v3 = vld [vmem:[#allocation25_spill] sm:$0xff] }
 0x587   :  { %6303 = vmatmul.mubr.bf16.gmra.mrb[4].mxu0 %v7925_v26  ;;  %v8807_v26 = vld [vmem:[%s15529_s2 + $0x3f8] sm:$0xff] }
 0x588   :  { %v13924_v36 = vpop.permute.xlu1 %4342  ;;  %6310 = vmatprep.mubr.bf16.mxu0 %v7929_v17  ;;  %v3988_v17 = vmul.f32 %v16602_v3, %v16601_v21 }
 0x589   :  { %4737 = vperm.xlu1 %7911, %v8800_v48   ;;  %v13932_v1 = vpop.permute.xlu0 %4407  ;;  %v5163_v48 = vadd.f32 %v4378_v46, %v3987_v39 }
 0x58a   :  { %4762 = vperm.xlu0 %7912, %v8801_v56   ;;  %v16603_v56 = vld [vmem:[#allocation108_spill] sm:$0xff] }
 0x58b   :  { %v5359_v21 = vmax.f32 %v5163_v48, 0.0 }
 0x58c   :  { %v13940_v34 = vpop.permute.xlu1 %4352 }
 0x58d   :  { %4657 = vperm.xlu1 %7911, %v8802_v58   ;;  %v13945_v19 = vpop.permute.xlu0 %4417 }
 0x58e   :  { %4682 = vperm.xlu0 %7912, %v8803_v55   ;;  %v5147_v55 = vadd.f32 %v13759_v4, %v3971_v14  ;;  %v5344_v4 = vmax.f32 %v5148_v57, 0.0  ;;  %v3990_v14 = vmul.f32 %v16610_v33, %v16609_v53  ;;  %v16611_v57 = vld [vmem:[#allocation110_spill] sm:$0xff]  ;;  %v16618_v33 = vld [vmem:[#allocation152_spill] sm:$0xff] }
 0x58f   :  { %6311 = vmatmul.mubr.bf16.gmra.mrb[8].mxu0 %v7931_v28  ;;  %v16604_v28 = vld [vmem:[#allocation257_spill] sm:$0xff]  ;;  %v16617_v53 = vld [vmem:[#allocation130_spill] sm:$0xff] }
 0x590   :  { %v13950_v25 = vpop.permute.xlu1 %4362  ;;  %6318 = vmatprep.mubr.bf16.mxu0 %v7935_v47  ;;  %v3974_v58 = vmul.f32 %v16604_v28, %v16603_v56  ;;  %v16612_v56 = vld [vmem:[#allocation13_spill] sm:$0xff]  ;;  %v5343_v28 = vmax.f32 %v5147_v55, 0.0 }
 0x591   :  { %4587 = vperm.xlu1 %7911, %v8804_v5   ;;  %v13958_v9 = vpop.permute.xlu0 %4427  ;;  %v16605_v5 = vld [vmem:[#allocation4_spill] sm:$0xff] }
 0x592   :  { %4612 = vperm.xlu0 %7912, %v8805_v41   ;;  %v16606_v41 = vld [vmem:[#allocation276_spill] sm:$0xff]  ;;  %v5150_v39 = vadd.f32 %v13890_v12, %v3974_v58  ;;  %v3976_v12 = vmul.f32 %v16612_v56, %v16611_v57 }
 0x593   :  { %v3989_v6 = vmul.f32 %v16606_v41, %v16605_v5  ;;  %v16613_v5 = vld [vmem:[#allocation131_spill] sm:$0xff] }
 0x594   :  { %v13968_v54 = vpop.permute.xlu1 %4372  ;;  %v5152_v55 = vadd.f32 %v13898_v50, %v3976_v12 }
 0x595   :  { %4747 = vperm.xlu1 %7911, %v8806_v63   ;;  %v13975_v22 = vpop.permute.xlu0 %4437  ;;  %v8809_v63 = vld [vmem:[%s15529_s2 + $0x370] sm:$0xff] }
 0x596   :  { %4772 = vperm.xlu0 %7912, %v8807_v26   ;;  %v5165_v26 = vadd.f32 %v13906_v43, %v3989_v6  ;;  %v8810_v43 = vld [vmem:[%s15529_s2 + $0x2e0] sm:$0xff] }
 0x597   :  { %6319 = vmatmul.mubr.bf16.gmra.mrb[12].mxu0 %v7937_v13  ;;  %v16607_v13 = vld [vmem:[#allocation109_spill] sm:$0xff] }
 0x598   :  { %v4383_v47 = vpop.permute.xlu1 %4382  ;;  %v3973_v42 = vmul.f32 %v16608_v30, %v16607_v13  ;;  %6326 = vmatprep.mubr.bf16.mxu0 %v7941_v2  ;;  %v16614_v2 = vld [vmem:[#allocation277_spill] sm:$0xff]  ;;  %v16616_v13 = vld [vmem:[#allocation14_spill] sm:$0xff]  ;;  %v5361_v57 = vmax.f32 %v5165_v26, 0.0 }
 0x599   :  { %v5164_v59 = vadd.f32 %v4383_v47, %v3988_v17  ;;  %4667 = vperm.xlu1 %7911, %v8808_v7   ;;  %v13996_v46 = vpop.permute.xlu0 %4447  ;;  %v7943_v17 = vld [vmem:[%s15530_s1 + $0x1a0] ss:$52 sps:$4 sm:$0xff]   ;;  %v3991_v41 = vmul.f32 %v16614_v2, %v16613_v5  ;;  %v16622_v2 = vld [vmem:[#allocation153_spill] sm:$0xff] }
 0x59a   :  { %4687 = vperm.xlu0 %7912, %v8809_v63   ;;  %v5149_v58 = vadd.f32 %v13778_v29, %v3973_v42  ;;  %v5346_v63 = vmax.f32 %v5150_v39, 0.0  ;;  %v8811_v29 = vld [vmem:[%s15529_s2 + $0x480] sm:$0xff]  ;;  %v5635_v42 = vpack.c.bf16 %v5344_v4, %v5343_v28  ;;  %v16621_v28 = vld [vmem:[#allocation133_spill] sm:$0xff] }
 0x59b   :  { %v5360_v3 = vmax.f32 %v5164_v59, 0.0  ;;  %v16615_v59 = vld [vmem:[#allocation111_spill] sm:$0xff]  ;;  %v5167_v56 = vadd.f32 %v13919_v45, %v3991_v41  ;;  %v3993_v26 = vmul.f32 %v16622_v2, %v16621_v28  ;;  %v8812_v45 = vld [vmem:[%s15529_s2 + $0x3e0] sm:$0xff]  ;;  %v16623_v41 = vld [vmem:[#allocation113_spill] sm:$0xff] }
 0x59c   :  { %v4393_v47 = vpop.permute.xlu1 %4392  ;;  %v3975_v30 = vmul.f32 %v16616_v13, %v16615_v59  ;;  %v5345_v5 = vmax.f32 %v5149_v58, 0.0  ;;  %v7947_v4 = vld [vmem:[%s15530_s1 + $0x20c] ss:$52 sps:$4 sm:$0xff]  }
 0x59d   :  { %v5166_v7 = vadd.f32 %v4393_v47, %v3990_v14  ;;  %4597 = vperm.xlu1 %7911, %v8810_v43   ;;  %v14018_v48 = vpop.permute.xlu0 %4457  ;;  %v5643_v6 = vpack.c.bf16 %v5360_v3, %v5359_v21  ;;  %v3992_v14 = vmul.f32 %v16618_v33, %v16617_v53  ;;  %v16619_v21 = vld [vmem:[#allocation112_spill] sm:$0xff]  ;;  %v16620_v3 = vld [vmem:[#allocation15_spill] sm:$0xff]  ;;  %v8813_v13 = vld [vmem:[%s15529_s2 + $0x580] sm:$0xff]  ;;  %v5363_v33 = vmax.f32 %v5167_v56, 0.0 }
 0x59e   :  { %4857 = vperm.xlu0 %7912, %v8811_v29   ;;  %v3978_v39 = vmul.f32 %v16620_v3, %v16619_v21  ;;  %v5151_v50 = vadd.f32 %v13800_v27, %v3975_v30  ;;  %v16624_v27 = vld [vmem:[#allocation16_spill] sm:$0xff]  ;;  %v5636_v30 = vpack.c.bf16 %v5346_v63, %v5345_v5  ;;  %v16629_v5 = vld [vmem:[#allocation135_spill] sm:$0xff] }
 0x59f   :  { %v5362_v47 = vmax.f32 %v5166_v7, 0.0  ;;  %7553 = vmatprep.subr.bf16.mxu1 %v5643_v6  ;;  %6327 = vmatmul.mubr.bf16.gmra.mrb[16].mxu0 %v7943_v17  ;;  %v3977_v7 = vmul.f32 %v16624_v27, %v16623_v41  ;;  %v5348_v6 = vmax.f32 %v5152_v55, 0.0  ;;  %v16625_v29 = vld [vmem:[#allocation132_spill] sm:$0xff]  ;;  %v7949_v55 = vld [vmem:[%s15530_s1 + $0x208] ss:$52 sps:$4 sm:$0xff]   ;;  %v16633_v27 = vld [vmem:[#allocation134_spill] sm:$0xff] }
 0x5a0   :  { %v4403_v12 = vpop.permute.xlu1 %4402  ;;  %7554 = vmatpush3.bf16.msra.mxu1 %v5635_v42  ;;  %v5154_v59 = vadd.f32 %v13914_v44, %v3978_v39  ;;  %6334 = vmatprep.mubr.bf16.mxu0 %v7947_v4  ;;  %v16626_v42 = vld [vmem:[#allocation30_spill] sm:$0xff]  ;;  %v5347_v3 = vmax.f32 %v5151_v50, 0.0 }
 0x5a1   :  { %v5168_v43 = vadd.f32 %v4403_v12, %v3992_v14  ;;  %4757 = vperm.xlu1 %7911, %v8812_v45   ;;  %v14040_v17 = vpop.permute.xlu0 %4467  ;;  %v5644_v58 = vpack.c.bf16 %v5362_v47, %v5361_v57  ;;  %v3994_v53 = vmul.f32 %v16626_v42, %v16625_v29  ;;  %v5169_v14 = vadd.f32 %v13932_v1, %v3993_v26  ;;  %v16627_v44 = vld [vmem:[#allocation114_spill] sm:$0xff]  ;;  %v16628_v47 = vld [vmem:[#allocation17_spill] sm:$0xff]  ;;  %v16630_v12 = vld [vmem:[#allocation160_spill] sm:$0xff] }
 0x5a2   :  { %5017 = vperm.xlu0 %7912, %v8813_v13   ;;  %v3980_v21 = vmul.f32 %v16628_v47, %v16627_v44  ;;  %v5153_v39 = vadd.f32 %v13819_v23, %v3977_v7  ;;  %v3995_v4 = vmul.f32 %v16630_v12, %v16629_v5  ;;  %v8814_v1 = vld [vmem:[%s15529_s2 + $0x360] sm:$0xff]  ;;  %v16631_v26 = vld [vmem:[#allocation115_spill] sm:$0xff]  ;;  %v5350_v50 = vmax.f32 %v5154_v59, 0.0  ;;  %v16634_v7 = vld [vmem:[#allocation29_spill] sm:$0xff] }
 0x5a3   :  { %v5364_v57 = vmax.f32 %v5168_v43, 0.0  ;;  %7555 = vmatprep.subr.bf16.mxu1 %v5644_v58  ;;  %v16632_v43 = vld [vmem:[#allocation18_spill] sm:$0xff]  ;;  %v5637_v41 = vpack.c.bf16 %v5348_v6, %v5347_v3  ;;  %v3996_v13 = vmul.f32 %v16634_v7, %v16633_v27  ;;  %v7953_v6 = vld [vmem:[%s15530_s1 + $0x274] ss:$52 sps:$4 sm:$0xff]   ;;  %v16644_v27 = vld [vmem:[#allocation21_spill] sm:$0xff] }
 0x5a4   :  { %v4413_v63 = vpop.permute.xlu1 %4412  ;;  %7556 = vmatpush3.bf16.msra.mxu1 %v5636_v30  ;;  %v3979_v45 = vmul.f32 %v16632_v43, %v16631_v26  ;;  %v5156_v23 = vadd.f32 %v13924_v36, %v3980_v21  ;;  %v8815_v58 = vld [vmem:[%s15529_s2 + $0x400] sm:$0xff]  ;;  %v5365_v30 = vmax.f32 %v5169_v14, 0.0  ;;  %v5171_v29 = vadd.f32 %v13945_v19, %v3995_v4  ;;  %v16637_v47 = vld [vmem:[#allocation12_spill] sm:$0xff]  ;;  %v16638_v21 = vld [vmem:[#allocation37_spill] sm:$0xff] }
 0x5a5   :  { %v5170_v56 = vadd.f32 %v4413_v63, %v3994_v53  ;;  %4677 = vperm.xlu1 %7911, %v8814_v1   ;;  %v14062_v28 = vpop.permute.xlu0 %4477  ;;  %v5645_v2 = vpack.c.bf16 %v5364_v57, %v5363_v33  ;;  %v16635_v53 = vld [vmem:[#allocation116_spill] sm:$0xff]  ;;  %v16636_v33 = vld [vmem:[#allocation265_spill] sm:$0xff]  ;;  %v5349_v57 = vmax.f32 %v5153_v39, 0.0  ;;  %v3997_v14 = vmul.f32 %v16638_v21, %v16637_v47 }
 0x5a6   :  { %4777 = vperm.xlu0 %7912, %v8815_v58   ;;  %v3982_v59 = vmul.f32 %v16636_v33, %v16635_v53  ;;  %v5155_v36 = vadd.f32 %v13838_v15, %v3979_v45  ;;  %v8816_v19 = vld [vmem:[%s15529_s2 + $0x2f0] sm:$0xff]  ;;  %v16639_v63 = vld [vmem:[#allocation117_spill] sm:$0xff]  ;;  %v16640_v15 = vld [vmem:[#allocation266_spill] sm:$0xff]  ;;  %v5352_v12 = vmax.f32 %v5156_v23, 0.0  ;;  %v5367_v45 = vmax.f32 %v5171_v29, 0.0 }
 0x5a7   :  { %v5366_v42 = vmax.f32 %v5170_v56, 0.0  ;;  %7557 = vmatprep.subr.bf16.mxu1 %v5645_v2  ;;  %6335 = vmatmul.mubr.bf16.gmra.mrb[20].mxu0 %v7949_v55  ;;  %v3981_v5 = vmul.f32 %v16640_v15, %v16639_v63  ;;  %v8817_v56 = vld [vmem:[%s15529_s2 + $0x500] sm:$0xff]  ;;  %v5638_v1 = vpack.c.bf16 %v5350_v50, %v5349_v57  ;;  %v16641_v2 = vld [vmem:[#allocation11_spill] sm:$0xff]  ;;  %v16642_v26 = vld [vmem:[#allocation32_spill] sm:$0xff]  ;;  %v5173_v58 = vadd.f32 %v13958_v9, %v3997_v14 }
 0x5a8   :  { %v4423_v44 = vpop.permute.xlu1 %4422  ;;  %7558 = vmatpush3.bf16.msra.mxu1 %v5637_v41  ;;  %v5158_v4 = vadd.f32 %v13940_v34, %v3982_v59  ;;  %6342 = vmatprep.mubr.bf16.mxu0 %v7953_v6  ;;  %v3998_v43 = vmul.f32 %v16642_v26, %v16641_v2  ;;  %v7955_v23 = vld [vmem:[%s15530_s1 + $0x270] ss:$52 sps:$4 sm:$0xff]   ;;  %v16646_v53 = vld [vmem:[#allocation39_spill] sm:$0xff] }
 0x5a9   :  { %v5172_v3 = vadd.f32 %v4423_v44, %v3996_v13  ;;  %4607 = vperm.xlu1 %7911, %v8816_v19   ;;  %v14084_v55 = vpop.permute.xlu0 %4487  ;;  %v5646_v39 = vpack.c.bf16 %v5366_v42, %v5365_v30  ;;  %v16643_v34 = vld [vmem:[#allocation118_spill] sm:$0xff]  ;;  %v5351_v13 = vmax.f32 %v5155_v36, 0.0  ;;  %v5157_v30 = vadd.f32 %v13857_v61, %v3981_v5  ;;  %v16645_v42 = vld [vmem:[#allocation139_spill] sm:$0xff]  ;;  %v8818_v9 = vld [vmem:[%s15529_s2 + $0x3f0] sm:$0xff] }
 0x5aa   :  { %4937 = vperm.xlu0 %7912, %v8817_v56   ;;  %v3984_v7 = vmul.f32 %v16644_v27, %v16643_v34  ;;  %v3999_v33 = vmul.f32 %v16646_v53, %v16645_v42  ;;  %v16647_v44 = vld [vmem:[#allocation119_spill] sm:$0xff]  ;;  %v16648_v6 = vld [vmem:[#allocation22_spill] sm:$0xff]  ;;  %v5354_v36 = vmax.f32 %v5158_v4, 0.0  ;;  %v8819_v21 = vld [vmem:[%s15529_s2 + $0x490] sm:$0xff]  ;;  %v5369_v63 = vmax.f32 %v5173_v58, 0.0 }
 0x5ab   :  { %v5368_v41 = vmax.f32 %v5172_v3, 0.0  ;;  %7559 = vmatprep.subr.bf16.mxu1 %v5646_v39  ;;  %v3983_v47 = vmul.f32 %v16648_v6, %v16647_v44  ;;  %v5639_v14 = vpack.c.bf16 %v5352_v12, %v5351_v13  ;;  %v16649_v3 = vld [vmem:[#allocation138_spill] sm:$0xff]  ;;  %v16650_v19 = vld [vmem:[#allocation31_spill] sm:$0xff]  ;;  %v16651_v56 = vld [vmem:[#allocation121_spill] sm:$0xff]  ;;  %v5353_v2 = vmax.f32 %v5157_v30, 0.0 }
 0x5ac   :  { %v4433_v50 = vpop.permute.xlu1 %4432  ;;  %7560 = vmatpush3.bf16.msra.mxu1 %v5638_v1  ;;  %v5160_v61 = vadd.f32 %v13950_v25, %v3984_v7  ;;  %v4000_v39 = vmul.f32 %v16650_v19, %v16649_v3  ;;  %v5175_v15 = vadd.f32 %v13975_v22, %v3999_v33  ;;  %v16652_v1 = vld [vmem:[#allocation23_spill] sm:$0xff]  ;;  %v7959_v12 = vld [vmem:[%s15530_s1 + $0x2dc] ss:$52 sps:$4 sm:$0xff]   ;;  %v16655_v27 = vld [vmem:[#allocation122_spill] sm:$0xff] }
 0x5ad   :  { %v5174_v29 = vadd.f32 %v4433_v50, %v3998_v43  ;;  %4767 = vperm.xlu1 %7911, %v8818_v9   ;;  %v14106_v59 = vpop.permute.xlu0 %4497  ;;  %v5647_v57 = vpack.c.bf16 %v5368_v41, %v5367_v45  ;;  %v3986_v4 = vmul.f32 %v16652_v1, %v16651_v56  ;;  %v5159_v25 = vadd.f32 %v13872_v0, %v3983_v47  ;;  %v16653_v43 = vld [vmem:[#allocation141_spill] sm:$0xff]  ;;  %v16656_v0 = vld [vmem:[#allocation24_spill] sm:$0xff]  ;;  %v16658_v33 = vld [vmem:[#allocation34_spill] sm:$0xff] }
 0x5ae   :  { %4867 = vperm.xlu0 %7912, %v8819_v21   ;;  %v16654_v45 = vld [vmem:[#allocation41_spill] sm:$0xff]  ;;  %v3985_v7 = vmul.f32 %v16656_v0, %v16655_v27  ;;  %v5356_v13 = vmax.f32 %v5160_v61, 0.0  ;;  %v8821_v50 = vld [vmem:[%s15529_s2 + $0x590] sm:$0xff]  ;;  %v5640_v42 = vpack.c.bf16 %v5354_v36, %v5353_v2  ;;  %v5371_v9 = vmax.f32 %v5175_v15, 0.0  ;;  %v8824_v1 = vld [vmem:[%s15529_s2 + $0x488] sm:$0xff] }
 0x5af   :  { %v5370_v5 = vmax.f32 %v5174_v29, 0.0  ;;  %7561 = vmatprep.subr.bf16.mxu1 %v5647_v57  ;;  %6343 = vmatmul.mubr.bf16.gmra.mrb[24].mxu0 %v7955_v23  ;;  %v4001_v58 = vmul.f32 %v16654_v45, %v16653_v43  ;;  %v8820_v22 = vld [vmem:[%s15529_s2 + $0x278] sm:$0xff]  ;;  %v5162_v30 = vadd.f32 %v13968_v54, %v3986_v4  ;;  %v16657_v53 = vld [vmem:[#allocation140_spill] sm:$0xff]  ;;  %v5355_v54 = vmax.f32 %v5159_v25, 0.0  ;;  %v8828_v27 = vld [vmem:[%s15529_s2 + $0x408] sm:$0xff] }
 0x5b0   :  { %v4443_v26 = vpop.permute.xlu1 %4442  ;;  %7562 = vmatpush3.bf16.msra.mxu1 %v5639_v14  ;;  %6350 = vmatprep.mubr.bf16.mxu0 %v7959_v12  ;;  %v4002_v29 = vmul.f32 %v16658_v33, %v16657_v53  ;;  %v7961_v6 = vld [vmem:[%s15530_s1 + $0x2d8] ss:$52 sps:$4 sm:$0xff]   ;;  %v5161_v47 = vadd.f32 %v13882_v38, %v3985_v7  ;;  %v8823_v19 = vld [vmem:[%s15529_s2 + $0x410] sm:$0xff]  ;;  %v7920_v12 = vld [vmem:[%s15530_s1 + $0x8] ss:$52 sps:$4 sm:$0xff]  }
 0x5b1   :  { %v5176_v41 = vadd.f32 %v4443_v26, %v4000_v39  ;;  %4532 = vperm.xlu1 %7911, %v8820_v22   ;;  %v14128_v23 = vpop.permute.xlu0 %4507  ;;  %v5648_v34 = vpack.c.bf16 %v5370_v5, %v5369_v63  ;;  %v5177_v57 = vadd.f32 %v13996_v46, %v4001_v58  ;;  %v8822_v36 = vld [vmem:[%s15529_s2 + $0x378] sm:$0xff]  ;;  %v5358_v3 = vmax.f32 %v5162_v30, 0.0  ;;  %v7967_v56 = vld [vmem:[%s15530_s1 + $0x14] ss:$52 sps:$4 sm:$0xff]   ;;  %v8827_v22 = vld [vmem:[%s15529_s2 + $0x4a0] sm:$0xff] }
 0x5b2   :  { %5027 = vperm.xlu0 %7912, %v8821_v50   ;;  %v5641_v39 = vpack.c.bf16 %v5356_v13, %v5355_v54  ;;  %v5357_v15 = vmax.f32 %v5161_v47, 0.0  ;;  %v8825_v25 = vld [vmem:[%s15529_s2 + $0x510] sm:$0xff]  ;;  %v8826_v58 = vld [vmem:[%s15529_s2 + $0x588] sm:$0xff]  ;;  %v8829_v7 = vld [vmem:[%s15529_s2 + $0x5a0] sm:$0xff] }
 0x5b3   :  { %v5372_v44 = vmax.f32 %v5176_v41, 0.0  ;;  %7563 = vmatprep.subr.bf16.mxu1 %v5648_v34  ;;  %v5373_v63 = vmax.f32 %v5177_v57, 0.0  ;;  %v7926_v45 = vld [vmem:[%s15530_s1 + $0x74] ss:$52 sps:$4 sm:$0xff]   ;;  %v7928_v13 = vld [vmem:[%s15530_s1 + $0x70] ss:$52 sps:$4 sm:$0xff]  }
 0x5b4   :  { %v4453_v61 = vpop.permute.xlu1 %4452  ;;  %7564 = vmatpush3.bf16.msra.mxu1 %v5640_v42  ;;  %v5642_v26 = vpack.c.bf16 %v5358_v3, %v5357_v15  ;;  %v7932_v50 = vld [vmem:[%s15530_s1 + $0xdc] ss:$52 sps:$4 sm:$0xff]   ;;  %v8830_v42 = vld [vmem:[%s15529_s2 + $0x508] sm:$0xff]  ;;  %v8831_v33 = vld [vmem:[%s15529_s2 + $0x420] sm:$0xff] }
 0x5b5   :  { %v5178_v21 = vadd.f32 %v4453_v61, %v4002_v29  ;;  %4692 = vperm.xlu1 %7911, %v8822_v36   ;;  %v14146_v14 = vpop.permute.xlu0 %4517  ;;  %v5649_v46 = vpack.c.bf16 %v5372_v44, %v5371_v9  ;;  %v8832_v9 = vld [vmem:[%s15529_s2 + $0x498] sm:$0xff]  ;;  %v8833_v44 = vld [vmem:[%s15529_s2 + $0x520] sm:$0xff]  ;;  %v8835_v36 = vld [vmem:[%s15529_s2 + $0x4b0] sm:$0xff] }
 0x5b6   :  { %4787 = vperm.xlu0 %7912, %v8823_v19   ;;  %v7938_v47 = vld [vmem:[%s15530_s1 + $0x144] ss:$52 sps:$4 sm:$0xff]  }
 0x5b7   :  { %v5374_v38 = vmax.f32 %v5178_v21, 0.0  ;;  %7565 = vmatprep.subr.bf16.mxu1 %v5649_v46  ;;  %6351 = vmatmul.mubr.bf16.gmra.mrb[28].mxu0 %v7961_v6  ;;  %v7934_v6 = vld [vmem:[%s15530_s1 + $0xd8] ss:$52 sps:$4 sm:$0xff]   ;;  %v16659_v46 = vld [vmem:[#allocation142_spill] sm:$0xff] }
 0x5b8   :  { %v4463_v5 = vpop.permute.xlu1 %4462  ;;  %7566 = vmatpush3.bf16.msra.mxu1 %v5641_v39  ;;  %6488 = vmatprep.mubr.bf16.mxu0 %v7967_v56  ;;  %v8834_v61 = vld [vmem:[%s15529_s2 + $0x598] sm:$0xff] }
 0x5b9   :  { %4862 = vperm.xlu1 %7911, %v8824_v1   ;;  %v14157_v4 = vpop.permute.xlu0 %4527  ;;  %v5650_v2 = vpack.c.bf16 %v5374_v38, %v5373_v63  ;;  %v16660_v3 = vld [vmem:[#allocation33_spill] sm:$0xff]  ;;  %v16661_v63 = vld [vmem:[#allocation158_spill] sm:$0xff]  ;;  %v16662_v1 = vld [vmem:[#allocation143_spill] sm:$0xff] }
 0x5ba   :  { %4947 = vperm.xlu0 %7912, %v8825_v25   ;;  %v4004_v19 = vmul.f32 %v16660_v3, %v16659_v46  ;;  %v4020_v38 = vmul.f32 %v12975_v32, %v16661_v63  ;;  %v8836_v15 = vld [vmem:[%s15529_s2 + $0x418] sm:$0xff]  ;;  %v16667_v46 = vld [vmem:[#allocation174_spill] sm:$0xff]  ;;  %v8840_v63 = vld [vmem:[%s15529_s2 + $0x4a8] sm:$0xff] }
 0x5bb   :  { %7567 = vmatprep.subr.bf16.mxu1 %v5650_v2  ;;  %v16663_v2 = vld [vmem:[#allocation168_spill] sm:$0xff]  ;;  %v4036_v3 = vmul.f32 %v13071_v49, %v16667_v46  ;;  %v16675_v46 = vld [vmem:[#allocation66_spill] sm:$0xff] }
 0x5bc   :  { %v14165_v43 = vpop.permute.xlu1 %4472  ;;  %7568 = vmatpush3.bf16.msra.mxu1 %v5642_v26  ;;  %v4003_v25 = vmul.f32 %v16663_v2, %v16662_v1  ;;  %v5180_v26 = vadd.f32 %v4463_v5, %v4004_v19  ;;  %v7944_v5 = vld [vmem:[%s15530_s1 + $0x1ac] ss:$52 sps:$4 sm:$0xff]  }
 0x5bd   :  { %5022 = vperm.xlu1 %7911, %v8826_v58   ;;  %v4543_v41 = vpop.permute.xlu0 %4542  ;;  %v16668_v1 = vld [vmem:[#allocation175_spill] sm:$0xff] }
 0x5be   :  { %4877 = vperm.xlu0 %7912, %v8827_v22   ;;  %v5196_v32 = vadd.f32 %v4543_v41, %v4020_v38  ;;  %v7940_v22 = vld [vmem:[%s15530_s1 + $0x140] ss:$52 sps:$4 sm:$0xff]   ;;  %v4035_v2 = vmul.f32 %v13129_v31, %v16668_v1 }
 0x5bf   :  { %6392 = vmatmul.mubr.bf16.vlgmr.msra.gmra.mrb[0].mxu1 %v7920_v12  ;;  %v8837_v12 = vld [vmem:[%s15529_s2 + $0x5b0] sm:$0xff] }
 0x5c0   :  { %v14176_v34 = vpop.permute.xlu1 %4482  ;;  %6399 = vmatprep.mubr.bf16.mxu1 %v7926_v45  ;;  %v16664_v45 = vld [vmem:[#allocation159_spill] sm:$0xff] }
 0x5c1   :  { %4782 = vperm.xlu1 %7911, %v8828_v27   ;;  %v4703_v0 = vpop.permute.xlu0 %4702  ;;  %v4019_v58 = vmul.f32 %v13033_v11, %v16664_v45  ;;  %v5179_v27 = vadd.f32 %v14018_v48, %v4003_v25  ;;  %v8838_v11 = vld [vmem:[%s15529_s2 + $0x518] sm:$0xff]  ;;  %v8839_v48 = vld [vmem:[%s15529_s2 + $0x430] sm:$0xff]  ;;  %v16669_v45 = vld [vmem:[#allocation19_spill] sm:$0xff] }
 0x5c2   :  { %5037 = vperm.xlu0 %7912, %v8829_v7  }
 0x5c4   :  { %v14187_v30 = vpop.permute.xlu1 %4492 }
 0x5c5   :  { %4942 = vperm.xlu1 %7911, %v8830_v42   ;;  %v14195_v53 = vpop.permute.xlu0 %4622 }
 0x5c6   :  { %4797 = vperm.xlu0 %7912, %v8831_v33   ;;  %v5376_v33 = vmax.f32 %v5180_v26, 0.0  ;;  %v5212_v49 = vadd.f32 %v14195_v53, %v4036_v3  ;;  %v8842_v53 = vld [vmem:[%s15529_s2 + $0x5a8] sm:$0xff] }
 0x5c7   :  { %6400 = vmatmul.mubr.bf16.gmra.mrb[4].mxu1 %v7928_v13  ;;  %v16665_v13 = vld [vmem:[#allocation190_spill] sm:$0xff] }
 0x5c8   :  { %v14200_v29 = vpop.permute.xlu1 %4502  ;;  %6407 = vmatprep.mubr.bf16.mxu1 %v7932_v50  ;;  %v4052_v50 = vmul.f32 %v13167_v18, %v16665_v13 }
 0x5c9   :  { %4872 = vperm.xlu1 %7911, %v8832_v9   ;;  %v14205_v57 = vpop.permute.xlu0 %4552  ;;  %v16666_v9 = vld [vmem:[#allocation191_spill] sm:$0xff] }
 0x5ca   :  { %4957 = vperm.xlu0 %7912, %v8833_v44   ;;  %v4051_v44 = vmul.f32 %v13224_v35, %v16666_v9  ;;  %v8843_v9 = vld [vmem:[%s15529_s2 + $0x4c0] sm:$0xff] }
 0x5cc   :  { %v14213_v54 = vpop.permute.xlu1 %4512 }
 0x5cd   :  { %5032 = vperm.xlu1 %7911, %v8834_v61   ;;  %v14221_v21 = vpop.permute.xlu0 %4712  ;;  %v5375_v61 = vmax.f32 %v5179_v27, 0.0  ;;  %v7950_v27 = vld [vmem:[%s15530_s1 + $0x214] ss:$52 sps:$4 sm:$0xff]  }
 0x5ce   :  { %4887 = vperm.xlu0 %7912, %v8835_v36  }
 0x5cf   :  { %6408 = vmatmul.mubr.bf16.gmra.mrb[8].mxu1 %v7934_v6  ;;  %v5392_v6 = vmax.f32 %v5196_v32, 0.0  ;;  %v5651_v35 = vpack.c.bf16 %v5376_v33, %v5375_v61 }
 0x5d0   :  { %v14228_v39 = vpop.permute.xlu1 %4522  ;;  %6415 = vmatprep.mubr.bf16.mxu1 %v7938_v47  ;;  %v5228_v47 = vadd.f32 %v4703_v0, %v4052_v50  ;;  %v8841_v0 = vld [vmem:[%s15529_s2 + $0x530] sm:$0xff] }
 0x5d1   :  { %4792 = vperm.xlu1 %7911, %v8836_v15   ;;  %v14235_v56 = vpop.permute.xlu0 %4632 }
 0x5d2   :  { %5047 = vperm.xlu0 %7912, %v8837_v12   ;;  %v5424_v25 = vmax.f32 %v5228_v47, 0.0  ;;  %v7946_v12 = vld [vmem:[%s15530_s1 + $0x1a8] ss:$52 sps:$4 sm:$0xff]  }
 0x5d4   :  { %v4538_v7 = vpop.permute.xlu1 %4537 }
 0x5d5   :  { %v5195_v42 = vadd.f32 %v4538_v7, %v4019_v58  ;;  %4952 = vperm.xlu1 %7911, %v8838_v11   ;;  %v14256_v41 = vpop.permute.xlu0 %4562  ;;  %v16670_v58 = vld [vmem:[#allocation161_spill] sm:$0xff]  ;;  %v16671_v7 = vld [vmem:[#allocation35_spill] sm:$0xff] }
 0x5d6   :  { %4807 = vperm.xlu0 %7912, %v8839_v48   ;;  %v4006_v32 = vmul.f32 %v16670_v58, %v16669_v45  ;;  %v4022_v31 = vmul.f32 %v12987_v60, %v16671_v7  ;;  %v16673_v11 = vld [vmem:[#allocation45_spill] sm:$0xff]  ;;  %v16674_v60 = vld [vmem:[#allocation36_spill] sm:$0xff] }
 0x5d7   :  { %v5391_v18 = vmax.f32 %v5195_v42, 0.0  ;;  %6416 = vmatmul.mubr.bf16.gmra.mrb[12].mxu1 %v7940_v22  ;;  %v16672_v42 = vld [vmem:[#allocation20_spill] sm:$0xff] }
 0x5d8   :  { %v4698_v36 = vpop.permute.xlu1 %4697  ;;  %6423 = vmatprep.mubr.bf16.mxu1 %v7944_v5  ;;  %v4005_v33 = vmul.f32 %v16673_v11, %v16672_v42  ;;  %v5182_v48 = vadd.f32 %v14165_v43, %v4006_v32  ;;  %v5198_v47 = vadd.f32 %v14205_v57, %v4022_v31  ;;  %v4054_v43 = vmul.f32 %v13179_v10, %v16675_v46  ;;  %v16678_v7 = vld [vmem:[#allocation52_spill] sm:$0xff]  ;;  %v16680_v42 = vld [vmem:[#allocation38_spill] sm:$0xff] }
 0x5d9   :  { %v5227_v19 = vadd.f32 %v4698_v36, %v4051_v44  ;;  %4882 = vperm.xlu1 %7911, %v8840_v63   ;;  %v14268_v38 = vpop.permute.xlu0 %4722  ;;  %v5659_v15 = vpack.c.bf16 %v5392_v6, %v5391_v18  ;;  %v4021_v44 = vmul.f32 %v13045_v24, %v16674_v60  ;;  %v5408_v6 = vmax.f32 %v5212_v49, 0.0  ;;  %v8844_v63 = vld [vmem:[%s15529_s2 + $0x428] sm:$0xff] }
 0x5da   :  { %4967 = vperm.xlu0 %7912, %v8841_v0   ;;  %v5181_v61 = vadd.f32 %v14040_v17, %v4005_v33  ;;  %v5378_v57 = vmax.f32 %v5182_v48, 0.0  ;;  %v16676_v17 = vld [vmem:[#allocation67_spill] sm:$0xff]  ;;  %v5394_v0 = vmax.f32 %v5198_v47, 0.0  ;;  %v5230_v10 = vadd.f32 %v14221_v21, %v4054_v43  ;;  %v16681_v48 = vld [vmem:[#allocation162_spill] sm:$0xff] }
 0x5db   :  { %v5423_v26 = vmax.f32 %v5227_v19, 0.0  ;;  %7617 = vmatprep.subr.bf16.mxu0 %v5659_v15  ;;  %v8845_v15 = vld [vmem:[%s15529_s2 + $0x5c0] sm:$0xff]  ;;  %v4037_v31 = vmul.f32 %v13141_v52, %v16678_v7  ;;  %v8848_v52 = vld [vmem:[%s15529_s2 + $0x4b8] sm:$0xff]  ;;  %v16688_v7 = vld [vmem:[#allocation179_spill] sm:$0xff] }
 0x5dc   :  { %v4618_v22 = vpop.permute.xlu1 %4617  ;;  %7618 = vmatpush3.bf16.msra.mxu0 %v5651_v35  ;;  %v4053_v35 = vmul.f32 %v13235_v62, %v16676_v17  ;;  %v8846_v62 = vld [vmem:[%s15529_s2 + $0x528] sm:$0xff] }
 0x5dd   :  { %v5211_v5 = vadd.f32 %v4618_v22, %v4035_v2  ;;  %5042 = vperm.xlu1 %7911, %v8842_v53   ;;  %v14289_v13 = vpop.permute.xlu0 %4642  ;;  %v5675_v50 = vpack.c.bf16 %v5424_v25, %v5423_v26  ;;  %v7952_v2 = vld [vmem:[%s15530_s1 + $0x210] ss:$52 sps:$4 sm:$0xff]   ;;  %v5377_v25 = vmax.f32 %v5181_v61, 0.0 }
 0x5de   :  { %4897 = vperm.xlu0 %7912, %v8843_v9   ;;  %v7956_v26 = vld [vmem:[%s15530_s1 + $0x27c] ss:$52 sps:$4 sm:$0xff]   ;;  %v4024_v9 = vmul.f32 %v12999_v40, %v16681_v48  ;;  %v8849_v61 = vld [vmem:[%s15529_s2 + $0x540] sm:$0xff]  ;;  %v16683_v40 = vld [vmem:[#allocation163_spill] sm:$0xff] }
 0x5df   :  { %v5407_v18 = vmax.f32 %v5211_v5, 0.0  ;;  %7681 = vmatprep.subr.bf16.mxu1 %v5675_v50  ;;  %6424 = vmatmul.mubr.bf16.gmra.mrb[16].mxu1 %v7946_v12  ;;  %v16677_v12 = vld [vmem:[#allocation51_spill] sm:$0xff]  ;;  %v5652_v22 = vpack.c.bf16 %v5378_v57, %v5377_v25  ;;  %v5426_v5 = vmax.f32 %v5230_v10, 0.0  ;;  %v16679_v50 = vld [vmem:[#allocation146_spill] sm:$0xff] }
 0x5e0   :  { %v4548_v36 = vpop.permute.xlu1 %4547  ;;  %6431 = vmatprep.mubr.bf16.mxu1 %v7950_v27  ;;  %v4038_v45 = vmul.f32 %v13083_v16, %v16677_v12  ;;  %v8847_v27 = vld [vmem:[%s15529_s2 + $0x440] sm:$0xff]  ;;  %v4008_v11 = vmul.f32 %v16680_v42, %v16679_v50  ;;  %v5200_v43 = vadd.f32 %v14256_v41, %v4024_v9  ;;  %v16690_v42 = vld [vmem:[#allocation148_spill] sm:$0xff] }
 0x5e1   :  { %v5667_v3 = vpack.c.bf16 %v5408_v6, %v5407_v18  ;;  %v5197_v19 = vadd.f32 %v4548_v36, %v4021_v44  ;;  %4802 = vperm.xlu1 %7911, %v8844_v63   ;;  %v14306_v24 = vpop.permute.xlu0 %4572  ;;  %v16682_v6 = vld [vmem:[#allocation147_spill] sm:$0xff]  ;;  %v4023_v36 = vmul.f32 %v13057_v37, %v16683_v40  ;;  %v8850_v37 = vld [vmem:[%s15529_s2 + $0x5b8] sm:$0xff]  ;;  %v16686_v12 = vld [vmem:[#allocation178_spill] sm:$0xff] }
 0x5e2   :  { %5057 = vperm.xlu0 %7912, %v8845_v15   ;;  %v5214_v16 = vadd.f32 %v14235_v56, %v4038_v45  ;;  %v4007_v47 = vmul.f32 %v12961_v8, %v16682_v6  ;;  %v5184_v18 = vadd.f32 %v14176_v34, %v4008_v11  ;;  %v7958_v8 = vld [vmem:[%s15530_s1 + $0x278] ss:$52 sps:$4 sm:$0xff]   ;;  %v16684_v34 = vld [vmem:[#allocation192_spill] sm:$0xff]  ;;  %v16687_v45 = vld [vmem:[#allocation58_spill] sm:$0xff] }
 0x5e3   :  { %v5393_v1 = vmax.f32 %v5197_v19, 0.0  ;;  %7682 = vmatpush3.bf16.msra.mxu1 %v5667_v3  ;;  %v4056_v57 = vmul.f32 %v13191_v51, %v16684_v34  ;;  %v16685_v51 = vld [vmem:[#allocation193_spill] sm:$0xff]  ;;  %v16691_v11 = vld [vmem:[#allocation40_spill] sm:$0xff] }
 0x5e4   :  { %v4708_v49 = vpop.permute.xlu1 %4707  ;;  %v5410_v46 = vmax.f32 %v5214_v16, 0.0  ;;  %v5183_v19 = vadd.f32 %v14062_v28, %v4007_v47  ;;  %v7962_v28 = vld [vmem:[%s15530_s1 + $0x2e4] ss:$52 sps:$4 sm:$0xff]   ;;  %v4055_v10 = vmul.f32 %v13246_v20, %v16685_v51  ;;  %v7964_v9 = vld [vmem:[%s15530_s1 + $0x2e0] ss:$52 sps:$4 sm:$0xff]  }
 0x5e5   :  { %v5229_v58 = vadd.f32 %v4708_v49, %v4053_v35  ;;  %4962 = vperm.xlu1 %7911, %v8846_v62   ;;  %v14325_v21 = vpop.permute.xlu0 %4732  ;;  %v5660_v32 = vpack.c.bf16 %v5394_v0, %v5393_v1  ;;  %v5380_v35 = vmax.f32 %v5184_v18, 0.0  ;;  %v8851_v0 = vld [vmem:[%s15529_s2 + $0x4d0] sm:$0xff]  ;;  %v5396_v1 = vmax.f32 %v5200_v43, 0.0  ;;  %v8854_v47 = vld [vmem:[%s15529_s2 + $0x538] sm:$0xff] }
 0x5e6   :  { %4817 = vperm.xlu0 %7912, %v8847_v27   ;;  %v5379_v49 = vmax.f32 %v5183_v19, 0.0  ;;  %v16694_v40 = vld [vmem:[#allocation149_spill] sm:$0xff] }
 0x5e7   :  { %v5425_v53 = vmax.f32 %v5229_v58, 0.0  ;;  %7619 = vmatprep.subr.bf16.mxu0 %v5660_v32  ;;  %6432 = vmatmul.mubr.bf16.gmra.mrb[20].mxu1 %v7952_v2  ;;  %v5232_v2 = vadd.f32 %v14268_v38, %v4056_v57  ;;  %v4040_v58 = vmul.f32 %v16687_v45, %v16686_v12  ;;  %v8852_v32 = vld [vmem:[%s15529_s2 + $0x438] sm:$0xff]  ;;  %v8853_v38 = vld [vmem:[%s15529_s2 + $0x5d0] sm:$0xff] }
 0x5e8   :  { %v4628_v33 = vpop.permute.xlu1 %4627  ;;  %7620 = vmatpush3.bf16.msra.mxu0 %v5652_v22  ;;  %6439 = vmatprep.mubr.bf16.mxu1 %v7956_v26  ;;  %v5653_v27 = vpack.c.bf16 %v5380_v35, %v5379_v49  ;;  %v16696_v19 = vld [vmem:[#allocation165_spill] sm:$0xff]  ;;  %v16699_v35 = vld [vmem:[#allocation287_spill] sm:$0xff] }
 0x5e9   :  { %v5213_v60 = vadd.f32 %v4628_v33, %v4037_v31  ;;  %4892 = vperm.xlu1 %7911, %v8848_v52   ;;  %v14340_v44 = vpop.permute.xlu0 %4652  ;;  %v5676_v56 = vpack.c.bf16 %v5426_v5, %v5425_v53  ;;  %v16689_v31 = vld [vmem:[#allocation282_spill] sm:$0xff]  ;;  %v5428_v16 = vmax.f32 %v5232_v2, 0.0  ;;  %v5216_v53 = vadd.f32 %v14289_v13, %v4040_v58  ;;  %v16693_v52 = vld [vmem:[#allocation177_spill] sm:$0xff] }
 0x5ea   :  { %4977 = vperm.xlu0 %7912, %v8849_v61   ;;  %v4039_v5 = vmul.f32 %v16689_v31, %v16688_v7  ;;  %v4010_v33 = vmul.f32 %v16691_v11, %v16690_v42  ;;  %v7970_v61 = vld [vmem:[%s15530_s1 + $0x1c] ss:$52 sps:$4 sm:$0xff]   ;;  %v16700_v2 = vld [vmem:[#allocation194_spill] sm:$0xff]  ;;  %v8858_v7 = vld [vmem:[%s15529_s2 + $0x5c8] sm:$0xff] }
 0x5eb   :  { %v5409_v3 = vmax.f32 %v5213_v60, 0.0  ;;  %7683 = vmatprep.subr.bf16.mxu1 %v5676_v56  ;;  %v16692_v60 = vld [vmem:[#allocation164_spill] sm:$0xff]  ;;  %v5412_v34 = vmax.f32 %v5216_v53, 0.0  ;;  %v16704_v53 = vld [vmem:[#allocation181_spill] sm:$0xff] }
 0x5ec   :  { %v4558_v63 = vpop.permute.xlu1 %4557  ;;  %v4026_v56 = vmul.f32 %v16693_v52, %v16692_v60  ;;  %v5186_v43 = vadd.f32 %v14187_v30, %v4010_v33  ;;  %v16707_v60 = vld [vmem:[#allocation42_spill] sm:$0xff] }
 0x5ed   :  { %v5668_v15 = vpack.c.bf16 %v5410_v46, %v5409_v3  ;;  %v5199_v17 = vadd.f32 %v4558_v63, %v4023_v36  ;;  %5052 = vperm.xlu1 %7911, %v8850_v37   ;;  %v14360_v41 = vpop.permute.xlu0 %4582  ;;  %v16695_v36 = vld [vmem:[#allocation48_spill] sm:$0xff]  ;;  %v16697_v63 = vld [vmem:[#allocation54_spill] sm:$0xff] }
 0x5ee   :  { %4907 = vperm.xlu0 %7912, %v8851_v0   ;;  %v4009_v46 = vmul.f32 %v16695_v36, %v16694_v40  ;;  %v8855_v3 = vld [vmem:[%s15529_s2 + $0x450] sm:$0xff]  ;;  %v5202_v57 = vadd.f32 %v14306_v24, %v4026_v56  ;;  %v5382_v24 = vmax.f32 %v5186_v43, 0.0  ;;  %v8860_v40 = vld [vmem:[%s15529_s2 + $0x448] sm:$0xff]  ;;  %v16711_v43 = vld [vmem:[#allocation49_spill] sm:$0xff] }
 0x5ef   :  { %v5395_v25 = vmax.f32 %v5199_v17, 0.0  ;;  %7684 = vmatpush3.bf16.msra.mxu1 %v5668_v15 }
 0x5f0   :  { %v4718_v26 = vpop.permute.xlu1 %4717  ;;  %6440 = vmatmul.mubr.bf16.gmra.mrb[24].mxu1 %v7958_v8  ;;  %v4025_v8 = vmul.f32 %v16697_v63, %v16696_v19  ;;  %v5185_v17 = vadd.f32 %v14084_v55, %v4009_v46  ;;  %v8857_v55 = vld [vmem:[%s15529_s2 + $0x550] sm:$0xff]  ;;  %v8861_v63 = vld [vmem:[%s15529_s2 + $0x5e0] sm:$0xff] }
 0x5f1   :  { %v5231_v62 = vadd.f32 %v4718_v26, %v4055_v10  ;;  %4812 = vperm.xlu1 %7911, %v8852_v32   ;;  %v14376_v22 = vpop.permute.xlu0 %4742  ;;  %v5661_v20 = vpack.c.bf16 %v5396_v1, %v5395_v25  ;;  %6447 = vmatprep.mubr.bf16.mxu1 %v7962_v28  ;;  %v16698_v28 = vld [vmem:[#allocation70_spill] sm:$0xff]  ;;  %v8856_v10 = vld [vmem:[%s15529_s2 + $0x4c8] sm:$0xff]  ;;  %v16701_v25 = vld [vmem:[#allocation293_spill] sm:$0xff]  ;;  %v5398_v26 = vmax.f32 %v5202_v57, 0.0 }
 0x5f2   :  { %5067 = vperm.xlu0 %7912, %v8853_v38   ;;  %v4058_v30 = vmul.f32 %v16699_v35, %v16698_v28  ;;  %v4057_v49 = vmul.f32 %v16701_v25, %v16700_v2  ;;  %v5381_v58 = vmax.f32 %v5185_v17, 0.0  ;;  %v16702_v32 = vld [vmem:[#allocation180_spill] sm:$0xff]  ;;  %v16717_v25 = vld [vmem:[#allocation295_spill] sm:$0xff] }
 0x5f3   :  { %v5427_v50 = vmax.f32 %v5231_v62, 0.0  ;;  %7621 = vmatprep.subr.bf16.mxu0 %v5661_v20  ;;  %v16703_v20 = vld [vmem:[#allocation62_spill] sm:$0xff] }
 0x5f4   :  { %v4638_v48 = vpop.permute.xlu1 %4637  ;;  %7622 = vmatpush3.bf16.msra.mxu0 %v5653_v27  ;;  %v5234_v12 = vadd.f32 %v14325_v21, %v4058_v30  ;;  %v4042_v27 = vmul.f32 %v16703_v20, %v16702_v32  ;;  %v8859_v21 = vld [vmem:[%s15529_s2 + $0x4e0] sm:$0xff]  ;;  %v16714_v30 = vld [vmem:[#allocation72_spill] sm:$0xff]  ;;  %v16719_v20 = vld [vmem:[#allocation65_spill] sm:$0xff] }
 0x5f5   :  { %v5215_v6 = vadd.f32 %v4638_v48, %v4039_v5  ;;  %4972 = vperm.xlu1 %7911, %v8854_v47   ;;  %v14394_v13 = vpop.permute.xlu0 %4662  ;;  %v5677_v18 = vpack.c.bf16 %v5428_v16, %v5427_v50  ;;  %v5654_v16 = vpack.c.bf16 %v5382_v24, %v5381_v58  ;;  %v16705_v50 = vld [vmem:[#allocation284_spill] sm:$0xff]  ;;  %v16709_v47 = vld [vmem:[#allocation55_spill] sm:$0xff]  ;;  %v16718_v32 = vld [vmem:[#allocation182_spill] sm:$0xff] }
 0x5f6   :  { %4827 = vperm.xlu0 %7912, %v8855_v3   ;;  %v4041_v42 = vmul.f32 %v16705_v50, %v16704_v53  ;;  %v5430_v11 = vmax.f32 %v5234_v12, 0.0  ;;  %v5218_v33 = vadd.f32 %v14340_v44, %v4042_v27  ;;  %v16710_v44 = vld [vmem:[#allocation151_spill] sm:$0xff]  ;;  %v4044_v27 = vmul.f32 %v16719_v20, %v16718_v32  ;;  %v16721_v50 = vld [vmem:[#allocation69_spill] sm:$0xff] }
 0x5f7   :  { %v5411_v15 = vmax.f32 %v5215_v6, 0.0  ;;  %7685 = vmatprep.subr.bf16.mxu1 %v5677_v18  ;;  %v16708_v6 = vld [vmem:[#allocation166_spill] sm:$0xff]  ;;  %v4011_v3 = vmul.f32 %v16711_v43, %v16710_v44  ;;  %v8862_v24 = vld [vmem:[%s15529_s2 + $0x548] sm:$0xff] }
 0x5f8   :  { %v4568_v37 = vpop.permute.xlu1 %4567  ;;  %6448 = vmatmul.mubr.bf16.gmra.mrb[28].mxu1 %v7964_v9  ;;  %v16706_v9 = vld [vmem:[#allocation150_spill] sm:$0xff]  ;;  %v4028_v18 = vmul.f32 %v16709_v47, %v16708_v6  ;;  %v16720_v53 = vld [vmem:[#allocation183_spill] sm:$0xff]  ;;  %v16725_v47 = vld [vmem:[#allocation57_spill] sm:$0xff] }
 0x5f9   :  { %v5669_v0 = vpack.c.bf16 %v5412_v34, %v5411_v15  ;;  %v5201_v51 = vadd.f32 %v4568_v37, %v4025_v8  ;;  %4902 = vperm.xlu1 %7911, %v8856_v10   ;;  %v14414_v1 = vpop.permute.xlu0 %4592  ;;  %6585 = vmatprep.mubr.bf16.mxu1 %v7970_v61  ;;  %v4012_v52 = vmul.f32 %v16707_v60, %v16706_v9  ;;  %v16712_v8 = vld [vmem:[#allocation167_spill] sm:$0xff]  ;;  %v5414_v15 = vmax.f32 %v5218_v33, 0.0  ;;  %v16723_v60 = vld [vmem:[#allocation169_spill] sm:$0xff]  ;;  %v16727_v43 = vld [vmem:[#allocation50_spill] sm:$0xff] }
 0x5fa   :  { %4987 = vperm.xlu0 %7912, %v8857_v55   ;;  %v16713_v34 = vld [vmem:[#allocation63_spill] sm:$0xff]  ;;  %v5204_v17 = vadd.f32 %v14360_v41, %v4028_v18  ;;  %v5187_v28 = vadd.f32 %v14106_v59, %v4011_v3  ;;  %v8863_v41 = vld [vmem:[%s15529_s2 + $0x460] sm:$0xff]  ;;  %v5220_v33 = vadd.f32 %v14394_v13, %v4044_v27  ;;  %v16726_v13 = vld [vmem:[#allocation28_spill] sm:$0xff] }
 0x5fb   :  { %v5397_v45 = vmax.f32 %v5201_v51, 0.0  ;;  %7686 = vmatpush3.bf16.msra.mxu1 %v5669_v0  ;;  %v5188_v19 = vadd.f32 %v14200_v29, %v4012_v52  ;;  %v4027_v57 = vmul.f32 %v16713_v34, %v16712_v8  ;;  %v16715_v0 = vld [vmem:[#allocation289_spill] sm:$0xff]  ;;  %v16716_v59 = vld [vmem:[#allocation195_spill] sm:$0xff]  ;;  %v4013_v3 = vmul.f32 %v16727_v43, %v16726_v13  ;;  %v16728_v8 = vld [vmem:[#allocation44_spill] sm:$0xff] }
 0x5fc   :  { %v4728_v62 = vpop.permute.xlu1 %4727  ;;  %v4060_v51 = vmul.f32 %v16715_v0, %v16714_v30  ;;  %v5383_v58 = vmax.f32 %v5187_v28, 0.0  ;;  %v16722_v9 = vld [vmem:[#allocation27_spill] sm:$0xff]  ;;  %v16729_v34 = vld [vmem:[#allocation56_spill] sm:$0xff]  ;;  %v16731_v0 = vld [vmem:[#allocation290_spill] sm:$0xff] }
 0x5fd   :  { %v5233_v38 = vadd.f32 %v4728_v62, %v4057_v49  ;;  %5062 = vperm.xlu1 %7911, %v8858_v7   ;;  %v14427_v31 = vpop.permute.xlu0 %4752  ;;  %v5662_v5 = vpack.c.bf16 %v5398_v26, %v5397_v45  ;;  %v5384_v2 = vmax.f32 %v5188_v19, 0.0  ;;  %v4059_v49 = vmul.f32 %v16717_v25, %v16716_v59  ;;  %v8864_v7 = vld [vmem:[%s15529_s2 + $0x4d8] sm:$0xff]  ;;  %v16724_v6 = vld [vmem:[#allocation43_spill] sm:$0xff]  ;;  %v16730_v30 = vld [vmem:[#allocation196_spill] sm:$0xff] }
 0x5fe   :  { %4917 = vperm.xlu0 %7912, %v8859_v21   ;;  %v5400_v26 = vmax.f32 %v5204_v17, 0.0  ;;  %v5236_v12 = vadd.f32 %v14376_v22, %v4060_v51  ;;  %v8865_v22 = vld [vmem:[%s15529_s2 + $0x560] sm:$0xff]  ;;  %v4014_v52 = vmul.f32 %v16723_v60, %v16722_v9  ;;  %v4030_v18 = vmul.f32 %v16725_v47, %v16724_v6  ;;  %v8870_v27 = vld [vmem:[%s15529_s2 + $0x558] sm:$0xff] }
 0x5ff   :  { %v5429_v48 = vmax.f32 %v5233_v38, 0.0  ;;  %7623 = vmatprep.subr.bf16.mxu0 %v5662_v5  ;;  %v5655_v21 = vpack.c.bf16 %v5384_v2, %v5383_v58  ;;  %v5189_v28 = vadd.f32 %v14128_v23, %v4013_v3  ;;  %v4062_v51 = vmul.f32 %v16731_v0, %v16730_v30  ;;  %v16732_v23 = vld [vmem:[#allocation197_spill] sm:$0xff]  ;;  %v16734_v58 = vld [vmem:[#allocation59_spill] sm:$0xff]  ;;  %v8873_v3 = vld [vmem:[%s15529_s2 + $0x570] sm:$0xff] }
 0x600   :  { %v4648_v56 = vpop.permute.xlu1 %4647  ;;  %7624 = vmatpush3.bf16.msra.mxu0 %v5654_v16  ;;  %v5190_v19 = vadd.f32 %v14213_v54, %v4014_v52  ;;  %v5206_v17 = vadd.f32 %v14414_v1, %v4030_v18  ;;  %v8869_v1 = vld [vmem:[%s15529_s2 + $0x5f0] sm:$0xff]  ;;  %v16740_v52 = vld [vmem:[#allocation170_spill] sm:$0xff]  ;;  %v8872_v18 = vld [vmem:[%s15529_s2 + $0x4e8] sm:$0xff] }
 0x601   :  { %v5217_v61 = vadd.f32 %v4648_v56, %v4041_v42  ;;  %4822 = vperm.xlu1 %7911, %v8860_v40   ;;  %v14442_v36 = vpop.permute.xlu0 %4672  ;;  %v5678_v46 = vpack.c.bf16 %v5430_v11, %v5429_v48  ;;  %v4043_v42 = vmul.f32 %v16721_v50, %v16720_v53  ;;  %v5432_v11 = vmax.f32 %v5236_v12, 0.0  ;;  %v8866_v40 = vld [vmem:[%s15529_s2 + $0x5d8] sm:$0xff] }
 0x602   :  { %5077 = vperm.xlu0 %7912, %v8861_v63   ;;  %v8867_v63 = vld [vmem:[%s15529_s2 + $0x4f0] sm:$0xff]  ;;  %v5386_v2 = vmax.f32 %v5190_v19, 0.0  ;;  %v5402_v25 = vmax.f32 %v5206_v17, 0.0  ;;  %v5385_v12 = vmax.f32 %v5189_v28, 0.0  ;;  %v16744_v19 = vld [vmem:[#allocation171_spill] sm:$0xff]  ;;  %v16746_v28 = vld [vmem:[#allocation198_spill] sm:$0xff] }
 0x603   :  { %v5413_v37 = vmax.f32 %v5217_v61, 0.0  ;;  %7687 = vmatprep.subr.bf16.mxu1 %v5678_v46 }
 0x604   :  { %v4578_v35 = vpop.permute.xlu1 %4577 }
 0x605   :  { %v5670_v29 = vpack.c.bf16 %v5414_v15, %v5413_v37  ;;  %v5203_v10 = vadd.f32 %v4578_v35, %v4027_v57  ;;  %4982 = vperm.xlu1 %7911, %v8862_v24   ;;  %v14459_v55 = vpop.permute.xlu0 %4602  ;;  %v4029_v57 = vmul.f32 %v16729_v34, %v16728_v8  ;;  %v5416_v15 = vmax.f32 %v5220_v33, 0.0  ;;  %v16738_v33 = vld [vmem:[#allocation154_spill] sm:$0xff] }
 0x606   :  { %4837 = vperm.xlu0 %7912, %v8863_v41   ;;  %v16733_v41 = vld [vmem:[#allocation297_spill] sm:$0xff] }
 0x607   :  { %v5399_v45 = vmax.f32 %v5203_v10, 0.0  ;;  %7688 = vmatpush3.bf16.msra.mxu1 %v5670_v29  ;;  %v8868_v10 = vld [vmem:[%s15529_s2 + $0x458] sm:$0xff]  ;;  %v4061_v59 = vmul.f32 %v16733_v41, %v16732_v23 }
 0x608   :  { %v4738_v62 = vpop.permute.xlu1 %4737 }
 0x609   :  { %v5235_v38 = vadd.f32 %v4738_v62, %v4059_v49  ;;  %4912 = vperm.xlu1 %7911, %v8864_v7   ;;  %v14472_v5 = vpop.permute.xlu0 %4762  ;;  %v5663_v16 = vpack.c.bf16 %v5400_v26, %v5399_v45  ;;  %v5238_v49 = vadd.f32 %v14427_v31, %v4062_v51  ;;  %v16735_v62 = vld [vmem:[#allocation68_spill] sm:$0xff]  ;;  %v8874_v51 = vld [vmem:[%s15529_s2 + $0x5e8] sm:$0xff] }
 0x60a   :  { %4997 = vperm.xlu0 %7912, %v8865_v22   ;;  %v4046_v32 = vmul.f32 %v16735_v62, %v16734_v58  ;;  %v8871_v31 = vld [vmem:[%s15529_s2 + $0x470] sm:$0xff]  ;;  %v16737_v22 = vld [vmem:[#allocation285_spill] sm:$0xff]  ;;  %v8876_v58 = vld [vmem:[%s15529_s2 + $0x468] sm:$0xff] }
 0x60b   :  { %v5431_v48 = vmax.f32 %v5235_v38, 0.0  ;;  %7625 = vmatprep.subr.bf16.mxu0 %v5663_v16  ;;  %v5656_v16 = vpack.c.bf16 %v5386_v2, %v5385_v12  ;;  %v5434_v50 = vmax.f32 %v5238_v49, 0.0  ;;  %v16750_v49 = vld [vmem:[#allocation186_spill] sm:$0xff] }
 0x60c   :  { %v4658_v56 = vpop.permute.xlu1 %4657  ;;  %7626 = vmatpush3.bf16.msra.mxu0 %v5655_v21  ;;  %v16736_v21 = vld [vmem:[#allocation60_spill] sm:$0xff] }
 0x60d   :  { %v5219_v61 = vadd.f32 %v4658_v56, %v4043_v42  ;;  %5072 = vperm.xlu1 %7911, %v8866_v40   ;;  %v14487_v46 = vpop.permute.xlu0 %4682  ;;  %v5679_v44 = vpack.c.bf16 %v5432_v11, %v5431_v48  ;;  %v4045_v53 = vmul.f32 %v16737_v22, %v16736_v21  ;;  %v5222_v42 = vadd.f32 %v14442_v36, %v4046_v32  ;;  %v16739_v48 = vld [vmem:[#allocation46_spill] sm:$0xff]  ;;  %v16741_v56 = vld [vmem:[#allocation184_spill] sm:$0xff]  ;;  %v16742_v36 = vld [vmem:[#allocation155_spill] sm:$0xff] }
 0x60e   :  { %4927 = vperm.xlu0 %7912, %v8867_v63   ;;  %v4016_v9 = vmul.f32 %v16739_v48, %v16738_v33  ;;  %v4032_v6 = vmul.f32 %v16741_v56, %v16740_v52  ;;  %v16745_v63 = vld [vmem:[#allocation185_spill] sm:$0xff]  ;;  %v8878_v48 = vld [vmem:[%s15529_s2 + $0x568] sm:$0xff]  ;;  %v16756_v52 = vmov 0  }
 0x60f   :  { %v5415_v37 = vmax.f32 %v5219_v61, 0.0  ;;  %7689 = vmatprep.subr.bf16.mxu1 %v5679_v44  ;;  %v16743_v44 = vld [vmem:[#allocation176_spill] sm:$0xff]  ;;  %v4031_v8 = vmul.f32 %v16745_v63, %v16744_v19  ;;  %v5418_v34 = vmax.f32 %v5222_v42, 0.0  ;;  %v16755_v42 = vld [vmem:[#allocation61_spill] sm:$0xff] }
 0x610   :  { %v4588_v35 = vpop.permute.xlu1 %4587  ;;  %v4015_v13 = vmul.f32 %v16743_v44, %v16742_v36  ;;  %v5192_v43 = vadd.f32 %v14228_v39, %v4016_v9  ;;  %v16757_v56 = vld [vmem:[#allocation173_spill] sm:$0xff]  ;;  %v16759_v44 = vld [vmem:[#allocation200_spill] sm:$0xff] }
 0x611   :  { %v5671_v54 = vpack.c.bf16 %v5416_v15, %v5415_v37  ;;  %v5205_v29 = vadd.f32 %v4588_v35, %v4029_v57  ;;  %4832 = vperm.xlu1 %7911, %v8868_v10   ;;  %v14504_v24 = vpop.permute.xlu0 %4612  ;;  %v5208_v57 = vadd.f32 %v14459_v55, %v4032_v6  ;;  %v16747_v35 = vld [vmem:[#allocation291_spill] sm:$0xff]  ;;  %v8875_v55 = vld [vmem:[%s15529_s2 + $0x600] sm:$0xff]  ;;  %v8879_v63 = vld [vmem:[%s15529_s2 + $0x4f8] sm:$0xff] }
 0x612   :  { %5087 = vperm.xlu0 %7912, %v8869_v1   ;;  %v5191_v17 = vadd.f32 %v14146_v14, %v4015_v13  ;;  %v4064_v30 = vmul.f32 %v16747_v35, %v16746_v28  ;;  %v16748_v14 = vld [vmem:[#allocation199_spill] sm:$0xff]  ;;  %v16760_v13 = vld [vmem:[#allocation292_spill] sm:$0xff]  ;;  %v16763_v35 = vld [vmem:[#allocation157_spill] sm:$0xff] }
 0x613   :  { %v5401_v26 = vmax.f32 %v5205_v29, 0.0  ;;  %7690 = vmatpush3.bf16.msra.mxu1 %v5671_v54  ;;  %v5388_v29 = vmax.f32 %v5192_v43, 0.0  ;;  %v16749_v10 = vld [vmem:[#allocation299_spill] sm:$0xff]  ;;  %v5404_v1 = vmax.f32 %v5208_v57, 0.0  ;;  %v4066_v43 = vmul.f32 %v16760_v13, %v16759_v44  ;;  %v16762_v57 = vld [vmem:[#allocation301_spill] sm:$0xff] }
 0x614   :  { %v4748_v45 = vpop.permute.xlu1 %4747  ;;  %v4063_v2 = vmul.f32 %v16749_v10, %v16748_v14  ;;  %v5240_v23 = vadd.f32 %v14472_v5, %v4064_v30  ;;  %v8877_v5 = vld [vmem:[%s15529_s2 + $0x610] sm:$0xff]  ;;  %v16764_v30 = vld [vmem:[#allocation53_spill] sm:$0xff]  ;;  %v16766_v10 = vld [vmem:[#allocation47_spill] sm:$0xff] }
 0x615   :  { %v5237_v20 = vadd.f32 %v4748_v45, %v4061_v59  ;;  %4992 = vperm.xlu1 %7911, %v8870_v27   ;;  %v14517_v38 = vpop.permute.xlu0 %4772  ;;  %v5664_v7 = vpack.c.bf16 %v5402_v25, %v5401_v26  ;;  %v5387_v59 = vmax.f32 %v5191_v17, 0.0  ;;  %v16751_v26 = vld [vmem:[#allocation281_spill] sm:$0xff]  ;;  %v16752_v27 = vld [vmem:[#allocation187_spill] sm:$0xff]  ;;  %v16765_v14 = vld [vmem:[#allocation156_spill] sm:$0xff] }
 0x616   :  { %4847 = vperm.xlu0 %7912, %v8871_v31   ;;  %v4048_v12 = vmul.f32 %v16751_v26, %v16750_v49  ;;  %v5436_v31 = vmax.f32 %v5240_v23, 0.0 }
 0x617   :  { %v5433_v11 = vmax.f32 %v5237_v20, 0.0  ;;  %7627 = vmatprep.subr.bf16.mxu0 %v5664_v7  ;;  %v5657_v20 = vpack.c.bf16 %v5388_v29, %v5387_v59  ;;  %v16753_v7 = vld [vmem:[#allocation286_spill] sm:$0xff]  ;;  %v16767_v59 = vld [vmem:[#allocation189_spill] sm:$0xff] }
 0x618   :  { %v4668_v60 = vpop.permute.xlu1 %4667  ;;  %7628 = vmatpush3.bf16.msra.mxu0 %v5656_v16  ;;  %v4047_v16 = vmul.f32 %v16753_v7, %v16752_v27  ;;  %v5224_v21 = vadd.f32 %v14487_v46, %v4048_v12  ;;  %v16758_v46 = vld [vmem:[#allocation64_spill] sm:$0xff]  ;;  %v8881_v12 = vld [vmem:[%s15529_s2 + $0x478] sm:$0xff] }
 0x619   :  { %v5221_v47 = vadd.f32 %v4668_v60, %v4045_v53  ;;  %4922 = vperm.xlu1 %7911, %v8872_v18   ;;  %v14532_v61 = vpop.permute.xlu0 %4687  ;;  %v5680_v40 = vpack.c.bf16 %v5434_v50, %v5433_v11  ;;  %v16754_v50 = vld [vmem:[#allocation172_spill] sm:$0xff]  ;;  %v4033_v6 = vmul.f32 %v16758_v46, %v16757_v56 }
 0x61a   :  { %5007 = vperm.xlu0 %7912, %v8873_v3   ;;  %v4034_v11 = vmul.f32 %v16755_v42, %v16754_v50  ;;  %v8882_v42 = vld [vmem:[%s15529_s2 + $0x578] sm:$0xff] }
 0x61b   :  { %v5417_v15 = vmax.f32 %v5221_v47, 0.0  ;;  %7691 = vmatprep.subr.bf16.mxu1 %v5680_v40  ;;  %v5420_v47 = vmax.f32 %v5224_v21, 0.0  ;;  %v16772_v21 = vld [vmem:[#allocation319_spill] sm:$0xff] }
 0x61c   :  { %v4598_v37 = vpop.permute.xlu1 %4597  ;;  %v5210_v18 = vadd.f32 %v14504_v24, %v4034_v11  ;;  %v5242_v24 = vadd.f32 %v14517_v38, %v4066_v43 }
 0x61d   :  { %v5672_v39 = vpack.c.bf16 %v5418_v34, %v5417_v15  ;;  %v5207_v0 = vadd.f32 %v4598_v37, %v4031_v8  ;;  %5082 = vperm.xlu1 %7911, %v8874_v51   ;;  %v14549_v54 = vpop.permute.xlu0 %4857  ;;  %v16761_v34 = vld [vmem:[#allocation201_spill] sm:$0xff] }
 0x61e   :  { %5097 = vperm.xlu0 %7912, %v8875_v55   ;;  %v4065_v15 = vmul.f32 %v16762_v57, %v16761_v34  ;;  %v5406_v17 = vmax.f32 %v5210_v18, 0.0  ;;  %v8880_v51 = vld [vmem:[%s15529_s2 + $0x5f8] sm:$0xff]  ;;  %v16778_v34 = vld [vmem:[#allocation342_spill] sm:$0xff] }
 0x61f   :  { %v5403_v41 = vmax.f32 %v5207_v0, 0.0  ;;  %7692 = vmatpush3.bf16.msra.mxu1 %v5672_v39  ;;  %v4017_v39 = vmul.f32 %v16764_v30, %v16763_v35  ;;  %v16779_v35 = vld [vmem:[#allocation203_spill] sm:$0xff] }
 0x620   :  { %v4758_v25 = vpop.permute.xlu1 %4757  ;;  %v16780_v30 = vld [vmem:[#allocation303_spill] sm:$0xff] }
 0x621   :  { %v5239_v45 = vadd.f32 %v4758_v25, %v4063_v2  ;;  %4842 = vperm.xlu1 %7911, %v8876_v58   ;;  %v14562_v62 = vpop.permute.xlu0 %5017  ;;  %v5665_v32 = vpack.c.bf16 %v5404_v1, %v5403_v41  ;;  %v4018_v2 = vmul.f32 %v16766_v10, %v16765_v14  ;;  %v5193_v38 = vadd.f32 %v14157_v4, %v4017_v39  ;;  %v16768_v25 = vld [vmem:[#allocation288_spill] sm:$0xff]  ;;  %v7973_v14 = vld [vmem:[%s15530_s1 + $0x78] ss:$52 sps:$4 sm:$0xff]   ;;  %v16781_v10 = vld [vmem:[#allocation202_spill] sm:$0xff] }
 0x622   :  { %5107 = vperm.xlu0 %7912, %v8877_v5   ;;  %v5438_v1 = vmax.f32 %v5242_v24, 0.0  ;;  %v4049_v49 = vmul.f32 %v16768_v25, %v16767_v59  ;;  %v4067_v39 = vmul.f32 %v16780_v30, %v16779_v35  ;;  %v7977_v59 = vld [vmem:[%s15530_s1 + $0xe4] ss:$52 sps:$4 sm:$0xff]  }
 0x623   :  { %v5435_v22 = vmax.f32 %v5239_v45, 0.0  ;;  %7629 = vmatprep.subr.bf16.mxu0 %v5665_v32  ;;  %v16769_v32 = vld [vmem:[#allocation188_spill] sm:$0xff]  ;;  %v5389_v4 = vmax.f32 %v5193_v38, 0.0  ;;  %v16795_v35 = vld [vmem:[#allocation205_spill] sm:$0xff] }
 0x624   :  { %v4678_v53 = vpop.permute.xlu1 %4677  ;;  %7630 = vmatpush3.bf16.msra.mxu0 %v5657_v20  ;;  %v16770_v20 = vld [vmem:[#allocation283_spill] sm:$0xff]  ;;  %v5225_v27 = vadd.f32 %v14532_v61, %v4049_v49  ;;  %v16773_v61 = vld [vmem:[#allocation218_spill] sm:$0xff]  ;;  %v16783_v49 = vld [vmem:[#allocation237_spill] sm:$0xff] }
 0x625   :  { %v5223_v33 = vadd.f32 %v4678_v53, %v4047_v16  ;;  %5002 = vperm.xlu1 %7911, %v8878_v48   ;;  %v14575_v9 = vpop.permute.xlu0 %4777  ;;  %v5681_v60 = vpack.c.bf16 %v5436_v31, %v5435_v22  ;;  %v4050_v5 = vmul.f32 %v16770_v20, %v16769_v32  ;;  %v16771_v31 = vld [vmem:[#allocation219_spill] sm:$0xff]  ;;  %v16774_v48 = vld [vmem:[#allocation310_spill] sm:$0xff]  ;;  %v16796_v30 = vld [vmem:[#allocation305_spill] sm:$0xff] }
 0x626   :  { %7914 = vset.pattern.permute.xlu0 %v16756_v52  ;;  %v4083_v22 = vmul.f32 %v16772_v21, %v16771_v31  ;;  %v5421_v56 = vmax.f32 %v5225_v27, 0.0  ;;  %v7980_v21 = vld [vmem:[%s15530_s1 + $0xec] ss:$52 sps:$4 sm:$0xff]  }
 0x627   :  { %v5419_v40 = vmax.f32 %v5223_v33, 0.0  ;;  %7693 = vmatprep.subr.bf16.mxu1 %v5681_v60  ;;  %v7965_v33 = vld [vmem:[%s15530_s1 + $0x10] ss:$52 sps:$4 sm:$0xff]   ;;  %v4084_v60 = vmul.f32 %v16774_v48, %v16773_v61 }
 0x628   :  { %v4608_v36 = vpop.permute.xlu1 %4607  ;;  %v5259_v46 = vadd.f32 %v14549_v54, %v4083_v22  ;;  %v7968_v54 = vld [vmem:[%s15530_s1 + $0x18] ss:$52 sps:$4 sm:$0xff]   ;;  %v16789_v48 = vld [vmem:[#allocation220_spill] sm:$0xff] }
 0x629   :  { %v5673_v3 = vpack.c.bf16 %v5420_v47, %v5419_v40  ;;  %v5209_v19 = vadd.f32 %v4608_v36, %v4033_v6  ;;  %4932 = vperm.xlu1 %7911, %v8879_v63   ;;  %v14586_v8 = vpop.permute.xlu0 %4937  ;;  %v7971_v47 = vld [vmem:[%s15530_s1 + $0x7c] ss:$52 sps:$4 sm:$0xff]   ;;  %v16776_v36 = vld [vmem:[#allocation351_spill] sm:$0xff] }
 0x62a   :  { %v16775_v40 = vld [vmem:[#allocation256_spill] sm:$0xff]  ;;  %v16777_v63 = vld [vmem:[#allocation255_spill] sm:$0xff] }
 0x62b   :  { %v5405_v37 = vmax.f32 %v5209_v19, 0.0  ;;  %7694 = vmatpush3.bf16.msra.mxu1 %v5673_v3  ;;  %v4115_v44 = vmul.f32 %v16776_v36, %v16775_v40  ;;  %v8883_v3 = vld [vmem:[%s15529_s2 + $0x608] sm:$0xff]  ;;  %v4116_v57 = vmul.f32 %v16778_v34, %v16777_v63  ;;  %v16791_v36 = vld [vmem:[#allocation137_spill] sm:$0xff]  ;;  %v16793_v63 = vld [vmem:[#allocation136_spill] sm:$0xff] }
 0x62c   :  { %v4768_v28 = vpop.permute.xlu1 %4767  ;;  %v16794_v34 = vld [vmem:[#allocation344_spill] sm:$0xff] }
 0x62d   :  { %v5241_v0 = vadd.f32 %v4768_v28, %v4065_v15  ;;  %5092 = vperm.xlu1 %7911, %v8880_v51   ;;  %v14596_v29 = vpop.permute.xlu0 %4867  ;;  %v5666_v55 = vpack.c.bf16 %v5406_v17, %v5405_v37  ;;  %v5455_v15 = vmax.f32 %v5259_v46, 0.0  ;;  %v5291_v17 = vadd.f32 %v14562_v62, %v4115_v44  ;;  %v7974_v37 = vld [vmem:[%s15530_s1 + $0x84] ss:$52 sps:$4 sm:$0xff]  }
 0x62e   :  { %v8884_v51 = vld [vmem:[%s15529_s2 + $0x618] sm:$0xff] }
 0x62f   :  { %v5437_v23 = vmax.f32 %v5241_v0, 0.0  ;;  %7631 = vmatprep.subr.bf16.mxu0 %v5666_v55  ;;  %v16792_v44 = vld [vmem:[#allocation353_spill] sm:$0xff] }
 0x630   :  { %v4533_v41 = vpop.permute.xlu1 %4532 }
 0x631   :  { %v5194_v26 = vadd.f32 %v4533_v41, %v4018_v2  ;;  %4852 = vperm.xlu1 %7911, %v8881_v12   ;;  %v14606_v45 = vpop.permute.xlu0 %5027  ;;  %v5682_v58 = vpack.c.bf16 %v5438_v1, %v5437_v23  ;;  %v16782_v2 = vld [vmem:[#allocation294_spill] sm:$0xff]  ;;  %v5487_v1 = vmax.f32 %v5291_v17, 0.0  ;;  %v5243_v23 = vadd.f32 %v14575_v9, %v4067_v39 }
 0x632   :  { %v4068_v38 = vmul.f32 %v16782_v2, %v16781_v10  ;;  %v7976_v9 = vld [vmem:[%s15530_s1 + $0x80] ss:$52 sps:$4 sm:$0xff]   ;;  %v4069_v39 = vmul.f32 %v16796_v30, %v16795_v35  ;;  %v16812_v35 = vld [vmem:[#allocation307_spill] sm:$0xff] }
 0x633   :  { %v5390_v7 = vmax.f32 %v5194_v26, 0.0  ;;  %7695 = vmatprep.subr.bf16.mxu1 %v5682_v58  ;;  %v16784_v26 = vld [vmem:[#allocation335_spill] sm:$0xff]  ;;  %v16798_v10 = vld [vmem:[#allocation296_spill] sm:$0xff] }
 0x634   :  { %v4693_v16 = vpop.permute.xlu1 %4692  ;;  %v4099_v12 = vmul.f32 %v16784_v26, %v16783_v49  ;;  %v16800_v49 = vld [vmem:[#allocation337_spill] sm:$0xff] }
 0x635   :  { %v5658_v53 = vpack.c.bf16 %v5390_v7, %v5389_v4  ;;  %v5226_v50 = vadd.f32 %v4693_v16, %v4050_v5  ;;  %5012 = vperm.xlu1 %7911, %v8882_v42   ;;  %v14616_v11 = vpop.permute.xlu0 %4787  ;;  %v16785_v5 = vld [vmem:[#allocation236_spill] sm:$0xff]  ;;  %v16786_v4 = vld [vmem:[#allocation326_spill] sm:$0xff]  ;;  %v5439_v7 = vmax.f32 %v5243_v23, 0.0 }
 0x636   :  { %v4100_v27 = vmul.f32 %v16786_v4, %v16785_v5  ;;  %v5275_v16 = vadd.f32 %v14586_v8, %v4099_v12  ;;  %v7979_v8 = vld [vmem:[%s15530_s1 + $0xe0] ss:$52 sps:$4 sm:$0xff]  }
 0x637   :  { %v5422_v6 = vmax.f32 %v5226_v50, 0.0  ;;  %7632 = vmatpush3.bf16.msra.mxu0 %v5658_v53  ;;  %v16788_v53 = vld [vmem:[#allocation321_spill] sm:$0xff]  ;;  %v16802_v5 = vld [vmem:[#allocation328_spill] sm:$0xff] }
 0x638   :  { %v4863_v18 = vpop.permute.xlu1 %4862  ;;  %v5471_v46 = vmax.f32 %v5275_v16, 0.0 }
 0x639   :  { %v5674_v13 = vpack.c.bf16 %v5422_v6, %v5421_v56  ;;  %v5260_v43 = vadd.f32 %v4863_v18, %v4084_v60  ;;  %5102 = vperm.xlu1 %7911, %v8883_v3   ;;  %v14632_v19 = vpop.permute.xlu0 %4947  ;;  %v16790_v60 = vld [vmem:[#allocation312_spill] sm:$0xff]  ;;  %v7983_v18 = vld [vmem:[%s15530_s1 + $0x14c] ss:$52 sps:$4 sm:$0xff]  }
 0x63a   :  { %6489 = vmatmul.mubr.bf16.vlgmr.msra.gmra.mrb[32].mxu0 %v7965_v33  ;;  %v4086_v56 = vmul.f32 %v16790_v60, %v16789_v48  ;;  %v16806_v48 = vld [vmem:[#allocation314_spill] sm:$0xff] }
 0x63b   :  { %v5456_v24 = vmax.f32 %v5260_v43, 0.0  ;;  %7696 = vmatpush3.bf16.msra.mxu1 %v5674_v13  ;;  %6496 = vmatprep.mubr.bf16.mxu0 %v7971_v47  ;;  %v4117_v13 = vmul.f32 %v16792_v44, %v16791_v36  ;;  %v16808_v36 = vld [vmem:[#allocation355_spill] sm:$0xff] }
 0x63c   :  { %v5023_v28 = vpop.permute.xlu1 %5022 }
 0x63d   :  { %v5292_v0 = vadd.f32 %v5023_v28, %v4116_v57  ;;  %5112 = vperm.xlu1 %7911, %v8884_v51   ;;  %v14648_v55 = vpop.permute.xlu0 %4877  ;;  %v5691_v62 = vpack.c.bf16 %v5456_v24, %v5455_v15  ;;  %v4118_v57 = vmul.f32 %v16794_v34, %v16793_v63  ;;  %v5293_v17 = vadd.f32 %v14606_v45, %v4117_v13  ;;  %v7985_v45 = vld [vmem:[%s15530_s1 + $0x148] ss:$52 sps:$4 sm:$0xff]   ;;  %v16810_v63 = vld [vmem:[#allocation346_spill] sm:$0xff] }
 0x63e   :  { %6586 = vmatmul.mubr.bf16.vlgmr.msra.gmra.mrb[32].mxu1 %v7968_v54 }
 0x63f   :  { %v5488_v41 = vmax.f32 %v5292_v0, 0.0  ;;  %7745 = vmatprep.subr.bf16.mxu0 %v5691_v62  ;;  %6593 = vmatprep.mubr.bf16.mxu1 %v7974_v37  ;;  %v7986_v37 = vld [vmem:[%s15530_s1 + $0x154] ss:$52 sps:$4 sm:$0xff]  }
 0x640   :  { %v4783_v25 = vpop.permute.xlu1 %4782 }
 0x641   :  { %v5244_v58 = vadd.f32 %v4783_v25, %v4068_v38  ;;  %v14661_v32 = vpop.permute.xlu0 %5037  ;;  %v5707_v20 = vpack.c.bf16 %v5488_v41, %v5487_v1  ;;  %7913 = vset.pattern.permute.xlu1 %v16756_v52  ;;  %v16787_v52 = vld [vmem:[#allocation221_spill] sm:$0xff]  ;;  %v5489_v38 = vmax.f32 %v5293_v17, 0.0  ;;  %v5245_v1 = vadd.f32 %v14616_v11, %v4069_v39  ;;  %v7989_v41 = vld [vmem:[%s15530_s1 + $0x1b4] ss:$52 sps:$4 sm:$0xff]   ;;  %v7988_v11 = vld [vmem:[%s15530_s1 + $0x150] ss:$52 sps:$4 sm:$0xff]  }
 0x642   :  { %6497 = vmatmul.mubr.bf16.gmra.mrb[36].mxu0 %v7973_v14  ;;  %v4085_v50 = vmul.f32 %v16788_v53, %v16787_v52  ;;  %v16797_v14 = vld [vmem:[#allocation204_spill] sm:$0xff]  ;;  %v16804_v52 = vld [vmem:[#allocation323_spill] sm:$0xff] }
 0x643   :  { %v5440_v31 = vmax.f32 %v5244_v58, 0.0  ;;  %7809 = vmatprep.subr.bf16.mxu1 %v5707_v20  ;;  %6504 = vmatprep.mubr.bf16.mxu0 %v7977_v59  ;;  %v4070_v2 = vmul.f32 %v16798_v10, %v16797_v14  ;;  %v16799_v25 = vld [vmem:[#allocation240_spill] sm:$0xff]  ;;  %v16814_v14 = vld [vmem:[#allocation298_spill] sm:$0xff] }
 0x644   :  { %v4943_v22 = vpop.permute.xlu1 %4942  ;;  %v5261_v6 = vadd.f32 %v14596_v29, %v4085_v50  ;;  %v7982_v29 = vld [vmem:[%s15530_s1 + $0xe8] ss:$52 sps:$4 sm:$0xff]   ;;  %v4101_v26 = vmul.f32 %v16800_v49, %v16799_v25 }
 0x645   :  { %v5683_v42 = vpack.c.bf16 %v5440_v31, %v5439_v7  ;;  %v5276_v33 = vadd.f32 %v4943_v22, %v4100_v27  ;;  %v14675_v61 = vpop.permute.xlu0 %4797  ;;  %v5441_v27 = vmax.f32 %v5245_v1, 0.0  ;;  %v7992_v31 = vld [vmem:[%s15530_s1 + $0x1bc] ss:$52 sps:$4 sm:$0xff]   ;;  %v16803_v22 = vld [vmem:[#allocation223_spill] sm:$0xff] }
 0x646   :  { %6594 = vmatmul.mubr.bf16.gmra.mrb[36].mxu1 %v7976_v9  ;;  %v5457_v15 = vmax.f32 %v5261_v6, 0.0  ;;  %v16801_v9 = vld [vmem:[#allocation239_spill] sm:$0xff]  ;;  %v5277_v7 = vadd.f32 %v14632_v19, %v4101_v26  ;;  %v4087_v53 = vmul.f32 %v16804_v52, %v16803_v22  ;;  %v7991_v19 = vld [vmem:[%s15530_s1 + $0x1b0] ss:$52 sps:$4 sm:$0xff]   ;;  %v16820_v22 = vld [vmem:[#allocation325_spill] sm:$0xff] }
 0x647   :  { %v5472_v47 = vmax.f32 %v5276_v33, 0.0  ;;  %7746 = vmatpush3.bf16.msra.mxu0 %v5683_v42  ;;  %6601 = vmatprep.mubr.bf16.mxu1 %v7980_v21  ;;  %v4102_v4 = vmul.f32 %v16802_v5, %v16801_v9  ;;  %v16816_v25 = vld [vmem:[#allocation339_spill] sm:$0xff]  ;;  %v16818_v9 = vld [vmem:[#allocation330_spill] sm:$0xff] }
 0x648   :  { %v4873_v40 = vpop.permute.xlu1 %4872 }
 0x649   :  { %v5699_v43 = vpack.c.bf16 %v5472_v47, %v5471_v46  ;;  %v5262_v3 = vadd.f32 %v4873_v40, %v4086_v56  ;;  %v14688_v54 = vpop.permute.xlu0 %4957  ;;  %v5473_v56 = vmax.f32 %v5277_v7, 0.0  ;;  %v5263_v46 = vadd.f32 %v14648_v55, %v4087_v53  ;;  %v7995_v47 = vld [vmem:[%s15530_s1 + $0x21c] ss:$52 sps:$4 sm:$0xff]   ;;  %v7994_v55 = vld [vmem:[%s15530_s1 + $0x1b8] ss:$52 sps:$4 sm:$0xff]  }
 0x64a   :  { %6505 = vmatmul.mubr.bf16.gmra.mrb[40].mxu0 %v7979_v8  ;;  %v16805_v8 = vld [vmem:[#allocation222_spill] sm:$0xff]  ;;  %v16807_v40 = vld [vmem:[#allocation260_spill] sm:$0xff] }
 0x64b   :  { %v5458_v24 = vmax.f32 %v5262_v3, 0.0  ;;  %7810 = vmatpush3.bf16.msra.mxu1 %v5699_v43  ;;  %6512 = vmatprep.mubr.bf16.mxu0 %v7983_v18  ;;  %v4088_v60 = vmul.f32 %v16806_v48, %v16805_v8  ;;  %v4119_v44 = vmul.f32 %v16808_v36, %v16807_v40  ;;  %v16822_v8 = vld [vmem:[#allocation316_spill] sm:$0xff]  ;;  %v16824_v40 = vld [vmem:[#allocation357_spill] sm:$0xff] }
 0x64c   :  { %v5033_v28 = vpop.permute.xlu1 %5032 }
 0x64d   :  { %v5294_v0 = vadd.f32 %v5033_v28, %v4118_v57  ;;  %v14701_v51 = vpop.permute.xlu0 %4887  ;;  %v5692_v62 = vpack.c.bf16 %v5458_v24, %v5457_v15  ;;  %v5459_v57 = vmax.f32 %v5263_v46, 0.0  ;;  %v5295_v15 = vadd.f32 %v14661_v32, %v4119_v44  ;;  %v7998_v24 = vld [vmem:[%s15530_s1 + $0x224] ss:$52 sps:$4 sm:$0xff]   ;;  %v16811_v28 = vld [vmem:[#allocation207_spill] sm:$0xff] }
 0x64e   :  { %6602 = vmatmul.mubr.bf16.gmra.mrb[40].mxu1 %v7982_v29  ;;  %v16809_v29 = vld [vmem:[#allocation259_spill] sm:$0xff]  ;;  %v4071_v30 = vmul.f32 %v16812_v35, %v16811_v28  ;;  %v16828_v28 = vld [vmem:[#allocation309_spill] sm:$0xff] }
 0x64f   :  { %v5490_v23 = vmax.f32 %v5294_v0, 0.0  ;;  %7747 = vmatprep.subr.bf16.mxu0 %v5692_v62  ;;  %6609 = vmatprep.mubr.bf16.mxu1 %v7986_v37  ;;  %v4120_v34 = vmul.f32 %v16810_v63, %v16809_v29  ;;  %v7997_v32 = vld [vmem:[%s15530_s1 + $0x218] ss:$52 sps:$4 sm:$0xff]   ;;  %v16826_v29 = vld [vmem:[#allocation348_spill] sm:$0xff] }
 0x650   :  { %v4793_v59 = vpop.permute.xlu1 %4792 }
 0x651   :  { %v5246_v12 = vadd.f32 %v4793_v59, %v4070_v2  ;;  %v14714_v58 = vpop.permute.xlu0 %5047  ;;  %v5708_v20 = vpack.c.bf16 %v5490_v23, %v5489_v38  ;;  %v5491_v2 = vmax.f32 %v5295_v15, 0.0  ;;  %v5247_v38 = vadd.f32 %v14675_v61, %v4071_v30  ;;  %v8001_v23 = vld [vmem:[%s15530_s1 + $0x284] ss:$52 sps:$4 sm:$0xff]   ;;  %v16815_v59 = vld [vmem:[#allocation243_spill] sm:$0xff]  ;;  %v8000_v61 = vld [vmem:[%s15530_s1 + $0x220] ss:$52 sps:$4 sm:$0xff]  }
 0x652   :  { %6513 = vmatmul.mubr.bf16.gmra.mrb[44].mxu0 %v7985_v45  ;;  %v16813_v45 = vld [vmem:[#allocation206_spill] sm:$0xff]  ;;  %v4103_v49 = vmul.f32 %v16816_v25, %v16815_v59 }
 0x653   :  { %v5442_v16 = vmax.f32 %v5246_v12, 0.0  ;;  %7811 = vmatprep.subr.bf16.mxu1 %v5708_v20  ;;  %6520 = vmatprep.mubr.bf16.mxu0 %v7989_v41  ;;  %v4072_v10 = vmul.f32 %v16814_v14, %v16813_v45  ;;  %v16829_v45 = vld [vmem:[#allocation208_spill] sm:$0xff] }
 0x654   :  { %v4953_v21 = vpop.permute.xlu1 %4952  ;;  %v16830_v14 = vld [vmem:[#allocation300_spill] sm:$0xff] }
 0x655   :  { %v5684_v50 = vpack.c.bf16 %v5442_v16, %v5441_v27  ;;  %v5278_v42 = vadd.f32 %v4953_v21, %v4102_v4  ;;  %v14727_v33 = vpop.permute.xlu0 %4807  ;;  %v5443_v4 = vmax.f32 %v5247_v38, 0.0  ;;  %v5279_v27 = vadd.f32 %v14688_v54, %v4103_v49  ;;  %v8004_v16 = vld [vmem:[%s15530_s1 + $0x28c] ss:$52 sps:$4 sm:$0xff]   ;;  %v16819_v21 = vld [vmem:[#allocation225_spill] sm:$0xff] }
 0x656   :  { %6610 = vmatmul.mubr.bf16.gmra.mrb[44].mxu1 %v7988_v11  ;;  %v16817_v11 = vld [vmem:[#allocation242_spill] sm:$0xff]  ;;  %v4089_v52 = vmul.f32 %v16820_v22, %v16819_v21 }
 0x657   :  { %v5474_v6 = vmax.f32 %v5278_v42, 0.0  ;;  %7748 = vmatpush3.bf16.msra.mxu0 %v5684_v50  ;;  %6617 = vmatprep.mubr.bf16.mxu1 %v7992_v31  ;;  %v4104_v5 = vmul.f32 %v16818_v9, %v16817_v11  ;;  %v8003_v54 = vld [vmem:[%s15530_s1 + $0x280] ss:$52 sps:$4 sm:$0xff]  }
 0x658   :  { %v4883_v18 = vpop.permute.xlu1 %4882  ;;  %v16831_v49 = vld [vmem:[#allocation246_spill] sm:$0xff] }
 0x659   :  { %v5700_v13 = vpack.c.bf16 %v5474_v6, %v5473_v56  ;;  %v5264_v43 = vadd.f32 %v4883_v18, %v4088_v60  ;;  %v14740_v3 = vpop.permute.xlu0 %4967  ;;  %v5475_v60 = vmax.f32 %v5279_v27, 0.0  ;;  %v5265_v56 = vadd.f32 %v14701_v51, %v4089_v52  ;;  %v8007_v6 = vld [vmem:[%s15530_s1 + $0x2ec] ss:$52 sps:$4 sm:$0xff]   ;;  %v8006_v51 = vld [vmem:[%s15530_s1 + $0x288] ss:$52 sps:$4 sm:$0xff]  }
 0x65a   :  { %6521 = vmatmul.mubr.bf16.gmra.mrb[48].mxu0 %v7991_v19  ;;  %v16821_v19 = vld [vmem:[#allocation224_spill] sm:$0xff]  ;;  %v16823_v18 = vld [vmem:[#allocation262_spill] sm:$0xff] }
 0x65b   :  { %v5460_v17 = vmax.f32 %v5264_v43, 0.0  ;;  %7812 = vmatpush3.bf16.msra.mxu1 %v5700_v13  ;;  %6528 = vmatprep.mubr.bf16.mxu0 %v7995_v47  ;;  %v4090_v48 = vmul.f32 %v16822_v8, %v16821_v19  ;;  %v4121_v36 = vmul.f32 %v16824_v40, %v16823_v18 }
 0x65c   :  { %v5043_v37 = vpop.permute.xlu1 %5042 }
 0x65d   :  { %v5296_v39 = vadd.f32 %v5043_v37, %v4120_v34  ;;  %v14753_v0 = vpop.permute.xlu0 %4897  ;;  %v5693_v62 = vpack.c.bf16 %v5460_v17, %v5459_v57  ;;  %v5461_v34 = vmax.f32 %v5265_v56, 0.0  ;;  %v5297_v57 = vadd.f32 %v14714_v58, %v4121_v36  ;;  %v8010_v17 = vld [vmem:[%s15530_s1 + $0x2f4] ss:$52 sps:$4 sm:$0xff]   ;;  %v16827_v37 = vld [vmem:[#allocation209_spill] sm:$0xff] }
 0x65e   :  { %6618 = vmatmul.mubr.bf16.gmra.mrb[48].mxu1 %v7994_v55  ;;  %v16825_v55 = vld [vmem:[#allocation261_spill] sm:$0xff]  ;;  %v4073_v35 = vmul.f32 %v16828_v28, %v16827_v37 }
 0x65f   :  { %v5492_v1 = vmax.f32 %v5296_v39, 0.0  ;;  %7749 = vmatprep.subr.bf16.mxu0 %v5693_v62  ;;  %6625 = vmatprep.mubr.bf16.mxu1 %v7998_v24  ;;  %v4122_v63 = vmul.f32 %v16826_v29, %v16825_v55  ;;  %v8009_v58 = vld [vmem:[%s15530_s1 + $0x2e8] ss:$52 sps:$4 sm:$0xff]  }
 0x660   :  { %v4803_v41 = vpop.permute.xlu1 %4802  ;;  %v5249_v38 = vadd.f32 %v14727_v33, %v4073_v35  ;;  %v8012_v33 = vld [vmem:[%s15530_s1 + $0x2f0] ss:$52 sps:$4 sm:$0xff]  }
 0x661   :  { %v5248_v26 = vadd.f32 %v4803_v41, %v4072_v10  ;;  %v14766_v12 = vpop.permute.xlu0 %5057  ;;  %v5709_v20 = vpack.c.bf16 %v5492_v1, %v5491_v2  ;;  %v4074_v10 = vmul.f32 %v16830_v14, %v16829_v45  ;;  %v5493_v2 = vmax.f32 %v5297_v57, 0.0  ;;  %v16841_v45 = vld [vmem:[#allocation263_spill] sm:$0xff]  ;;  %v16842_v14 = vld [vmem:[#allocation350_spill] sm:$0xff] }
 0x662   :  { %6529 = vmatmul.mubr.bf16.gmra.mrb[52].mxu0 %v7997_v32  ;;  %v7505_v32 = vpop.f32.mrb[0].mxu0  ;;  %v5445_v22 = vmax.f32 %v5249_v38, 0.0 }
 0x663   :  { %v5444_v7 = vmax.f32 %v5248_v26, 0.0  ;;  %7813 = vmatprep.subr.bf16.mxu1 %v5709_v20  ;;  %6536 = vmatprep.mubr.bf16.mxu0 %v8001_v23  ;;  %v8015_v23 = vld [vmem:[%s15530_s1 + $0x24] ss:$52 sps:$4 sm:$0xff]   ;;  %v7506_v41 = vpop.f32.mrb[1].mxu0 }
 0x664   :  { %v4963_v31 = vpop.permute.xlu1 %4962  ;;  %v7508_v25 = vpop.f32.mrb[2].mxu0  ;;  %v16832_v26 = vld [vmem:[#allocation341_spill] sm:$0xff] }
 0x665   :  { %v5685_v53 = vpack.c.bf16 %v5444_v7, %v5443_v4  ;;  %v5280_v50 = vadd.f32 %v4963_v31, %v4104_v5  ;;  %v14779_v42 = vpop.permute.xlu0 %4817  ;;  %v4105_v20 = vmul.f32 %v16832_v26, %v16831_v49  ;;  %v7509_v5 = vpop.f32.mrb[3].mxu0  ;;  %v14823_v4 = vadd.f32 %v7506_v41, %v7505_v32  ;;  %v16834_v31 = vld [vmem:[#allocation332_spill] sm:$0xff]  ;;  %v16844_v49 = vld [vmem:[#allocation311_spill] sm:$0xff] }
 0x666   :  { %6626 = vmatmul.mubr.bf16.gmra.mrb[52].mxu1 %v8000_v61  ;;  %v14825_v27 = vadd.f32 %v7509_v5, %v7508_v25  ;;  %v7511_v7 = vpop.f32.mrb[4].mxu0  ;;  %v16843_v25 = vld [vmem:[#allocation211_spill] sm:$0xff] }
 0x667   :  { %v5476_v46 = vmax.f32 %v5280_v50, 0.0  ;;  %7750 = vmatpush3.bf16.msra.mxu0 %v5685_v53  ;;  %6633 = vmatprep.mubr.bf16.mxu1 %v8004_v16  ;;  %v16833_v16 = vld [vmem:[#allocation245_spill] sm:$0xff]  ;;  %v5281_v52 = vadd.f32 %v14740_v3, %v4105_v20  ;;  %v8018_v50 = vld [vmem:[%s15530_s1 + $0x2c] ss:$52 sps:$4 sm:$0xff]   ;;  %v4075_v26 = vmul.f32 %v16844_v49, %v16843_v25 }
 0x668   :  { %v4893_v47 = vpop.permute.xlu1 %4892  ;;  %v4106_v21 = vmul.f32 %v16834_v31, %v16833_v16  ;;  %v16845_v16 = vld [vmem:[#allocation210_spill] sm:$0xff] }
 0x669   :  { %v5701_v44 = vpack.c.bf16 %v5476_v46, %v5475_v60  ;;  %v5266_v13 = vadd.f32 %v4893_v47, %v4090_v48  ;;  %v14792_v43 = vpop.permute.xlu0 %4977  ;;  %v16835_v48 = vld [vmem:[#allocation227_spill] sm:$0xff]  ;;  %v5477_v55 = vmax.f32 %v5281_v52, 0.0 }
 0x66a   :  { %6537 = vmatmul.mubr.bf16.gmra.mrb[56].mxu0 %v8003_v54  ;;  %v7512_v54 = vpop.f32.mrb[5].mxu0  ;;  %v16836_v60 = vld [vmem:[#allocation327_spill] sm:$0xff] }
 0x66b   :  { %v5462_v15 = vmax.f32 %v5266_v13, 0.0  ;;  %7814 = vmatpush3.bf16.msra.mxu1 %v5701_v44  ;;  %6544 = vmatprep.mubr.bf16.mxu0 %v8007_v6  ;;  %v7514_v8 = vpop.f32.mrb[6].mxu0  ;;  %v4091_v56 = vmul.f32 %v16836_v60, %v16835_v48  ;;  %v14837_v3 = vadd.f32 %v7512_v54, %v7511_v7  ;;  %v16837_v44 = vld [vmem:[#allocation226_spill] sm:$0xff] }
 0x66c   :  { %v5053_v24 = vpop.permute.xlu1 %5052  ;;  %v7515_v18 = vpop.f32.mrb[7].mxu0  ;;  %v16838_v13 = vld [vmem:[#allocation318_spill] sm:$0xff] }
 0x66d   :  { %v5298_v30 = vadd.f32 %v5053_v24, %v4122_v63  ;;  %v14805_v39 = vpop.permute.xlu0 %4907  ;;  %v5694_v62 = vpack.c.bf16 %v5462_v15, %v5461_v34  ;;  %v14839_v40 = vadd.f32 %v7515_v18, %v7514_v8  ;;  %v7517_v36 = vpop.f32.mrb[8].mxu0  ;;  %v5267_v29 = vadd.f32 %v14753_v0, %v4091_v56  ;;  %v16840_v24 = vld [vmem:[#allocation359_spill] sm:$0xff] }
 0x66e   :  { %6634 = vmatmul.mubr.bf16.gmra.mrb[56].mxu1 %v8006_v51  ;;  %v4092_v51 = vmul.f32 %v16838_v13, %v16837_v44  ;;  %v7518_v34 = vpop.f32.mrb[9].mxu0  ;;  %v4124_v0 = vmul.f32 %v16842_v14, %v16841_v45  ;;  %v16848_v8 = vld [vmem:[#allocation343_spill] sm:$0xff] }
 0x66f   :  { %v5494_v1 = vmax.f32 %v5298_v30, 0.0  ;;  %7751 = vmatprep.subr.bf16.mxu0 %v5694_v62  ;;  %6641 = vmatprep.mubr.bf16.mxu1 %v8010_v17  ;;  %v7520_v15 = vpop.f32.mrb[10].mxu0  ;;  %v16839_v17 = vld [vmem:[#allocation264_spill] sm:$0xff]  ;;  %v14846_v62 = vadd.f32 %v7518_v34, %v7517_v36  ;;  %v16849_v13 = vld [vmem:[#allocation247_spill] sm:$0xff] }
 0x670   :  { %v4813_v59 = vpop.permute.xlu1 %4812  ;;  %v4123_v37 = vmul.f32 %v16840_v24, %v16839_v17  ;;  %v7521_v30 = vpop.f32.mrb[11].mxu0  ;;  %v16851_v17 = vld [vmem:[#allocation229_spill] sm:$0xff] }
 0x671   :  { %v5250_v61 = vadd.f32 %v4813_v59, %v4074_v10  ;;  %v14818_v11 = vpop.permute.xlu0 %5067  ;;  %v5710_v9 = vpack.c.bf16 %v5494_v1, %v5493_v2  ;;  %v7523_v32 = vpop.f32.mrb[12].mxu0  ;;  %v5463_v10 = vmax.f32 %v5267_v29, 0.0  ;;  %v16852_v24 = vld [vmem:[#allocation329_spill] sm:$0xff] }
 0x672   :  { %6545 = vmatmul.mubr.bf16.gmra.mrb[60].mxu0 %v8009_v58  ;;  %v14848_v58 = vadd.f32 %v7521_v30, %v7520_v15  ;;  %v5299_v2 = vadd.f32 %v14766_v12, %v4123_v37  ;;  %v16846_v12 = vld [vmem:[#allocation302_spill] sm:$0xff]  ;;  %v4093_v37 = vmul.f32 %v16852_v24, %v16851_v17 }
 0x673   :  { %v5446_v53 = vmax.f32 %v5250_v61, 0.0  ;;  %7815 = vmatprep.subr.bf16.mxu1 %v5710_v9  ;;  %6682 = vmatprep.mubr.bf16.mxu0 %v8015_v23  ;;  %v7524_v23 = vpop.f32.mrb[13].mxu0  ;;  %v4076_v31 = vmul.f32 %v16846_v12, %v16845_v16 }
 0x674   :  { %v4973_v19 = vpop.permute.xlu1 %4972  ;;  %v7526_v59 = vpop.f32.mrb[14].mxu0  ;;  %v14857_v5 = vadd.f32 %v7524_v23, %v7523_v32 }
 0x675   :  { %v5686_v46 = vpack.c.bf16 %v5446_v53, %v5445_v22  ;;  %v5282_v6 = vadd.f32 %v4973_v19, %v4106_v21  ;;  %v14835_v47 = vpop.permute.xlu0 %4827  ;;  %v7527_v9 = vpop.f32.mrb[15].mxu0  ;;  %v5495_v21 = vmax.f32 %v5299_v2, 0.0  ;;  %v5251_v22 = vadd.f32 %v14779_v42, %v4075_v26  ;;  %v16847_v19 = vld [vmem:[#allocation248_spill] sm:$0xff]  ;;  %v16850_v42 = vld [vmem:[#allocation334_spill] sm:$0xff] }
 0x676   :  { %6642 = vmatmul.mubr.bf16.gmra.mrb[60].mxu1 %v8012_v33  ;;  %v14859_v33 = vadd.f32 %v7527_v9, %v7526_v59  ;;  %v7529_v7 = vpop.f32.mrb[16].mxu0  ;;  %v4107_v48 = vmul.f32 %v16848_v8, %v16847_v19 }
 0x677   :  { %v5478_v63 = vmax.f32 %v5282_v6, 0.0  ;;  %7752 = vmatpush3.bf16.msra.mxu0 %v5686_v46  ;;  %6779 = vmatprep.mubr.bf16.mxu1 %v8018_v50  ;;  %v7530_v53 = vpop.f32.mrb[17].mxu0 }
 0x678   :  { %v4903_v57 = vpop.permute.xlu1 %4902  ;;  %v7532_v54 = vpop.f32.mrb[18].mxu0  ;;  %v14868_v18 = vadd.f32 %v7530_v53, %v7529_v7  ;;  %v5283_v29 = vadd.f32 %v14792_v43, %v4107_v48 }
 0x679   :  { %v5702_v28 = vpack.c.bf16 %v5478_v63, %v5477_v55  ;;  %v5268_v35 = vadd.f32 %v4903_v57, %v4092_v51  ;;  %v14853_v1 = vpop.permute.xlu0 %4987  ;;  %v7533_v6 = vpop.f32.mrb[19].mxu0  ;;  %v4108_v51 = vmul.f32 %v16850_v42, %v16849_v13  ;;  %v5447_v55 = vmax.f32 %v5251_v22, 0.0  ;;  %v16857_v22 = vld [vmem:[#allocation144_spill] sm:$0xff] }
 0x67a   :  { %v14870_v36 = vadd.f32 %v7533_v6, %v7532_v54  ;;  %v7535_v44 = vpop.f32.mrb[20].mxu0  ;;  %v5479_v43 = vmax.f32 %v5283_v29, 0.0  ;;  %v16860_v6 = vld [vmem:[#allocation313_spill] sm:$0xff] }
 0x67b   :  { %v5464_v38 = vmax.f32 %v5268_v35, 0.0  ;;  %7816 = vmatpush3.bf16.msra.mxu1 %v5702_v28  ;;  %v7536_v34 = vpop.f32.mrb[21].mxu0 }
 0x67c   :  { %v5063_v41 = vpop.permute.xlu1 %5062  ;;  %v7538_v15 = vpop.f32.mrb[22].mxu0  ;;  %v14877_v32 = vadd.f32 %v7536_v34, %v7535_v44  ;;  %v16862_v34 = vld [vmem:[#allocation304_spill] sm:$0xff] }
 0x67d   :  { %v5300_v20 = vadd.f32 %v5063_v41, %v4124_v0  ;;  %v5695_v61 = vpack.c.bf16 %v5464_v38, %v5463_v10  ;;  %v14866_v60 = vpop.permute.xlu0 %4917  ;;  %v7539_v30 = vpop.f32.mrb[23].mxu0  ;;  %v16853_v0 = vld [vmem:[#allocation228_spill] sm:$0xff]  ;;  %v5269_v38 = vadd.f32 %v14805_v39, %v4093_v37  ;;  %v16863_v37 = vld [vmem:[#allocation129_spill] sm:$0xff] }
 0x67e   :  { %v14879_v45 = vadd.f32 %v7539_v30, %v7538_v15  ;;  %v16854_v10 = vld [vmem:[#allocation320_spill] sm:$0xff] }
 0x67f   :  { %v5496_v52 = vmax.f32 %v5300_v20, 0.0  ;;  %7753 = vmatprep.subr.bf16.mxu0 %v5695_v61  ;;  %v4094_v2 = vmul.f32 %v16854_v10, %v16853_v0  ;;  %v16855_v20 = vld [vmem:[#allocation145_spill] sm:$0xff]  ;;  %v16858_v39 = vld [vmem:[#allocation352_spill] sm:$0xff]  ;;  %v5465_v53 = vmax.f32 %v5269_v38, 0.0 }
 0x680   :  { %v4823_v50 = vpop.permute.xlu1 %4822  ;;  %v16856_v61 = vld [vmem:[#allocation361_spill] sm:$0xff]  ;;  %v16865_v10 = vld [vmem:[#allocation128_spill] sm:$0xff] }
 0x681   :  { %v5252_v56 = vadd.f32 %v4823_v50, %v4076_v31  ;;  %v5711_v46 = vpack.c.bf16 %v5496_v52, %v5495_v21  ;;  %v14884_v23 = vpop.permute.xlu0 %5077  ;;  %v4125_v9 = vmul.f32 %v16856_v61, %v16855_v20  ;;  %v4126_v52 = vmul.f32 %v16858_v39, %v16857_v22 }
 0x682   :  { %v7541_v14 = vpop.f32.mrb[24].mxu0 }
 0x683   :  { %v5448_v63 = vmax.f32 %v5252_v56, 0.0  ;;  %7817 = vmatprep.subr.bf16.mxu1 %v5711_v46  ;;  %v7542_v59 = vpop.f32.mrb[25].mxu0  ;;  %v5301_v50 = vadd.f32 %v14818_v11, %v4125_v9  ;;  %v16859_v46 = vld [vmem:[#allocation213_spill] sm:$0xff]  ;;  %v16867_v9 = vld [vmem:[#allocation231_spill] sm:$0xff] }
 0x684   :  { %v4983_v57 = vpop.permute.xlu1 %4982  ;;  %v14886_v49 = vadd.f32 %v7542_v59, %v7541_v14  ;;  %v7544_v26 = vpop.f32.mrb[26].mxu0  ;;  %v4077_v44 = vmul.f32 %v16860_v6, %v16859_v46  ;;  %v16871_v6 = vld [vmem:[#allocation268_spill] sm:$0xff] }
 0x685   :  { %v5687_v28 = vpack.c.bf16 %v5448_v63, %v5447_v55  ;;  %v5284_v35 = vadd.f32 %v4983_v57, %v4108_v51  ;;  %v7545_v12 = vpop.f32.mrb[27].mxu0  ;;  %v4838_v13 = vpop.permute.xlu0 %4837  ;;  %v16861_v63 = vld [vmem:[#allocation212_spill] sm:$0xff]  ;;  %v5497_v11 = vmax.f32 %v5301_v50, 0.0  ;;  %v16870_v50 = vld [vmem:[#allocation322_spill] sm:$0xff] }
 0x686   :  { %v14890_v31 = vadd.f32 %v7545_v12, %v7544_v26  ;;  %v4078_v57 = vmul.f32 %v16862_v34, %v16861_v63  ;;  %v5253_v15 = vadd.f32 %v14835_v47, %v4077_v44  ;;  %v16872_v44 = vld [vmem:[#allocation362_spill] sm:$0xff]  ;;  %v16873_v34 = vld [vmem:[#allocation267_spill] sm:$0xff] }
 0x687   :  { %v5480_v41 = vmax.f32 %v5284_v35, 0.0  ;;  %7754 = vmatpush3.bf16.msra.mxu0 %v5687_v28  ;;  %v16864_v28 = vld [vmem:[#allocation345_spill] sm:$0xff] }
 0x688   :  { %v4913_v25 = vpop.permute.xlu1 %4912  ;;  %v4109_v35 = vmul.f32 %v16864_v28, %v16863_v37  ;;  %v5449_v38 = vmax.f32 %v5253_v15, 0.0 }
 0x689   :  { %v5703_v7 = vpack.c.bf16 %v5480_v41, %v5479_v43  ;;  %v5270_v16 = vadd.f32 %v4913_v25, %v4094_v2  ;;  %v16866_v2 = vld [vmem:[#allocation336_spill] sm:$0xff]  ;;  %v4998_v59 = vpop.permute.xlu0 %4997 }
 0x68a   :  { %v7547_v21 = vpop.f32.mrb[28].mxu0  ;;  %v4110_v43 = vmul.f32 %v16866_v2, %v16865_v10  ;;  %v5285_v41 = vadd.f32 %v14853_v1, %v4109_v35  ;;  %v16875_v35 = vld [vmem:[#allocation215_spill] sm:$0xff] }
 0x68b   :  { %v5466_v54 = vmax.f32 %v5270_v16, 0.0  ;;  %7818 = vmatpush3.bf16.msra.mxu1 %v5703_v7  ;;  %v7548_v19 = vpop.f32.mrb[29].mxu0  ;;  %v16868_v7 = vld [vmem:[#allocation331_spill] sm:$0xff] }
 0x68c   :  { %v5073_v8 = vpop.permute.xlu1 %5072  ;;  %v14895_v48 = vadd.f32 %v7548_v19, %v7547_v21  ;;  %v7550_v56 = vpop.f32.mrb[30].mxu0  ;;  %v4095_v16 = vmul.f32 %v16868_v7, %v16867_v9 }
 0x68d   :  { %v5696_v42 = vpack.c.bf16 %v5466_v54, %v5465_v53  ;;  %v5302_v51 = vadd.f32 %v5073_v8, %v4126_v52  ;;  %v7551_v55 = vpop.f32.mrb[31].mxu0  ;;  %v16869_v53 = vld [vmem:[#allocation230_spill] sm:$0xff]  ;;  %v5481_v54 = vmax.f32 %v5285_v41, 0.0 }
 0x68e   :  { %v14899_v29 = vadd.f32 %v7551_v55, %v7550_v56  ;;  %v4096_v1 = vmul.f32 %v16870_v50, %v16869_v53  ;;  %v5271_v19 = vadd.f32 %v14866_v60, %v4095_v16  ;;  %v16877_v41 = vld [vmem:[#allocation214_spill] sm:$0xff]  ;;  %v16879_v16 = vld [vmem:[#allocation252_spill] sm:$0xff]  ;;  %v16881_v53 = vld [vmem:[#allocation251_spill] sm:$0xff] }
 0x68f   :  { %v5498_v17 = vmax.f32 %v5302_v51, 0.0  ;;  %7755 = vmatprep.subr.bf16.mxu0 %v5696_v42  ;;  %v4127_v42 = vmul.f32 %v16872_v44, %v16871_v6  ;;  %v4928_v51 = vpop.permute.xlu0 %4927  ;;  %v16882_v50 = vld [vmem:[#allocation338_spill] sm:$0xff] }
 0x690   :  { %v4833_v24 = vpop.permute.xlu1 %4832  ;;  %v5467_v15 = vmax.f32 %v5271_v19, 0.0 }
 0x691   :  { %v5712_v30 = vpack.c.bf16 %v5498_v17, %v5497_v11  ;;  %v5254_v14 = vadd.f32 %v4833_v24, %v4078_v57  ;;  %v16874_v57 = vld [vmem:[#allocation354_spill] sm:$0xff]  ;;  %v5303_v17 = vadd.f32 %v14884_v23, %v4127_v42 }
 0x692   :  { %v7569_v0 = vpop.f32.mrb[0].mxu1  ;;  %v4128_v11 = vmul.f32 %v16874_v57, %v16873_v34  ;;  %v16883_v42 = vld [vmem:[#allocation234_spill] sm:$0xff] }
 0x693   :  { %v5450_v25 = vmax.f32 %v5254_v14, 0.0  ;;  %7819 = vmatprep.subr.bf16.mxu1 %v5712_v30  ;;  %v7570_v26 = vpop.f32.mrb[1].mxu1  ;;  %v16876_v30 = vld [vmem:[#allocation315_spill] sm:$0xff]  ;;  %v5499_v23 = vmax.f32 %v5303_v17, 0.0  ;;  %v16885_v17 = vld [vmem:[#allocation233_spill] sm:$0xff] }
 0x694   :  { %v4993_v47 = vpop.permute.xlu1 %4992  ;;  %v7571_v20 = vadd.f32 %v7570_v26, %v7569_v0  ;;  %v7572_v61 = vpop.f32.mrb[2].mxu1  ;;  %v4079_v14 = vmul.f32 %v16876_v30, %v16875_v35  ;;  %v16887_v30 = vld [vmem:[#allocation270_spill] sm:$0xff] }
 0x695   :  { %v5688_v12 = vpack.c.bf16 %v5450_v25, %v5449_v38  ;;  %v5286_v21 = vadd.f32 %v4993_v47, %v4110_v43  ;;  %v7573_v22 = vpop.f32.mrb[3].mxu1  ;;  %v16878_v25 = vld [vmem:[#allocation306_spill] sm:$0xff] }
 0x696   :  { %v14912_v39 = vadd.f32 %v7571_v20, %v14823_v4  ;;  %v7574_v52 = vadd.f32 %v7573_v22, %v7572_v61  ;;  %v4080_v26 = vmul.f32 %v16878_v25, %v16877_v41  ;;  %v5255_v47 = vadd.f32 %v4838_v13, %v4079_v14  ;;  %v5088_v20 = vpop.permute.xlu0 %5087  ;;  %v16888_v14 = vld [vmem:[#allocation363_spill] sm:$0xff]  ;;  %v16890_v41 = vld [vmem:[#allocation356_spill] sm:$0xff] }
 0x697   :  { %v5482_v8 = vmax.f32 %v5286_v21, 0.0  ;;  %7756 = vmatpush3.bf16.msra.mxu0 %v5688_v12  ;;  %v16880_v12 = vld [vmem:[#allocation347_spill] sm:$0xff] }
 0x698   :  { %v4923_v56 = vpop.permute.xlu1 %4922  ;;  %v14918_v46 = vadd.f32 %v7574_v52, %v14825_v27  ;;  %v4111_v21 = vmul.f32 %v16880_v12, %v16879_v16 }
 0x699   :  { %v5704_v55 = vpack.c.bf16 %v5482_v8, %v5481_v54  ;;  %v5272_v4 = vadd.f32 %v4923_v56, %v4096_v1  ;;  %v4112_v1 = vmul.f32 %v16882_v50, %v16881_v53  ;;  %v5451_v54 = vmax.f32 %v5255_v47, 0.0 }
 0x69a   :  { %v7575_v63 = vpop.f32.mrb[4].mxu1  ;;  %v5287_v19 = vadd.f32 %v4998_v59, %v4111_v21  ;;  %v16892_v21 = vld [vmem:[#allocation317_spill] sm:$0xff] }
 0x69b   :  { %v5468_v60 = vmax.f32 %v5272_v4, 0.0  ;;  %7820 = vmatpush3.bf16.msra.mxu1 %v5704_v55  ;;  %v7576_v24 = vpop.f32.mrb[5].mxu1  ;;  %v4848_v4 = vpop.permute.xlu0 %4847 }
 0x69c   :  { %v5083_v37 = vpop.permute.xlu1 %5082  ;;  %v7577_v28 = vadd.f32 %v7576_v24, %v7575_v63  ;;  %v7578_v27 = vpop.f32.mrb[6].mxu1  ;;  %v5483_v24 = vmax.f32 %v5287_v19, 0.0  ;;  %v16894_v19 = vld [vmem:[#allocation308_spill] sm:$0xff] }
 0x69d   :  { %v5697_v0 = vpack.c.bf16 %v5468_v60, %v5467_v15  ;;  %v5304_v10 = vadd.f32 %v5083_v37, %v4128_v11  ;;  %v7579_v2 = vpop.f32.mrb[7].mxu1  ;;  %v16886_v60 = vld [vmem:[#allocation324_spill] sm:$0xff] }
 0x69e   :  { %v14928_v43 = vadd.f32 %v7577_v28, %v14837_v3  ;;  %v7580_v38 = vadd.f32 %v7579_v2, %v7578_v27  ;;  %v4098_v59 = vmul.f32 %v16886_v60, %v16885_v17  ;;  %v16898_v17 = vld [vmem:[#allocation340_spill] sm:$0xff] }
 0x69f   :  { %v5500_v61 = vmax.f32 %v5304_v10, 0.0  ;;  %7757 = vmatprep.subr.bf16.mxu0 %v5697_v0  ;;  %v4129_v0 = vmul.f32 %v16888_v14, %v16887_v30  ;;  %v5008_v47 = vpop.permute.xlu0 %5007  ;;  %v16900_v14 = vld [vmem:[#allocation364_spill] sm:$0xff] }
 0x6a0   :  { %v4843_v9 = vpop.permute.xlu1 %4842  ;;  %v14933_v7 = vadd.f32 %v7580_v38, %v14839_v40  ;;  %v16884_v40 = vld [vmem:[#allocation333_spill] sm:$0xff] }
 0x6a1   :  { %v5713_v22 = vpack.c.bf16 %v5500_v61, %v5499_v23  ;;  %v5256_v52 = vadd.f32 %v4843_v9, %v4080_v26  ;;  %v4097_v55 = vmul.f32 %v16884_v40, %v16883_v42  ;;  %v5305_v23 = vadd.f32 %v5088_v20, %v4129_v0  ;;  %v16895_v42 = vld [vmem:[#allocation254_spill] sm:$0xff]  ;;  %v16896_v40 = vld [vmem:[#allocation349_spill] sm:$0xff] }
 0x6a2   :  { %v7581_v3 = vpop.f32.mrb[8].mxu1 }
 0x6a3   :  { %v5452_v8 = vmax.f32 %v5256_v52, 0.0  ;;  %7821 = vmatprep.subr.bf16.mxu1 %v5713_v22  ;;  %v7582_v13 = vpop.f32.mrb[9].mxu1  ;;  %v5273_v37 = vadd.f32 %v4928_v51, %v4097_v55  ;;  %v4113_v55 = vmul.f32 %v16896_v40, %v16895_v42 }
 0x6a4   :  { %v5003_v56 = vpop.permute.xlu1 %5002  ;;  %v7583_v6 = vadd.f32 %v7582_v13, %v7581_v3  ;;  %v7584_v44 = vpop.f32.mrb[10].mxu1 }
 0x6a5   :  { %v5689_v63 = vpack.c.bf16 %v5452_v8, %v5451_v54  ;;  %v5288_v34 = vadd.f32 %v5003_v56, %v4112_v1  ;;  %v7585_v57 = vpop.f32.mrb[11].mxu1  ;;  %v5469_v26 = vmax.f32 %v5273_v37, 0.0  ;;  %v16893_v54 = vld [vmem:[#allocation216_spill] sm:$0xff]  ;;  %v5501_v8 = vmax.f32 %v5305_v23, 0.0  ;;  %v16902_v23 = vld [vmem:[#allocation358_spill] sm:$0xff] }
 0x6a6   :  { %v14942_v11 = vadd.f32 %v7583_v6, %v14846_v62  ;;  %v7586_v15 = vadd.f32 %v7585_v57, %v7584_v44  ;;  %v16889_v62 = vld [vmem:[#allocation269_spill] sm:$0xff]  ;;  %v4082_v20 = vmul.f32 %v16894_v19, %v16893_v54  ;;  %v5098_v57 = vpop.permute.xlu0 %5097 }
 0x6a7   :  { %v5484_v28 = vmax.f32 %v5288_v34, 0.0  ;;  %7758 = vmatpush3.bf16.msra.mxu0 %v5689_v63  ;;  %v4130_v25 = vmul.f32 %v16890_v41, %v16889_v62  ;;  %v8013_v62 = vld [vmem:[%s15530_s1 + $0x20] ss:$52 sps:$4 sm:$0xff]   ;;  %v16905_v19 = vld [vmem:[#allocation273_spill] sm:$0xff] }
 0x6a8   :  { %v4933_v27 = vpop.permute.xlu1 %4932  ;;  %v14947_v35 = vadd.f32 %v7586_v15, %v14848_v58  ;;  %v16891_v58 = vld [vmem:[#allocation217_spill] sm:$0xff] }
 0x6a9   :  { %v5705_v10 = vpack.c.bf16 %v5484_v28, %v5483_v24  ;;  %v5274_v2 = vadd.f32 %v4933_v27, %v4098_v59  ;;  %v4081_v22 = vmul.f32 %v16892_v21, %v16891_v58  ;;  %v16897_v15 = vld [vmem:[#allocation253_spill] sm:$0xff]  ;;  %v5289_v24 = vadd.f32 %v5008_v47, %v4113_v55 }
 0x6aa   :  { %v7587_v38 = vpop.f32.mrb[12].mxu1  ;;  %v4114_v60 = vmul.f32 %v16898_v17, %v16897_v15  ;;  %v8021_v15 = vld [vmem:[%s15530_s1 + $0x88] ss:$52 sps:$4 sm:$0xff]  }
 0x6ab   :  { %v5470_v61 = vmax.f32 %v5274_v2, 0.0  ;;  %7822 = vmatpush3.bf16.msra.mxu1 %v5705_v10  ;;  %v7588_v51 = vpop.f32.mrb[13].mxu1  ;;  %v5257_v13 = vadd.f32 %v4848_v4, %v4081_v22  ;;  %v16903_v22 = vld [vmem:[#allocation274_spill] sm:$0xff] }
 0x6ac   :  { %v5093_v9 = vpop.permute.xlu1 %5092  ;;  %v7589_v16 = vadd.f32 %v7588_v51, %v7587_v38  ;;  %v7590_v12 = vpop.f32.mrb[14].mxu1 }
 0x6ad   :  { %v5698_v52 = vpack.c.bf16 %v5470_v61, %v5469_v26  ;;  %v5306_v3 = vadd.f32 %v5093_v9, %v4130_v25  ;;  %v7591_v53 = vpop.f32.mrb[15].mxu1  ;;  %v5453_v59 = vmax.f32 %v5257_v13, 0.0  ;;  %v16901_v26 = vld [vmem:[#allocation271_spill] sm:$0xff]  ;;  %v5485_v61 = vmax.f32 %v5289_v24, 0.0 }
 0x6ae   :  { %v14956_v50 = vadd.f32 %v7589_v16, %v14857_v5  ;;  %v7592_v1 = vadd.f32 %v7591_v53, %v7590_v12  ;;  %v4132_v47 = vmul.f32 %v16902_v23, %v16901_v26  ;;  %v8019_v16 = vld [vmem:[%s15530_s1 + $0x8c] ss:$52 sps:$4 sm:$0xff]   ;;  %v5108_v12 = vpop.permute.xlu0 %5107  ;;  %v8034_v23 = vld [vmem:[%s15530_s1 + $0x164] ss:$52 sps:$4 sm:$0xff]  }
 0x6af   :  { %v5502_v56 = vmax.f32 %v5306_v3, 0.0  ;;  %7759 = vmatprep.subr.bf16.mxu0 %v5698_v52  ;;  %v8030_v26 = vld [vmem:[%s15530_s1 + $0xf8] ss:$52 sps:$4 sm:$0xff]  }
 0x6b0   :  { %v4853_v6 = vpop.permute.xlu1 %4852  ;;  %v14961_v44 = vadd.f32 %v7592_v1, %v14859_v33  ;;  %v16899_v33 = vld [vmem:[#allocation272_spill] sm:$0xff]  ;;  %v8016_v1 = vld [vmem:[%s15530_s1 + $0x28] ss:$52 sps:$4 sm:$0xff]  }
 0x6b1   :  { %v5714_v63 = vpack.c.bf16 %v5502_v56, %v5501_v8  ;;  %v5258_v34 = vadd.f32 %v4853_v6, %v4082_v20  ;;  %v4131_v0 = vmul.f32 %v16900_v14, %v16899_v33  ;;  %v16906_v20 = vld [vmem:[#allocation360_spill] sm:$0xff] }
 0x6b2   :  { %v7593_v5 = vpop.f32.mrb[16].mxu1  ;;  %v4134_v8 = vmul.f32 %v16906_v20, %v16905_v19  ;;  %v8048_v19 = vld [vmem:[%s15530_s1 + $0x230] ss:$52 sps:$4 sm:$0xff]  }
 0x6b3   :  { %v5454_v37 = vmax.f32 %v5258_v34, 0.0  ;;  %7823 = vmatprep.subr.bf16.mxu1 %v5714_v63  ;;  %v7594_v4 = vpop.f32.mrb[17].mxu1  ;;  %v5307_v51 = vadd.f32 %v5098_v57, %v4131_v0  ;;  %v8022_v57 = vld [vmem:[%s15530_s1 + $0x94] ss:$52 sps:$4 sm:$0xff]   ;;  %v8027_v0 = vld [vmem:[%s15530_s1 + $0xf0] ss:$52 sps:$4 sm:$0xff]  }
 0x6b4   :  { %v5013_v28 = vpop.permute.xlu1 %5012  ;;  %v7595_v27 = vadd.f32 %v7594_v4, %v7593_v5  ;;  %v7596_v30 = vpop.f32.mrb[18].mxu1  ;;  %v8052_v20 = vld [vmem:[%s15530_s1 + $0x29c] ss:$52 sps:$4 sm:$0xff]  }
 0x6b5   :  { %v5690_v10 = vpack.c.bf16 %v5454_v37, %v5453_v59  ;;  %v5290_v2 = vadd.f32 %v5013_v28, %v4114_v60  ;;  %v7597_v38 = vpop.f32.mrb[19].mxu1  ;;  %v5503_v13 = vmax.f32 %v5307_v51, 0.0  ;;  %v8025_v28 = vld [vmem:[%s15530_s1 + $0xf4] ss:$52 sps:$4 sm:$0xff]  }
 0x6b6   :  { %v14973_v41 = vadd.f32 %v7595_v27, %v14868_v18  ;;  %v7598_v25 = vadd.f32 %v7597_v38, %v7596_v30  ;;  %v16904_v18 = vld [vmem:[#allocation365_spill] sm:$0xff] }
 0x6b7   :  { %v5486_v9 = vmax.f32 %v5290_v2, 0.0  ;;  %7760 = vmatpush3.bf16.msra.mxu0 %v5690_v10  ;;  %v4133_v52 = vmul.f32 %v16904_v18, %v16903_v22  ;;  %v8028_v27 = vld [vmem:[%s15530_s1 + $0xfc] ss:$52 sps:$4 sm:$0xff]   ;;  %v8036_v18 = vld [vmem:[%s15530_s1 + $0x160] ss:$52 sps:$4 sm:$0xff]  }
 0x6b8   :  { %v5103_v58 = vpop.permute.xlu1 %5102  ;;  %v14981_v21 = vadd.f32 %v7598_v25, %v14870_v36  ;;  %v8031_v2 = vld [vmem:[%s15530_s1 + $0x15c] ss:$52 sps:$4 sm:$0xff]  }
 0x6b9   :  { %v5706_v3 = vpack.c.bf16 %v5486_v9, %v5485_v61  ;;  %v5308_v53 = vadd.f32 %v5103_v58, %v4132_v47  ;;  %v5309_v56 = vadd.f32 %v5108_v12, %v4133_v52  ;;  %v8040_v52 = vld [vmem:[%s15530_s1 + $0x1cc] ss:$52 sps:$4 sm:$0xff]  }
 0x6ba   :  { %6683 = vmatmul.mubr.bf16.vlgmr.msra.gmra.mrb[64].mxu0 %v8013_v62  ;;  %v7599_v54 = vpop.f32.mrb[20].mxu1 }
 0x6bb   :  { %v5504_v6 = vmax.f32 %v5308_v53, 0.0  ;;  %7824 = vmatpush3.bf16.msra.mxu1 %v5706_v3  ;;  %6690 = vmatprep.mubr.bf16.mxu0 %v8019_v16  ;;  %v7600_v36 = vpop.f32.mrb[21].mxu1  ;;  %v5505_v59 = vmax.f32 %v5309_v56, 0.0  ;;  %v8037_v16 = vld [vmem:[%s15530_s1 + $0x1c4] ss:$52 sps:$4 sm:$0xff]  }
 0x6bc   :  { %v5113_v42 = vpop.permute.xlu1 %5112  ;;  %v7601_v40 = vadd.f32 %v7600_v36, %v7599_v54  ;;  %v7602_v55 = vpop.f32.mrb[22].mxu1  ;;  %v8042_v3 = vld [vmem:[%s15530_s1 + $0x1c8] ss:$52 sps:$4 sm:$0xff]   ;;  %v8054_v56 = vld [vmem:[%s15530_s1 + $0x298] ss:$52 sps:$4 sm:$0xff]  }
 0x6bd   :  { %v5715_v63 = vpack.c.bf16 %v5504_v6, %v5503_v13  ;;  %v5310_v34 = vadd.f32 %v5113_v42, %v4134_v8  ;;  %v7603_v5 = vpop.f32.mrb[23].mxu1  ;;  %v8046_v53 = vld [vmem:[%s15530_s1 + $0x234] ss:$52 sps:$4 sm:$0xff]   ;;  %v8051_v8 = vld [vmem:[%s15530_s1 + $0x290] ss:$52 sps:$4 sm:$0xff]  }
 0x6be   :  { %6780 = vmatmul.mubr.bf16.vlgmr.msra.gmra.mrb[64].mxu1 %v8016_v1  ;;  %v14997_v17 = vadd.f32 %v7601_v40, %v14877_v32  ;;  %v7604_v60 = vadd.f32 %v7603_v5, %v7602_v55  ;;  %v8024_v32 = vld [vmem:[%s15530_s1 + $0x90] ss:$52 sps:$4 sm:$0xff]   ;;  %v8045_v1 = vld [vmem:[%s15530_s1 + $0x228] ss:$52 sps:$4 sm:$0xff]   ;;  %v8057_v36 = vld [vmem:[%s15530_s1 + $0x2f8] ss:$52 sps:$4 sm:$0xff]  }
 0x6bf   :  { %v5506_v24 = vmax.f32 %v5310_v34, 0.0  ;;  %7883 = vmatprep.subr.bf16.mxu0 %v5715_v63  ;;  %7903 = vmatprep.subr.bf16.mxu1 %v5715_v63  ;;  %v8049_v54 = vld [vmem:[%s15530_s1 + $0x294] ss:$52 sps:$4 sm:$0xff]   ;;  %v8055_v13 = vld [vmem:[%s15530_s1 + $0x2fc] ss:$52 sps:$4 sm:$0xff]  }
 0x6c0   :  { %7884 = vmatpush3.bf16.msra.mxu0 %v5715_v63  ;;  %7905 = vmatpush3.bf16.msra.mxu1 %v5715_v63  ;;  %v15000_v37 = vadd.f32 %v7604_v60, %v14879_v45  ;;  %v8058_v6 = vld [vmem:[%s15530_s1 + $0x304] ss:$52 sps:$4 sm:$0xff]   ;;  %v8060_v40 = vld [vmem:[%s15530_s1 + $0x300] ss:$52 sps:$4 sm:$0xff]   ;;  %v8068_v60 = vld [vmem:[%s15530_s1 + $0x308] ss:$52 sps:$4 sm:$0xff]  }
 0x6c1   :  { %v5716_v4 = vpack.c.bf16 %v5506_v24, %v5505_v59  ;;  %6787 = vmatprep.mubr.bf16.mxu1 %v8022_v57  ;;  %v8061_v42 = vld [vmem:[%s15530_s1 + $0x30] ss:$52 sps:$4 sm:$0xff]   ;;  %v8062_v63 = vld [vmem:[%s15530_s1 + $0x98] ss:$52 sps:$4 sm:$0xff]   ;;  %v8065_v34 = vld [vmem:[%s15530_s1 + $0x100] ss:$52 sps:$4 sm:$0xff]  }
 0x6c2   :  { %6691 = vmatmul.mubr.bf16.gmra.mrb[68].mxu0 %v8021_v15  ;;  %v8063_v55 = vld [vmem:[%s15530_s1 + $0x1d0] ss:$52 sps:$4 sm:$0xff]   ;;  %v8064_v57 = vld [vmem:[%s15530_s1 + $0x238] ss:$52 sps:$4 sm:$0xff]   ;;  %v8067_v5 = vld [vmem:[%s15530_s1 + $0x2a0] ss:$52 sps:$4 sm:$0xff]  }
 0x6c3   :  { %7885 = vmatprep.subr.bf16.mxu0 %v5716_v4  ;;  %7904 = vmatprep.subr.bf16.mxu1 %v5716_v4  ;;  %v7605_v30 = vpop.f32.mrb[24].mxu1  ;;  %v8066_v15 = vld [vmem:[%s15530_s1 + $0x168] ss:$52 sps:$4 sm:$0xff]  }
 0x6c4   :  { %7886 = vmatpush3.bf16.msra.mxu0 %v5716_v4  ;;  %7906 = vmatpush3.bf16.msra.mxu1 %v5716_v4  ;;  %v7606_v45 = vpop.f32.mrb[25].mxu1 }
 0x6c5   :  { %6698 = vmatprep.mubr.bf16.mxu0 %v8025_v28  ;;  %v7607_v33 = vadd.f32 %v7606_v45, %v7605_v30  ;;  %v7608_v14 = vpop.f32.mrb[26].mxu1 }
 0x6c6   :  { %6788 = vmatmul.mubr.bf16.gmra.mrb[68].mxu1 %v8024_v32  ;;  %v7609_v10 = vpop.f32.mrb[27].mxu1 }
 0x6c7   :  { %6795 = vmatprep.mubr.bf16.mxu1 %v8028_v27  ;;  %v15018_v38 = vadd.f32 %v7607_v33, %v14886_v49  ;;  %v7610_v62 = vadd.f32 %v7609_v10, %v7608_v14  ;;  %v8033_v49 = vld [vmem:[%s15530_s1 + $0x158] ss:$52 sps:$4 sm:$0xff]  }
 0x6c9   :  { %v15021_v25 = vadd.f32 %v7610_v62, %v14890_v31 }
 0x6ca   :  { %6699 = vmatmul.mubr.bf16.gmra.mrb[72].mxu0 %v8027_v0 }
 0x6cb   :  { %6706 = vmatprep.mubr.bf16.mxu0 %v8031_v2  ;;  %v7611_v47 = vpop.f32.mrb[28].mxu1 }
 0x6cc   :  { %v7612_v61 = vpop.f32.mrb[29].mxu1 }
 0x6cd   :  { %v7613_v51 = vadd.f32 %v7612_v61, %v7611_v47  ;;  %v7614_v9 = vpop.f32.mrb[30].mxu1 }
 0x6ce   :  { %6796 = vmatmul.mubr.bf16.gmra.mrb[72].mxu1 %v8030_v26  ;;  %v7615_v31 = vpop.f32.mrb[31].mxu1 }
 0x6cf   :  { %6803 = vmatprep.mubr.bf16.mxu1 %v8034_v23  ;;  %v15036_v12 = vadd.f32 %v7613_v51, %v14895_v48  ;;  %v7616_v58 = vadd.f32 %v7615_v31, %v7614_v9  ;;  %v8039_v48 = vld [vmem:[%s15530_s1 + $0x1c0] ss:$52 sps:$4 sm:$0xff]  }
 0x6d1   :  { %v15039_v22 = vadd.f32 %v7616_v58, %v14899_v29  ;;  %v8043_v29 = vld [vmem:[%s15530_s1 + $0x22c] ss:$52 sps:$4 sm:$0xff]  }
 0x6d2   :  { %6707 = vmatmul.mubr.bf16.gmra.mrb[76].mxu0 %v8033_v49 }
 0x6d3   :  { %6714 = vmatprep.mubr.bf16.mxu0 %v8037_v16 }
 0x6d6   :  { %6804 = vmatmul.mubr.bf16.gmra.mrb[76].mxu1 %v8036_v18 }
 0x6d7   :  { %6811 = vmatprep.mubr.bf16.mxu1 %v8040_v52 }
 0x6da   :  { %6715 = vmatmul.mubr.bf16.gmra.mrb[80].mxu0 %v8039_v48 }
 0x6db   :  { %6722 = vmatprep.mubr.bf16.mxu0 %v8043_v29 }
 0x6de   :  { %6812 = vmatmul.mubr.bf16.gmra.mrb[80].mxu1 %v8042_v3 }
 0x6df   :  { %6819 = vmatprep.mubr.bf16.mxu1 %v8046_v53 }
 0x6e2   :  { %6723 = vmatmul.mubr.bf16.gmra.mrb[84].mxu0 %v8045_v1 }
 0x6e3   :  { %6730 = vmatprep.mubr.bf16.mxu0 %v8049_v54 }
 0x6e6   :  { %6820 = vmatmul.mubr.bf16.gmra.mrb[84].mxu1 %v8048_v19 }
 0x6e7   :  { %6827 = vmatprep.mubr.bf16.mxu1 %v8052_v20 }
 0x6ea   :  { %6731 = vmatmul.mubr.bf16.gmra.mrb[88].mxu0 %v8051_v8 }
 0x6eb   :  { %6738 = vmatprep.mubr.bf16.mxu0 %v8055_v13 }
 0x6ee   :  { %6828 = vmatmul.mubr.bf16.gmra.mrb[88].mxu1 %v8054_v56 }
 0x6ef   :  { %6835 = vmatprep.mubr.bf16.mxu1 %v8058_v6 }
 0x6f2   :  { %6739 = vmatmul.mubr.bf16.gmra.mrb[92].mxu0 %v8057_v36 }
 0x6f3   :  { %7887 = vmatprep.mubr.msk.bf16.mxu0 %vm6237_vm1, %v8061_v42 }
 0x6f6   :  { %6836 = vmatmul.mubr.bf16.gmra.mrb[92].mxu1 %v8060_v40 }
 0x6f7   :  { %7895 = vmatprep.mubr.msk.bf16.mxu1 %vm6237_vm1, %v8063_v55 }
 0x6fa   :  { %7888 = vmatmul.mubr.msk.bf16.vlgmr.msra.gmra.mrb[96].mxu0 %vm6237_vm1, %v8062_v63 }
 0x6fb   :  { %7891 = vmatprep.mubr.msk.bf16.mxu0 %vm6237_vm1, %v8065_v34 }
 0x6fe   :  { %7896 = vmatmul.mubr.msk.bf16.vlgmr.msra.gmra.mrb[96].mxu1 %vm6237_vm1, %v8064_v57 }
 0x6ff   :  { %7899 = vmatprep.mubr.msk.bf16.mxu1 %vm6237_vm1, %v8067_v5 }
 0x702   :  { %7892 = vmatmul.mubr.msk.bf16.gmra.mrb[100].mxu0 %vm6237_vm1, %v8066_v15 }
 0x706   :  { %7900 = vmatmul.mubr.msk.bf16.gmra.mrb[100].mxu1 %vm6237_vm1, %v8068_v60 }
 0x70d   :  { %v7633_v59 = vpop.f32.mrb[32].mxu0 }
 0x70e   :  { %v7634_v24 = vpop.f32.mrb[33].mxu0 }
 0x70f   :  { %v7635_v4 = vadd.f32 %v7634_v24, %v7633_v59  ;;  %v7636_v28 = vpop.f32.mrb[34].mxu0 }
 0x710   :  { %v7637_v32 = vpop.f32.mrb[35].mxu0 }
 0x711   :  { %v6491_v27 = vadd.f32 %v7635_v4, %v14912_v39  ;;  %v7697_v30 = vpop.f32.mrb[32].mxu1  ;;  %v7638_v45 = vadd.f32 %v7637_v32, %v7636_v28 }
 0x712   :  { %v7698_v33 = vpop.f32.mrb[33].mxu1 }
 0x713   :  { %v6494_v14 = vadd.f32 %v7638_v45, %v14918_v46  ;;  %v7699_v0 = vadd.f32 %v7698_v33, %v7697_v30  ;;  %v7700_v10 = vpop.f32.mrb[34].mxu1 }
 0x714   :  { %v7701_v2 = vpop.f32.mrb[35].mxu1 }
 0x715   :  { %v15123_v62 = vadd.f32 %v7699_v0, %v6491_v27  ;;  %v7702_v26 = vadd.f32 %v7701_v2, %v7700_v10  ;;  %v7639_v23 = vpop.f32.mrb[36].mxu0 }
 0x716   :  { %v7640_v47 = vpop.f32.mrb[37].mxu0 }
 0x717   :  { %v15125_v61 = vadd.f32 %v7702_v26, %v6494_v14  ;;  %v7641_v51 = vadd.f32 %v7640_v47, %v7639_v23  ;;  %v7642_v9 = vpop.f32.mrb[38].mxu0 }
 0x718   :  { %v7643_v49 = vpop.f32.mrb[39].mxu0 }
 0x719   :  { %v6499_v39 = vadd.f32 %v7641_v51, %v14928_v43  ;;  %v7703_v31 = vpop.f32.mrb[36].mxu1  ;;  %v7644_v16 = vadd.f32 %v7643_v49, %v7642_v9 }
 0x71a   :  { %v7704_v58 = vpop.f32.mrb[37].mxu1 }
 0x71b   :  { %v6502_v46 = vadd.f32 %v7644_v16, %v14933_v7  ;;  %v7705_v18 = vadd.f32 %v7704_v58, %v7703_v31  ;;  %v7706_v52 = vpop.f32.mrb[38].mxu1 }
 0x71c   :  { %v7707_v48 = vpop.f32.mrb[39].mxu1 }
 0x71d   :  { %v15129_v29 = vadd.f32 %v7705_v18, %v6499_v39  ;;  %v7708_v3 = vadd.f32 %v7707_v48, %v7706_v52  ;;  %v7645_v53 = vpop.f32.mrb[40].mxu0 }
 0x71e   :  { %v7646_v1 = vpop.f32.mrb[41].mxu0 }
 0x71f   :  { %v15131_v54 = vadd.f32 %v7708_v3, %v6502_v46  ;;  %v7647_v19 = vadd.f32 %v7646_v1, %v7645_v53  ;;  %v7648_v20 = vpop.f32.mrb[42].mxu0 }
 0x720   :  { %v7649_v8 = vpop.f32.mrb[43].mxu0 }
 0x721   :  { %v6507_v43 = vadd.f32 %v7647_v19, %v14942_v11  ;;  %v7709_v13 = vpop.f32.mrb[40].mxu1  ;;  %v7650_v56 = vadd.f32 %v7649_v8, %v7648_v20 }
 0x722   :  { %v7710_v6 = vpop.f32.mrb[41].mxu1 }
 0x723   :  { %v6510_v7 = vadd.f32 %v7650_v56, %v14947_v35  ;;  %v7711_v36 = vadd.f32 %v7710_v6, %v7709_v13  ;;  %v7712_v42 = vpop.f32.mrb[42].mxu1 }
 0x724   :  { %v7713_v40 = vpop.f32.mrb[43].mxu1 }
 0x725   :  { %v15135_v55 = vadd.f32 %v7711_v36, %v6507_v43  ;;  %v7714_v63 = vadd.f32 %v7713_v40, %v7712_v42  ;;  %v7651_v34 = vpop.f32.mrb[44].mxu0 }
 0x726   :  { %v7652_v57 = vpop.f32.mrb[45].mxu0 }
 0x727   :  { %v15137_v5 = vadd.f32 %v7714_v63, %v6510_v7  ;;  %v7653_v15 = vadd.f32 %v7652_v57, %v7651_v34  ;;  %v7654_v60 = vpop.f32.mrb[46].mxu0 }
 0x728   :  { %v7655_v59 = vpop.f32.mrb[47].mxu0 }
 0x729   :  { %v6515_v11 = vadd.f32 %v7653_v15, %v14956_v50  ;;  %v7715_v24 = vpop.f32.mrb[44].mxu1  ;;  %v7656_v4 = vadd.f32 %v7655_v59, %v7654_v60 }
 0x72a   :  { %v7716_v28 = vpop.f32.mrb[45].mxu1 }
 0x72b   :  { %v6518_v35 = vadd.f32 %v7656_v4, %v14961_v44  ;;  %v7717_v32 = vadd.f32 %v7716_v28, %v7715_v24  ;;  %v7718_v27 = vpop.f32.mrb[46].mxu1 }
 0x72c   :  { %v7719_v30 = vpop.f32.mrb[47].mxu1 }
 0x72d   :  { %v15141_v45 = vadd.f32 %v7717_v32, %v6515_v11  ;;  %v7720_v33 = vadd.f32 %v7719_v30, %v7718_v27  ;;  %v7657_v14 = vpop.f32.mrb[48].mxu0 }
 0x72e   :  { %v7658_v0 = vpop.f32.mrb[49].mxu0 }
 0x72f   :  { %v15143_v10 = vadd.f32 %v7720_v33, %v6518_v35  ;;  %v7659_v2 = vadd.f32 %v7658_v0, %v7657_v14  ;;  %v7660_v26 = vpop.f32.mrb[50].mxu0 }
 0x730   :  { %v7661_v23 = vpop.f32.mrb[51].mxu0 }
 0x731   :  { %v6523_v50 = vadd.f32 %v7659_v2, %v14973_v41  ;;  %v7721_v47 = vpop.f32.mrb[48].mxu1  ;;  %v7662_v51 = vadd.f32 %v7661_v23, %v7660_v26 }
 0x732   :  { %v7722_v9 = vpop.f32.mrb[49].mxu1 }
 0x733   :  { %v6526_v44 = vadd.f32 %v7662_v51, %v14981_v21  ;;  %v7723_v49 = vadd.f32 %v7722_v9, %v7721_v47  ;;  %v7724_v39 = vpop.f32.mrb[50].mxu1 }
 0x734   :  { %v7725_v31 = vpop.f32.mrb[51].mxu1 }
 0x735   :  { %v15147_v16 = vadd.f32 %v7723_v49, %v6523_v50  ;;  %v7726_v58 = vadd.f32 %v7725_v31, %v7724_v39  ;;  %v7663_v46 = vpop.f32.mrb[52].mxu0 }
 0x736   :  { %v7664_v18 = vpop.f32.mrb[53].mxu0 }
 0x737   :  { %v15149_v52 = vadd.f32 %v7726_v58, %v6526_v44  ;;  %v7665_v48 = vadd.f32 %v7664_v18, %v7663_v46  ;;  %v7666_v3 = vpop.f32.mrb[54].mxu0 }
 0x738   :  { %v7667_v53 = vpop.f32.mrb[55].mxu0 }
 0x739   :  { %v6531_v41 = vadd.f32 %v7665_v48, %v14997_v17  ;;  %v7727_v1 = vpop.f32.mrb[52].mxu1  ;;  %v7668_v19 = vadd.f32 %v7667_v53, %v7666_v3 }
 0x73a   :  { %v7728_v20 = vpop.f32.mrb[53].mxu1 }
 0x73b   :  { %v6534_v21 = vadd.f32 %v7668_v19, %v15000_v37  ;;  %v7729_v8 = vadd.f32 %v7728_v20, %v7727_v1  ;;  %v7730_v43 = vpop.f32.mrb[54].mxu1 }
 0x73c   :  { %v7731_v13 = vpop.f32.mrb[55].mxu1 }
 0x73d   :  { %v15153_v56 = vadd.f32 %v7729_v8, %v6531_v41  ;;  %v7732_v6 = vadd.f32 %v7731_v13, %v7730_v43  ;;  %v7669_v7 = vpop.f32.mrb[56].mxu0 }
 0x73e   :  { %v7670_v36 = vpop.f32.mrb[57].mxu0 }
 0x73f   :  { %v15155_v42 = vadd.f32 %v7732_v6, %v6534_v21  ;;  %v7671_v40 = vadd.f32 %v7670_v36, %v7669_v7  ;;  %v7672_v63 = vpop.f32.mrb[58].mxu0 }
 0x740   :  { %v7673_v34 = vpop.f32.mrb[59].mxu0 }
 0x741   :  { %v6539_v17 = vadd.f32 %v7671_v40, %v15018_v38  ;;  %v7733_v57 = vpop.f32.mrb[56].mxu1  ;;  %v7674_v15 = vadd.f32 %v7673_v34, %v7672_v63 }
 0x742   :  { %v7734_v60 = vpop.f32.mrb[57].mxu1 }
 0x743   :  { %v6542_v37 = vadd.f32 %v7674_v15, %v15021_v25  ;;  %v7735_v59 = vadd.f32 %v7734_v60, %v7733_v57  ;;  %v7736_v11 = vpop.f32.mrb[58].mxu1 }
 0x744   :  { %v7737_v24 = vpop.f32.mrb[59].mxu1 }
 0x745   :  { %v15159_v4 = vadd.f32 %v7735_v59, %v6539_v17  ;;  %v7738_v28 = vadd.f32 %v7737_v24, %v7736_v11  ;;  %v7675_v35 = vpop.f32.mrb[60].mxu0 }
 0x746   :  { %v7676_v32 = vpop.f32.mrb[61].mxu0 }
 0x747   :  { %v15161_v27 = vadd.f32 %v7738_v28, %v6542_v37  ;;  %v7677_v30 = vadd.f32 %v7676_v32, %v7675_v35  ;;  %v7678_v33 = vpop.f32.mrb[62].mxu0 }
 0x748   :  { %v7679_v14 = vpop.f32.mrb[63].mxu0 }
 0x749   :  { %v6547_v38 = vadd.f32 %v7677_v30, %v15036_v12  ;;  %v7739_v0 = vpop.f32.mrb[60].mxu1  ;;  %v7680_v2 = vadd.f32 %v7679_v14, %v7678_v33 }
 0x74a   :  { %v7740_v26 = vpop.f32.mrb[61].mxu1 }
 0x74b   :  { %v6550_v25 = vadd.f32 %v7680_v2, %v15039_v22  ;;  %v7741_v23 = vadd.f32 %v7740_v26, %v7739_v0  ;;  %v7742_v50 = vpop.f32.mrb[62].mxu1 }
 0x74c   :  { %v7743_v47 = vpop.f32.mrb[63].mxu1 }
 0x74d   :  { %v15165_v51 = vadd.f32 %v7741_v23, %v6547_v38  ;;  %v7744_v9 = vadd.f32 %v7743_v47, %v7742_v50 }
 0x74f   :  { %v15167_v44 = vadd.f32 %v7744_v9, %v6550_v25 }
 0x78d   :  { %v7761_v49 = vpop.f32.mrb[64].mxu0 }
 0x78e   :  { %v7762_v39 = vpop.f32.mrb[65].mxu0 }
 0x78f   :  { %v7763_v31 = vadd.f32 %v7762_v39, %v7761_v49  ;;  %v7764_v58 = vpop.f32.mrb[66].mxu0 }
 0x790   :  { %v7765_v46 = vpop.f32.mrb[67].mxu0 }
 0x791   :  { %v6685_v12 = vadd.f32 %v7763_v31, %v15123_v62  ;;  %v7766_v18 = vadd.f32 %v7765_v46, %v7764_v58  ;;  %v7825_v48 = vpop.f32.mrb[64].mxu1 }
 0x792   :  { %v7826_v3 = vpop.f32.mrb[65].mxu1 }
 0x793   :  { %v6688_v22 = vadd.f32 %v7766_v18, %v15125_v61  ;;  %v7827_v53 = vadd.f32 %v7826_v3, %v7825_v48  ;;  %v7828_v41 = vpop.f32.mrb[66].mxu1 }
 0x794   :  { %v7829_v1 = vpop.f32.mrb[67].mxu1 }
 0x795   :  { %v7830_v19 = vadd.f32 %v7829_v1, %v7828_v41  ;;  %v7767_v20 = vpop.f32.mrb[68].mxu0  ;;  %v15171_v21 = vadd.f32 %v7827_v53, %v6685_v12 }
 0x796   :  { %v7768_v8 = vpop.f32.mrb[69].mxu0 }
 0x797   :  { %v7769_v43 = vadd.f32 %v7768_v8, %v7767_v20  ;;  %v7770_v13 = vpop.f32.mrb[70].mxu0  ;;  %v15173_v6 = vadd.f32 %v7830_v19, %v6688_v22 }
 0x798   :  { %v7771_v7 = vpop.f32.mrb[71].mxu0 }
 0x799   :  { %v6693_v62 = vadd.f32 %v7769_v43, %v15129_v29  ;;  %v7772_v36 = vadd.f32 %v7771_v7, %v7770_v13  ;;  %v7831_v40 = vpop.f32.mrb[68].mxu1 }
 0x79a   :  { %v7832_v63 = vpop.f32.mrb[69].mxu1 }
 0x79b   :  { %v6696_v61 = vadd.f32 %v7772_v36, %v15131_v54  ;;  %v7833_v34 = vadd.f32 %v7832_v63, %v7831_v40  ;;  %v7834_v17 = vpop.f32.mrb[70].mxu1 }
 0x79c   :  { %v7835_v57 = vpop.f32.mrb[71].mxu1 }
 0x79d   :  { %v7836_v15 = vadd.f32 %v7835_v57, %v7834_v17  ;;  %v7773_v60 = vpop.f32.mrb[72].mxu0  ;;  %v15177_v37 = vadd.f32 %v7833_v34, %v6693_v62 }
 0x79e   :  { %v7774_v59 = vpop.f32.mrb[73].mxu0 }
 0x79f   :  { %v7775_v11 = vadd.f32 %v7774_v59, %v7773_v60  ;;  %v7776_v24 = vpop.f32.mrb[74].mxu0  ;;  %v15179_v28 = vadd.f32 %v7836_v15, %v6696_v61 }
 0x7a0   :  { %v7777_v35 = vpop.f32.mrb[75].mxu0 }
 0x7a1   :  { %v6701_v29 = vadd.f32 %v7775_v11, %v15135_v55  ;;  %v7778_v32 = vadd.f32 %v7777_v35, %v7776_v24  ;;  %v7837_v30 = vpop.f32.mrb[72].mxu1 }
 0x7a2   :  { %v7838_v33 = vpop.f32.mrb[73].mxu1 }
 0x7a3   :  { %v6704_v54 = vadd.f32 %v7778_v32, %v15137_v5  ;;  %v7839_v14 = vadd.f32 %v7838_v33, %v7837_v30  ;;  %v7840_v38 = vpop.f32.mrb[74].mxu1 }
 0x7a4   :  { %v7841_v0 = vpop.f32.mrb[75].mxu1 }
 0x7a5   :  { %v7842_v2 = vadd.f32 %v7841_v0, %v7840_v38  ;;  %v7779_v26 = vpop.f32.mrb[76].mxu0  ;;  %v15183_v25 = vadd.f32 %v7839_v14, %v6701_v29 }
 0x7a6   :  { %v7780_v23 = vpop.f32.mrb[77].mxu0 }
 0x7a7   :  { %v7781_v50 = vadd.f32 %v7780_v23, %v7779_v26  ;;  %v7782_v47 = vpop.f32.mrb[78].mxu0  ;;  %v15185_v9 = vadd.f32 %v7842_v2, %v6704_v54 }
 0x7a8   :  { %v7783_v49 = vpop.f32.mrb[79].mxu0 }
 0x7a9   :  { %v6709_v55 = vadd.f32 %v7781_v50, %v15141_v45  ;;  %v7784_v39 = vadd.f32 %v7783_v49, %v7782_v47  ;;  %v7843_v31 = vpop.f32.mrb[76].mxu1 }
 0x7aa   :  { %v7844_v58 = vpop.f32.mrb[77].mxu1 }
 0x7ab   :  { %v6712_v5 = vadd.f32 %v7784_v39, %v15143_v10  ;;  %v7845_v46 = vadd.f32 %v7844_v58, %v7843_v31  ;;  %v7846_v12 = vpop.f32.mrb[78].mxu1 }
 0x7ac   :  { %v7847_v18 = vpop.f32.mrb[79].mxu1 }
 0x7ad   :  { %v7848_v48 = vadd.f32 %v7847_v18, %v7846_v12  ;;  %v7785_v3 = vpop.f32.mrb[80].mxu0  ;;  %v15189_v22 = vadd.f32 %v7845_v46, %v6709_v55 }
 0x7ae   :  { %v7786_v53 = vpop.f32.mrb[81].mxu0 }
 0x7af   :  { %v7787_v41 = vadd.f32 %v7786_v53, %v7785_v3  ;;  %v7788_v1 = vpop.f32.mrb[82].mxu0  ;;  %v15191_v19 = vadd.f32 %v7848_v48, %v6712_v5 }
 0x7b0   :  { %v7789_v20 = vpop.f32.mrb[83].mxu0 }
 0x7b1   :  { %v6717_v45 = vadd.f32 %v7787_v41, %v15147_v16  ;;  %v7790_v8 = vadd.f32 %v7789_v20, %v7788_v1  ;;  %v7849_v43 = vpop.f32.mrb[80].mxu1 }
 0x7b2   :  { %v7850_v13 = vpop.f32.mrb[81].mxu1 }
 0x7b3   :  { %v6720_v10 = vadd.f32 %v7790_v8, %v15149_v52  ;;  %v7851_v7 = vadd.f32 %v7850_v13, %v7849_v43  ;;  %v7852_v62 = vpop.f32.mrb[82].mxu1 }
 0x7b4   :  { %v7853_v36 = vpop.f32.mrb[83].mxu1 }
 0x7b5   :  { %v7854_v40 = vadd.f32 %v7853_v36, %v7852_v62  ;;  %v7791_v63 = vpop.f32.mrb[84].mxu0  ;;  %v6814_v61 = vadd.f32 %v7851_v7, %v6717_v45 }
 0x7b6   :  { %v7792_v34 = vpop.f32.mrb[85].mxu0 }
 0x7b7   :  { %v7793_v17 = vadd.f32 %v7792_v34, %v7791_v63  ;;  %v7794_v57 = vpop.f32.mrb[86].mxu0  ;;  %v15195_v15 = vadd.f32 %v7854_v40, %v6720_v10 }
 0x7b8   :  { %v7795_v60 = vpop.f32.mrb[87].mxu0 }
 0x7b9   :  { %v6725_v59 = vadd.f32 %v7793_v17, %v15153_v56  ;;  %v7796_v16 = vadd.f32 %v7795_v60, %v7794_v57  ;;  %v7855_v11 = vpop.f32.mrb[84].mxu1 }
 0x7ba   :  { %v7856_v24 = vpop.f32.mrb[85].mxu1 }
 0x7bb   :  { %v6728_v35 = vadd.f32 %v7796_v16, %v15155_v42  ;;  %v7857_v52 = vadd.f32 %v7856_v24, %v7855_v11  ;;  %v7858_v29 = vpop.f32.mrb[86].mxu1 }
 0x7bc   :  { %v7859_v32 = vpop.f32.mrb[87].mxu1 }
 0x7bd   :  { %v7860_v30 = vadd.f32 %v7859_v32, %v7858_v29  ;;  %v7797_v33 = vpop.f32.mrb[88].mxu0  ;;  %v6822_v54 = vadd.f32 %v7857_v52, %v6725_v59 }
 0x7be   :  { %v7798_v14 = vpop.f32.mrb[89].mxu0 }
 0x7bf   :  { %v7799_v38 = vadd.f32 %v7798_v14, %v7797_v33  ;;  %v7800_v0 = vpop.f32.mrb[90].mxu0  ;;  %v6825_v2 = vadd.f32 %v7860_v30, %v6728_v35 }
 0x7c0   :  { %v7801_v26 = vpop.f32.mrb[91].mxu0 }
 0x7c1   :  { %v6733_v23 = vadd.f32 %v7799_v38, %v15159_v4  ;;  %v7802_v50 = vadd.f32 %v7801_v26, %v7800_v0  ;;  %v7861_v56 = vpop.f32.mrb[88].mxu1 }
 0x7c2   :  { %v7862_v47 = vpop.f32.mrb[89].mxu1 }
 0x7c3   :  { %v6736_v49 = vadd.f32 %v7802_v50, %v15161_v27  ;;  %v7863_v55 = vadd.f32 %v7862_v47, %v7861_v56  ;;  %v7864_v42 = vpop.f32.mrb[90].mxu1 }
 0x7c4   :  { %v7865_v39 = vpop.f32.mrb[91].mxu1 }
 0x7c5   :  { %v7866_v31 = vadd.f32 %v7865_v39, %v7864_v42  ;;  %v7803_v58 = vpop.f32.mrb[92].mxu0  ;;  %v6830_v5 = vadd.f32 %v7863_v55, %v6733_v23 }
 0x7c6   :  { %v7804_v46 = vpop.f32.mrb[93].mxu0 }
 0x7c7   :  { %v7805_v12 = vadd.f32 %v7804_v46, %v7803_v58  ;;  %v7806_v18 = vpop.f32.mrb[94].mxu0  ;;  %v6833_v48 = vadd.f32 %v7866_v31, %v6736_v49 }
 0x7c8   :  { %v7807_v3 = vpop.f32.mrb[95].mxu0 }
 0x7c9   :  { %v6741_v53 = vadd.f32 %v7805_v12, %v15165_v51  ;;  %v7808_v41 = vadd.f32 %v7807_v3, %v7806_v18  ;;  %v7867_v4 = vpop.f32.mrb[92].mxu1 }
 0x7ca   :  { %v7868_v1 = vpop.f32.mrb[93].mxu1 }
 0x7cb   :  { %v6744_v20 = vadd.f32 %v7808_v41, %v15167_v44  ;;  %v7869_v45 = vadd.f32 %v7868_v1, %v7867_v4  ;;  %v7870_v27 = vpop.f32.mrb[94].mxu1 }
 0x7cc   :  { %v7871_v8 = vpop.f32.mrb[95].mxu1 }
 0x7cd   :  { %v7872_v43 = vadd.f32 %v7871_v8, %v7870_v27  ;;  %v7889_v13 = vpop.f32.mrb[96].mxu0  ;;  %v6838_v10 = vadd.f32 %v7869_v45, %v6741_v53 }
 0x7ce   :  { %v15204_v7 = vadd.f32 %v7889_v13, %v15177_v37  ;;  %v6878_v62 = vpop.f32.mrb[97].mxu0 }
 0x7cf   :  { %v15207_v36 = vadd.f32 %v6878_v62, %v15171_v21  ;;  %v7890_v40 = vpop.f32.mrb[98].mxu0  ;;  %v6841_v51 = vadd.f32 %v7872_v43, %v6744_v20 }
 0x7d0   :  { %v15210_v63 = vadd.f32 %v7890_v40, %v15179_v28  ;;  %v6881_v34 = vpop.f32.mrb[99].mxu0  ;;  %v6947_v35 = vsel %vm214_vm0, %v15204_v7, 0.0 }
 0x7d1   :  { %v15213_v44 = vadd.f32 %v6881_v34, %v15173_v6  ;;  %v7897_v17 = vpop.f32.mrb[96].mxu1  ;;  %v6941_v57 = vsel %vm214_vm0, %v15207_v36, 0.0 }
 0x7d2   :  { %v15217_v60 = vadd.f32 %v7897_v17, %v6822_v54  ;;  %v6910_v37 = vpop.f32.mrb[97].mxu1  ;;  %6942 = vadd.xlane.f32.xlu0 %v6941_v57  ;;  %v6950_v38 = vsel %vm214_vm0, %v15210_v63, 0.0 }
 0x7d3   :  { %v15219_v59 = vadd.f32 %v6910_v37, %v6814_v61  ;;  %v7898_v21 = vpop.f32.mrb[98].mxu1  ;;  %v6944_v16 = vsel %vm214_vm0, %v15213_v44, 0.0 }
 0x7d4   :  { %v15223_v28 = vadd.f32 %v7898_v21, %v6825_v2  ;;  %v6913_v11 = vpop.f32.mrb[99].mxu1  ;;  %6945 = vadd.xlane.f32.xlu1 %v6944_v16  ;;  %v6971_v49 = vsel %vm214_vm0, %v15217_v60, 0.0 }
 0x7d5   :  { %v15226_v6 = vadd.f32 %v6913_v11, %v15195_v15  ;;  %v7893_v24 = vpop.f32.mrb[100].mxu0  ;;  %v6965_v56 = vsel %vm214_vm0, %v15219_v59, 0.0 }
 0x7d6   :  { %v15231_v52 = vadd.f32 %v7893_v24, %v15189_v22  ;;  %v6894_v61 = vpop.f32.mrb[101].mxu0  ;;  %6948 = vadd.xlane.f32.xlu0 %v6947_v35  ;;  %v6974_v39 = vsel %vm214_vm0, %v15223_v28, 0.0 }
 0x7d7   :  { %v6895_v29 = vadd.f32 %v6894_v61, %v15183_v25  ;;  %v7894_v32 = vpop.f32.mrb[102].mxu0  ;;  %v6968_v55 = vsel %vm214_vm0, %v15226_v6, 0.0 }
 0x7d8   :  { %v15235_v30 = vadd.f32 %v7894_v32, %v15191_v19  ;;  %v6897_v33 = vpop.f32.mrb[103].mxu0 }
 0x7d9   :  { %v15238_v54 = vadd.f32 %v6897_v33, %v15185_v9  ;;  %v7901_v15 = vpop.f32.mrb[100].mxu1  ;;  %v6953_v14 = vsel %vm214_vm0, %v6895_v29, 0.0  ;;  %v6959_v9 = vsel %vm214_vm0, %v15231_v52, 0.0 }
 0x7da   :  { %v15243_v22 = vadd.f32 %v7901_v15, %v6838_v10  ;;  %v6926_v0 = vpop.f32.mrb[101].mxu1  ;;  %6954 = vadd.xlane.f32.xlu1 %v6953_v14  ;;  %6951 = vadd.xlane.f32.xlu0 %v6950_v38  ;;  %v6962_v47 = vsel %vm214_vm0, %v15235_v30, 0.0 }
 0x7db   :  { %v15245_v25 = vadd.f32 %v6926_v0, %v6830_v5  ;;  %v7902_v2 = vpop.f32.mrb[102].mxu1  ;;  %v6956_v50 = vsel %vm214_vm0, %v15238_v54, 0.0 }
 0x7dc   :  { %v15247_v19 = vadd.f32 %v7902_v2, %v6841_v51  ;;  %v6929_v26 = vpop.f32.mrb[103].mxu1  ;;  %v6983_v31 = vsel %vm214_vm0, %v15243_v22, 0.0 }
 0x7dd   :  { %v15249_v23 = vadd.f32 %v6929_v26, %v6833_v48  ;;  %v6977_v42 = vsel %vm214_vm0, %v15245_v25, 0.0 }
 0x7de   :  { %6960 = vadd.xlane.f32.xlu1 %v6959_v9  ;;  %6957 = vadd.xlane.f32.xlu0 %v6956_v50  ;;  %v6986_v5 = vsel %vm214_vm0, %v15247_v19, 0.0 }
 0x7df   :  { %v6980_v58 = vsel %vm214_vm0, %v15249_v23, 0.0 }
 0x7e2   :  { %6966 = vadd.xlane.f32.xlu1 %v6965_v56  ;;  %6963 = vadd.xlane.f32.xlu0 %v6962_v47 }
 0x7e6   :  { %6972 = vadd.xlane.f32.xlu1 %v6971_v49  ;;  %6969 = vadd.xlane.f32.xlu0 %v6968_v55 }
 0x7ea   :  { %6978 = vadd.xlane.f32.xlu1 %v6977_v42  ;;  %6975 = vadd.xlane.f32.xlu0 %v6974_v39 }
 0x7ee   :  { %6984 = vadd.xlane.f32.xlu1 %v6983_v31  ;;  %6981 = vadd.xlane.f32.xlu0 %v6980_v58 }
 0x7f2   :  { %6987 = vadd.xlane.f32.xlu0 %v6986_v5 }
 0x85f   :  { %v6943_v46 = vpop.xlane.xlu0 %6942 }
 0x860   :  { %v6989_v12 = vmul.f32 0.020408163, %v6943_v46 }
 0x861   :  { %v6946_v18 = vpop.xlane.xlu1 %6945 }
 0x862   :  { %v15274_v48 = vsub.f32 %v15207_v36, %v6989_v12  ;;  %v6990_v3 = vmul.f32 0.020408163, %v6946_v18 }
 0x863   :  { %v6949_v53 = vpop.xlane.xlu0 %6948 }
 0x864   :  { %v15277_v41 = vsub.f32 %v15213_v44, %v6990_v3  ;;  %v6991_v4 = vmul.f32 0.020408163, %v6949_v53  ;;  %v7021_v1 = vmul.f32 %v15274_v48, %v15274_v48 }
 0x866   :  { %v15282_v20 = vsub.f32 %v15204_v7, %v6991_v4  ;;  %v7037_v45 = vsel %vm214_vm0, %v7021_v1, 0.0  ;;  %v7022_v27 = vmul.f32 %v15277_v41, %v15277_v41 }
 0x867   :  { %v6955_v8 = vpop.xlane.xlu1 %6954  ;;  %7038 = vadd.xlane.f32.xlu1 %v7037_v45  ;;  %v6952_v43 = vpop.xlane.xlu0 %6951 }
 0x868   :  { %v6993_v13 = vmul.f32 0.020408163, %v6955_v8  ;;  %v6992_v10 = vmul.f32 0.020408163, %v6952_v43  ;;  %v7040_v62 = vsel %vm214_vm0, %v7022_v27, 0.0  ;;  %v7023_v36 = vmul.f32 %v15282_v20, %v15282_v20 }
 0x869   :  { %7041 = vadd.xlane.f32.xlu0 %v7040_v62 }
 0x86a   :  { %v15290_v40 = vsub.f32 %v6895_v29, %v6993_v13  ;;  %v15293_v7 = vsub.f32 %v15210_v63, %v6992_v10  ;;  %v7043_v51 = vsel %vm214_vm0, %v7023_v36, 0.0 }
 0x86b   :  { %v6961_v34 = vpop.xlane.xlu1 %6960  ;;  %7044 = vadd.xlane.f32.xlu1 %v7043_v51  ;;  %v6958_v44 = vpop.xlane.xlu0 %6957 }
 0x86c   :  { %v6995_v17 = vmul.f32 0.020408163, %v6961_v34  ;;  %v6994_v57 = vmul.f32 0.020408163, %v6958_v44  ;;  %v7025_v37 = vmul.f32 %v15290_v40, %v15290_v40  ;;  %v7024_v21 = vmul.f32 %v15293_v7, %v15293_v7 }
 0x86e   :  { %v15301_v16 = vsub.f32 %v15231_v52, %v6995_v17  ;;  %v15304_v11 = vsub.f32 %v15238_v54, %v6994_v57  ;;  %v7049_v63 = vsel %vm214_vm0, %v7025_v37, 0.0  ;;  %v7046_v24 = vsel %vm214_vm0, %v7024_v21, 0.0 }
 0x86f   :  { %v6967_v35 = vpop.xlane.xlu1 %6966  ;;  %7050 = vadd.xlane.f32.xlu1 %v7049_v63  ;;  %7047 = vadd.xlane.f32.xlu0 %v7046_v24  ;;  %v6964_v61 = vpop.xlane.xlu0 %6963 }
 0x870   :  { %v6997_v29 = vmul.f32 0.020408163, %v6967_v35  ;;  %v6996_v32 = vmul.f32 0.020408163, %v6964_v61  ;;  %v7027_v33 = vmul.f32 %v15301_v16, %v15301_v16  ;;  %v7026_v52 = vmul.f32 %v15304_v11, %v15304_v11 }
 0x872   :  { %v15313_v15 = vsub.f32 %v15219_v59, %v6997_v29  ;;  %v15316_v54 = vsub.f32 %v15235_v30, %v6996_v32  ;;  %v7055_v14 = vsel %vm214_vm0, %v7027_v33, 0.0  ;;  %v7052_v38 = vsel %vm214_vm0, %v7026_v52, 0.0 }
 0x873   :  { %v6973_v0 = vpop.xlane.xlu1 %6972  ;;  %7056 = vadd.xlane.f32.xlu1 %v7055_v14  ;;  %7053 = vadd.xlane.f32.xlu0 %v7052_v38  ;;  %v6970_v2 = vpop.xlane.xlu0 %6969 }
 0x874   :  { %v6999_v26 = vmul.f32 0.020408163, %v6973_v0  ;;  %v6998_v9 = vmul.f32 0.020408163, %v6970_v2  ;;  %v7029_v50 = vmul.f32 %v15313_v15, %v15313_v15  ;;  %v7028_v59 = vmul.f32 %v15316_v54, %v15316_v54 }
 0x876   :  { %v15325_v56 = vsub.f32 %v15217_v60, %v6999_v26  ;;  %v15328_v30 = vsub.f32 %v15226_v6, %v6998_v9  ;;  %v7061_v47 = vsel %vm214_vm0, %v7029_v50, 0.0  ;;  %v7058_v49 = vsel %vm214_vm0, %v7028_v59, 0.0  ;;  %v15371_v26 = vld [vmem:[%s15531_s3] sm:$0xff]  ;;  %v15376_v50 = vld [vmem:[%s15531_s3 + $0x8] sm:$0xff] }
 0x877   :  { %v6979_v55 = vpop.xlane.xlu1 %6978  ;;  %7062 = vadd.xlane.f32.xlu1 %v7061_v47  ;;  %7059 = vadd.xlane.f32.xlu0 %v7058_v49  ;;  %v6976_v42 = vpop.xlane.xlu0 %6975 }
 0x878   :  { %v7001_v39 = vmul.f32 0.020408163, %v6979_v55  ;;  %v7000_v31 = vmul.f32 0.020408163, %v6976_v42  ;;  %v7031_v58 = vmul.f32 %v15325_v56, %v15325_v56  ;;  %v7030_v60 = vmul.f32 %v15328_v30, %v15328_v30 }
 0x87a   :  { %v15337_v5 = vsub.f32 %v15245_v25, %v7001_v39  ;;  %v15340_v6 = vsub.f32 %v15223_v28, %v7000_v31  ;;  %v7067_v46 = vsel %vm214_vm0, %v7031_v58, 0.0  ;;  %v7064_v12 = vsel %vm214_vm0, %v7030_v60, 0.0  ;;  %v15382_v31 = vld [vmem:[%s15531_s3 + $0x10] sm:$0xff] }
 0x87b   :  { %v6985_v18 = vpop.xlane.xlu1 %6984  ;;  %7068 = vadd.xlane.f32.xlu1 %v7067_v46  ;;  %7065 = vadd.xlane.f32.xlu0 %v7064_v12  ;;  %v6982_v3 = vpop.xlane.xlu0 %6981 }
 0x87c   :  { %v7003_v53 = vmul.f32 0.020408163, %v6985_v18  ;;  %v7002_v4 = vmul.f32 0.020408163, %v6982_v3  ;;  %v7033_v1 = vmul.f32 %v15337_v5, %v15337_v5  ;;  %v7032_v25 = vmul.f32 %v15340_v6, %v15340_v6 }
 0x87e   :  { %v15349_v45 = vsub.f32 %v15243_v22, %v7003_v53  ;;  %v15352_v28 = vsub.f32 %v15249_v23, %v7002_v4  ;;  %v7073_v27 = vsel %vm214_vm0, %v7033_v1, 0.0  ;;  %v7070_v8 = vsel %vm214_vm0, %v7032_v25, 0.0  ;;  %v15389_v1 = vld [vmem:[%s15531_s3 + $0x18] sm:$0xff] }
 0x87f   :  { %7074 = vadd.xlane.f32.xlu1 %v7073_v27  ;;  %7071 = vadd.xlane.f32.xlu0 %v7070_v8  ;;  %v6988_v43 = vpop.xlane.xlu0 %6987 }
 0x880   :  { %v7004_v13 = vmul.f32 0.020408163, %v6988_v43  ;;  %v7035_v10 = vmul.f32 %v15349_v45, %v15349_v45  ;;  %v7034_v62 = vmul.f32 %v15352_v28, %v15352_v28 }
 0x882   :  { %v15361_v22 = vsub.f32 %v15247_v19, %v7004_v13  ;;  %v7079_v23 = vsel %vm214_vm0, %v7035_v10, 0.0  ;;  %v7076_v36 = vsel %vm214_vm0, %v7034_v62, 0.0 }
 0x883   :  { %7080 = vadd.xlane.f32.xlu1 %v7079_v23  ;;  %7077 = vadd.xlane.f32.xlu0 %v7076_v36 }
 0x884   :  { %v7036_v51 = vmul.f32 %v15361_v22, %v15361_v22 }
 0x886   :  { %v7082_v34 = vsel %vm214_vm0, %v7036_v51, 0.0  ;;  %v15395_v51 = vld [vmem:[%s15531_s3 + $0x20] sm:$0xff] }
 0x887   :  { %7083 = vadd.xlane.f32.xlu0 %v7082_v34 }
 0x8f4   :  { %v7039_v44 = vpop.xlane.xlu1 %7038 }
 0x8f5   :  { %v7085_v17 = vmul.f32 0.020408163, %v7039_v44 }
 0x8f6   :  { %v7042_v57 = vpop.xlane.xlu0 %7041 }
 0x8f7   :  { %v7117_v37 = vadd.f32 1e-05, %v7085_v17  ;;  %v7086_v21 = vmul.f32 0.020408163, %v7042_v57 }
 0x8f8   :  { %v7045_v63 = vpop.xlane.xlu1 %7044 }
 0x8f9   :  { %8461 = vrsqrt.f32 %v7117_v37  ;;  %v7118_v19 = vadd.f32 1e-05, %v7086_v21  ;;  %v7087_v24 = vmul.f32 0.020408163, %v7045_v63 }
 0x8fb   :  { %8463 = vrsqrt.f32 %v7118_v19  ;;  %v7119_v35 = vadd.f32 1e-05, %v7087_v24  ;;  %v7106_v19 = vld [vmem:[%s15531_s3 + $0x28] sm:$0xff] }
 0x8fc   :  { %v7051_v61 = vpop.xlane.xlu1 %7050  ;;  %v7048_v29 = vpop.xlane.xlu0 %7047 }
 0x8fd   :  { %8465 = vrsqrt.f32 %v7119_v35  ;;  %v7089_v32 = vmul.f32 0.020408163, %v7051_v61  ;;  %v7088_v33 = vmul.f32 0.020408163, %v7048_v29 }
 0x8ff   :  { %v7120_v52 = vadd.f32 1e-05, %v7088_v33  ;;  %v7121_v14 = vadd.f32 1e-05, %v7089_v32  ;;  %v15404_v33 = vld [vmem:[%s15531_s3 + $0x50] sm:$0xff] }
 0x900   :  { %v7057_v38 = vpop.xlane.xlu1 %7056  ;;  %v7054_v0 = vpop.xlane.xlu0 %7053 }
 0x901   :  { %v7090_v2 = vmul.f32 0.020408163, %v7054_v0  ;;  %8467 = vrsqrt.f32 %v7120_v52  ;;  %v7091_v59 = vmul.f32 0.020408163, %v7057_v38 }
 0x902   :  { %8469 = vrsqrt.f32 %v7121_v14  ;;  %v7107_v14 = vld [vmem:[%s15531_s3 + $0x30] sm:$0xff] }
 0x903   :  { %v8462_v9 = vpop.eup %8461  ;;  %v7122_v47 = vadd.f32 1e-05, %v7090_v2  ;;  %v7123_v46 = vadd.f32 1e-05, %v7091_v59 }
 0x904   :  { %v7063_v49 = vpop.xlane.xlu1 %7062  ;;  %v7060_v55 = vpop.xlane.xlu0 %7059  ;;  %v7149_v42 = vmul.f32 %v8462_v9, %v15371_v26 }
 0x905   :  { %v8464_v39 = vpop.eup %8463  ;;  %8471 = vrsqrt.f32 %v7122_v47  ;;  %v7092_v12 = vmul.f32 0.020408163, %v7060_v55  ;;  %v7093_v8 = vmul.f32 0.020408163, %v7063_v49  ;;  %v7113_v49 = vld [vmem:[%s15531_s3 + $0x60] sm:$0xff] }
 0x906   :  { %7167 = vperm.xlu1 %7913, %v7149_v42   ;;  %v7150_v58 = vmul.f32 %v8464_v39, %v15376_v50  ;;  %8473 = vrsqrt.f32 %v7123_v46  ;;  %v7108_v42 = vld [vmem:[%s15531_s3 + $0x38] sm:$0xff] }
 0x907   :  { %v8466_v60 = vpop.eup %8465  ;;  %v7124_v43 = vadd.f32 1e-05, %v7092_v12  ;;  %v7125_v44 = vadd.f32 1e-05, %v7093_v8 }
 0x908   :  { %v7069_v18 = vpop.xlane.xlu1 %7068  ;;  %7172 = vperm.xlu0 %7914, %v7150_v58   ;;  %v7066_v3 = vpop.xlane.xlu0 %7065  ;;  %v7151_v53 = vmul.f32 %v8466_v60, %v15382_v31 }
 0x909   :  { %v7095_v4 = vmul.f32 0.020408163, %v7069_v18  ;;  %v7094_v17 = vmul.f32 0.020408163, %v7066_v3  ;;  %v7115_v18 = vld [vmem:[%s15531_s3 + $0x70] sm:$0xff] }
 0x90a   :  { %7177 = vperm.xlu1 %7913, %v7151_v53   ;;  %v7109_v53 = vld [vmem:[%s15531_s3 + $0x40] sm:$0xff] }
 0x90b   :  { %v7127_v25 = vadd.f32 1e-05, %v7095_v4  ;;  %v8468_v27 = vpop.eup %8467  ;;  %v7126_v61 = vadd.f32 1e-05, %v7094_v17  ;;  %v7114_v17 = vld [vmem:[%s15531_s3 + $0x68] sm:$0xff] }
 0x90c   :  { %v7075_v13 = vpop.xlane.xlu1 %7074  ;;  %v7072_v62 = vpop.xlane.xlu0 %7071  ;;  %v7152_v23 = vmul.f32 %v8468_v27, %v15389_v1 }
 0x90d   :  { %8475 = vrsqrt.f32 %v7127_v25  ;;  %v7097_v10 = vmul.f32 0.020408163, %v7075_v13  ;;  %v8470_v36 = vpop.eup %8469  ;;  %v7096_v29 = vmul.f32 0.020408163, %v7072_v62  ;;  %v7110_v13 = vld [vmem:[%s15531_s3 + $0x48] sm:$0xff] }
 0x90e   :  { %7182 = vperm.xlu1 %7913, %v7152_v23   ;;  %8477 = vrsqrt.f32 %v7124_v43  ;;  %v7153_v21 = vmul.f32 %v8470_v36, %v15395_v51  ;;  %v16907_v23 = vmov 1   ;;  %v7112_v36 = vld [vmem:[%s15531_s3 + $0x58] sm:$0xff] }
 0x90f   :  { %v7129_v34 = vadd.f32 1e-05, %v7097_v10  ;;  %v8472_v63 = vpop.eup %8471  ;;  %v7128_v0 = vadd.f32 1e-05, %v7096_v29 }
 0x910   :  { %v7081_v57 = vpop.xlane.xlu1 %7080  ;;  %v7078_v35 = vpop.xlane.xlu0 %7077  ;;  %v7154_v32 = vmul.f32 %v8472_v63, %v7106_v19 }
 0x911   :  { %8479 = vrsqrt.f32 %v7129_v34  ;;  %v7099_v37 = vmul.f32 0.020408163, %v7081_v57  ;;  %v8474_v52 = vpop.eup %8473  ;;  %v7098_v2 = vmul.f32 0.020408163, %v7078_v35 }
 0x912   :  { %7187 = vperm.xlu1 %7913, %v7153_v21   ;;  %8481 = vrsqrt.f32 %v7125_v44  ;;  %v7155_v47 = vmul.f32 %v8474_v52, %v7107_v14  ;;  %v7116_v21 = vld [vmem:[%s15531_s3 + $0x78] sm:$0xff] }
 0x913   :  { %v7131_v24 = vadd.f32 1e-05, %v7099_v37  ;;  %v7130_v58 = vadd.f32 1e-05, %v7098_v2 }
 0x914   :  { %v7084_v59 = vpop.xlane.xlu0 %7083 }
 0x915   :  { %8483 = vrsqrt.f32 %v7131_v24  ;;  %v7100_v60 = vmul.f32 0.020408163, %v7084_v59 }
 0x916   :  { %7192 = vperm.xlu1 %7913, %v7154_v32   ;;  %8485 = vrsqrt.f32 %v7126_v61 }
 0x917   :  { %v8476_v38 = vpop.eup %8475  ;;  %8487 = vrsqrt.f32 %v7128_v0  ;;  %v7132_v25 = vadd.f32 1e-05, %v7100_v60 }
 0x918   :  { %v7159_v9 = vmul.f32 %v8476_v38, %v15404_v33  ;;  %v8478_v55 = vpop.eup %8477  ;;  %8489 = vrsqrt.f32 %v7130_v58 }
 0x919   :  { %v7156_v12 = vmul.f32 %v8478_v55, %v7108_v42  ;;  %8491 = vrsqrt.f32 %v7132_v25 }
 0x91a   :  { %7217 = vperm.xlu0 %7914, %v7159_v9   ;;  %7197 = vperm.xlu1 %7913, %v7155_v47  }
 0x91b   :  { %v8480_v39 = vpop.eup %8479 }
 0x91c   :  { %v7161_v46 = vmul.f32 %v8480_v39, %v7113_v49  ;;  %v8482_v3 = vpop.eup %8481 }
 0x91d   :  { %v7157_v8 = vmul.f32 %v8482_v3, %v7109_v53 }
 0x91e   :  { %7227 = vperm.xlu0 %7914, %v7161_v46   ;;  %7202 = vperm.xlu1 %7913, %v7156_v12  }
 0x91f   :  { %v8484_v4 = vpop.eup %8483 }
 0x920   :  { %v7163_v27 = vmul.f32 %v8484_v4, %v7115_v18  ;;  %v8486_v43 = vpop.eup %8485 }
 0x921   :  { %v7158_v10 = vmul.f32 %v8486_v43, %v7110_v13  ;;  %v8488_v62 = vpop.eup %8487 }
 0x922   :  { %7237 = vperm.xlu0 %7914, %v7163_v27   ;;  %7207 = vperm.xlu1 %7913, %v7157_v8   ;;  %v7160_v34 = vmul.f32 %v8488_v62, %v7112_v36  ;;  %v8490_v44 = vpop.eup %8489 }
 0x923   :  { %v7162_v57 = vmul.f32 %v8490_v44, %v7114_v17  ;;  %v8492_v37 = vpop.eup %8491 }
 0x924   :  { %v7164_v63 = vmul.f32 %v8492_v37, %v7116_v21 }
 0x926   :  { %7915 = vset.pattern.permute.xlu0 %v16907_v23  ;;  %7212 = vperm.xlu1 %7913, %v7158_v10  }
 0x927   :  { %7263 = vperm.xlu0 %7915, %v15371_v26  }
 0x92a   :  { %7222 = vperm.xlu1 %7913, %v7160_v34  }
 0x92b   :  { %7278 = vperm.xlu0 %7915, %v15389_v1  }
 0x92e   :  { %7232 = vperm.xlu1 %7913, %v7162_v57  }
 0x92f   :  { %7288 = vperm.xlu0 %7915, %v7106_v19  }
 0x932   :  { %7242 = vperm.xlu1 %7913, %v7164_v63  }
 0x933   :  { %7298 = vperm.xlu0 %7915, %v7108_v42  }
 0x936   :  { %7916 = vset.pattern.permute.xlu1 %v16907_v23 }
 0x937   :  { %7308 = vperm.xlu0 %7915, %v7110_v13   ;;  %7268 = vperm.xlu1 %7916, %v15376_v50  }
 0x93b   :  { %7318 = vperm.xlu0 %7915, %v7112_v36   ;;  %7273 = vperm.xlu1 %7916, %v15382_v31  }
 0x93f   :  { %7328 = vperm.xlu0 %7915, %v7114_v17   ;;  %7283 = vperm.xlu1 %7916, %v15395_v51  }
 0x943   :  { %7338 = vperm.xlu0 %7915, %v7116_v21   ;;  %7293 = vperm.xlu1 %7916, %v7107_v14  }
 0x947   :  { %7303 = vperm.xlu1 %7916, %v7109_v53  }
 0x94b   :  { %7313 = vperm.xlu1 %7916, %v15404_v33  }
 0x94f   :  { %7323 = vperm.xlu1 %7916, %v7113_v49  }
 0x953   :  { %7333 = vperm.xlu1 %7916, %v7115_v18  }
 0x985   :  { %v7168_v26 = vpop.permute.xlu1 %7167 }
 0x986   :  { %v7245_v14 = vmul.f32 %v7168_v26, %v15274_v48 }
 0x987   :  { %v7173_v35 = vpop.permute.xlu0 %7172 }
 0x988   :  { %v7246_v46 = vmul.f32 %v7173_v35, %v15277_v41 }
 0x989   :  { %v7178_v1 = vpop.permute.xlu1 %7177 }
 0x98d   :  { %v7183_v19 = vpop.permute.xlu1 %7182 }
 0x98e   :  { %v7248_v2 = vmul.f32 %v7183_v19, %v15293_v7 }
 0x991   :  { %v7188_v24 = vpop.permute.xlu1 %7187 }
 0x995   :  { %v7193_v61 = vpop.permute.xlu1 %7192 }
 0x996   :  { %v7250_v49 = vmul.f32 %v7193_v61, %v15304_v11 }
 0x999   :  { %v7218_v50 = vpop.permute.xlu0 %7217  ;;  %v7198_v29 = vpop.permute.xlu1 %7197 }
 0x99a   :  { %v7255_v17 = vmul.f32 %v7218_v50, %v15325_v56 }
 0x99d   :  { %v15442_v32 = vpop.permute.xlu0 %7227  ;;  %v7203_v31 = vpop.permute.xlu1 %7202 }
 0x99e   :  { %v7252_v7 = vmul.f32 %v7203_v31, %v15316_v54  ;;  %v7257_v21 = vmul.f32 %v15442_v32, %v15337_v5 }
 0x9a1   :  { %v15444_v52 = vpop.permute.xlu0 %7237  ;;  %v7208_v51 = vpop.permute.xlu1 %7207 }
 0x9a2   :  { %v7259_v56 = vmul.f32 %v15444_v52, %v15349_v45 }
 0x9a5   :  { %v7213_v38 = vpop.permute.xlu1 %7212 }
 0x9a6   :  { %v7264_v33 = vpop.permute.xlu0 %7263  ;;  %v7254_v11 = vmul.f32 %v7213_v38, %v15328_v30  ;;  %v7247_v30 = vmul.f32 %v7178_v1, %v15282_v20 }
 0x9a7   :  { %v7341_v0 = vadd.f32 %v7264_v33, %v7245_v14 }
 0x9a9   :  { %7357 = vst.msk [vmem:[%s15532_s4] sm:$0xff] %vm214_vm0, %v7341_v0  ;;  %v7223_v9 = vpop.permute.xlu1 %7222 }
 0x9aa   :  { %v7279_v59 = vpop.permute.xlu0 %7278  ;;  %v7256_v53 = vmul.f32 %v7223_v9, %v15340_v6  ;;  %v7249_v6 = vmul.f32 %v7188_v24, %v15290_v40 }
 0x9ab   :  { %v7344_v47 = vadd.f32 %v7279_v59, %v7248_v2 }
 0x9ad   :  { %7360 = vst.msk [vmem:[%s15532_s4 + $0x18] sm:$0xff] %vm214_vm0, %v7344_v47  ;;  %v7233_v48 = vpop.permute.xlu1 %7232 }
 0x9ae   :  { %v7289_v55 = vpop.permute.xlu0 %7288  ;;  %v7258_v8 = vmul.f32 %v7233_v48, %v15352_v28  ;;  %v7251_v28 = vmul.f32 %v7198_v29, %v15301_v16 }
 0x9af   :  { %v7346_v42 = vadd.f32 %v7289_v55, %v7250_v49 }
 0x9b1   :  { %7362 = vst.msk [vmem:[%s15532_s4 + $0x28] sm:$0xff] %vm214_vm0, %v7346_v42  ;;  %v7243_v39 = vpop.permute.xlu1 %7242 }
 0x9b2   :  { %v7299_v58 = vpop.permute.xlu0 %7298  ;;  %v7260_v62 = vmul.f32 %v7243_v39, %v15361_v22  ;;  %v7253_v22 = vmul.f32 %v7208_v51, %v15313_v15 }
 0x9b3   :  { %v7348_v60 = vadd.f32 %v7299_v58, %v7252_v7 }
 0x9b5   :  { %7364 = vst.msk [vmem:[%s15532_s4 + $0x38] sm:$0xff] %vm214_vm0, %v7348_v60 }
 0x9b6   :  { %v7309_v12 = vpop.permute.xlu0 %7308  ;;  %v7269_v18 = vpop.permute.xlu1 %7268 }
 0x9b7   :  { %v7350_v54 = vadd.f32 %v7309_v12, %v7254_v11  ;;  %v7342_v3 = vadd.f32 %v7269_v18, %v7246_v46 }
 0x9b9   :  { %7366 = vst.msk [vmem:[%s15532_s4 + $0x48] sm:$0xff] %vm214_vm0, %v7350_v54  ;;  %7358 = vst.msk [vmem:[%s15532_s4 + $0x8] sm:$0xff] %vm214_vm0, %v7342_v3 }
 0x9ba   :  { %v7319_v4 = vpop.permute.xlu0 %7318  ;;  %v7274_v41 = vpop.permute.xlu1 %7273 }
 0x9bb   :  { %v7352_v25 = vadd.f32 %v7319_v4, %v7256_v53  ;;  %v7343_v27 = vadd.f32 %v7274_v41, %v7247_v30 }
 0x9bd   :  { %7368 = vst.msk [vmem:[%s15532_s4 + $0x58] sm:$0xff] %vm214_vm0, %v7352_v25  ;;  %7359 = vst.msk [vmem:[%s15532_s4 + $0x10] sm:$0xff] %vm214_vm0, %v7343_v27 }
 0x9be   :  { %v7329_v20 = vpop.permute.xlu0 %7328  ;;  %v7284_v43 = vpop.permute.xlu1 %7283 }
 0x9bf   :  { %v7354_v13 = vadd.f32 %v7329_v20, %v7258_v8  ;;  %v7345_v10 = vadd.f32 %v7284_v43, %v7249_v6 }
 0x9c1   :  { %7370 = vst.msk [vmem:[%s15532_s4 + $0x68] sm:$0xff] %vm214_vm0, %v7354_v13  ;;  %7361 = vst.msk [vmem:[%s15532_s4 + $0x20] sm:$0xff] %vm214_vm0, %v7345_v10 }
 0x9c2   :  { %v7339_v40 = vpop.permute.xlu0 %7338  ;;  %v7294_v23 = vpop.permute.xlu1 %7293 }
 0x9c3   :  { %v7356_v36 = vadd.f32 %v7339_v40, %v7260_v62  ;;  %v7347_v34 = vadd.f32 %v7294_v23, %v7251_v28 }
 0x9c5   :  { %7372 = vst.msk [vmem:[%s15532_s4 + $0x78] sm:$0xff] %vm214_vm0, %v7356_v36  ;;  %7363 = vst.msk [vmem:[%s15532_s4 + $0x30] sm:$0xff] %vm214_vm0, %v7347_v34 }
 0x9c6   :  { %v7304_v16 = vpop.permute.xlu1 %7303 }
 0x9c7   :  { %v7349_v44 = vadd.f32 %v7304_v16, %v7253_v22 }
 0x9c9   :  { %7365 = vst.msk [vmem:[%s15532_s4 + $0x40] sm:$0xff] %vm214_vm0, %v7349_v44 }
 0x9ca   :  { %v7314_v57 = vpop.permute.xlu1 %7313 }
 0x9cb   :  { %v7351_v37 = vadd.f32 %v7314_v57, %v7255_v17 }
 0x9cd   :  { %7367 = vst.msk [vmem:[%s15532_s4 + $0x50] sm:$0xff] %vm214_vm0, %v7351_v37 }
 0x9ce   :  { %v7324_v15 = vpop.permute.xlu1 %7323 }
 0x9cf   :  { %v7353_v63 = vadd.f32 %v7324_v15, %v7257_v21 }
 0x9d1   :  { %7369 = vst.msk [vmem:[%s15532_s4 + $0x60] sm:$0xff] %vm214_vm0, %v7353_v63 }
 0x9d2   :  { %v7334_v26 = vpop.permute.xlu1 %7333 }
 0x9d3   :  { %v7355_v1 = vadd.f32 %v7334_v26, %v7259_v56 }
 0x9d5   :  { %7371 = vst.msk [vmem:[%s15532_s4 + $0x70] sm:$0xff] %vm214_vm0, %v7355_v1 }

</bundles_post_ra>
